<compile_context>
chip_gen: v6e
topology: v6e:2x2x1
jax: 0.10.0
libtpu: 0.0.40
codegen_flags: <defaults>
</compile_context>

<pallas_src>
import functools
import math

import jax
import jax.numpy as jnp
from jax import lax
from jax.experimental import pallas as pl
from jax.experimental.pallas import tpu as pltpu


_LEAKY_SLOPE = 0.01


def _leaky(x):
    return jnp.where(x >= 0, x, _LEAKY_SLOPE * x)


@functools.lru_cache(maxsize=None)
def _vmem_limit_bytes():
    """Generation-aware scoped-VMEM budget: ~96 MiB on v5e/v6e (128 MiB physical),
    ~48 MiB on v7x (64 MiB physical).  Conservative fallback if the query fails."""
    cap = 64 * 1024 * 1024
    try:
        cap = int(getattr(pltpu.get_tpu_info(), "vmem_capacity_bytes", cap))
    except Exception:
        pass
    return int(min(cap * 3 // 4, 96 * 1024 * 1024))


@functools.lru_cache(maxsize=None)
def _buffered_supported():
    """Probe for BlockSpec(pipeline_mode=pl.Buffered(n)) support."""
    try:
        pl.BlockSpec((8, 128), lambda i: (0, 0), pipeline_mode=pl.Buffered(2))
        return True
    except Exception:
        return False


def _pick_tile(dim, unit, max_tile):
    """Largest multiple of `unit` that divides `dim` and is <= max_tile.
    Returns None when no such divisor exists (caller falls back to XLA) -- guarded so
    it can never silently return a block far larger than the cap (v7x 64 MiB VMEM)."""
    if dim <= max_tile:
        return dim
    t = (max_tile // unit) * unit
    while t >= unit:
        if dim % t == 0:
            return t
        t -= unit
    return None


# --------------------------------------------------------------------------- #
# Kernel 1: fused tiled matmul (1x1 convs / linears with lane-dense outputs)
# --------------------------------------------------------------------------- #

def _fused_matmul_kernel(*refs, in_act, out_act, has_in, has_out, has_res):
    it = iter(refs)
    x_ref = next(it)
    w_ref = next(it)
    isc_ref = ish_ref = osc_ref = osh_ref = res_ref = None
    if has_in:
        isc_ref = next(it)
        ish_ref = next(it)
    if has_out:
        osc_ref = next(it)
        osh_ref = next(it)
    if has_res:
        res_ref = next(it)
    o_ref = next(it)
    acc_ref = next(it)

    k = pl.program_id(2)

    @pl.when(k == 0)
    def _init():
        acc_ref[...] = jnp.zeros_like(acc_ref)

    # Prologue: per-input-channel affine (folded eval-mode BN) + LeakyReLU.
    # (gn is almost always 1 at ZhuGo shapes, so this is not recomputed per j-tile.)
    xt = x_ref[...]
    if has_in or in_act != "none":
        xt = xt.astype(jnp.float32)
        if has_in:
            xt = xt * isc_ref[...] + ish_ref[...]
        if in_act == "leaky_relu":
            xt = jnp.where(xt >= 0, xt, _LEAKY_SLOPE * xt)

    acc_ref[...] += jnp.dot(xt.astype(jnp.bfloat16), w_ref[...],
                            preferred_element_type=jnp.float32)

    @pl.when(k == pl.num_programs(2) - 1)
    def _finish():
        y = acc_ref[...]
        if has_out:
            y = y * osc_ref[...] + osh_ref[...]
        if out_act == "leaky_relu":
            y = jnp.where(y >= 0, y, _LEAKY_SLOPE * y)
        elif out_act == "sigmoid":
            y = jax.nn.sigmoid(y)
        if has_res:
            y = y + res_ref[...].astype(jnp.float32)
        o_ref[...] = y.astype(o_ref.dtype)


def _fused_matmul_xla(x, w, in_affine, in_act, out_affine, out_act, residual, out_dtype):
    """Same math for tiny / lane-sparse projections: stays on the VPU, fused by XLA."""
    x = x.astype(jnp.float32)
    if in_affine is not None:
        s, b = in_affine
        x = x * s.reshape(1, -1) + b.reshape(1, -1)
    if in_act == "leaky_relu":
        x = _leaky(x)
    y = jnp.dot(x, w.astype(jnp.float32), preferred_element_type=jnp.float32)
    if out_affine is not None:
        s, b = out_affine
        y = y * s.reshape(1, -1) + b.reshape(1, -1)
    if out_act == "leaky_relu":
        y = _leaky(y)
    elif out_act == "sigmoid":
        y = jax.nn.sigmoid(y)
    if residual is not None:
        y = y + residual.astype(jnp.float32)
    return y.astype(out_dtype)


def fused_matmul(x, w, *, in_affine=None, in_act="none",
                 out_affine=None, out_act="none", residual=None,
                 out_dtype=jnp.float32):
    """(M, K) @ (K, N) with fused affine/activation prologue+epilogue and residual."""
    M, K = x.shape
    Kw, N = w.shape
    assert K == Kw, (x.shape, w.shape)

    # Routing gate (review): lane-dense output required.  Sub-128-lane outputs lower
    # to masked vst.msk stores and the MXU tile is mostly padding -> XLA VPU instead.
    if N < 128 or M < 8 or K < 8:
        return _fused_matmul_xla(x, w, in_affine, in_act, out_affine, out_act,
                                 residual, out_dtype)

    # Weight residency: whole bf16 weight as one full-extent block, constant index map
    # -> DMA'd exactly once per call when it fits comfortably in VMEM.
    if K * N * 2 <= 2 * 1024 * 1024:
        tk, tn = K, N
    else:
        tk = _pick_tile(K, 128, 1024)
        tn = _pick_tile(N, 128, 256)
    tm = _pick_tile(M, 8, 512)
    if tm is None or tk is None or tn is None:
        return _fused_matmul_xla(x, w, in_affine, in_act, out_affine, out_act,
                                 residual, out_dtype)
    gm, gn, gk = M // tm, N // tn, K // tk

    # v7x has two TensorCores: keep >= 2 blocks on the parallel axes so both get work
    # (one extra ~0.35us grid step on single-TC v5e/v6e -- negligible).
    if gm * gn == 1 and M > 8:
        tm2 = _pick_tile(M, 8, max(8, tm // 2))
        if tm2 is not None:
            tm, gm = tm2, M // tm2

    has_in = in_affine is not None
    has_out = out_affine is not None
    has_res = residual is not None

    # Deeper multi-buffering on the K-streamed operands when the reduction is long.
    stream_kwargs = {}
    if gk >= 3 and _buffered_supported():
        stream_kwargs = dict(pipeline_mode=pl.Buffered(3))

    w = w.astype(jnp.bfloat16)
    inputs = [x, w]
    in_specs = [
        pl.BlockSpec((tm, tk), lambda i, j, k: (i, k), **stream_kwargs),
        pl.BlockSpec((tk, tn), lambda i, j, k: (k, j), **stream_kwargs),
    ]
    if has_in:
        isc, ish = in_affine
        inputs += [isc.reshape(1, K).astype(jnp.float32),
                   ish.reshape(1, K).astype(jnp.float32)]
        in_specs += [pl.BlockSpec((1, tk), lambda i, j, k: (0, k))] * 2
    if has_out:
        osc, osh = out_affine
        inputs += [osc.reshape(1, N).astype(jnp.float32),
                   osh.reshape(1, N).astype(jnp.float32)]
        in_specs += [pl.BlockSpec((1, tn), lambda i, j, k: (0, j))] * 2
    if has_res:
        inputs.append(residual)
        in_specs.append(pl.BlockSpec((tm, tn), lambda i, j, k: (i, j)))

    kernel = functools.partial(_fused_matmul_kernel, in_act=in_act, out_act=out_act,
                               has_in=has_in, has_out=has_out, has_res=has_res)

    out_bytes = M * N * jnp.dtype(out_dtype).itemsize
    bytes_accessed = (M * K * x.dtype.itemsize + K * N * 2 + out_bytes
                      + (M * N * residual.dtype.itemsize if has_res else 0))

    return pl.pallas_call(
        kernel,
        out_shape=jax.ShapeDtypeStruct((M, N), out_dtype),
        grid=(gm, gn, gk),
        in_specs=in_specs,
        out_specs=pl.BlockSpec((tm, tn), lambda i, j, k: (i, j)),
        scratch_shapes=[pltpu.VMEM((tm, tn), jnp.float32)],
        compiler_params=pltpu.CompilerParams(
            dimension_semantics=("parallel", "parallel", "arbitrary"),
            vmem_limit_bytes=_vmem_limit_bytes()),
        cost_estimate=pl.CostEstimate(
            flops=2 * M * N * K,
            transcendentals=M * N if out_act == "sigmoid" else 0,
            bytes_accessed=int(bytes_accessed)),
    )(*inputs)


# --------------------------------------------------------------------------- #
# Kernel 2: spatial KxK conv with IN-KERNEL tap accumulation (no HBM im2col)
# --------------------------------------------------------------------------- #

def _conv_tap_kernel(*refs, kh, kw, ho, wo, cin, out_act, has_out, has_res):
    it = iter(refs)
    x_ref = next(it)          # (Hp, Wp, Cin) bf16, prologue + zero-pad already applied
    w_ref = next(it)          # (kh*kw*Cin, tn) bf16, VMEM-resident across the batch axis
    osc_ref = osh_ref = res_ref = None
    if has_out:
        osc_ref = next(it)    # (1, tn) f32
        osh_ref = next(it)
    if has_res:
        res_ref = next(it)    # (ho, wo, tn)
    o_ref = next(it)          # (ho, wo, tn)
    tn = o_ref.shape[-1]

    # The kh*kw taps are the conv's K reduction; accumulate them in f32 ON CHIP,
    # reading shifted/haloed windows straight out of the padded VMEM plane.
    acc = jnp.zeros((ho * wo, tn), jnp.float32)
    for di in range(kh):
        for dj in range(kw):
            t = di * kw + dj
            win = x_ref[di:di + ho, dj:dj + wo, :]        # (ho, wo, cin) haloed window
            a = win.reshape(ho * wo, cin)
            acc = acc + jnp.dot(a, w_ref[t * cin:(t + 1) * cin, :],
                                preferred_element_type=jnp.float32)

    y = acc
    if has_out:
        y = y * osc_ref[...] + osh_ref[...]
    if out_act == "leaky_relu":
        y = jnp.where(y >= 0, y, _LEAKY_SLOPE * y)
    elif out_act == "sigmoid":
        y = jax.nn.sigmoid(y)
    if has_res:
        y = y + res_ref[...].reshape(ho * wo, tn).astype(jnp.float32)
    o_ref[...] = y.reshape(ho, wo, tn).astype(o_ref.dtype)


def _conv_pallas(hp, w_mat, cout, kh, kw, ho, wo, out_affine, out_act, residual,
                 out_dtype):
    B, Hp, Wp, cin = hp.shape
    if cout <= 256:
        tn = cout
    else:
        tn = _pick_tile(cout, 128, 256) or cout
    gn = cout // tn

    has_out = out_affine is not None
    has_res = residual is not None

    inputs = [hp, w_mat.astype(jnp.bfloat16)]
    in_specs = [
        # one padded plane per batch element stays resident across the Cout tiles;
        # the weight block is constant across the batch axis -> DMA'd once (gn==1)
        pl.BlockSpec((None, Hp, Wp, cin), lambda b, j: (b, 0, 0, 0)),
        pl.BlockSpec((kh * kw * cin, tn), lambda b, j: (0, j)),
    ]
    if has_out:
        osc, osh = out_affine
        inputs += [osc.reshape(1, cout).astype(jnp.float32),
                   osh.reshape(1, cout).astype(jnp.float32)]
        in_specs += [pl.BlockSpec((1, tn), lambda b, j: (0, j))] * 2
    if has_res:
        inputs.append(residual)
        in_specs.append(pl.BlockSpec((None, ho, wo, tn), lambda b, j: (b, 0, 0, j)))

    kernel = functools.partial(_conv_tap_kernel, kh=kh, kw=kw, ho=ho, wo=wo, cin=cin,
                               out_act=out_act, has_out=has_out, has_res=has_res)

    out_bytes = B * ho * wo * cout * jnp.dtype(out_dtype).itemsize
    bytes_accessed = (hp.size * hp.dtype.itemsize + w_mat.size * 2 + out_bytes
                      + (residual.size * residual.dtype.itemsize if has_res else 0))

    # TODO(synk): for boards much larger than 19x19, tile output rows with halo'd
    # input windows (manual make_async_copy) instead of one padded plane per step.
    return pl.pallas_call(
        kernel,
        out_shape=jax.ShapeDtypeStruct((B, ho, wo, cout), out_dtype),
        grid=(B, gn),
        in_specs=in_specs,
        out_specs=pl.BlockSpec((None, ho, wo, tn), lambda b, j: (b, 0, 0, j)),
        compiler_params=pltpu.CompilerParams(
            # both axes parallel: lets v7x's 2 TensorCores split the batch
            dimension_semantics=("parallel", "parallel"),
            vmem_limit_bytes=_vmem_limit_bytes()),
        cost_estimate=pl.CostEstimate(
            flops=2 * B * ho * wo * kh * kw * cin * cout,
            transcendentals=B * ho * wo * cout if out_act == "sigmoid" else 0,
            bytes_accessed=int(bytes_accessed)),
    )(*inputs)


def _conv_xla(h, w_mat, cin, cout, kh, kw, stride, padding,
              out_affine, out_act, residual, out_dtype):
    """Fallback for tiny / lane-sparse / strided convs (stays on XLA)."""
    w = w_mat.reshape(kh, kw, cin, cout).astype(jnp.float32)
    y = lax.conv_general_dilated(
        h.astype(jnp.float32), w, window_strides=(stride, stride),
        padding=((padding, padding), (padding, padding)),
        dimension_numbers=("NHWC", "HWIO", "NHWC"))
    if out_affine is not None:
        s, b = out_affine
        y = y * s.reshape(1, 1, 1, -1) + b.reshape(1, 1, 1, -1)
    if out_act == "leaky_relu":
        y = _leaky(y)
    elif out_act == "sigmoid":
        y = jax.nn.sigmoid(y)
    if residual is not None:
        y = y + residual.astype(jnp.float32)
    return y.astype(out_dtype)


def conv2d(x, w_mat, *, kh=1, kw=1, stride=1, padding=0, in_affine=None, in_act="none",
           out_affine=None, out_act="none", residual=None, out_dtype=jnp.bfloat16):
    """NHWC conv (cross-correlation, like nn.Conv2d).  Weights are pre-reshaped once at
    init to (kh*kw*Cin, Cout) bf16.  BN / activation / residual are fused."""
    B, H, W, C = x.shape
    cout = w_mat.shape[1]
    assert w_mat.shape[0] == kh * kw * C, (w_mat.shape, (kh, kw, C))

    if kh == 1 and kw == 1 and stride == 1 and padding == 0:
        res2d = None if residual is None else residual.reshape(B * H * W, cout)
        out = fused_matmul(x.reshape(B * H * W, C), w_mat,
                           in_affine=in_affine, in_act=in_act,
                           out_affine=out_affine, out_act=out_act,
                           residual=res2d, out_dtype=out_dtype)
        return out.reshape(B, H, W, cout)

    ho = (H + 2 * padding - kh) // stride + 1
    wo = (W + 2 * padding - kw) // stride + 1

    # Prologue (folded BN / LeakyReLU) runs BEFORE zero padding, matching
    # nn.Sequential(BN, LeakyReLU, Conv(padding=p)).  XLA fuses it into the pad write
    # we need anyway -> one HBM write of the slightly padded bf16 plane, no im2col.
    h = x
    if in_affine is not None or in_act != "none":
        h = h.astype(jnp.float32)
        if in_affine is not None:
            s, b = in_affine
            h = h * s.reshape(1, 1, 1, -1) + b.reshape(1, 1, 1, -1)
        if in_act == "leaky_relu":
            h = _leaky(h)

    # Routing: spatial convs with a non-trivial channel count use the Pallas tap
    # kernel (lane-dense at production Cout>=128); the 7x7 plane-attention conv
    # (Cin=2, Cout=1) and the single stride-2 conv stay on XLA (lane-sparse, tiny).
    if stride == 1 and cout >= 8 and C >= 4:
        hp = jnp.pad(h.astype(jnp.bfloat16),
                     ((0, 0), (padding, padding), (padding, padding), (0, 0)))
        return _conv_pallas(hp, w_mat, cout, kh, kw, ho, wo,
                            out_affine, out_act, residual, out_dtype)
    return _conv_xla(h, w_mat, C, cout, kh, kw, stride, padding,
                     out_affine, out_act, residual, out_dtype)


# --------------------------------------------------------------------------- #
# Blocks
# --------------------------------------------------------------------------- #

def bn_affine(p):
    return (p["scale"], p["shift"])


def mix(x, atten, alpha_param, min_alpha=0.2, max_alpha=0.8):
    alpha = jax.nn.sigmoid(alpha_param) * (max_alpha - min_alpha) + min_alpha
    return x + alpha * x * (atten - 1.0)


def apply_res_block(x, p):
    h = conv2d(x, p["conv1"], kh=3, kw=3, padding=1,
               in_affine=bn_affine(p["bn1"]), in_act="leaky_relu",
               out_dtype=jnp.bfloat16)
    # residual added after the (activation-free) second conv, matching model(x) + x
    return conv2d(h, p["conv2"], kh=3, kw=3, padding=1,
                  in_affine=bn_affine(p["bn2"]), in_act="leaky_relu",
                  residual=x, out_dtype=jnp.bfloat16)


def apply_eca(x, p):
    """x is the BN'd (f32) tensor; returns mix(x, channel attention)."""
    B, H, W, C = x.shape
    avg = jnp.mean(x, axis=(1, 2))
    mx = jnp.max(x, axis=(1, 2))
    s = jnp.stack([avg, mx], axis=1)                              # (B, 2, C)
    k = p["conv"].shape[0] // 2
    pad = (k - 1) // 2
    sp = jnp.pad(s, ((0, 0), (0, 0), (pad, pad)))
    taps = jnp.stack([sp[:, :, t:t + C] for t in range(k)], axis=-1)   # (B, 2, C, k)
    A = jnp.transpose(taps, (0, 2, 1, 3)).reshape(B * C, 2 * k)
    atten = fused_matmul(A, p["conv"], out_affine=bn_affine(p["bn"]),
                         out_act="sigmoid", out_dtype=jnp.float32)      # XLA (tiny)
    atten = atten.reshape(B, 1, 1, C)
    return mix(x, atten, p["alpha"])


def apply_cbam(x, p):
    """x is the BN'd (f32) tensor; returns mix(x, channel*plane attention)."""
    B, H, W, C = x.shape
    avg = jnp.mean(x, axis=(1, 2))
    mx = jnp.max(x, axis=(1, 2))
    m = fused_matmul(mx, p["max_fc"]["mat"],
                     out_affine=(p["max_fc"]["scale"], p["max_fc"]["shift"]),
                     out_act="leaky_relu", out_dtype=jnp.float32)
    a = fused_matmul(avg, p["avg_fc"]["mat"],
                     out_affine=(p["avg_fc"]["scale"], p["avg_fc"]["shift"]),
                     out_act="leaky_relu", residual=m, out_dtype=jnp.float32)
    ch = fused_matmul(a, p["shared_fc"]["mat"],
                      out_affine=(p["shared_fc"]["scale"], p["shared_fc"]["shift"]),
                      out_act="sigmoid", out_dtype=jnp.float32)
    ch_atten = ch.reshape(B, 1, 1, C)
    avg_plane = jnp.mean(x, axis=-1, keepdims=True)
    max_plane = jnp.max(x, axis=-1, keepdims=True)
    plane = jnp.concatenate([avg_plane, max_plane], axis=-1)      # (B, H, W, 2)
    pa = conv2d(plane, p["plane_conv"], kh=7, kw=7, padding=3,
                out_affine=bn_affine(p["plane_bn"]), out_act="sigmoid",
                out_dtype=jnp.float32)                            # XLA (Cin=2, Cout=1)
    return mix(x, ch_atten * pa, p["alpha"])


def apply_zrcb(x, p):
    h = conv2d(x, p["enc_conv"], in_affine=bn_affine(p["enc_bn"]), in_act="leaky_relu",
               out_dtype=jnp.bfloat16)
    h = apply_res_block(h, p["res1"])
    h = apply_res_block(h, p["res2"])
    # decoder BN feeds both the ECA pooling and the mixing; plain jnp so XLA fuses it
    b = h.astype(jnp.float32) * p["dec_bn"]["scale"] + p["dec_bn"]["shift"]
    e = apply_eca(b, p["eca"])
    # trailing leaky as prologue; ZRCB skip fused into the epilogue
    return conv2d(e, p["dec_conv"], in_act="leaky_relu", residual=x,
                  out_dtype=jnp.bfloat16)


def apply_shared(x, p):
    h = conv2d(x, p["conv_in"], kh=5, kw=5, padding=2, out_dtype=jnp.bfloat16)
    for stage in p["stages"]:
        for blk in stage["blocks"]:
            h = apply_zrcb(h, blk)
        if stage["trans"] is not None:
            h = conv2d(h, stage["trans"]["conv"], kh=3, kw=3, padding=1,
                       in_affine=bn_affine(stage["trans"]["bn"]), in_act="leaky_relu",
                       out_dtype=jnp.bfloat16)
    t = h.astype(jnp.float32) * p["final_bn"]["scale"] + p["final_bn"]["shift"]
    t = apply_cbam(t, p["cbam"])
    return conv2d(t, p["conv_out"], in_act="leaky_relu", out_dtype=jnp.bfloat16)


def apply_policy(x, p):
    h = x
    for blk in p["shared_blocks"]:
        h = apply_zrcb(h, blk)
    t = h.astype(jnp.float32) * p["shared_bn"]["scale"] + p["shared_bn"]["shift"]
    t = apply_cbam(t, p["cbam"])
    B, H, W, C = t.shape
    m = conv2d(t, p["move_conv1"], in_act="leaky_relu",
               out_affine=bn_affine(p["move_bn"]), out_act="leaky_relu",
               out_dtype=jnp.float32)
    m = conv2d(m, p["move_conv2"], out_affine=(p["move_scale"], p["move_bias"]),
               out_dtype=jnp.float32)
    move = m.reshape(B, H * W)
    q = conv2d(t, p["pass_conv"], in_act="leaky_relu",
               out_affine=bn_affine(p["pass_bn"]), out_act="leaky_relu",
               out_dtype=jnp.float32)
    q = q.reshape(B, H * W)
    q = fused_matmul(q, p["pass_lin1"]["mat"],
                     out_affine=(p["pass_lin1"]["scale"], p["pass_lin1"]["shift"]),
                     out_act="leaky_relu", out_dtype=jnp.float32)
    q = fused_matmul(q, p["pass_lin2"]["mat"],
                     out_affine=(p["pass_lin2"]["scale"], p["pass_lin2"]["shift"]),
                     out_dtype=jnp.float32)
    return jnp.concatenate([move, q], axis=1)


def apply_value(x, p):
    h = x
    for blk in p["res_blocks"]:
        h = apply_zrcb(h, blk)
    t = h.astype(jnp.float32) * p["res_bn"]["scale"] + p["res_bn"]["shift"]
    t = apply_cbam(t, p["cbam"])
    B, H, W, C = t.shape
    f1 = jnp.mean(_leaky(t), axis=(1, 2))                       # AdaptiveAvgPool + Flatten
    g = conv2d(t, p["f2_conv1"], kh=3, kw=3, stride=2, padding=1, in_act="leaky_relu",
               out_affine=bn_affine(p["f2_bn1"]), out_act="leaky_relu",
               out_dtype=jnp.float32)                           # stride-2: XLA fallback
    g = conv2d(g, p["f2_conv2"], out_affine=bn_affine(p["f2_bn2"]),
               out_act="leaky_relu", out_dtype=jnp.float32)
    g = conv2d(g, p["f2_conv3"], out_affine=bn_affine(p["f2_bn3"]),
               out_act="leaky_relu", out_dtype=jnp.float32)
    f2 = g.reshape(B, -1)
    f = jnp.concatenate([f1, f2], axis=1)
    d = fused_matmul(f, p["dense1"]["mat"],
                     out_affine=(p["dense1"]["scale"], p["dense1"]["shift"]),
                     out_act="leaky_relu", out_dtype=jnp.float32)
    # TODO(synk): nn.Dropout(0.5) is identity in eval mode; no stochastic drop implemented.
    return fused_matmul(d, p["dense2"]["mat"],
                        out_affine=(p["dense2"]["scale"], p["dense2"]["shift"]),
                        out_dtype=jnp.float32)


def zhugo_forward(x_nchw, params):
    x = jnp.transpose(x_nchw, (0, 2, 3, 1)).astype(jnp.float32)     # NCHW -> NHWC
    shared = apply_shared(x, params["shared"])
    policy = apply_policy(shared, params["policy"])
    value = apply_value(shared, params["value"])
    return policy, value


# --------------------------------------------------------------------------- #
# Deterministic parameter construction (weights prepped ONCE for the kernels)
# --------------------------------------------------------------------------- #

class PInit:
    def __init__(self, seed):
        self.key = jax.random.PRNGKey(seed)
        self.cnt = 0

    def _k(self):
        self.cnt += 1
        return jax.random.fold_in(self.key, self.cnt)

    def normal(self, shape, std=1.0):
        return std * jax.random.normal(self._k(), shape, jnp.float32)

    def kaiming_conv(self, o, i, kh, kw):
        gain = math.sqrt(2.0 / (1.0 + 0.01 ** 2))
        return self.normal((o, i, kh, kw), gain / math.sqrt(i * kh * kw))

    def xavier_conv(self, o, i, kh, kw):
        std = math.sqrt(2.0 / (i * kh * kw + o * kh * kw))
        return self.normal((o, i, kh, kw), std)

    def xavier_conv1d(self, o, i, k):
        std = math.sqrt(2.0 / (i * k + o * k))
        return self.normal((o, i, k), std)

    def kaiming_linear(self, out, inp):
        gain = math.sqrt(2.0 / (1.0 + 0.01 ** 2))
        return self.normal((out, inp), gain / math.sqrt(inp))

    def xavier_linear(self, out, inp):
        std = math.sqrt(2.0 / (out + inp))
        return self.normal((out, inp), std)

    def bn(self, c, eps=1e-5):
        # eval-mode BatchNorm folded once at init into per-channel (scale, shift)
        gamma = 1.0 + 0.1 * self.normal((c,))
        beta = 0.1 * self.normal((c,))
        mean = 0.1 * self.normal((c,))
        var = 1.0 + 0.1 * jnp.abs(self.normal((c,)))
        scale = gamma / jnp.sqrt(var + eps)
        shift = beta - mean * scale
        return dict(scale=scale.astype(jnp.float32), shift=shift.astype(jnp.float32))


def _prep_conv(w_oihw):
    """OIHW conv weight -> (kh*kw*Cin, Cout) bf16 matmul operand (done once at init)."""
    o, i, kh, kw = w_oihw.shape
    return jnp.transpose(w_oihw, (2, 3, 1, 0)).reshape(kh * kw * i, o).astype(jnp.bfloat16)


def _prep_conv1d(w_oik):
    o, i, k = w_oik.shape
    return w_oik.reshape(o, i * k).T.astype(jnp.bfloat16)


def _prep_linear(w_oi, bias):
    return dict(mat=w_oi.T.astype(jnp.bfloat16),
                scale=jnp.ones((w_oi.shape[0],), jnp.float32),
                shift=bias.astype(jnp.float32))


def _eca_ksize(channels, gamma=2.0, beta=1.0):
    k = max(int((math.log2(channels) + beta) / gamma), 1)
    return k if k % 2 else k + 1


def init_res_block(pi, c):
    return dict(bn1=pi.bn(c), conv1=_prep_conv(pi.kaiming_conv(c, c, 3, 3)),
                bn2=pi.bn(c), conv2=_prep_conv(pi.kaiming_conv(c, c, 3, 3)))


def init_eca(pi, c):
    k = _eca_ksize(c)
    return dict(conv=_prep_conv1d(pi.xavier_conv1d(1, 2, k)), bn=pi.bn(1),
                alpha=jnp.asarray(0.0, jnp.float32))


def init_cbam(pi, c, reduction):
    bott = c // reduction
    return dict(
        avg_fc=_prep_linear(pi.kaiming_linear(bott, c), jnp.zeros((bott,), jnp.float32)),
        max_fc=_prep_linear(pi.kaiming_linear(bott, c), jnp.zeros((bott,), jnp.float32)),
        shared_fc=_prep_linear(pi.xavier_linear(c, bott), jnp.zeros((c,), jnp.float32)),
        plane_conv=_prep_conv(pi.xavier_conv(1, 2, 7, 7)),
        plane_bn=pi.bn(1),
        alpha=jnp.asarray(0.0, jnp.float32),
    )


def init_zrcb(pi, c):
    inner = c // 2
    return dict(
        enc_bn=pi.bn(c), enc_conv=_prep_conv(pi.kaiming_conv(inner, c, 1, 1)),
        res1=init_res_block(pi, inner), res2=init_res_block(pi, inner),
        dec_bn=pi.bn(inner), eca=init_eca(pi, inner),
        dec_conv=_prep_conv(pi.kaiming_conv(c, inner, 1, 1)),
    )


def init_shared(pi, input_channels, residual_channels, residual_depths, bottleneck_channels):
    first, last = residual_channels[0], residual_channels[-1]
    stages = []
    for idx, (ch, depth) in enumerate(zip(residual_channels, residual_depths)):
        blocks = [init_zrcb(pi, ch) for _ in range(depth)]
        if idx < len(residual_channels) - 1:
            nxt = residual_channels[idx + 1]
            trans = dict(bn=pi.bn(ch), conv=_prep_conv(pi.kaiming_conv(nxt, ch, 3, 3)))
        else:
            trans = None
        stages.append(dict(blocks=blocks, trans=trans))
    return dict(
        conv_in=_prep_conv(pi.kaiming_conv(first, input_channels, 5, 5)),
        stages=stages,
        final_bn=pi.bn(last),
        cbam=init_cbam(pi, last, 8),
        conv_out=_prep_conv(pi.kaiming_conv(bottleneck_channels, last, 1, 1)),
    )


def init_policy(pi, board_size, b, depth):
    H, W = board_size
    return dict(
        shared_blocks=[init_zrcb(pi, b) for _ in range(depth)],
        shared_bn=pi.bn(b),
        cbam=init_cbam(pi, b, 8),
        move_conv1=_prep_conv(pi.kaiming_conv(b // 2, b, 1, 1)),
        move_bn=pi.bn(b // 2),
        move_conv2=_prep_conv(pi.xavier_conv(1, b // 2, 1, 1)),
        move_scale=jnp.ones((1,), jnp.float32),
        move_bias=jnp.zeros((1,), jnp.float32),
        pass_conv=_prep_conv(pi.kaiming_conv(1, b, 1, 1)),
        pass_bn=pi.bn(1),
        pass_lin1=_prep_linear(pi.kaiming_linear(H * W // 4, H * W),
                               jnp.zeros((H * W // 4,), jnp.float32)),
        pass_lin2=_prep_linear(pi.xavier_linear(1, H * W // 4),
                               jnp.zeros((1,), jnp.float32)),
    )


def init_value(pi, board_size, b, depth, mid):
    H, W = board_size
    H2, W2 = (H + 1) // 2, (W + 1) // 2
    return dict(
        res_blocks=[init_zrcb(pi, b) for _ in range(depth)],
        res_bn=pi.bn(b),
        cbam=init_cbam(pi, b, 8),
        f2_conv1=_prep_conv(pi.kaiming_conv(b, b, 3, 3)),
        f2_bn1=pi.bn(b),
        f2_conv2=_prep_conv(pi.kaiming_conv(b // 2, b, 1, 1)),
        f2_bn2=pi.bn(b // 2),
        f2_conv3=_prep_conv(pi.kaiming_conv(1, b // 2, 1, 1)),
        f2_bn3=pi.bn(1),
        dense1=_prep_linear(pi.kaiming_linear(mid, b + H2 * W2),
                            jnp.zeros((mid,), jnp.float32)),
        dense2=_prep_linear(pi.xavier_linear(1, mid), jnp.zeros((1,), jnp.float32)),
    )


# --------------------------------------------------------------------------- #
# Main
# --------------------------------------------------------------------------- #

if __name__ == "__main__":
    board_size = (8, 8)
    input_channels = 4
    residual_channels = (16, 32)
    residual_depths = (1, 1)
    bottleneck_channels = 16
    policy_residual_depth = 1
    value_residual_depth = 1
    value_middle_width = 32

    pi = PInit(0)
    params = dict(
        shared=init_shared(pi, input_channels, residual_channels, residual_depths,
                           bottleneck_channels),
        policy=init_policy(pi, board_size, bottleneck_channels, policy_residual_depth),
        value=init_value(pi, board_size, bottleneck_channels, value_residual_depth,
                         value_middle_width),
    )

    x = jax.random.normal(jax.random.PRNGKey(0),
                          (2, input_channels, board_size[0], board_size[1]), jnp.float32)

    fwd = jax.jit(zhugo_forward)
    policy, value = fwd(x, params)
    jax.block_until_ready((policy, value))

    assert policy.shape == (2, board_size[0] * board_size[1] + 1), policy.shape
    assert value.shape == (2, 1), value.shape
    assert bool(jnp.all(jnp.isfinite(policy))) and bool(jnp.all(jnp.isfinite(value)))
    print("KERNEL_OK")
</pallas_src>

<mosaic_0001>
module attributes {stable_mosaic.version = 11 : i64} {
  func.func @_conv_tap_kernel(%arg0: i32, %arg1: i32, %arg2: memref<1x12x12x4xbf16, #tpu.memory_space<vmem>>, %arg3: memref<100x16xbf16, #tpu.memory_space<vmem>>, %arg4: memref<1x8x8x16xbf16, #tpu.memory_space<vmem>>) attributes {dimension_semantics = [#tpu.dimension_semantics<parallel>, #tpu.dimension_semantics<parallel>], iteration_bounds = array<i64: 2, 1>, scalar_prefetch = 0 : i64, scratch_operands = 0 : i64, tpu.core_type = #tpu.core_type<tc>, window_params = [{transform_indices = @transform_0, window_bounds = array<i64: 1, 12, 12, 4>}, {transform_indices = @transform_1, window_bounds = array<i64: 100, 16>}, {transform_indices = @transform_2, window_bounds = array<i64: 1, 8, 8, 16>}]} {
    %cst = arith.constant 0.000000e+00 : f32
    %0 = vector.broadcast %cst : f32 to vector<64x16xf32>
    %c0 = arith.constant 0 : index
    %c0_0 = arith.constant 0 : index
    %c0_1 = arith.constant 0 : index
    %c0_2 = arith.constant 0 : index
    %1 = vector.load %arg2[%c0, %c0_0, %c0_1, %c0_2] : memref<1x12x12x4xbf16, #tpu.memory_space<vmem>>, vector<1x8x8x4xbf16>
    %2 = vector.shape_cast %1 : vector<1x8x8x4xbf16> to vector<8x8x4xbf16>
    %3 = vector.shape_cast %2 : vector<8x8x4xbf16> to vector<64x4xbf16>
    %c0_3 = arith.constant 0 : index
    %c0_4 = arith.constant 0 : index
    %4 = vector.load %arg3[%c0_3, %c0_4] : memref<100x16xbf16, #tpu.memory_space<vmem>>, vector<4x16xbf16>
    %cst_5 = arith.constant dense<0.000000e+00> : vector<64x16xf32>
    %5 = tpu.matmul %3, %4, %cst_5 {dimension_numbers = #tpu.dot_dimension_numbers<[1], [0], [0], [1], [0, 0, 1, 1], [], []>} : vector<64x4xbf16>, vector<4x16xbf16>, vector<64x16xf32> -> vector<64x16xf32>
    %6 = arith.addf %0, %5 : vector<64x16xf32>
    %c0_6 = arith.constant 0 : index
    %c0_7 = arith.constant 0 : index
    %c1 = arith.constant 1 : index
    %c0_8 = arith.constant 0 : index
    %7 = vector.load %arg2[%c0_6, %c0_7, %c1, %c0_8] : memref<1x12x12x4xbf16, #tpu.memory_space<vmem>>, vector<1x8x8x4xbf16>
    %8 = vector.shape_cast %7 : vector<1x8x8x4xbf16> to vector<8x8x4xbf16>
    %9 = vector.shape_cast %8 : vector<8x8x4xbf16> to vector<64x4xbf16>
    %c4 = arith.constant 4 : index
    %c0_9 = arith.constant 0 : index
    %10 = vector.load %arg3[%c4, %c0_9] : memref<100x16xbf16, #tpu.memory_space<vmem>>, vector<4x16xbf16>
    %cst_10 = arith.constant dense<0.000000e+00> : vector<64x16xf32>
    %11 = tpu.matmul %9, %10, %cst_10 {dimension_numbers = #tpu.dot_dimension_numbers<[1], [0], [0], [1], [0, 0, 1, 1], [], []>} : vector<64x4xbf16>, vector<4x16xbf16>, vector<64x16xf32> -> vector<64x16xf32>
    %12 = arith.addf %6, %11 : vector<64x16xf32>
    %c0_11 = arith.constant 0 : index
    %c0_12 = arith.constant 0 : index
    %c2 = arith.constant 2 : index
    %c0_13 = arith.constant 0 : index
    %13 = vector.load %arg2[%c0_11, %c0_12, %c2, %c0_13] : memref<1x12x12x4xbf16, #tpu.memory_space<vmem>>, vector<1x8x8x4xbf16>
    %14 = vector.shape_cast %13 : vector<1x8x8x4xbf16> to vector<8x8x4xbf16>
    %15 = vector.shape_cast %14 : vector<8x8x4xbf16> to vector<64x4xbf16>
    %c8 = arith.constant 8 : index
    %c0_14 = arith.constant 0 : index
    %16 = vector.load %arg3[%c8, %c0_14] : memref<100x16xbf16, #tpu.memory_space<vmem>>, vector<4x16xbf16>
    %cst_15 = arith.constant dense<0.000000e+00> : vector<64x16xf32>
    %17 = tpu.matmul %15, %16, %cst_15 {dimension_numbers = #tpu.dot_dimension_numbers<[1], [0], [0], [1], [0, 0, 1, 1], [], []>} : vector<64x4xbf16>, vector<4x16xbf16>, vector<64x16xf32> -> vector<64x16xf32>
    %18 = arith.addf %12, %17 : vector<64x16xf32>
    %c0_16 = arith.constant 0 : index
    %c0_17 = arith.constant 0 : index
    %c3 = arith.constant 3 : index
    %c0_18 = arith.constant 0 : index
    %19 = vector.load %arg2[%c0_16, %c0_17, %c3, %c0_18] : memref<1x12x12x4xbf16, #tpu.memory_space<vmem>>, vector<1x8x8x4xbf16>
    %20 = vector.shape_cast %19 : vector<1x8x8x4xbf16> to vector<8x8x4xbf16>
    %21 = vector.shape_cast %20 : vector<8x8x4xbf16> to vector<64x4xbf16>
    %c12 = arith.constant 12 : index
    %c0_19 = arith.constant 0 : index
    %22 = vector.load %arg3[%c12, %c0_19] : memref<100x16xbf16, #tpu.memory_space<vmem>>, vector<4x16xbf16>
    %cst_20 = arith.constant dense<0.000000e+00> : vector<64x16xf32>
    %23 = tpu.matmul %21, %22, %cst_20 {dimension_numbers = #tpu.dot_dimension_numbers<[1], [0], [0], [1], [0, 0, 1, 1], [], []>} : vector<64x4xbf16>, vector<4x16xbf16>, vector<64x16xf32> -> vector<64x16xf32>
    %24 = arith.addf %18, %23 : vector<64x16xf32>
    %c0_21 = arith.constant 0 : index
    %c0_22 = arith.constant 0 : index
    %c4_23 = arith.constant 4 : index
    %c0_24 = arith.constant 0 : index
    %25 = vector.load %arg2[%c0_21, %c0_22, %c4_23, %c0_24] : memref<1x12x12x4xbf16, #tpu.memory_space<vmem>>, vector<1x8x8x4xbf16>
    %26 = vector.shape_cast %25 : vector<1x8x8x4xbf16> to vector<8x8x4xbf16>
    %27 = vector.shape_cast %26 : vector<8x8x4xbf16> to vector<64x4xbf16>
    %c16 = arith.constant 16 : index
    %c0_25 = arith.constant 0 : index
    %28 = vector.load %arg3[%c16, %c0_25] : memref<100x16xbf16, #tpu.memory_space<vmem>>, vector<4x16xbf16>
    %cst_26 = arith.constant dense<0.000000e+00> : vector<64x16xf32>
    %29 = tpu.matmul %27, %28, %cst_26 {dimension_numbers = #tpu.dot_dimension_numbers<[1], [0], [0], [1], [0, 0, 1, 1], [], []>} : vector<64x4xbf16>, vector<4x16xbf16>, vector<64x16xf32> -> vector<64x16xf32>
    %30 = arith.addf %24, %29 : vector<64x16xf32>
    %c0_27 = arith.constant 0 : index
    %c1_28 = arith.constant 1 : index
    %c0_29 = arith.constant 0 : index
    %c0_30 = arith.constant 0 : index
    %31 = vector.load %arg2[%c0_27, %c1_28, %c0_29, %c0_30] : memref<1x12x12x4xbf16, #tpu.memory_space<vmem>>, vector<1x8x8x4xbf16>
    %32 = vector.shape_cast %31 : vector<1x8x8x4xbf16> to vector<8x8x4xbf16>
    %33 = vector.shape_cast %32 : vector<8x8x4xbf16> to vector<64x4xbf16>
    %c20 = arith.constant 20 : index
    %c0_31 = arith.constant 0 : index
    %34 = vector.load %arg3[%c20, %c0_31] : memref<100x16xbf16, #tpu.memory_space<vmem>>, vector<4x16xbf16>
    %cst_32 = arith.constant dense<0.000000e+00> : vector<64x16xf32>
    %35 = tpu.matmul %33, %34, %cst_32 {dimension_numbers = #tpu.dot_dimension_numbers<[1], [0], [0], [1], [0, 0, 1, 1], [], []>} : vector<64x4xbf16>, vector<4x16xbf16>, vector<64x16xf32> -> vector<64x16xf32>
    %36 = arith.addf %30, %35 : vector<64x16xf32>
    %c0_33 = arith.constant 0 : index
    %c1_34 = arith.constant 1 : index
    %c1_35 = arith.constant 1 : index
    %c0_36 = arith.constant 0 : index
    %37 = vector.load %arg2[%c0_33, %c1_34, %c1_35, %c0_36] : memref<1x12x12x4xbf16, #tpu.memory_space<vmem>>, vector<1x8x8x4xbf16>
    %38 = vector.shape_cast %37 : vector<1x8x8x4xbf16> to vector<8x8x4xbf16>
    %39 = vector.shape_cast %38 : vector<8x8x4xbf16> to vector<64x4xbf16>
    %c24 = arith.constant 24 : index
    %c0_37 = arith.constant 0 : index
    %40 = vector.load %arg3[%c24, %c0_37] : memref<100x16xbf16, #tpu.memory_space<vmem>>, vector<4x16xbf16>
    %cst_38 = arith.constant dense<0.000000e+00> : vector<64x16xf32>
    %41 = tpu.matmul %39, %40, %cst_38 {dimension_numbers = #tpu.dot_dimension_numbers<[1], [0], [0], [1], [0, 0, 1, 1], [], []>} : vector<64x4xbf16>, vector<4x16xbf16>, vector<64x16xf32> -> vector<64x16xf32>
    %42 = arith.addf %36, %41 : vector<64x16xf32>
    %c0_39 = arith.constant 0 : index
    %c1_40 = arith.constant 1 : index
    %c2_41 = arith.constant 2 : index
    %c0_42 = arith.constant 0 : index
    %43 = vector.load %arg2[%c0_39, %c1_40, %c2_41, %c0_42] : memref<1x12x12x4xbf16, #tpu.memory_space<vmem>>, vector<1x8x8x4xbf16>
    %44 = vector.shape_cast %43 : vector<1x8x8x4xbf16> to vector<8x8x4xbf16>
    %45 = vector.shape_cast %44 : vector<8x8x4xbf16> to vector<64x4xbf16>
    %c28 = arith.constant 28 : index
    %c0_43 = arith.constant 0 : index
    %46 = vector.load %arg3[%c28, %c0_43] : memref<100x16xbf16, #tpu.memory_space<vmem>>, vector<4x16xbf16>
    %cst_44 = arith.constant dense<0.000000e+00> : vector<64x16xf32>
    %47 = tpu.matmul %45, %46, %cst_44 {dimension_numbers = #tpu.dot_dimension_numbers<[1], [0], [0], [1], [0, 0, 1, 1], [], []>} : vector<64x4xbf16>, vector<4x16xbf16>, vector<64x16xf32> -> vector<64x16xf32>
    %48 = arith.addf %42, %47 : vector<64x16xf32>
    %c0_45 = arith.constant 0 : index
    %c1_46 = arith.constant 1 : index
    %c3_47 = arith.constant 3 : index
    %c0_48 = arith.constant 0 : index
    %49 = vector.load %arg2[%c0_45, %c1_46, %c3_47, %c0_48] : memref<1x12x12x4xbf16, #tpu.memory_space<vmem>>, vector<1x8x8x4xbf16>
    %50 = vector.shape_cast %49 : vector<1x8x8x4xbf16> to vector<8x8x4xbf16>
    %51 = vector.shape_cast %50 : vector<8x8x4xbf16> to vector<64x4xbf16>
    %c32 = arith.constant 32 : index
    %c0_49 = arith.constant 0 : index
    %52 = vector.load %arg3[%c32, %c0_49] : memref<100x16xbf16, #tpu.memory_space<vmem>>, vector<4x16xbf16>
    %cst_50 = arith.constant dense<0.000000e+00> : vector<64x16xf32>
    %53 = tpu.matmul %51, %52, %cst_50 {dimension_numbers = #tpu.dot_dimension_numbers<[1], [0], [0], [1], [0, 0, 1, 1], [], []>} : vector<64x4xbf16>, vector<4x16xbf16>, vector<64x16xf32> -> vector<64x16xf32>
    %54 = arith.addf %48, %53 : vector<64x16xf32>
    %c0_51 = arith.constant 0 : index
    %c1_52 = arith.constant 1 : index
    %c4_53 = arith.constant 4 : index
    %c0_54 = arith.constant 0 : index
    %55 = vector.load %arg2[%c0_51, %c1_52, %c4_53, %c0_54] : memref<1x12x12x4xbf16, #tpu.memory_space<vmem>>, vector<1x8x8x4xbf16>
    %56 = vector.shape_cast %55 : vector<1x8x8x4xbf16> to vector<8x8x4xbf16>
    %57 = vector.shape_cast %56 : vector<8x8x4xbf16> to vector<64x4xbf16>
    %c36 = arith.constant 36 : index
    %c0_55 = arith.constant 0 : index
    %58 = vector.load %arg3[%c36, %c0_55] : memref<100x16xbf16, #tpu.memory_space<vmem>>, vector<4x16xbf16>
    %cst_56 = arith.constant dense<0.000000e+00> : vector<64x16xf32>
    %59 = tpu.matmul %57, %58, %cst_56 {dimension_numbers = #tpu.dot_dimension_numbers<[1], [0], [0], [1], [0, 0, 1, 1], [], []>} : vector<64x4xbf16>, vector<4x16xbf16>, vector<64x16xf32> -> vector<64x16xf32>
    %60 = arith.addf %54, %59 : vector<64x16xf32>
    %c0_57 = arith.constant 0 : index
    %c2_58 = arith.constant 2 : index
    %c0_59 = arith.constant 0 : index
    %c0_60 = arith.constant 0 : index
    %61 = vector.load %arg2[%c0_57, %c2_58, %c0_59, %c0_60] : memref<1x12x12x4xbf16, #tpu.memory_space<vmem>>, vector<1x8x8x4xbf16>
    %62 = vector.shape_cast %61 : vector<1x8x8x4xbf16> to vector<8x8x4xbf16>
    %63 = vector.shape_cast %62 : vector<8x8x4xbf16> to vector<64x4xbf16>
    %c40 = arith.constant 40 : index
    %c0_61 = arith.constant 0 : index
    %64 = vector.load %arg3[%c40, %c0_61] : memref<100x16xbf16, #tpu.memory_space<vmem>>, vector<4x16xbf16>
    %cst_62 = arith.constant dense<0.000000e+00> : vector<64x16xf32>
    %65 = tpu.matmul %63, %64, %cst_62 {dimension_numbers = #tpu.dot_dimension_numbers<[1], [0], [0], [1], [0, 0, 1, 1], [], []>} : vector<64x4xbf16>, vector<4x16xbf16>, vector<64x16xf32> -> vector<64x16xf32>
    %66 = arith.addf %60, %65 : vector<64x16xf32>
    %c0_63 = arith.constant 0 : index
    %c2_64 = arith.constant 2 : index
    %c1_65 = arith.constant 1 : index
    %c0_66 = arith.constant 0 : index
    %67 = vector.load %arg2[%c0_63, %c2_64, %c1_65, %c0_66] : memref<1x12x12x4xbf16, #tpu.memory_space<vmem>>, vector<1x8x8x4xbf16>
    %68 = vector.shape_cast %67 : vector<1x8x8x4xbf16> to vector<8x8x4xbf16>
    %69 = vector.shape_cast %68 : vector<8x8x4xbf16> to vector<64x4xbf16>
    %c44 = arith.constant 44 : index
    %c0_67 = arith.constant 0 : index
    %70 = vector.load %arg3[%c44, %c0_67] : memref<100x16xbf16, #tpu.memory_space<vmem>>, vector<4x16xbf16>
    %cst_68 = arith.constant dense<0.000000e+00> : vector<64x16xf32>
    %71 = tpu.matmul %69, %70, %cst_68 {dimension_numbers = #tpu.dot_dimension_numbers<[1], [0], [0], [1], [0, 0, 1, 1], [], []>} : vector<64x4xbf16>, vector<4x16xbf16>, vector<64x16xf32> -> vector<64x16xf32>
    %72 = arith.addf %66, %71 : vector<64x16xf32>
    %c0_69 = arith.constant 0 : index
    %c2_70 = arith.constant 2 : index
    %c2_71 = arith.constant 2 : index
    %c0_72 = arith.constant 0 : index
    %73 = vector.load %arg2[%c0_69, %c2_70, %c2_71, %c0_72] : memref<1x12x12x4xbf16, #tpu.memory_space<vmem>>, vector<1x8x8x4xbf16>
    %74 = vector.shape_cast %73 : vector<1x8x8x4xbf16> to vector<8x8x4xbf16>
    %75 = vector.shape_cast %74 : vector<8x8x4xbf16> to vector<64x4xbf16>
    %c48 = arith.constant 48 : index
    %c0_73 = arith.constant 0 : index
    %76 = vector.load %arg3[%c48, %c0_73] : memref<100x16xbf16, #tpu.memory_space<vmem>>, vector<4x16xbf16>
    %cst_74 = arith.constant dense<0.000000e+00> : vector<64x16xf32>
    %77 = tpu.matmul %75, %76, %cst_74 {dimension_numbers = #tpu.dot_dimension_numbers<[1], [0], [0], [1], [0, 0, 1, 1], [], []>} : vector<64x4xbf16>, vector<4x16xbf16>, vector<64x16xf32> -> vector<64x16xf32>
    %78 = arith.addf %72, %77 : vector<64x16xf32>
    %c0_75 = arith.constant 0 : index
    %c2_76 = arith.constant 2 : index
    %c3_77 = arith.constant 3 : index
    %c0_78 = arith.constant 0 : index
    %79 = vector.load %arg2[%c0_75, %c2_76, %c3_77, %c0_78] : memref<1x12x12x4xbf16, #tpu.memory_space<vmem>>, vector<1x8x8x4xbf16>
    %80 = vector.shape_cast %79 : vector<1x8x8x4xbf16> to vector<8x8x4xbf16>
    %81 = vector.shape_cast %80 : vector<8x8x4xbf16> to vector<64x4xbf16>
    %c52 = arith.constant 52 : index
    %c0_79 = arith.constant 0 : index
    %82 = vector.load %arg3[%c52, %c0_79] : memref<100x16xbf16, #tpu.memory_space<vmem>>, vector<4x16xbf16>
    %cst_80 = arith.constant dense<0.000000e+00> : vector<64x16xf32>
    %83 = tpu.matmul %81, %82, %cst_80 {dimension_numbers = #tpu.dot_dimension_numbers<[1], [0], [0], [1], [0, 0, 1, 1], [], []>} : vector<64x4xbf16>, vector<4x16xbf16>, vector<64x16xf32> -> vector<64x16xf32>
    %84 = arith.addf %78, %83 : vector<64x16xf32>
    %c0_81 = arith.constant 0 : index
    %c2_82 = arith.constant 2 : index
    %c4_83 = arith.constant 4 : index
    %c0_84 = arith.constant 0 : index
    %85 = vector.load %arg2[%c0_81, %c2_82, %c4_83, %c0_84] : memref<1x12x12x4xbf16, #tpu.memory_space<vmem>>, vector<1x8x8x4xbf16>
    %86 = vector.shape_cast %85 : vector<1x8x8x4xbf16> to vector<8x8x4xbf16>
    %87 = vector.shape_cast %86 : vector<8x8x4xbf16> to vector<64x4xbf16>
    %c56 = arith.constant 56 : index
    %c0_85 = arith.constant 0 : index
    %88 = vector.load %arg3[%c56, %c0_85] : memref<100x16xbf16, #tpu.memory_space<vmem>>, vector<4x16xbf16>
    %cst_86 = arith.constant dense<0.000000e+00> : vector<64x16xf32>
    %89 = tpu.matmul %87, %88, %cst_86 {dimension_numbers = #tpu.dot_dimension_numbers<[1], [0], [0], [1], [0, 0, 1, 1], [], []>} : vector<64x4xbf16>, vector<4x16xbf16>, vector<64x16xf32> -> vector<64x16xf32>
    %90 = arith.addf %84, %89 : vector<64x16xf32>
    %c0_87 = arith.constant 0 : index
    %c3_88 = arith.constant 3 : index
    %c0_89 = arith.constant 0 : index
    %c0_90 = arith.constant 0 : index
    %91 = vector.load %arg2[%c0_87, %c3_88, %c0_89, %c0_90] : memref<1x12x12x4xbf16, #tpu.memory_space<vmem>>, vector<1x8x8x4xbf16>
    %92 = vector.shape_cast %91 : vector<1x8x8x4xbf16> to vector<8x8x4xbf16>
    %93 = vector.shape_cast %92 : vector<8x8x4xbf16> to vector<64x4xbf16>
    %c60 = arith.constant 60 : index
    %c0_91 = arith.constant 0 : index
    %94 = vector.load %arg3[%c60, %c0_91] : memref<100x16xbf16, #tpu.memory_space<vmem>>, vector<4x16xbf16>
    %cst_92 = arith.constant dense<0.000000e+00> : vector<64x16xf32>
    %95 = tpu.matmul %93, %94, %cst_92 {dimension_numbers = #tpu.dot_dimension_numbers<[1], [0], [0], [1], [0, 0, 1, 1], [], []>} : vector<64x4xbf16>, vector<4x16xbf16>, vector<64x16xf32> -> vector<64x16xf32>
    %96 = arith.addf %90, %95 : vector<64x16xf32>
    %c0_93 = arith.constant 0 : index
    %c3_94 = arith.constant 3 : index
    %c1_95 = arith.constant 1 : index
    %c0_96 = arith.constant 0 : index
    %97 = vector.load %arg2[%c0_93, %c3_94, %c1_95, %c0_96] : memref<1x12x12x4xbf16, #tpu.memory_space<vmem>>, vector<1x8x8x4xbf16>
    %98 = vector.shape_cast %97 : vector<1x8x8x4xbf16> to vector<8x8x4xbf16>
    %99 = vector.shape_cast %98 : vector<8x8x4xbf16> to vector<64x4xbf16>
    %c64 = arith.constant 64 : index
    %c0_97 = arith.constant 0 : index
    %100 = vector.load %arg3[%c64, %c0_97] : memref<100x16xbf16, #tpu.memory_space<vmem>>, vector<4x16xbf16>
    %cst_98 = arith.constant dense<0.000000e+00> : vector<64x16xf32>
    %101 = tpu.matmul %99, %100, %cst_98 {dimension_numbers = #tpu.dot_dimension_numbers<[1], [0], [0], [1], [0, 0, 1, 1], [], []>} : vector<64x4xbf16>, vector<4x16xbf16>, vector<64x16xf32> -> vector<64x16xf32>
    %102 = arith.addf %96, %101 : vector<64x16xf32>
    %c0_99 = arith.constant 0 : index
    %c3_100 = arith.constant 3 : index
    %c2_101 = arith.constant 2 : index
    %c0_102 = arith.constant 0 : index
    %103 = vector.load %arg2[%c0_99, %c3_100, %c2_101, %c0_102] : memref<1x12x12x4xbf16, #tpu.memory_space<vmem>>, vector<1x8x8x4xbf16>
    %104 = vector.shape_cast %103 : vector<1x8x8x4xbf16> to vector<8x8x4xbf16>
    %105 = vector.shape_cast %104 : vector<8x8x4xbf16> to vector<64x4xbf16>
    %c68 = arith.constant 68 : index
    %c0_103 = arith.constant 0 : index
    %106 = vector.load %arg3[%c68, %c0_103] : memref<100x16xbf16, #tpu.memory_space<vmem>>, vector<4x16xbf16>
    %cst_104 = arith.constant dense<0.000000e+00> : vector<64x16xf32>
    %107 = tpu.matmul %105, %106, %cst_104 {dimension_numbers = #tpu.dot_dimension_numbers<[1], [0], [0], [1], [0, 0, 1, 1], [], []>} : vector<64x4xbf16>, vector<4x16xbf16>, vector<64x16xf32> -> vector<64x16xf32>
    %108 = arith.addf %102, %107 : vector<64x16xf32>
    %c0_105 = arith.constant 0 : index
    %c3_106 = arith.constant 3 : index
    %c3_107 = arith.constant 3 : index
    %c0_108 = arith.constant 0 : index
    %109 = vector.load %arg2[%c0_105, %c3_106, %c3_107, %c0_108] : memref<1x12x12x4xbf16, #tpu.memory_space<vmem>>, vector<1x8x8x4xbf16>
    %110 = vector.shape_cast %109 : vector<1x8x8x4xbf16> to vector<8x8x4xbf16>
    %111 = vector.shape_cast %110 : vector<8x8x4xbf16> to vector<64x4xbf16>
    %c72 = arith.constant 72 : index
    %c0_109 = arith.constant 0 : index
    %112 = vector.load %arg3[%c72, %c0_109] : memref<100x16xbf16, #tpu.memory_space<vmem>>, vector<4x16xbf16>
    %cst_110 = arith.constant dense<0.000000e+00> : vector<64x16xf32>
    %113 = tpu.matmul %111, %112, %cst_110 {dimension_numbers = #tpu.dot_dimension_numbers<[1], [0], [0], [1], [0, 0, 1, 1], [], []>} : vector<64x4xbf16>, vector<4x16xbf16>, vector<64x16xf32> -> vector<64x16xf32>
    %114 = arith.addf %108, %113 : vector<64x16xf32>
    %c0_111 = arith.constant 0 : index
    %c3_112 = arith.constant 3 : index
    %c4_113 = arith.constant 4 : index
    %c0_114 = arith.constant 0 : index
    %115 = vector.load %arg2[%c0_111, %c3_112, %c4_113, %c0_114] : memref<1x12x12x4xbf16, #tpu.memory_space<vmem>>, vector<1x8x8x4xbf16>
    %116 = vector.shape_cast %115 : vector<1x8x8x4xbf16> to vector<8x8x4xbf16>
    %117 = vector.shape_cast %116 : vector<8x8x4xbf16> to vector<64x4xbf16>
    %c76 = arith.constant 76 : index
    %c0_115 = arith.constant 0 : index
    %118 = vector.load %arg3[%c76, %c0_115] : memref<100x16xbf16, #tpu.memory_space<vmem>>, vector<4x16xbf16>
    %cst_116 = arith.constant dense<0.000000e+00> : vector<64x16xf32>
    %119 = tpu.matmul %117, %118, %cst_116 {dimension_numbers = #tpu.dot_dimension_numbers<[1], [0], [0], [1], [0, 0, 1, 1], [], []>} : vector<64x4xbf16>, vector<4x16xbf16>, vector<64x16xf32> -> vector<64x16xf32>
    %120 = arith.addf %114, %119 : vector<64x16xf32>
    %c0_117 = arith.constant 0 : index
    %c4_118 = arith.constant 4 : index
    %c0_119 = arith.constant 0 : index
    %c0_120 = arith.constant 0 : index
    %121 = vector.load %arg2[%c0_117, %c4_118, %c0_119, %c0_120] : memref<1x12x12x4xbf16, #tpu.memory_space<vmem>>, vector<1x8x8x4xbf16>
    %122 = vector.shape_cast %121 : vector<1x8x8x4xbf16> to vector<8x8x4xbf16>
    %123 = vector.shape_cast %122 : vector<8x8x4xbf16> to vector<64x4xbf16>
    %c80 = arith.constant 80 : index
    %c0_121 = arith.constant 0 : index
    %124 = vector.load %arg3[%c80, %c0_121] : memref<100x16xbf16, #tpu.memory_space<vmem>>, vector<4x16xbf16>
    %cst_122 = arith.constant dense<0.000000e+00> : vector<64x16xf32>
    %125 = tpu.matmul %123, %124, %cst_122 {dimension_numbers = #tpu.dot_dimension_numbers<[1], [0], [0], [1], [0, 0, 1, 1], [], []>} : vector<64x4xbf16>, vector<4x16xbf16>, vector<64x16xf32> -> vector<64x16xf32>
    %126 = arith.addf %120, %125 : vector<64x16xf32>
    %c0_123 = arith.constant 0 : index
    %c4_124 = arith.constant 4 : index
    %c1_125 = arith.constant 1 : index
    %c0_126 = arith.constant 0 : index
    %127 = vector.load %arg2[%c0_123, %c4_124, %c1_125, %c0_126] : memref<1x12x12x4xbf16, #tpu.memory_space<vmem>>, vector<1x8x8x4xbf16>
    %128 = vector.shape_cast %127 : vector<1x8x8x4xbf16> to vector<8x8x4xbf16>
    %129 = vector.shape_cast %128 : vector<8x8x4xbf16> to vector<64x4xbf16>
    %c84 = arith.constant 84 : index
    %c0_127 = arith.constant 0 : index
    %130 = vector.load %arg3[%c84, %c0_127] : memref<100x16xbf16, #tpu.memory_space<vmem>>, vector<4x16xbf16>
    %cst_128 = arith.constant dense<0.000000e+00> : vector<64x16xf32>
    %131 = tpu.matmul %129, %130, %cst_128 {dimension_numbers = #tpu.dot_dimension_numbers<[1], [0], [0], [1], [0, 0, 1, 1], [], []>} : vector<64x4xbf16>, vector<4x16xbf16>, vector<64x16xf32> -> vector<64x16xf32>
    %132 = arith.addf %126, %131 : vector<64x16xf32>
    %c0_129 = arith.constant 0 : index
    %c4_130 = arith.constant 4 : index
    %c2_131 = arith.constant 2 : index
    %c0_132 = arith.constant 0 : index
    %133 = vector.load %arg2[%c0_129, %c4_130, %c2_131, %c0_132] : memref<1x12x12x4xbf16, #tpu.memory_space<vmem>>, vector<1x8x8x4xbf16>
    %134 = vector.shape_cast %133 : vector<1x8x8x4xbf16> to vector<8x8x4xbf16>
    %135 = vector.shape_cast %134 : vector<8x8x4xbf16> to vector<64x4xbf16>
    %c88 = arith.constant 88 : index
    %c0_133 = arith.constant 0 : index
    %136 = vector.load %arg3[%c88, %c0_133] : memref<100x16xbf16, #tpu.memory_space<vmem>>, vector<4x16xbf16>
    %cst_134 = arith.constant dense<0.000000e+00> : vector<64x16xf32>
    %137 = tpu.matmul %135, %136, %cst_134 {dimension_numbers = #tpu.dot_dimension_numbers<[1], [0], [0], [1], [0, 0, 1, 1], [], []>} : vector<64x4xbf16>, vector<4x16xbf16>, vector<64x16xf32> -> vector<64x16xf32>
    %138 = arith.addf %132, %137 : vector<64x16xf32>
    %c0_135 = arith.constant 0 : index
    %c4_136 = arith.constant 4 : index
    %c3_137 = arith.constant 3 : index
    %c0_138 = arith.constant 0 : index
    %139 = vector.load %arg2[%c0_135, %c4_136, %c3_137, %c0_138] : memref<1x12x12x4xbf16, #tpu.memory_space<vmem>>, vector<1x8x8x4xbf16>
    %140 = vector.shape_cast %139 : vector<1x8x8x4xbf16> to vector<8x8x4xbf16>
    %141 = vector.shape_cast %140 : vector<8x8x4xbf16> to vector<64x4xbf16>
    %c92 = arith.constant 92 : index
    %c0_139 = arith.constant 0 : index
    %142 = vector.load %arg3[%c92, %c0_139] : memref<100x16xbf16, #tpu.memory_space<vmem>>, vector<4x16xbf16>
    %cst_140 = arith.constant dense<0.000000e+00> : vector<64x16xf32>
    %143 = tpu.matmul %141, %142, %cst_140 {dimension_numbers = #tpu.dot_dimension_numbers<[1], [0], [0], [1], [0, 0, 1, 1], [], []>} : vector<64x4xbf16>, vector<4x16xbf16>, vector<64x16xf32> -> vector<64x16xf32>
    %144 = arith.addf %138, %143 : vector<64x16xf32>
    %c0_141 = arith.constant 0 : index
    %c4_142 = arith.constant 4 : index
    %c4_143 = arith.constant 4 : index
    %c0_144 = arith.constant 0 : index
    %145 = vector.load %arg2[%c0_141, %c4_142, %c4_143, %c0_144] : memref<1x12x12x4xbf16, #tpu.memory_space<vmem>>, vector<1x8x8x4xbf16>
    %146 = vector.shape_cast %145 : vector<1x8x8x4xbf16> to vector<8x8x4xbf16>
    %147 = vector.shape_cast %146 : vector<8x8x4xbf16> to vector<64x4xbf16>
    %c96 = arith.constant 96 : index
    %c0_145 = arith.constant 0 : index
    %148 = vector.load %arg3[%c96, %c0_145] : memref<100x16xbf16, #tpu.memory_space<vmem>>, vector<4x16xbf16>
    %cst_146 = arith.constant dense<0.000000e+00> : vector<64x16xf32>
    %149 = tpu.matmul %147, %148, %cst_146 {dimension_numbers = #tpu.dot_dimension_numbers<[1], [0], [0], [1], [0, 0, 1, 1], [], []>} : vector<64x4xbf16>, vector<4x16xbf16>, vector<64x16xf32> -> vector<64x16xf32>
    %150 = arith.addf %144, %149 : vector<64x16xf32>
    %151 = vector.shape_cast %150 : vector<64x16xf32> to vector<8x8x16xf32>
    %152 = arith.truncf %151 : vector<8x8x16xf32> to vector<8x8x16xbf16>
    %c0_147 = arith.constant 0 : index
    %c0_148 = arith.constant 0 : index
    %c0_149 = arith.constant 0 : index
    %c0_150 = arith.constant 0 : index
    %153 = vector.load %arg4[%c0_147, %c0_148, %c0_149, %c0_150] : memref<1x8x8x16xbf16, #tpu.memory_space<vmem>>, vector<1x8x8x16xbf16>
    %154 = vector.shape_cast %153 : vector<1x8x8x16xbf16> to vector<8x8x16xbf16>
    %155 = vector.shape_cast %152 : vector<8x8x16xbf16> to vector<1x8x8x16xbf16>
    tpu.vector_store %arg4[%c0_147, %c0_148, %c0_149, %c0_150], %155 {strides = array<i32>} : memref<1x8x8x16xbf16, #tpu.memory_space<vmem>>, vector<1x8x8x16xbf16>,
    return
  }
  func.func @transform_0(%arg0: i32, %arg1: i32) -> (i32, i32, i32, i32) {
    %c0_i32 = arith.constant 0 : i32
    %c0_i32_0 = arith.constant 0 : i32
    %c0_i32_1 = arith.constant 0 : i32
    %c0_i32_2 = arith.constant 0 : i32
    return %arg0, %c0_i32, %c0_i32_0, %c0_i32_1 : i32, i32, i32, i32
  }
  func.func @transform_1(%arg0: i32, %arg1: i32) -> (i32, i32) {
    %c0_i32 = arith.constant 0 : i32
    %c0_i32_0 = arith.constant 0 : i32
    return %c0_i32, %arg1 : i32, i32
  }
  func.func @transform_2(%arg0: i32, %arg1: i32) -> (i32, i32, i32, i32) {
    %c0_i32 = arith.constant 0 : i32
    %c0_i32_0 = arith.constant 0 : i32
    %c0_i32_1 = arith.constant 0 : i32
    return %arg0, %c0_i32, %c0_i32_0, %arg1 : i32, i32, i32, i32
  }
}

module attributes {stable_mosaic.version = 11 : i64} {
  func.func @_conv_tap_kernel(%arg0: i32, %arg1: i32, %arg2: memref<1x10x10x8xbf16, #tpu.memory_space<vmem>>, %arg3: memref<72x8xbf16, #tpu.memory_space<vmem>>, %arg4: memref<1x8x8x8xbf16, #tpu.memory_space<vmem>>) attributes {dimension_semantics = [#tpu.dimension_semantics<parallel>, #tpu.dimension_semantics<parallel>], iteration_bounds = array<i64: 2, 1>, scalar_prefetch = 0 : i64, scratch_operands = 0 : i64, tpu.core_type = #tpu.core_type<tc>, window_params = [{transform_indices = @transform_0, window_bounds = array<i64: 1, 10, 10, 8>}, {transform_indices = @transform_1, window_bounds = array<i64: 72, 8>}, {transform_indices = @transform_2, window_bounds = array<i64: 1, 8, 8, 8>}]} {
    %cst = arith.constant 0.000000e+00 : f32
    %0 = vector.broadcast %cst : f32 to vector<64x8xf32>
    %c0 = arith.constant 0 : index
    %c0_0 = arith.constant 0 : index
    %c0_1 = arith.constant 0 : index
    %c0_2 = arith.constant 0 : index
    %1 = vector.load %arg2[%c0, %c0_0, %c0_1, %c0_2] : memref<1x10x10x8xbf16, #tpu.memory_space<vmem>>, vector<1x8x8x8xbf16>
    %2 = vector.shape_cast %1 : vector<1x8x8x8xbf16> to vector<8x8x8xbf16>
    %3 = vector.shape_cast %2 : vector<8x8x8xbf16> to vector<64x8xbf16>
    %c0_3 = arith.constant 0 : index
    %c0_4 = arith.constant 0 : index
    %4 = vector.load %arg3[%c0_3, %c0_4] : memref<72x8xbf16, #tpu.memory_space<vmem>>, vector<8x8xbf16>
    %cst_5 = arith.constant dense<0.000000e+00> : vector<64x8xf32>
    %5 = tpu.matmul %3, %4, %cst_5 {dimension_numbers = #tpu.dot_dimension_numbers<[1], [0], [0], [1], [0, 0, 1, 1], [], []>} : vector<64x8xbf16>, vector<8x8xbf16>, vector<64x8xf32> -> vector<64x8xf32>
    %6 = arith.addf %0, %5 : vector<64x8xf32>
    %c0_6 = arith.constant 0 : index
    %c0_7 = arith.constant 0 : index
    %c1 = arith.constant 1 : index
    %c0_8 = arith.constant 0 : index
    %7 = vector.load %arg2[%c0_6, %c0_7, %c1, %c0_8] : memref<1x10x10x8xbf16, #tpu.memory_space<vmem>>, vector<1x8x8x8xbf16>
    %8 = vector.shape_cast %7 : vector<1x8x8x8xbf16> to vector<8x8x8xbf16>
    %9 = vector.shape_cast %8 : vector<8x8x8xbf16> to vector<64x8xbf16>
    %c8 = arith.constant 8 : index
    %c0_9 = arith.constant 0 : index
    %10 = vector.load %arg3[%c8, %c0_9] : memref<72x8xbf16, #tpu.memory_space<vmem>>, vector<8x8xbf16>
    %cst_10 = arith.constant dense<0.000000e+00> : vector<64x8xf32>
    %11 = tpu.matmul %9, %10, %cst_10 {dimension_numbers = #tpu.dot_dimension_numbers<[1], [0], [0], [1], [0, 0, 1, 1], [], []>} : vector<64x8xbf16>, vector<8x8xbf16>, vector<64x8xf32> -> vector<64x8xf32>
    %12 = arith.addf %6, %11 : vector<64x8xf32>
    %c0_11 = arith.constant 0 : index
    %c0_12 = arith.constant 0 : index
    %c2 = arith.constant 2 : index
    %c0_13 = arith.constant 0 : index
    %13 = vector.load %arg2[%c0_11, %c0_12, %c2, %c0_13] : memref<1x10x10x8xbf16, #tpu.memory_space<vmem>>, vector<1x8x8x8xbf16>
    %14 = vector.shape_cast %13 : vector<1x8x8x8xbf16> to vector<8x8x8xbf16>
    %15 = vector.shape_cast %14 : vector<8x8x8xbf16> to vector<64x8xbf16>
    %c16 = arith.constant 16 : index
    %c0_14 = arith.constant 0 : index
    %16 = vector.load %arg3[%c16, %c0_14] : memref<72x8xbf16, #tpu.memory_space<vmem>>, vector<8x8xbf16>
    %cst_15 = arith.constant dense<0.000000e+00> : vector<64x8xf32>
    %17 = tpu.matmul %15, %16, %cst_15 {dimension_numbers = #tpu.dot_dimension_numbers<[1], [0], [0], [1], [0, 0, 1, 1], [], []>} : vector<64x8xbf16>, vector<8x8xbf16>, vector<64x8xf32> -> vector<64x8xf32>
    %18 = arith.addf %12, %17 : vector<64x8xf32>
    %c0_16 = arith.constant 0 : index
    %c1_17 = arith.constant 1 : index
    %c0_18 = arith.constant 0 : index
    %c0_19 = arith.constant 0 : index
    %19 = vector.load %arg2[%c0_16, %c1_17, %c0_18, %c0_19] : memref<1x10x10x8xbf16, #tpu.memory_space<vmem>>, vector<1x8x8x8xbf16>
    %20 = vector.shape_cast %19 : vector<1x8x8x8xbf16> to vector<8x8x8xbf16>
    %21 = vector.shape_cast %20 : vector<8x8x8xbf16> to vector<64x8xbf16>
    %c24 = arith.constant 24 : index
    %c0_20 = arith.constant 0 : index
    %22 = vector.load %arg3[%c24, %c0_20] : memref<72x8xbf16, #tpu.memory_space<vmem>>, vector<8x8xbf16>
    %cst_21 = arith.constant dense<0.000000e+00> : vector<64x8xf32>
    %23 = tpu.matmul %21, %22, %cst_21 {dimension_numbers = #tpu.dot_dimension_numbers<[1], [0], [0], [1], [0, 0, 1, 1], [], []>} : vector<64x8xbf16>, vector<8x8xbf16>, vector<64x8xf32> -> vector<64x8xf32>
    %24 = arith.addf %18, %23 : vector<64x8xf32>
    %c0_22 = arith.constant 0 : index
    %c1_23 = arith.constant 1 : index
    %c1_24 = arith.constant 1 : index
    %c0_25 = arith.constant 0 : index
    %25 = vector.load %arg2[%c0_22, %c1_23, %c1_24, %c0_25] : memref<1x10x10x8xbf16, #tpu.memory_space<vmem>>, vector<1x8x8x8xbf16>
    %26 = vector.shape_cast %25 : vector<1x8x8x8xbf16> to vector<8x8x8xbf16>
    %27 = vector.shape_cast %26 : vector<8x8x8xbf16> to vector<64x8xbf16>
    %c32 = arith.constant 32 : index
    %c0_26 = arith.constant 0 : index
    %28 = vector.load %arg3[%c32, %c0_26] : memref<72x8xbf16, #tpu.memory_space<vmem>>, vector<8x8xbf16>
    %cst_27 = arith.constant dense<0.000000e+00> : vector<64x8xf32>
    %29 = tpu.matmul %27, %28, %cst_27 {dimension_numbers = #tpu.dot_dimension_numbers<[1], [0], [0], [1], [0, 0, 1, 1], [], []>} : vector<64x8xbf16>, vector<8x8xbf16>, vector<64x8xf32> -> vector<64x8xf32>
    %30 = arith.addf %24, %29 : vector<64x8xf32>
    %c0_28 = arith.constant 0 : index
    %c1_29 = arith.constant 1 : index
    %c2_30 = arith.constant 2 : index
    %c0_31 = arith.constant 0 : index
    %31 = vector.load %arg2[%c0_28, %c1_29, %c2_30, %c0_31] : memref<1x10x10x8xbf16, #tpu.memory_space<vmem>>, vector<1x8x8x8xbf16>
    %32 = vector.shape_cast %31 : vector<1x8x8x8xbf16> to vector<8x8x8xbf16>
    %33 = vector.shape_cast %32 : vector<8x8x8xbf16> to vector<64x8xbf16>
    %c40 = arith.constant 40 : index
    %c0_32 = arith.constant 0 : index
    %34 = vector.load %arg3[%c40, %c0_32] : memref<72x8xbf16, #tpu.memory_space<vmem>>, vector<8x8xbf16>
    %cst_33 = arith.constant dense<0.000000e+00> : vector<64x8xf32>
    %35 = tpu.matmul %33, %34, %cst_33 {dimension_numbers = #tpu.dot_dimension_numbers<[1], [0], [0], [1], [0, 0, 1, 1], [], []>} : vector<64x8xbf16>, vector<8x8xbf16>, vector<64x8xf32> -> vector<64x8xf32>
    %36 = arith.addf %30, %35 : vector<64x8xf32>
    %c0_34 = arith.constant 0 : index
    %c2_35 = arith.constant 2 : index
    %c0_36 = arith.constant 0 : index
    %c0_37 = arith.constant 0 : index
    %37 = vector.load %arg2[%c0_34, %c2_35, %c0_36, %c0_37] : memref<1x10x10x8xbf16, #tpu.memory_space<vmem>>, vector<1x8x8x8xbf16>
    %38 = vector.shape_cast %37 : vector<1x8x8x8xbf16> to vector<8x8x8xbf16>
    %39 = vector.shape_cast %38 : vector<8x8x8xbf16> to vector<64x8xbf16>
    %c48 = arith.constant 48 : index
    %c0_38 = arith.constant 0 : index
    %40 = vector.load %arg3[%c48, %c0_38] : memref<72x8xbf16, #tpu.memory_space<vmem>>, vector<8x8xbf16>
    %cst_39 = arith.constant dense<0.000000e+00> : vector<64x8xf32>
    %41 = tpu.matmul %39, %40, %cst_39 {dimension_numbers = #tpu.dot_dimension_numbers<[1], [0], [0], [1], [0, 0, 1, 1], [], []>} : vector<64x8xbf16>, vector<8x8xbf16>, vector<64x8xf32> -> vector<64x8xf32>
    %42 = arith.addf %36, %41 : vector<64x8xf32>
    %c0_40 = arith.constant 0 : index
    %c2_41 = arith.constant 2 : index
    %c1_42 = arith.constant 1 : index
    %c0_43 = arith.constant 0 : index
    %43 = vector.load %arg2[%c0_40, %c2_41, %c1_42, %c0_43] : memref<1x10x10x8xbf16, #tpu.memory_space<vmem>>, vector<1x8x8x8xbf16>
    %44 = vector.shape_cast %43 : vector<1x8x8x8xbf16> to vector<8x8x8xbf16>
    %45 = vector.shape_cast %44 : vector<8x8x8xbf16> to vector<64x8xbf16>
    %c56 = arith.constant 56 : index
    %c0_44 = arith.constant 0 : index
    %46 = vector.load %arg3[%c56, %c0_44] : memref<72x8xbf16, #tpu.memory_space<vmem>>, vector<8x8xbf16>
    %cst_45 = arith.constant dense<0.000000e+00> : vector<64x8xf32>
    %47 = tpu.matmul %45, %46, %cst_45 {dimension_numbers = #tpu.dot_dimension_numbers<[1], [0], [0], [1], [0, 0, 1, 1], [], []>} : vector<64x8xbf16>, vector<8x8xbf16>, vector<64x8xf32> -> vector<64x8xf32>
    %48 = arith.addf %42, %47 : vector<64x8xf32>
    %c0_46 = arith.constant 0 : index
    %c2_47 = arith.constant 2 : index
    %c2_48 = arith.constant 2 : index
    %c0_49 = arith.constant 0 : index
    %49 = vector.load %arg2[%c0_46, %c2_47, %c2_48, %c0_49] : memref<1x10x10x8xbf16, #tpu.memory_space<vmem>>, vector<1x8x8x8xbf16>
    %50 = vector.shape_cast %49 : vector<1x8x8x8xbf16> to vector<8x8x8xbf16>
    %51 = vector.shape_cast %50 : vector<8x8x8xbf16> to vector<64x8xbf16>
    %c64 = arith.constant 64 : index
    %c0_50 = arith.constant 0 : index
    %52 = vector.load %arg3[%c64, %c0_50] : memref<72x8xbf16, #tpu.memory_space<vmem>>, vector<8x8xbf16>
    %cst_51 = arith.constant dense<0.000000e+00> : vector<64x8xf32>
    %53 = tpu.matmul %51, %52, %cst_51 {dimension_numbers = #tpu.dot_dimension_numbers<[1], [0], [0], [1], [0, 0, 1, 1], [], []>} : vector<64x8xbf16>, vector<8x8xbf16>, vector<64x8xf32> -> vector<64x8xf32>
    %54 = arith.addf %48, %53 : vector<64x8xf32>
    %55 = vector.shape_cast %54 : vector<64x8xf32> to vector<8x8x8xf32>
    %56 = arith.truncf %55 : vector<8x8x8xf32> to vector<8x8x8xbf16>
    %c0_52 = arith.constant 0 : index
    %c0_53 = arith.constant 0 : index
    %c0_54 = arith.constant 0 : index
    %c0_55 = arith.constant 0 : index
    %57 = vector.load %arg4[%c0_52, %c0_53, %c0_54, %c0_55] : memref<1x8x8x8xbf16, #tpu.memory_space<vmem>>, vector<1x8x8x8xbf16>
    %58 = vector.shape_cast %57 : vector<1x8x8x8xbf16> to vector<8x8x8xbf16>
    %59 = vector.shape_cast %56 : vector<8x8x8xbf16> to vector<1x8x8x8xbf16>
    tpu.vector_store %arg4[%c0_52, %c0_53, %c0_54, %c0_55], %59 {strides = array<i32>} : memref<1x8x8x8xbf16, #tpu.memory_space<vmem>>, vector<1x8x8x8xbf16>,
    return
  }
  func.func @transform_0(%arg0: i32, %arg1: i32) -> (i32, i32, i32, i32) {
    %c0_i32 = arith.constant 0 : i32
    %c0_i32_0 = arith.constant 0 : i32
    %c0_i32_1 = arith.constant 0 : i32
    %c0_i32_2 = arith.constant 0 : i32
    return %arg0, %c0_i32, %c0_i32_0, %c0_i32_1 : i32, i32, i32, i32
  }
  func.func @transform_1(%arg0: i32, %arg1: i32) -> (i32, i32) {
    %c0_i32 = arith.constant 0 : i32
    %c0_i32_0 = arith.constant 0 : i32
    return %c0_i32, %arg1 : i32, i32
  }
  func.func @transform_2(%arg0: i32, %arg1: i32) -> (i32, i32, i32, i32) {
    %c0_i32 = arith.constant 0 : i32
    %c0_i32_0 = arith.constant 0 : i32
    %c0_i32_1 = arith.constant 0 : i32
    return %arg0, %c0_i32, %c0_i32_0, %arg1 : i32, i32, i32, i32
  }
}

module attributes {stable_mosaic.version = 11 : i64} {
  func.func @_conv_tap_kernel(%arg0: i32, %arg1: i32, %arg2: memref<1x10x10x8xbf16, #tpu.memory_space<vmem>>, %arg3: memref<72x8xbf16, #tpu.memory_space<vmem>>, %arg4: memref<1x8x8x8xbf16, #tpu.memory_space<vmem>>, %arg5: memref<1x8x8x8xbf16, #tpu.memory_space<vmem>>) attributes {dimension_semantics = [#tpu.dimension_semantics<parallel>, #tpu.dimension_semantics<parallel>], iteration_bounds = array<i64: 2, 1>, scalar_prefetch = 0 : i64, scratch_operands = 0 : i64, tpu.core_type = #tpu.core_type<tc>, window_params = [{transform_indices = @transform_0, window_bounds = array<i64: 1, 10, 10, 8>}, {transform_indices = @transform_1, window_bounds = array<i64: 72, 8>}, {transform_indices = @transform_2, window_bounds = array<i64: 1, 8, 8, 8>}, {transform_indices = @transform_3, window_bounds = array<i64: 1, 8, 8, 8>}]} {
    %cst = arith.constant 0.000000e+00 : f32
    %0 = vector.broadcast %cst : f32 to vector<64x8xf32>
    %c0 = arith.constant 0 : index
    %c0_0 = arith.constant 0 : index
    %c0_1 = arith.constant 0 : index
    %c0_2 = arith.constant 0 : index
    %1 = vector.load %arg2[%c0, %c0_0, %c0_1, %c0_2] : memref<1x10x10x8xbf16, #tpu.memory_space<vmem>>, vector<1x8x8x8xbf16>
    %2 = vector.shape_cast %1 : vector<1x8x8x8xbf16> to vector<8x8x8xbf16>
    %3 = vector.shape_cast %2 : vector<8x8x8xbf16> to vector<64x8xbf16>
    %c0_3 = arith.constant 0 : index
    %c0_4 = arith.constant 0 : index
    %4 = vector.load %arg3[%c0_3, %c0_4] : memref<72x8xbf16, #tpu.memory_space<vmem>>, vector<8x8xbf16>
    %cst_5 = arith.constant dense<0.000000e+00> : vector<64x8xf32>
    %5 = tpu.matmul %3, %4, %cst_5 {dimension_numbers = #tpu.dot_dimension_numbers<[1], [0], [0], [1], [0, 0, 1, 1], [], []>} : vector<64x8xbf16>, vector<8x8xbf16>, vector<64x8xf32> -> vector<64x8xf32>
    %6 = arith.addf %0, %5 : vector<64x8xf32>
    %c0_6 = arith.constant 0 : index
    %c0_7 = arith.constant 0 : index
    %c1 = arith.constant 1 : index
    %c0_8 = arith.constant 0 : index
    %7 = vector.load %arg2[%c0_6, %c0_7, %c1, %c0_8] : memref<1x10x10x8xbf16, #tpu.memory_space<vmem>>, vector<1x8x8x8xbf16>
    %8 = vector.shape_cast %7 : vector<1x8x8x8xbf16> to vector<8x8x8xbf16>
    %9 = vector.shape_cast %8 : vector<8x8x8xbf16> to vector<64x8xbf16>
    %c8 = arith.constant 8 : index
    %c0_9 = arith.constant 0 : index
    %10 = vector.load %arg3[%c8, %c0_9] : memref<72x8xbf16, #tpu.memory_space<vmem>>, vector<8x8xbf16>
    %cst_10 = arith.constant dense<0.000000e+00> : vector<64x8xf32>
    %11 = tpu.matmul %9, %10, %cst_10 {dimension_numbers = #tpu.dot_dimension_numbers<[1], [0], [0], [1], [0, 0, 1, 1], [], []>} : vector<64x8xbf16>, vector<8x8xbf16>, vector<64x8xf32> -> vector<64x8xf32>
    %12 = arith.addf %6, %11 : vector<64x8xf32>
    %c0_11 = arith.constant 0 : index
    %c0_12 = arith.constant 0 : index
    %c2 = arith.constant 2 : index
    %c0_13 = arith.constant 0 : index
    %13 = vector.load %arg2[%c0_11, %c0_12, %c2, %c0_13] : memref<1x10x10x8xbf16, #tpu.memory_space<vmem>>, vector<1x8x8x8xbf16>
    %14 = vector.shape_cast %13 : vector<1x8x8x8xbf16> to vector<8x8x8xbf16>
    %15 = vector.shape_cast %14 : vector<8x8x8xbf16> to vector<64x8xbf16>
    %c16 = arith.constant 16 : index
    %c0_14 = arith.constant 0 : index
    %16 = vector.load %arg3[%c16, %c0_14] : memref<72x8xbf16, #tpu.memory_space<vmem>>, vector<8x8xbf16>
    %cst_15 = arith.constant dense<0.000000e+00> : vector<64x8xf32>
    %17 = tpu.matmul %15, %16, %cst_15 {dimension_numbers = #tpu.dot_dimension_numbers<[1], [0], [0], [1], [0, 0, 1, 1], [], []>} : vector<64x8xbf16>, vector<8x8xbf16>, vector<64x8xf32> -> vector<64x8xf32>
    %18 = arith.addf %12, %17 : vector<64x8xf32>
    %c0_16 = arith.constant 0 : index
    %c1_17 = arith.constant 1 : index
    %c0_18 = arith.constant 0 : index
    %c0_19 = arith.constant 0 : index
    %19 = vector.load %arg2[%c0_16, %c1_17, %c0_18, %c0_19] : memref<1x10x10x8xbf16, #tpu.memory_space<vmem>>, vector<1x8x8x8xbf16>
    %20 = vector.shape_cast %19 : vector<1x8x8x8xbf16> to vector<8x8x8xbf16>
    %21 = vector.shape_cast %20 : vector<8x8x8xbf16> to vector<64x8xbf16>
    %c24 = arith.constant 24 : index
    %c0_20 = arith.constant 0 : index
    %22 = vector.load %arg3[%c24, %c0_20] : memref<72x8xbf16, #tpu.memory_space<vmem>>, vector<8x8xbf16>
    %cst_21 = arith.constant dense<0.000000e+00> : vector<64x8xf32>
    %23 = tpu.matmul %21, %22, %cst_21 {dimension_numbers = #tpu.dot_dimension_numbers<[1], [0], [0], [1], [0, 0, 1, 1], [], []>} : vector<64x8xbf16>, vector<8x8xbf16>, vector<64x8xf32> -> vector<64x8xf32>
    %24 = arith.addf %18, %23 : vector<64x8xf32>
    %c0_22 = arith.constant 0 : index
    %c1_23 = arith.constant 1 : index
    %c1_24 = arith.constant 1 : index
    %c0_25 = arith.constant 0 : index
    %25 = vector.load %arg2[%c0_22, %c1_23, %c1_24, %c0_25] : memref<1x10x10x8xbf16, #tpu.memory_space<vmem>>, vector<1x8x8x8xbf16>
    %26 = vector.shape_cast %25 : vector<1x8x8x8xbf16> to vector<8x8x8xbf16>
    %27 = vector.shape_cast %26 : vector<8x8x8xbf16> to vector<64x8xbf16>
    %c32 = arith.constant 32 : index
    %c0_26 = arith.constant 0 : index
    %28 = vector.load %arg3[%c32, %c0_26] : memref<72x8xbf16, #tpu.memory_space<vmem>>, vector<8x8xbf16>
    %cst_27 = arith.constant dense<0.000000e+00> : vector<64x8xf32>
    %29 = tpu.matmul %27, %28, %cst_27 {dimension_numbers = #tpu.dot_dimension_numbers<[1], [0], [0], [1], [0, 0, 1, 1], [], []>} : vector<64x8xbf16>, vector<8x8xbf16>, vector<64x8xf32> -> vector<64x8xf32>
    %30 = arith.addf %24, %29 : vector<64x8xf32>
    %c0_28 = arith.constant 0 : index
    %c1_29 = arith.constant 1 : index
    %c2_30 = arith.constant 2 : index
    %c0_31 = arith.constant 0 : index
    %31 = vector.load %arg2[%c0_28, %c1_29, %c2_30, %c0_31] : memref<1x10x10x8xbf16, #tpu.memory_space<vmem>>, vector<1x8x8x8xbf16>
    %32 = vector.shape_cast %31 : vector<1x8x8x8xbf16> to vector<8x8x8xbf16>
    %33 = vector.shape_cast %32 : vector<8x8x8xbf16> to vector<64x8xbf16>
    %c40 = arith.constant 40 : index
    %c0_32 = arith.constant 0 : index
    %34 = vector.load %arg3[%c40, %c0_32] : memref<72x8xbf16, #tpu.memory_space<vmem>>, vector<8x8xbf16>
    %cst_33 = arith.constant dense<0.000000e+00> : vector<64x8xf32>
    %35 = tpu.matmul %33, %34, %cst_33 {dimension_numbers = #tpu.dot_dimension_numbers<[1], [0], [0], [1], [0, 0, 1, 1], [], []>} : vector<64x8xbf16>, vector<8x8xbf16>, vector<64x8xf32> -> vector<64x8xf32>
    %36 = arith.addf %30, %35 : vector<64x8xf32>
    %c0_34 = arith.constant 0 : index
    %c2_35 = arith.constant 2 : index
    %c0_36 = arith.constant 0 : index
    %c0_37 = arith.constant 0 : index
    %37 = vector.load %arg2[%c0_34, %c2_35, %c0_36, %c0_37] : memref<1x10x10x8xbf16, #tpu.memory_space<vmem>>, vector<1x8x8x8xbf16>
    %38 = vector.shape_cast %37 : vector<1x8x8x8xbf16> to vector<8x8x8xbf16>
    %39 = vector.shape_cast %38 : vector<8x8x8xbf16> to vector<64x8xbf16>
    %c48 = arith.constant 48 : index
    %c0_38 = arith.constant 0 : index
    %40 = vector.load %arg3[%c48, %c0_38] : memref<72x8xbf16, #tpu.memory_space<vmem>>, vector<8x8xbf16>
    %cst_39 = arith.constant dense<0.000000e+00> : vector<64x8xf32>
    %41 = tpu.matmul %39, %40, %cst_39 {dimension_numbers = #tpu.dot_dimension_numbers<[1], [0], [0], [1], [0, 0, 1, 1], [], []>} : vector<64x8xbf16>, vector<8x8xbf16>, vector<64x8xf32> -> vector<64x8xf32>
    %42 = arith.addf %36, %41 : vector<64x8xf32>
    %c0_40 = arith.constant 0 : index
    %c2_41 = arith.constant 2 : index
    %c1_42 = arith.constant 1 : index
    %c0_43 = arith.constant 0 : index
    %43 = vector.load %arg2[%c0_40, %c2_41, %c1_42, %c0_43] : memref<1x10x10x8xbf16, #tpu.memory_space<vmem>>, vector<1x8x8x8xbf16>
    %44 = vector.shape_cast %43 : vector<1x8x8x8xbf16> to vector<8x8x8xbf16>
    %45 = vector.shape_cast %44 : vector<8x8x8xbf16> to vector<64x8xbf16>
    %c56 = arith.constant 56 : index
    %c0_44 = arith.constant 0 : index
    %46 = vector.load %arg3[%c56, %c0_44] : memref<72x8xbf16, #tpu.memory_space<vmem>>, vector<8x8xbf16>
    %cst_45 = arith.constant dense<0.000000e+00> : vector<64x8xf32>
    %47 = tpu.matmul %45, %46, %cst_45 {dimension_numbers = #tpu.dot_dimension_numbers<[1], [0], [0], [1], [0, 0, 1, 1], [], []>} : vector<64x8xbf16>, vector<8x8xbf16>, vector<64x8xf32> -> vector<64x8xf32>
    %48 = arith.addf %42, %47 : vector<64x8xf32>
    %c0_46 = arith.constant 0 : index
    %c2_47 = arith.constant 2 : index
    %c2_48 = arith.constant 2 : index
    %c0_49 = arith.constant 0 : index
    %49 = vector.load %arg2[%c0_46, %c2_47, %c2_48, %c0_49] : memref<1x10x10x8xbf16, #tpu.memory_space<vmem>>, vector<1x8x8x8xbf16>
    %50 = vector.shape_cast %49 : vector<1x8x8x8xbf16> to vector<8x8x8xbf16>
    %51 = vector.shape_cast %50 : vector<8x8x8xbf16> to vector<64x8xbf16>
    %c64 = arith.constant 64 : index
    %c0_50 = arith.constant 0 : index
    %52 = vector.load %arg3[%c64, %c0_50] : memref<72x8xbf16, #tpu.memory_space<vmem>>, vector<8x8xbf16>
    %cst_51 = arith.constant dense<0.000000e+00> : vector<64x8xf32>
    %53 = tpu.matmul %51, %52, %cst_51 {dimension_numbers = #tpu.dot_dimension_numbers<[1], [0], [0], [1], [0, 0, 1, 1], [], []>} : vector<64x8xbf16>, vector<8x8xbf16>, vector<64x8xf32> -> vector<64x8xf32>
    %54 = arith.addf %48, %53 : vector<64x8xf32>
    %c0_52 = arith.constant 0 : index
    %c0_53 = arith.constant 0 : index
    %c0_54 = arith.constant 0 : index
    %c0_55 = arith.constant 0 : index
    %55 = vector.load %arg4[%c0_52, %c0_53, %c0_54, %c0_55] : memref<1x8x8x8xbf16, #tpu.memory_space<vmem>>, vector<1x8x8x8xbf16>
    %56 = vector.shape_cast %55 : vector<1x8x8x8xbf16> to vector<8x8x8xbf16>
    %57 = vector.shape_cast %56 : vector<8x8x8xbf16> to vector<64x8xbf16>
    %58 = arith.extf %57 : vector<64x8xbf16> to vector<64x8xf32>
    %59 = arith.addf %54, %58 : vector<64x8xf32>
    %60 = vector.shape_cast %59 : vector<64x8xf32> to vector<8x8x8xf32>
    %61 = arith.truncf %60 : vector<8x8x8xf32> to vector<8x8x8xbf16>
    %c0_56 = arith.constant 0 : index
    %c0_57 = arith.constant 0 : index
    %c0_58 = arith.constant 0 : index
    %c0_59 = arith.constant 0 : index
    %62 = vector.load %arg5[%c0_56, %c0_57, %c0_58, %c0_59] : memref<1x8x8x8xbf16, #tpu.memory_space<vmem>>, vector<1x8x8x8xbf16>
    %63 = vector.shape_cast %62 : vector<1x8x8x8xbf16> to vector<8x8x8xbf16>
    %64 = vector.shape_cast %61 : vector<8x8x8xbf16> to vector<1x8x8x8xbf16>
    tpu.vector_store %arg5[%c0_56, %c0_57, %c0_58, %c0_59], %64 {strides = array<i32>} : memref<1x8x8x8xbf16, #tpu.memory_space<vmem>>, vector<1x8x8x8xbf16>,
    return
  }
  func.func @transform_0(%arg0: i32, %arg1: i32) -> (i32, i32, i32, i32) {
    %c0_i32 = arith.constant 0 : i32
    %c0_i32_0 = arith.constant 0 : i32
    %c0_i32_1 = arith.constant 0 : i32
    %c0_i32_2 = arith.constant 0 : i32
    return %arg0, %c0_i32, %c0_i32_0, %c0_i32_1 : i32, i32, i32, i32
  }
  func.func @transform_1(%arg0: i32, %arg1: i32) -> (i32, i32) {
    %c0_i32 = arith.constant 0 : i32
    %c0_i32_0 = arith.constant 0 : i32
    return %c0_i32, %arg1 : i32, i32
  }
  func.func @transform_2(%arg0: i32, %arg1: i32) -> (i32, i32, i32, i32) {
    %c0_i32 = arith.constant 0 : i32
    %c0_i32_0 = arith.constant 0 : i32
    %c0_i32_1 = arith.constant 0 : i32
    return %arg0, %c0_i32, %c0_i32_0, %arg1 : i32, i32, i32, i32
  }
  func.func @transform_3(%arg0: i32, %arg1: i32) -> (i32, i32, i32, i32) {
    %c0_i32 = arith.constant 0 : i32
    %c0_i32_0 = arith.constant 0 : i32
    %c0_i32_1 = arith.constant 0 : i32
    return %arg0, %c0_i32, %c0_i32_0, %arg1 : i32, i32, i32, i32
  }
}

module attributes {stable_mosaic.version = 11 : i64} {
  func.func @_conv_tap_kernel(%arg0: i32, %arg1: i32, %arg2: memref<1x10x10x16xbf16, #tpu.memory_space<vmem>>, %arg3: memref<144x32xbf16, #tpu.memory_space<vmem>>, %arg4: memref<1x8x8x32xbf16, #tpu.memory_space<vmem>>) attributes {dimension_semantics = [#tpu.dimension_semantics<parallel>, #tpu.dimension_semantics<parallel>], iteration_bounds = array<i64: 2, 1>, scalar_prefetch = 0 : i64, scratch_operands = 0 : i64, tpu.core_type = #tpu.core_type<tc>, window_params = [{transform_indices = @transform_0, window_bounds = array<i64: 1, 10, 10, 16>}, {transform_indices = @transform_1, window_bounds = array<i64: 144, 32>}, {transform_indices = @transform_2, window_bounds = array<i64: 1, 8, 8, 32>}]} {
    %cst = arith.constant 0.000000e+00 : f32
    %0 = vector.broadcast %cst : f32 to vector<64x32xf32>
    %c0 = arith.constant 0 : index
    %c0_0 = arith.constant 0 : index
    %c0_1 = arith.constant 0 : index
    %c0_2 = arith.constant 0 : index
    %1 = vector.load %arg2[%c0, %c0_0, %c0_1, %c0_2] : memref<1x10x10x16xbf16, #tpu.memory_space<vmem>>, vector<1x8x8x16xbf16>
    %2 = vector.shape_cast %1 : vector<1x8x8x16xbf16> to vector<8x8x16xbf16>
    %3 = vector.shape_cast %2 : vector<8x8x16xbf16> to vector<64x16xbf16>
    %c0_3 = arith.constant 0 : index
    %c0_4 = arith.constant 0 : index
    %4 = vector.load %arg3[%c0_3, %c0_4] : memref<144x32xbf16, #tpu.memory_space<vmem>>, vector<16x32xbf16>
    %cst_5 = arith.constant dense<0.000000e+00> : vector<64x32xf32>
    %5 = tpu.matmul %3, %4, %cst_5 {dimension_numbers = #tpu.dot_dimension_numbers<[1], [0], [0], [1], [0, 0, 1, 1], [], []>} : vector<64x16xbf16>, vector<16x32xbf16>, vector<64x32xf32> -> vector<64x32xf32>
    %6 = arith.addf %0, %5 : vector<64x32xf32>
    %c0_6 = arith.constant 0 : index
    %c0_7 = arith.constant 0 : index
    %c1 = arith.constant 1 : index
    %c0_8 = arith.constant 0 : index
    %7 = vector.load %arg2[%c0_6, %c0_7, %c1, %c0_8] : memref<1x10x10x16xbf16, #tpu.memory_space<vmem>>, vector<1x8x8x16xbf16>
    %8 = vector.shape_cast %7 : vector<1x8x8x16xbf16> to vector<8x8x16xbf16>
    %9 = vector.shape_cast %8 : vector<8x8x16xbf16> to vector<64x16xbf16>
    %c16 = arith.constant 16 : index
    %c0_9 = arith.constant 0 : index
    %10 = vector.load %arg3[%c16, %c0_9] : memref<144x32xbf16, #tpu.memory_space<vmem>>, vector<16x32xbf16>
    %cst_10 = arith.constant dense<0.000000e+00> : vector<64x32xf32>
    %11 = tpu.matmul %9, %10, %cst_10 {dimension_numbers = #tpu.dot_dimension_numbers<[1], [0], [0], [1], [0, 0, 1, 1], [], []>} : vector<64x16xbf16>, vector<16x32xbf16>, vector<64x32xf32> -> vector<64x32xf32>
    %12 = arith.addf %6, %11 : vector<64x32xf32>
    %c0_11 = arith.constant 0 : index
    %c0_12 = arith.constant 0 : index
    %c2 = arith.constant 2 : index
    %c0_13 = arith.constant 0 : index
    %13 = vector.load %arg2[%c0_11, %c0_12, %c2, %c0_13] : memref<1x10x10x16xbf16, #tpu.memory_space<vmem>>, vector<1x8x8x16xbf16>
    %14 = vector.shape_cast %13 : vector<1x8x8x16xbf16> to vector<8x8x16xbf16>
    %15 = vector.shape_cast %14 : vector<8x8x16xbf16> to vector<64x16xbf16>
    %c32 = arith.constant 32 : index
    %c0_14 = arith.constant 0 : index
    %16 = vector.load %arg3[%c32, %c0_14] : memref<144x32xbf16, #tpu.memory_space<vmem>>, vector<16x32xbf16>
    %cst_15 = arith.constant dense<0.000000e+00> : vector<64x32xf32>
    %17 = tpu.matmul %15, %16, %cst_15 {dimension_numbers = #tpu.dot_dimension_numbers<[1], [0], [0], [1], [0, 0, 1, 1], [], []>} : vector<64x16xbf16>, vector<16x32xbf16>, vector<64x32xf32> -> vector<64x32xf32>
    %18 = arith.addf %12, %17 : vector<64x32xf32>
    %c0_16 = arith.constant 0 : index
    %c1_17 = arith.constant 1 : index
    %c0_18 = arith.constant 0 : index
    %c0_19 = arith.constant 0 : index
    %19 = vector.load %arg2[%c0_16, %c1_17, %c0_18, %c0_19] : memref<1x10x10x16xbf16, #tpu.memory_space<vmem>>, vector<1x8x8x16xbf16>
    %20 = vector.shape_cast %19 : vector<1x8x8x16xbf16> to vector<8x8x16xbf16>
    %21 = vector.shape_cast %20 : vector<8x8x16xbf16> to vector<64x16xbf16>
    %c48 = arith.constant 48 : index
    %c0_20 = arith.constant 0 : index
    %22 = vector.load %arg3[%c48, %c0_20] : memref<144x32xbf16, #tpu.memory_space<vmem>>, vector<16x32xbf16>
    %cst_21 = arith.constant dense<0.000000e+00> : vector<64x32xf32>
    %23 = tpu.matmul %21, %22, %cst_21 {dimension_numbers = #tpu.dot_dimension_numbers<[1], [0], [0], [1], [0, 0, 1, 1], [], []>} : vector<64x16xbf16>, vector<16x32xbf16>, vector<64x32xf32> -> vector<64x32xf32>
    %24 = arith.addf %18, %23 : vector<64x32xf32>
    %c0_22 = arith.constant 0 : index
    %c1_23 = arith.constant 1 : index
    %c1_24 = arith.constant 1 : index
    %c0_25 = arith.constant 0 : index
    %25 = vector.load %arg2[%c0_22, %c1_23, %c1_24, %c0_25] : memref<1x10x10x16xbf16, #tpu.memory_space<vmem>>, vector<1x8x8x16xbf16>
    %26 = vector.shape_cast %25 : vector<1x8x8x16xbf16> to vector<8x8x16xbf16>
    %27 = vector.shape_cast %26 : vector<8x8x16xbf16> to vector<64x16xbf16>
    %c64 = arith.constant 64 : index
    %c0_26 = arith.constant 0 : index
    %28 = vector.load %arg3[%c64, %c0_26] : memref<144x32xbf16, #tpu.memory_space<vmem>>, vector<16x32xbf16>
    %cst_27 = arith.constant dense<0.000000e+00> : vector<64x32xf32>
    %29 = tpu.matmul %27, %28, %cst_27 {dimension_numbers = #tpu.dot_dimension_numbers<[1], [0], [0], [1], [0, 0, 1, 1], [], []>} : vector<64x16xbf16>, vector<16x32xbf16>, vector<64x32xf32> -> vector<64x32xf32>
    %30 = arith.addf %24, %29 : vector<64x32xf32>
    %c0_28 = arith.constant 0 : index
    %c1_29 = arith.constant 1 : index
    %c2_30 = arith.constant 2 : index
    %c0_31 = arith.constant 0 : index
    %31 = vector.load %arg2[%c0_28, %c1_29, %c2_30, %c0_31] : memref<1x10x10x16xbf16, #tpu.memory_space<vmem>>, vector<1x8x8x16xbf16>
    %32 = vector.shape_cast %31 : vector<1x8x8x16xbf16> to vector<8x8x16xbf16>
    %33 = vector.shape_cast %32 : vector<8x8x16xbf16> to vector<64x16xbf16>
    %c80 = arith.constant 80 : index
    %c0_32 = arith.constant 0 : index
    %34 = vector.load %arg3[%c80, %c0_32] : memref<144x32xbf16, #tpu.memory_space<vmem>>, vector<16x32xbf16>
    %cst_33 = arith.constant dense<0.000000e+00> : vector<64x32xf32>
    %35 = tpu.matmul %33, %34, %cst_33 {dimension_numbers = #tpu.dot_dimension_numbers<[1], [0], [0], [1], [0, 0, 1, 1], [], []>} : vector<64x16xbf16>, vector<16x32xbf16>, vector<64x32xf32> -> vector<64x32xf32>
    %36 = arith.addf %30, %35 : vector<64x32xf32>
    %c0_34 = arith.constant 0 : index
    %c2_35 = arith.constant 2 : index
    %c0_36 = arith.constant 0 : index
    %c0_37 = arith.constant 0 : index
    %37 = vector.load %arg2[%c0_34, %c2_35, %c0_36, %c0_37] : memref<1x10x10x16xbf16, #tpu.memory_space<vmem>>, vector<1x8x8x16xbf16>
    %38 = vector.shape_cast %37 : vector<1x8x8x16xbf16> to vector<8x8x16xbf16>
    %39 = vector.shape_cast %38 : vector<8x8x16xbf16> to vector<64x16xbf16>
    %c96 = arith.constant 96 : index
    %c0_38 = arith.constant 0 : index
    %40 = vector.load %arg3[%c96, %c0_38] : memref<144x32xbf16, #tpu.memory_space<vmem>>, vector<16x32xbf16>
    %cst_39 = arith.constant dense<0.000000e+00> : vector<64x32xf32>
    %41 = tpu.matmul %39, %40, %cst_39 {dimension_numbers = #tpu.dot_dimension_numbers<[1], [0], [0], [1], [0, 0, 1, 1], [], []>} : vector<64x16xbf16>, vector<16x32xbf16>, vector<64x32xf32> -> vector<64x32xf32>
    %42 = arith.addf %36, %41 : vector<64x32xf32>
    %c0_40 = arith.constant 0 : index
    %c2_41 = arith.constant 2 : index
    %c1_42 = arith.constant 1 : index
    %c0_43 = arith.constant 0 : index
    %43 = vector.load %arg2[%c0_40, %c2_41, %c1_42, %c0_43] : memref<1x10x10x16xbf16, #tpu.memory_space<vmem>>, vector<1x8x8x16xbf16>
    %44 = vector.shape_cast %43 : vector<1x8x8x16xbf16> to vector<8x8x16xbf16>
    %45 = vector.shape_cast %44 : vector<8x8x16xbf16> to vector<64x16xbf16>
    %c112 = arith.constant 112 : index
    %c0_44 = arith.constant 0 : index
    %46 = vector.load %arg3[%c112, %c0_44] : memref<144x32xbf16, #tpu.memory_space<vmem>>, vector<16x32xbf16>
    %cst_45 = arith.constant dense<0.000000e+00> : vector<64x32xf32>
    %47 = tpu.matmul %45, %46, %cst_45 {dimension_numbers = #tpu.dot_dimension_numbers<[1], [0], [0], [1], [0, 0, 1, 1], [], []>} : vector<64x16xbf16>, vector<16x32xbf16>, vector<64x32xf32> -> vector<64x32xf32>
    %48 = arith.addf %42, %47 : vector<64x32xf32>
    %c0_46 = arith.constant 0 : index
    %c2_47 = arith.constant 2 : index
    %c2_48 = arith.constant 2 : index
    %c0_49 = arith.constant 0 : index
    %49 = vector.load %arg2[%c0_46, %c2_47, %c2_48, %c0_49] : memref<1x10x10x16xbf16, #tpu.memory_space<vmem>>, vector<1x8x8x16xbf16>
    %50 = vector.shape_cast %49 : vector<1x8x8x16xbf16> to vector<8x8x16xbf16>
    %51 = vector.shape_cast %50 : vector<8x8x16xbf16> to vector<64x16xbf16>
    %c128 = arith.constant 128 : index
    %c0_50 = arith.constant 0 : index
    %52 = vector.load %arg3[%c128, %c0_50] : memref<144x32xbf16, #tpu.memory_space<vmem>>, vector<16x32xbf16>
    %cst_51 = arith.constant dense<0.000000e+00> : vector<64x32xf32>
    %53 = tpu.matmul %51, %52, %cst_51 {dimension_numbers = #tpu.dot_dimension_numbers<[1], [0], [0], [1], [0, 0, 1, 1], [], []>} : vector<64x16xbf16>, vector<16x32xbf16>, vector<64x32xf32> -> vector<64x32xf32>
    %54 = arith.addf %48, %53 : vector<64x32xf32>
    %55 = vector.shape_cast %54 : vector<64x32xf32> to vector<8x8x32xf32>
    %56 = arith.truncf %55 : vector<8x8x32xf32> to vector<8x8x32xbf16>
    %c0_52 = arith.constant 0 : index
    %c0_53 = arith.constant 0 : index
    %c0_54 = arith.constant 0 : index
    %c0_55 = arith.constant 0 : index
    %57 = vector.load %arg4[%c0_52, %c0_53, %c0_54, %c0_55] : memref<1x8x8x32xbf16, #tpu.memory_space<vmem>>, vector<1x8x8x32xbf16>
    %58 = vector.shape_cast %57 : vector<1x8x8x32xbf16> to vector<8x8x32xbf16>
    %59 = vector.shape_cast %56 : vector<8x8x32xbf16> to vector<1x8x8x32xbf16>
    tpu.vector_store %arg4[%c0_52, %c0_53, %c0_54, %c0_55], %59 {strides = array<i32>} : memref<1x8x8x32xbf16, #tpu.memory_space<vmem>>, vector<1x8x8x32xbf16>,
    return
  }
  func.func @transform_0(%arg0: i32, %arg1: i32) -> (i32, i32, i32, i32) {
    %c0_i32 = arith.constant 0 : i32
    %c0_i32_0 = arith.constant 0 : i32
    %c0_i32_1 = arith.constant 0 : i32
    %c0_i32_2 = arith.constant 0 : i32
    return %arg0, %c0_i32, %c0_i32_0, %c0_i32_1 : i32, i32, i32, i32
  }
  func.func @transform_1(%arg0: i32, %arg1: i32) -> (i32, i32) {
    %c0_i32 = arith.constant 0 : i32
    %c0_i32_0 = arith.constant 0 : i32
    return %c0_i32, %arg1 : i32, i32
  }
  func.func @transform_2(%arg0: i32, %arg1: i32) -> (i32, i32, i32, i32) {
    %c0_i32 = arith.constant 0 : i32
    %c0_i32_0 = arith.constant 0 : i32
    %c0_i32_1 = arith.constant 0 : i32
    return %arg0, %c0_i32, %c0_i32_0, %arg1 : i32, i32, i32, i32
  }
}

module attributes {stable_mosaic.version = 11 : i64} {
  func.func @_conv_tap_kernel(%arg0: i32, %arg1: i32, %arg2: memref<1x10x10x16xbf16, #tpu.memory_space<vmem>>, %arg3: memref<144x16xbf16, #tpu.memory_space<vmem>>, %arg4: memref<1x8x8x16xbf16, #tpu.memory_space<vmem>>) attributes {dimension_semantics = [#tpu.dimension_semantics<parallel>, #tpu.dimension_semantics<parallel>], iteration_bounds = array<i64: 2, 1>, scalar_prefetch = 0 : i64, scratch_operands = 0 : i64, tpu.core_type = #tpu.core_type<tc>, window_params = [{transform_indices = @transform_0, window_bounds = array<i64: 1, 10, 10, 16>}, {transform_indices = @transform_1, window_bounds = array<i64: 144, 16>}, {transform_indices = @transform_2, window_bounds = array<i64: 1, 8, 8, 16>}]} {
    %cst = arith.constant 0.000000e+00 : f32
    %0 = vector.broadcast %cst : f32 to vector<64x16xf32>
    %c0 = arith.constant 0 : index
    %c0_0 = arith.constant 0 : index
    %c0_1 = arith.constant 0 : index
    %c0_2 = arith.constant 0 : index
    %1 = vector.load %arg2[%c0, %c0_0, %c0_1, %c0_2] : memref<1x10x10x16xbf16, #tpu.memory_space<vmem>>, vector<1x8x8x16xbf16>
    %2 = vector.shape_cast %1 : vector<1x8x8x16xbf16> to vector<8x8x16xbf16>
    %3 = vector.shape_cast %2 : vector<8x8x16xbf16> to vector<64x16xbf16>
    %c0_3 = arith.constant 0 : index
    %c0_4 = arith.constant 0 : index
    %4 = vector.load %arg3[%c0_3, %c0_4] : memref<144x16xbf16, #tpu.memory_space<vmem>>, vector<16x16xbf16>
    %cst_5 = arith.constant dense<0.000000e+00> : vector<64x16xf32>
    %5 = tpu.matmul %3, %4, %cst_5 {dimension_numbers = #tpu.dot_dimension_numbers<[1], [0], [0], [1], [0, 0, 1, 1], [], []>} : vector<64x16xbf16>, vector<16x16xbf16>, vector<64x16xf32> -> vector<64x16xf32>
    %6 = arith.addf %0, %5 : vector<64x16xf32>
    %c0_6 = arith.constant 0 : index
    %c0_7 = arith.constant 0 : index
    %c1 = arith.constant 1 : index
    %c0_8 = arith.constant 0 : index
    %7 = vector.load %arg2[%c0_6, %c0_7, %c1, %c0_8] : memref<1x10x10x16xbf16, #tpu.memory_space<vmem>>, vector<1x8x8x16xbf16>
    %8 = vector.shape_cast %7 : vector<1x8x8x16xbf16> to vector<8x8x16xbf16>
    %9 = vector.shape_cast %8 : vector<8x8x16xbf16> to vector<64x16xbf16>
    %c16 = arith.constant 16 : index
    %c0_9 = arith.constant 0 : index
    %10 = vector.load %arg3[%c16, %c0_9] : memref<144x16xbf16, #tpu.memory_space<vmem>>, vector<16x16xbf16>
    %cst_10 = arith.constant dense<0.000000e+00> : vector<64x16xf32>
    %11 = tpu.matmul %9, %10, %cst_10 {dimension_numbers = #tpu.dot_dimension_numbers<[1], [0], [0], [1], [0, 0, 1, 1], [], []>} : vector<64x16xbf16>, vector<16x16xbf16>, vector<64x16xf32> -> vector<64x16xf32>
    %12 = arith.addf %6, %11 : vector<64x16xf32>
    %c0_11 = arith.constant 0 : index
    %c0_12 = arith.constant 0 : index
    %c2 = arith.constant 2 : index
    %c0_13 = arith.constant 0 : index
    %13 = vector.load %arg2[%c0_11, %c0_12, %c2, %c0_13] : memref<1x10x10x16xbf16, #tpu.memory_space<vmem>>, vector<1x8x8x16xbf16>
    %14 = vector.shape_cast %13 : vector<1x8x8x16xbf16> to vector<8x8x16xbf16>
    %15 = vector.shape_cast %14 : vector<8x8x16xbf16> to vector<64x16xbf16>
    %c32 = arith.constant 32 : index
    %c0_14 = arith.constant 0 : index
    %16 = vector.load %arg3[%c32, %c0_14] : memref<144x16xbf16, #tpu.memory_space<vmem>>, vector<16x16xbf16>
    %cst_15 = arith.constant dense<0.000000e+00> : vector<64x16xf32>
    %17 = tpu.matmul %15, %16, %cst_15 {dimension_numbers = #tpu.dot_dimension_numbers<[1], [0], [0], [1], [0, 0, 1, 1], [], []>} : vector<64x16xbf16>, vector<16x16xbf16>, vector<64x16xf32> -> vector<64x16xf32>
    %18 = arith.addf %12, %17 : vector<64x16xf32>
    %c0_16 = arith.constant 0 : index
    %c1_17 = arith.constant 1 : index
    %c0_18 = arith.constant 0 : index
    %c0_19 = arith.constant 0 : index
    %19 = vector.load %arg2[%c0_16, %c1_17, %c0_18, %c0_19] : memref<1x10x10x16xbf16, #tpu.memory_space<vmem>>, vector<1x8x8x16xbf16>
    %20 = vector.shape_cast %19 : vector<1x8x8x16xbf16> to vector<8x8x16xbf16>
    %21 = vector.shape_cast %20 : vector<8x8x16xbf16> to vector<64x16xbf16>
    %c48 = arith.constant 48 : index
    %c0_20 = arith.constant 0 : index
    %22 = vector.load %arg3[%c48, %c0_20] : memref<144x16xbf16, #tpu.memory_space<vmem>>, vector<16x16xbf16>
    %cst_21 = arith.constant dense<0.000000e+00> : vector<64x16xf32>
    %23 = tpu.matmul %21, %22, %cst_21 {dimension_numbers = #tpu.dot_dimension_numbers<[1], [0], [0], [1], [0, 0, 1, 1], [], []>} : vector<64x16xbf16>, vector<16x16xbf16>, vector<64x16xf32> -> vector<64x16xf32>
    %24 = arith.addf %18, %23 : vector<64x16xf32>
    %c0_22 = arith.constant 0 : index
    %c1_23 = arith.constant 1 : index
    %c1_24 = arith.constant 1 : index
    %c0_25 = arith.constant 0 : index
    %25 = vector.load %arg2[%c0_22, %c1_23, %c1_24, %c0_25] : memref<1x10x10x16xbf16, #tpu.memory_space<vmem>>, vector<1x8x8x16xbf16>
    %26 = vector.shape_cast %25 : vector<1x8x8x16xbf16> to vector<8x8x16xbf16>
    %27 = vector.shape_cast %26 : vector<8x8x16xbf16> to vector<64x16xbf16>
    %c64 = arith.constant 64 : index
    %c0_26 = arith.constant 0 : index
    %28 = vector.load %arg3[%c64, %c0_26] : memref<144x16xbf16, #tpu.memory_space<vmem>>, vector<16x16xbf16>
    %cst_27 = arith.constant dense<0.000000e+00> : vector<64x16xf32>
    %29 = tpu.matmul %27, %28, %cst_27 {dimension_numbers = #tpu.dot_dimension_numbers<[1], [0], [0], [1], [0, 0, 1, 1], [], []>} : vector<64x16xbf16>, vector<16x16xbf16>, vector<64x16xf32> -> vector<64x16xf32>
    %30 = arith.addf %24, %29 : vector<64x16xf32>
    %c0_28 = arith.constant 0 : index
    %c1_29 = arith.constant 1 : index
    %c2_30 = arith.constant 2 : index
    %c0_31 = arith.constant 0 : index
    %31 = vector.load %arg2[%c0_28, %c1_29, %c2_30, %c0_31] : memref<1x10x10x16xbf16, #tpu.memory_space<vmem>>, vector<1x8x8x16xbf16>
    %32 = vector.shape_cast %31 : vector<1x8x8x16xbf16> to vector<8x8x16xbf16>
    %33 = vector.shape_cast %32 : vector<8x8x16xbf16> to vector<64x16xbf16>
    %c80 = arith.constant 80 : index
    %c0_32 = arith.constant 0 : index
    %34 = vector.load %arg3[%c80, %c0_32] : memref<144x16xbf16, #tpu.memory_space<vmem>>, vector<16x16xbf16>
    %cst_33 = arith.constant dense<0.000000e+00> : vector<64x16xf32>
    %35 = tpu.matmul %33, %34, %cst_33 {dimension_numbers = #tpu.dot_dimension_numbers<[1], [0], [0], [1], [0, 0, 1, 1], [], []>} : vector<64x16xbf16>, vector<16x16xbf16>, vector<64x16xf32> -> vector<64x16xf32>
    %36 = arith.addf %30, %35 : vector<64x16xf32>
    %c0_34 = arith.constant 0 : index
    %c2_35 = arith.constant 2 : index
    %c0_36 = arith.constant 0 : index
    %c0_37 = arith.constant 0 : index
    %37 = vector.load %arg2[%c0_34, %c2_35, %c0_36, %c0_37] : memref<1x10x10x16xbf16, #tpu.memory_space<vmem>>, vector<1x8x8x16xbf16>
    %38 = vector.shape_cast %37 : vector<1x8x8x16xbf16> to vector<8x8x16xbf16>
    %39 = vector.shape_cast %38 : vector<8x8x16xbf16> to vector<64x16xbf16>
    %c96 = arith.constant 96 : index
    %c0_38 = arith.constant 0 : index
    %40 = vector.load %arg3[%c96, %c0_38] : memref<144x16xbf16, #tpu.memory_space<vmem>>, vector<16x16xbf16>
    %cst_39 = arith.constant dense<0.000000e+00> : vector<64x16xf32>
    %41 = tpu.matmul %39, %40, %cst_39 {dimension_numbers = #tpu.dot_dimension_numbers<[1], [0], [0], [1], [0, 0, 1, 1], [], []>} : vector<64x16xbf16>, vector<16x16xbf16>, vector<64x16xf32> -> vector<64x16xf32>
    %42 = arith.addf %36, %41 : vector<64x16xf32>
    %c0_40 = arith.constant 0 : index
    %c2_41 = arith.constant 2 : index
    %c1_42 = arith.constant 1 : index
    %c0_43 = arith.constant 0 : index
    %43 = vector.load %arg2[%c0_40, %c2_41, %c1_42, %c0_43] : memref<1x10x10x16xbf16, #tpu.memory_space<vmem>>, vector<1x8x8x16xbf16>
    %44 = vector.shape_cast %43 : vector<1x8x8x16xbf16> to vector<8x8x16xbf16>
    %45 = vector.shape_cast %44 : vector<8x8x16xbf16> to vector<64x16xbf16>
    %c112 = arith.constant 112 : index
    %c0_44 = arith.constant 0 : index
    %46 = vector.load %arg3[%c112, %c0_44] : memref<144x16xbf16, #tpu.memory_space<vmem>>, vector<16x16xbf16>
    %cst_45 = arith.constant dense<0.000000e+00> : vector<64x16xf32>
    %47 = tpu.matmul %45, %46, %cst_45 {dimension_numbers = #tpu.dot_dimension_numbers<[1], [0], [0], [1], [0, 0, 1, 1], [], []>} : vector<64x16xbf16>, vector<16x16xbf16>, vector<64x16xf32> -> vector<64x16xf32>
    %48 = arith.addf %42, %47 : vector<64x16xf32>
    %c0_46 = arith.constant 0 : index
    %c2_47 = arith.constant 2 : index
    %c2_48 = arith.constant 2 : index
    %c0_49 = arith.constant 0 : index
    %49 = vector.load %arg2[%c0_46, %c2_47, %c2_48, %c0_49] : memref<1x10x10x16xbf16, #tpu.memory_space<vmem>>, vector<1x8x8x16xbf16>
    %50 = vector.shape_cast %49 : vector<1x8x8x16xbf16> to vector<8x8x16xbf16>
    %51 = vector.shape_cast %50 : vector<8x8x16xbf16> to vector<64x16xbf16>
    %c128 = arith.constant 128 : index
    %c0_50 = arith.constant 0 : index
    %52 = vector.load %arg3[%c128, %c0_50] : memref<144x16xbf16, #tpu.memory_space<vmem>>, vector<16x16xbf16>
    %cst_51 = arith.constant dense<0.000000e+00> : vector<64x16xf32>
    %53 = tpu.matmul %51, %52, %cst_51 {dimension_numbers = #tpu.dot_dimension_numbers<[1], [0], [0], [1], [0, 0, 1, 1], [], []>} : vector<64x16xbf16>, vector<16x16xbf16>, vector<64x16xf32> -> vector<64x16xf32>
    %54 = arith.addf %48, %53 : vector<64x16xf32>
    %55 = vector.shape_cast %54 : vector<64x16xf32> to vector<8x8x16xf32>
    %56 = arith.truncf %55 : vector<8x8x16xf32> to vector<8x8x16xbf16>
    %c0_52 = arith.constant 0 : index
    %c0_53 = arith.constant 0 : index
    %c0_54 = arith.constant 0 : index
    %c0_55 = arith.constant 0 : index
    %57 = vector.load %arg4[%c0_52, %c0_53, %c0_54, %c0_55] : memref<1x8x8x16xbf16, #tpu.memory_space<vmem>>, vector<1x8x8x16xbf16>
    %58 = vector.shape_cast %57 : vector<1x8x8x16xbf16> to vector<8x8x16xbf16>
    %59 = vector.shape_cast %56 : vector<8x8x16xbf16> to vector<1x8x8x16xbf16>
    tpu.vector_store %arg4[%c0_52, %c0_53, %c0_54, %c0_55], %59 {strides = array<i32>} : memref<1x8x8x16xbf16, #tpu.memory_space<vmem>>, vector<1x8x8x16xbf16>,
    return
  }
  func.func @transform_0(%arg0: i32, %arg1: i32) -> (i32, i32, i32, i32) {
    %c0_i32 = arith.constant 0 : i32
    %c0_i32_0 = arith.constant 0 : i32
    %c0_i32_1 = arith.constant 0 : i32
    %c0_i32_2 = arith.constant 0 : i32
    return %arg0, %c0_i32, %c0_i32_0, %c0_i32_1 : i32, i32, i32, i32
  }
  func.func @transform_1(%arg0: i32, %arg1: i32) -> (i32, i32) {
    %c0_i32 = arith.constant 0 : i32
    %c0_i32_0 = arith.constant 0 : i32
    return %c0_i32, %arg1 : i32, i32
  }
  func.func @transform_2(%arg0: i32, %arg1: i32) -> (i32, i32, i32, i32) {
    %c0_i32 = arith.constant 0 : i32
    %c0_i32_0 = arith.constant 0 : i32
    %c0_i32_1 = arith.constant 0 : i32
    return %arg0, %c0_i32, %c0_i32_0, %arg1 : i32, i32, i32, i32
  }
}

module attributes {stable_mosaic.version = 11 : i64} {
  func.func @_conv_tap_kernel(%arg0: i32, %arg1: i32, %arg2: memref<1x10x10x16xbf16, #tpu.memory_space<vmem>>, %arg3: memref<144x16xbf16, #tpu.memory_space<vmem>>, %arg4: memref<1x8x8x16xbf16, #tpu.memory_space<vmem>>, %arg5: memref<1x8x8x16xbf16, #tpu.memory_space<vmem>>) attributes {dimension_semantics = [#tpu.dimension_semantics<parallel>, #tpu.dimension_semantics<parallel>], iteration_bounds = array<i64: 2, 1>, scalar_prefetch = 0 : i64, scratch_operands = 0 : i64, tpu.core_type = #tpu.core_type<tc>, window_params = [{transform_indices = @transform_0, window_bounds = array<i64: 1, 10, 10, 16>}, {transform_indices = @transform_1, window_bounds = array<i64: 144, 16>}, {transform_indices = @transform_2, window_bounds = array<i64: 1, 8, 8, 16>}, {transform_indices = @transform_3, window_bounds = array<i64: 1, 8, 8, 16>}]} {
    %cst = arith.constant 0.000000e+00 : f32
    %0 = vector.broadcast %cst : f32 to vector<64x16xf32>
    %c0 = arith.constant 0 : index
    %c0_0 = arith.constant 0 : index
    %c0_1 = arith.constant 0 : index
    %c0_2 = arith.constant 0 : index
    %1 = vector.load %arg2[%c0, %c0_0, %c0_1, %c0_2] : memref<1x10x10x16xbf16, #tpu.memory_space<vmem>>, vector<1x8x8x16xbf16>
    %2 = vector.shape_cast %1 : vector<1x8x8x16xbf16> to vector<8x8x16xbf16>
    %3 = vector.shape_cast %2 : vector<8x8x16xbf16> to vector<64x16xbf16>
    %c0_3 = arith.constant 0 : index
    %c0_4 = arith.constant 0 : index
    %4 = vector.load %arg3[%c0_3, %c0_4] : memref<144x16xbf16, #tpu.memory_space<vmem>>, vector<16x16xbf16>
    %cst_5 = arith.constant dense<0.000000e+00> : vector<64x16xf32>
    %5 = tpu.matmul %3, %4, %cst_5 {dimension_numbers = #tpu.dot_dimension_numbers<[1], [0], [0], [1], [0, 0, 1, 1], [], []>} : vector<64x16xbf16>, vector<16x16xbf16>, vector<64x16xf32> -> vector<64x16xf32>
    %6 = arith.addf %0, %5 : vector<64x16xf32>
    %c0_6 = arith.constant 0 : index
    %c0_7 = arith.constant 0 : index
    %c1 = arith.constant 1 : index
    %c0_8 = arith.constant 0 : index
    %7 = vector.load %arg2[%c0_6, %c0_7, %c1, %c0_8] : memref<1x10x10x16xbf16, #tpu.memory_space<vmem>>, vector<1x8x8x16xbf16>
    %8 = vector.shape_cast %7 : vector<1x8x8x16xbf16> to vector<8x8x16xbf16>
    %9 = vector.shape_cast %8 : vector<8x8x16xbf16> to vector<64x16xbf16>
    %c16 = arith.constant 16 : index
    %c0_9 = arith.constant 0 : index
    %10 = vector.load %arg3[%c16, %c0_9] : memref<144x16xbf16, #tpu.memory_space<vmem>>, vector<16x16xbf16>
    %cst_10 = arith.constant dense<0.000000e+00> : vector<64x16xf32>
    %11 = tpu.matmul %9, %10, %cst_10 {dimension_numbers = #tpu.dot_dimension_numbers<[1], [0], [0], [1], [0, 0, 1, 1], [], []>} : vector<64x16xbf16>, vector<16x16xbf16>, vector<64x16xf32> -> vector<64x16xf32>
    %12 = arith.addf %6, %11 : vector<64x16xf32>
    %c0_11 = arith.constant 0 : index
    %c0_12 = arith.constant 0 : index
    %c2 = arith.constant 2 : index
    %c0_13 = arith.constant 0 : index
    %13 = vector.load %arg2[%c0_11, %c0_12, %c2, %c0_13] : memref<1x10x10x16xbf16, #tpu.memory_space<vmem>>, vector<1x8x8x16xbf16>
    %14 = vector.shape_cast %13 : vector<1x8x8x16xbf16> to vector<8x8x16xbf16>
    %15 = vector.shape_cast %14 : vector<8x8x16xbf16> to vector<64x16xbf16>
    %c32 = arith.constant 32 : index
    %c0_14 = arith.constant 0 : index
    %16 = vector.load %arg3[%c32, %c0_14] : memref<144x16xbf16, #tpu.memory_space<vmem>>, vector<16x16xbf16>
    %cst_15 = arith.constant dense<0.000000e+00> : vector<64x16xf32>
    %17 = tpu.matmul %15, %16, %cst_15 {dimension_numbers = #tpu.dot_dimension_numbers<[1], [0], [0], [1], [0, 0, 1, 1], [], []>} : vector<64x16xbf16>, vector<16x16xbf16>, vector<64x16xf32> -> vector<64x16xf32>
    %18 = arith.addf %12, %17 : vector<64x16xf32>
    %c0_16 = arith.constant 0 : index
    %c1_17 = arith.constant 1 : index
    %c0_18 = arith.constant 0 : index
    %c0_19 = arith.constant 0 : index
    %19 = vector.load %arg2[%c0_16, %c1_17, %c0_18, %c0_19] : memref<1x10x10x16xbf16, #tpu.memory_space<vmem>>, vector<1x8x8x16xbf16>
    %20 = vector.shape_cast %19 : vector<1x8x8x16xbf16> to vector<8x8x16xbf16>
    %21 = vector.shape_cast %20 : vector<8x8x16xbf16> to vector<64x16xbf16>
    %c48 = arith.constant 48 : index
    %c0_20 = arith.constant 0 : index
    %22 = vector.load %arg3[%c48, %c0_20] : memref<144x16xbf16, #tpu.memory_space<vmem>>, vector<16x16xbf16>
    %cst_21 = arith.constant dense<0.000000e+00> : vector<64x16xf32>
    %23 = tpu.matmul %21, %22, %cst_21 {dimension_numbers = #tpu.dot_dimension_numbers<[1], [0], [0], [1], [0, 0, 1, 1], [], []>} : vector<64x16xbf16>, vector<16x16xbf16>, vector<64x16xf32> -> vector<64x16xf32>
    %24 = arith.addf %18, %23 : vector<64x16xf32>
    %c0_22 = arith.constant 0 : index
    %c1_23 = arith.constant 1 : index
    %c1_24 = arith.constant 1 : index
    %c0_25 = arith.constant 0 : index
    %25 = vector.load %arg2[%c0_22, %c1_23, %c1_24, %c0_25] : memref<1x10x10x16xbf16, #tpu.memory_space<vmem>>, vector<1x8x8x16xbf16>
    %26 = vector.shape_cast %25 : vector<1x8x8x16xbf16> to vector<8x8x16xbf16>
    %27 = vector.shape_cast %26 : vector<8x8x16xbf16> to vector<64x16xbf16>
    %c64 = arith.constant 64 : index
    %c0_26 = arith.constant 0 : index
    %28 = vector.load %arg3[%c64, %c0_26] : memref<144x16xbf16, #tpu.memory_space<vmem>>, vector<16x16xbf16>
    %cst_27 = arith.constant dense<0.000000e+00> : vector<64x16xf32>
    %29 = tpu.matmul %27, %28, %cst_27 {dimension_numbers = #tpu.dot_dimension_numbers<[1], [0], [0], [1], [0, 0, 1, 1], [], []>} : vector<64x16xbf16>, vector<16x16xbf16>, vector<64x16xf32> -> vector<64x16xf32>
    %30 = arith.addf %24, %29 : vector<64x16xf32>
    %c0_28 = arith.constant 0 : index
    %c1_29 = arith.constant 1 : index
    %c2_30 = arith.constant 2 : index
    %c0_31 = arith.constant 0 : index
    %31 = vector.load %arg2[%c0_28, %c1_29, %c2_30, %c0_31] : memref<1x10x10x16xbf16, #tpu.memory_space<vmem>>, vector<1x8x8x16xbf16>
    %32 = vector.shape_cast %31 : vector<1x8x8x16xbf16> to vector<8x8x16xbf16>
    %33 = vector.shape_cast %32 : vector<8x8x16xbf16> to vector<64x16xbf16>
    %c80 = arith.constant 80 : index
    %c0_32 = arith.constant 0 : index
    %34 = vector.load %arg3[%c80, %c0_32] : memref<144x16xbf16, #tpu.memory_space<vmem>>, vector<16x16xbf16>
    %cst_33 = arith.constant dense<0.000000e+00> : vector<64x16xf32>
    %35 = tpu.matmul %33, %34, %cst_33 {dimension_numbers = #tpu.dot_dimension_numbers<[1], [0], [0], [1], [0, 0, 1, 1], [], []>} : vector<64x16xbf16>, vector<16x16xbf16>, vector<64x16xf32> -> vector<64x16xf32>
    %36 = arith.addf %30, %35 : vector<64x16xf32>
    %c0_34 = arith.constant 0 : index
    %c2_35 = arith.constant 2 : index
    %c0_36 = arith.constant 0 : index
    %c0_37 = arith.constant 0 : index
    %37 = vector.load %arg2[%c0_34, %c2_35, %c0_36, %c0_37] : memref<1x10x10x16xbf16, #tpu.memory_space<vmem>>, vector<1x8x8x16xbf16>
    %38 = vector.shape_cast %37 : vector<1x8x8x16xbf16> to vector<8x8x16xbf16>
    %39 = vector.shape_cast %38 : vector<8x8x16xbf16> to vector<64x16xbf16>
    %c96 = arith.constant 96 : index
    %c0_38 = arith.constant 0 : index
    %40 = vector.load %arg3[%c96, %c0_38] : memref<144x16xbf16, #tpu.memory_space<vmem>>, vector<16x16xbf16>
    %cst_39 = arith.constant dense<0.000000e+00> : vector<64x16xf32>
    %41 = tpu.matmul %39, %40, %cst_39 {dimension_numbers = #tpu.dot_dimension_numbers<[1], [0], [0], [1], [0, 0, 1, 1], [], []>} : vector<64x16xbf16>, vector<16x16xbf16>, vector<64x16xf32> -> vector<64x16xf32>
    %42 = arith.addf %36, %41 : vector<64x16xf32>
    %c0_40 = arith.constant 0 : index
    %c2_41 = arith.constant 2 : index
    %c1_42 = arith.constant 1 : index
    %c0_43 = arith.constant 0 : index
    %43 = vector.load %arg2[%c0_40, %c2_41, %c1_42, %c0_43] : memref<1x10x10x16xbf16, #tpu.memory_space<vmem>>, vector<1x8x8x16xbf16>
    %44 = vector.shape_cast %43 : vector<1x8x8x16xbf16> to vector<8x8x16xbf16>
    %45 = vector.shape_cast %44 : vector<8x8x16xbf16> to vector<64x16xbf16>
    %c112 = arith.constant 112 : index
    %c0_44 = arith.constant 0 : index
    %46 = vector.load %arg3[%c112, %c0_44] : memref<144x16xbf16, #tpu.memory_space<vmem>>, vector<16x16xbf16>
    %cst_45 = arith.constant dense<0.000000e+00> : vector<64x16xf32>
    %47 = tpu.matmul %45, %46, %cst_45 {dimension_numbers = #tpu.dot_dimension_numbers<[1], [0], [0], [1], [0, 0, 1, 1], [], []>} : vector<64x16xbf16>, vector<16x16xbf16>, vector<64x16xf32> -> vector<64x16xf32>
    %48 = arith.addf %42, %47 : vector<64x16xf32>
    %c0_46 = arith.constant 0 : index
    %c2_47 = arith.constant 2 : index
    %c2_48 = arith.constant 2 : index
    %c0_49 = arith.constant 0 : index
    %49 = vector.load %arg2[%c0_46, %c2_47, %c2_48, %c0_49] : memref<1x10x10x16xbf16, #tpu.memory_space<vmem>>, vector<1x8x8x16xbf16>
    %50 = vector.shape_cast %49 : vector<1x8x8x16xbf16> to vector<8x8x16xbf16>
    %51 = vector.shape_cast %50 : vector<8x8x16xbf16> to vector<64x16xbf16>
    %c128 = arith.constant 128 : index
    %c0_50 = arith.constant 0 : index
    %52 = vector.load %arg3[%c128, %c0_50] : memref<144x16xbf16, #tpu.memory_space<vmem>>, vector<16x16xbf16>
    %cst_51 = arith.constant dense<0.000000e+00> : vector<64x16xf32>
    %53 = tpu.matmul %51, %52, %cst_51 {dimension_numbers = #tpu.dot_dimension_numbers<[1], [0], [0], [1], [0, 0, 1, 1], [], []>} : vector<64x16xbf16>, vector<16x16xbf16>, vector<64x16xf32> -> vector<64x16xf32>
    %54 = arith.addf %48, %53 : vector<64x16xf32>
    %c0_52 = arith.constant 0 : index
    %c0_53 = arith.constant 0 : index
    %c0_54 = arith.constant 0 : index
    %c0_55 = arith.constant 0 : index
    %55 = vector.load %arg4[%c0_52, %c0_53, %c0_54, %c0_55] : memref<1x8x8x16xbf16, #tpu.memory_space<vmem>>, vector<1x8x8x16xbf16>
    %56 = vector.shape_cast %55 : vector<1x8x8x16xbf16> to vector<8x8x16xbf16>
    %57 = vector.shape_cast %56 : vector<8x8x16xbf16> to vector<64x16xbf16>
    %58 = arith.extf %57 : vector<64x16xbf16> to vector<64x16xf32>
    %59 = arith.addf %54, %58 : vector<64x16xf32>
    %60 = vector.shape_cast %59 : vector<64x16xf32> to vector<8x8x16xf32>
    %61 = arith.truncf %60 : vector<8x8x16xf32> to vector<8x8x16xbf16>
    %c0_56 = arith.constant 0 : index
    %c0_57 = arith.constant 0 : index
    %c0_58 = arith.constant 0 : index
    %c0_59 = arith.constant 0 : index
    %62 = vector.load %arg5[%c0_56, %c0_57, %c0_58, %c0_59] : memref<1x8x8x16xbf16, #tpu.memory_space<vmem>>, vector<1x8x8x16xbf16>
    %63 = vector.shape_cast %62 : vector<1x8x8x16xbf16> to vector<8x8x16xbf16>
    %64 = vector.shape_cast %61 : vector<8x8x16xbf16> to vector<1x8x8x16xbf16>
    tpu.vector_store %arg5[%c0_56, %c0_57, %c0_58, %c0_59], %64 {strides = array<i32>} : memref<1x8x8x16xbf16, #tpu.memory_space<vmem>>, vector<1x8x8x16xbf16>,
    return
  }
  func.func @transform_0(%arg0: i32, %arg1: i32) -> (i32, i32, i32, i32) {
    %c0_i32 = arith.constant 0 : i32
    %c0_i32_0 = arith.constant 0 : i32
    %c0_i32_1 = arith.constant 0 : i32
    %c0_i32_2 = arith.constant 0 : i32
    return %arg0, %c0_i32, %c0_i32_0, %c0_i32_1 : i32, i32, i32, i32
  }
  func.func @transform_1(%arg0: i32, %arg1: i32) -> (i32, i32) {
    %c0_i32 = arith.constant 0 : i32
    %c0_i32_0 = arith.constant 0 : i32
    return %c0_i32, %arg1 : i32, i32
  }
  func.func @transform_2(%arg0: i32, %arg1: i32) -> (i32, i32, i32, i32) {
    %c0_i32 = arith.constant 0 : i32
    %c0_i32_0 = arith.constant 0 : i32
    %c0_i32_1 = arith.constant 0 : i32
    return %arg0, %c0_i32, %c0_i32_0, %arg1 : i32, i32, i32, i32
  }
  func.func @transform_3(%arg0: i32, %arg1: i32) -> (i32, i32, i32, i32) {
    %c0_i32 = arith.constant 0 : i32
    %c0_i32_0 = arith.constant 0 : i32
    %c0_i32_1 = arith.constant 0 : i32
    return %arg0, %c0_i32, %c0_i32_0, %arg1 : i32, i32, i32, i32
  }
}

</mosaic_0001>

<bundles_post_ra>
// kernel: zhugo_forward.20
= control target key start
LH: loop header
LB: loop body
LE: loop exit
PB: predicated region body
PF: predicated region fallthrough
CT: control target
= control target key end

     0   :  { %s2309_s12 = smov 0   ;;  %s2311_s13 = smov 0   ;;  %s2879_s0 = inlined_call_operand.vmem [shape: bf16[2,10,10,8], index: 0, kind: input, shape index: {}]   ;;  %s2880_s1 = inlined_call_operand.vmem [shape: bf16[72,8], index: 1, kind: input, shape index: {}]   ;;  %s2881_s2 = inlined_call_operand.vmem [shape: bf16[2,8,8,8], index: 2, kind: input, shape index: {}]   ;;  %s2882_s3 = inlined_call_operand.vmem [shape: bf16[2,8,8,8], index: 3, kind: output, shape index: {}]  }
   0x1   :  { %s2313_s14 = smov 0  }
   0x2 LB: > { %s25_s15 = sadd.s32 1, %s2283_s13  ;;  %p1892_p0 = scmp.ge.s32.totalorder %s2287_s14, 1  ;;  %s2287_s14 = sphi %s2313_s14, %s13_s14   ;;  %s2283_s13 = sphi %s2311_s13, %s2888_s13   ;;  %s2279_s12 = sphi %s2309_s12, %s2887_s12  }
   0x3   : > { %p27_p1 = scmp.ge.s32.totalorder %s25_s15, 2  ;;  %p175_p2 = scmp.lt.s32.totalorder %s2287_s14, 3 }
   0x5   : > { %s2890_s15 = smov (%p27_p1, %s25_s15), 0  ;;  %p176_p3 = pnand %p1892_p0, %p175_p2 }
   0x6   : > { %p214_p4 = scmp.lt.s32.totalorder (!%p176_p3), %s2279_s12, 1 }
   0x7   : > { %179 = sbr.rel (%p176_p3) target bundleno = 318 (0x13e), region = 32 }
   0xc   : > { %v372_v0 = vld [vmem:[%s2880_s1 + $0x4] sm:$0xf]  ;;  %vm398_vm0 = vcmask 1043456   ;;  %v248_v2 = vld [vmem:[%s2880_s1] sm:$0xf]  ;;  %s2892_s12 = smov (!%p214_p4, %s2279_s12), 1 }
   0xd   : > { %2219 = vmatprep.subr.msk.bf16.mxu1 %vm398_vm0, %v372_v0  ;;  %2218 = vmatprep.subr.msk.bf16.mxu0 %vm398_vm0, %v372_v0  ;;  %v400_v1 = vsel %vm398_vm0, %v372_v0, 0  ;;  %v626_v3 = vld [vmem:[%s2880_s1 + $0x8] sm:$0xf]  ;;  %v2346_v4 = vld [vmem:[%s2880_s1 + $0xc] sm:$0xf]  ;;  %s2228_s26 = smul.u32 80, %s2892_s12 }
   0xe   : > { %2217 = vmatpush3.bf16.msra.mxu1 %v400_v1  ;;  %2127 = vmatpush3.bf16.msra.mxu0 %v400_v1  ;;  %v2351_v5 = vld [vmem:[%s2880_s1 + $0x10] sm:$0xf]  ;;  %vm257_vm1 = vsmask.f32 3328  ;;  %v2357_v6 = vld [vmem:[%s2880_s1 + $0x14] sm:$0xf] }
   0xf   : > { %2220 = vmatprep.subr.msk.bf16.mxu1 %vm398_vm0, %v248_v2  ;;  %2221 = vmatprep.subr.msk.bf16.mxu0 %vm398_vm0, %v626_v3  ;;  %vm258_vm2 = vsmask.f32 7440  ;;  %v2360_v7 = vsel %vm398_vm0, %v248_v2, 0  ;;  %v2363_v8 = vsel %vm398_vm0, %v626_v3, 0  ;;  %v2368_v9 = vld [vmem:[%s2880_s1 + $0x18] sm:$0xf]  ;;  %s2373_s6 = scalar_lea.vmem %s2879_s0, %s2228_s26 }
  0x10   : > { %v2377_v10 = vsel %vm398_vm0, %v2346_v4, 0  ;;  %v2381_v11 = vsel %vm398_vm0, %v2351_v5, 0  ;;  %v2385_v12 = vsel %vm398_vm0, %v2357_v6, 0  ;;  %v2389_v13 = vsel %vm398_vm0, %v2368_v9, 0  ;;  %v2392_v14 = vld [vmem:[%s2373_s6] sm:$0xf]  ;;  %vm2430_vm4 = vmor %vm257_vm1, %vm258_vm2 }
  0x11   : > { %v2395_v15 = vld [vmem:[%s2373_s6 + $0x8] sm:$0xf]  ;;  %v2398_v16 = vld [vmem:[%s2373_s6 + $0x4] sm:$0x1]  ;;  %v2401_v17 = vld [vmem:[%s2373_s6 + $0xc] sm:$0x1] }
  0x12   : > { %v261_v18 = vshrl.u32 %v2392_v14, 16  ;;  %v264_v19 = vshll.u32 %v2392_v14, 16  ;;  %v270_v20 = vshll.u32 %v2398_v16, 16  ;;  %v275_v21 = vshrl.u32 %v2395_v15, 16  ;;  %v2412_v26 = vld [vmem:[%s2373_s6 + $0x20] sm:$0xf] }
  0x13   : > { %v278_v22 = vshll.u32 %v2395_v15, 16  ;;  %v284_v23 = vshll.u32 %v2401_v17, 16  ;;  %vm385_vm3 = vcmask 64512   ;;  %v596_v24 = vrot.slane %v2398_v16, 5  ;;  %v2415_v31 = vld [vmem:[%s2373_s6 + $0x28] sm:$0xf] }
  0x14   : > { %v600_v25 = vrot.slane %v2401_v17, 5  ;;  %v263_v27 = vrot.slane %v261_v18, 4  ;;  %v266_v28 = vrot.slane %v264_v19, 5  ;;  %v272_v29 = vrot.slane %v270_v20, 5  ;;  %v2418_v34 = vld [vmem:[%s2373_s6 + $0x24] sm:$0x1] }
  0x15   : > { %v277_v30 = vrot.slane %v275_v21, 4  ;;  %v280_v32 = vrot.slane %v278_v22, 5  ;;  %v286_v33 = vrot.slane %v284_v23, 5  ;;  %v2421_v35 = vld [vmem:[%s2373_s6 + $0x2c] sm:$0x1]  ;;  %v1906_v36 = vcombine.low %v2392_v14, %v2395_v15  ;;  %s2060_s11 = sshll.u32 %s2892_s12, 5 }
  0x16   : > { %v267_v37 = vor.u32 %v266_v28, %v263_v27  ;;  %v317_v38 = vshrl.u32 %v2412_v26, 16  ;;  %v320_v39 = vshll.u32 %v2412_v26, 16  ;;  %v326_v40 = vshll.u32 %v2418_v34, 16  ;;  %v2438_v46 = vld [vmem:[%s2373_s6 + $0x10] sm:$0xf]  ;;  %s2830_s18 = scalar_lea.vmem %s2881_s2, %s2060_s11  ;;  %s2848_s21 = scalar_lea.vmem %s2882_s3, %s2060_s11 }
  0x17   : > { %v281_v42 = vor.u32 %v280_v32, %v277_v30  ;;  %v331_v43 = vshrl.u32 %v2415_v31, 16  ;;  %v334_v44 = vshll.u32 %v2415_v31, 16  ;;  %v340_v45 = vshll.u32 %v2421_v35, 16  ;;  %v2441_v51 = vld [vmem:[%s2373_s6 + $0x18] sm:$0xf] }
  0x18   : > { %v268_v47 = vrot.slane %v267_v37, 4  ;;  %v319_v48 = vrot.slane %v317_v38, 4  ;;  %v322_v49 = vrot.slane %v320_v39, 5  ;;  %v328_v50 = vrot.slane %v326_v40, 5  ;;  %v2444_v56 = vld [vmem:[%s2373_s6 + $0x14] sm:$0x1] }
  0x19   : > { %vm591_vm5 = vcmask 1042432   ;;  %vm592_vm6 = vcmask 1046532   ;;  %v282_v52 = vrot.slane %v281_v42, 4  ;;  %v333_v53 = vrot.slane %v331_v43, 4  ;;  %v2453_v63 = vld [vmem:[%s2373_s6 + $0x1c] sm:$0x1] }
  0x1a   : > { %v336_v54 = vrot.slane %v334_v44, 5  ;;  %v342_v55 = vrot.slane %v340_v45, 5  ;;  %v273_v57 = vsel %vm2430_vm4, %v268_v47, %v272_v29  ;;  %v323_v58 = vor.u32 %v322_v49, %v319_v48  ;;  %v2461_v27 = vld [vmem:[%s2373_s6 + $0x30] sm:$0xf]  ;;  %v2468_v32 = vld [vmem:[%s2373_s6 + $0x38] sm:$0xf]  ;;  %vm2498_vm7 = vmor %vm591_vm5, %vm592_vm6 }
  0x1b   : > { %v612_v59 = vrot.slane %v2418_v34, 5  ;;  %v616_v60 = vrot.slane %v2421_v35, 5  ;;  %v287_v61 = vsel %vm2430_vm4, %v282_v52, %v286_v33  ;;  %v289_v0 = vshrl.u32 %v2438_v46, 16  ;;  %v2471_v33 = vld [vmem:[%s2373_s6 + $0x34] sm:$0x1] }
  0x1c   : > { %v337_v62 = vor.u32 %v336_v54, %v333_v53  ;;  %v292_v1 = vshll.u32 %v2438_v46, 16  ;;  %v1898_v2 = vcombine.low %v273_v57, %v287_v61  ;;  %v324_v3 = vrot.slane %v323_v58, 4  ;;  %v2478_v43 = vld [vmem:[%s2373_s6 + $0x3c] sm:$0x1]  ;;  %v567_v44 = vld [vmem:[%s2373_s6] sm:$0xe] }
  0x1d   : > { %v298_v18 = vshll.u32 %v2444_v56, 16  ;;  %v303_v19 = vshrl.u32 %v2441_v51, 16  ;;  %v291_v21 = vrot.slane %v289_v0, 4  ;;  %v306_v23 = vshll.u32 %v2441_v51, 16  ;;  %v569_v57 = vld [vmem:[%s2373_s6 + $0x10] sm:$0xe] }
  0x1e   : > { %v338_v20 = vrot.slane %v337_v62, 4  ;;  %v294_v22 = vrot.slane %v292_v1, 5  ;;  %2128 = vmatprep.mubr.msk.bf16.mxu0 %vm385_vm3, %v1898_v2  ;;  %v329_v28 = vsel %vm2430_vm4, %v324_v3, %v328_v50  ;;  %v312_v30 = vshll.u32 %v2453_v63, 16  ;;  %v568_v50 = vld [vmem:[%s2373_s6 + $0x8] sm:$0xe] }
  0x1f   : > { %v305_v29 = vrot.slane %v303_v19, 4  ;;  %v1908_v37 = vcombine.low %v2412_v26, %v2415_v31  ;;  %v300_v40 = vrot.slane %v298_v18, 5  ;;  %v308_v42 = vrot.slane %v306_v23, 5  ;;  %v571_v1 = vld [vmem:[%s2373_s6 + $0x20] sm:$0xe] }
  0x20   : > { %v343_v38 = vsel %vm2430_vm4, %v338_v20, %v342_v55  ;;  %v295_v39 = vor.u32 %v294_v22, %v291_v21  ;;  %v314_v47 = vrot.slane %v312_v30, 5  ;;  %v604_v48 = vrot.slane %v2444_v56, 5  ;;  %v570_v56 = vld [vmem:[%s2373_s6 + $0x18] sm:$0xe]  ;;  %v1954_v15 = vld [vmem:[%s2373_s6 + $0x28] sm:$0xf] }
  0x21   : > { %v1900_v45 = vcombine.low %v329_v28, %v343_v38  ;;  %v345_v49 = vshrl.u32 %v2461_v27, 16  ;;  %v309_v53 = vor.u32 %v308_v42, %v305_v29  ;;  %v348_v54 = vshll.u32 %v2461_v27, 16 }
  0x22   : > { %v296_v52 = vrot.slane %v295_v39, 4  ;;  %v354_v55 = vshll.u32 %v2471_v33, 16  ;;  %v359_v61 = vshrl.u32 %v2468_v32, 16  ;;  %v362_v62 = vshll.u32 %v2468_v32, 16 }
  0x23   : > { %2132 = vmatprep.mubr.msk.bf16.mxu1 %vm385_vm3, %v1900_v45  ;;  %v347_v58 = vrot.slane %v345_v49, 4  ;;  %v368_v0 = vshll.u32 %v2478_v43, 16  ;;  %v310_v3 = vrot.slane %v309_v53, 4  ;;  %v608_v18 = vrot.slane %v2453_v63, 5  ;;  %v572_v63 = vld [vmem:[%s2373_s6 + $0x28] sm:$0xe] }
  0x24   : > { %v301_v2 = vsel %vm2430_vm4, %v296_v52, %v300_v40  ;;  %v350_v19 = vrot.slane %v348_v54, 5  ;;  %v356_v21 = vrot.slane %v354_v55, 5  ;;  %v361_v22 = vrot.slane %v359_v61, 4  ;;  %v573_v52 = vld [vmem:[%s2373_s6 + $0x30] sm:$0xe] }
  0x25   : > { %v364_v23 = vrot.slane %v362_v62, 5  ;;  %v1914_v28 = vrot.slane %v567_v44, 9  ;;  %v315_v29 = vsel %vm2430_vm4, %v310_v3, %v314_v47  ;;  %v370_v38 = vrot.slane %v368_v0, 5  ;;  %v574_v54 = vld [vmem:[%s2373_s6 + $0x38] sm:$0xe] }
  0x26   : > { %v351_v30 = vor.u32 %v350_v19, %v347_v58  ;;  %v1915_v39 = vrot.slane %v568_v50, 9  ;;  %v1899_v40 = vcombine.low %v301_v2, %v315_v29  ;;  %v1916_v49 = vrot.slane %v569_v57, 9  ;;  %v2531_v62 = vld [vmem:[%s2373_s6 + $0xc] sm:$0x1] }
  0x27   : > { %v365_v42 = vor.u32 %v364_v23, %v361_v22  ;;  %v597_v45 = vsel %vm2498_vm7, %v1914_v28, %v596_v24  ;;  %v1917_v47 = vrot.slane %v570_v56, 9  ;;  %v1918_v50 = vrot.slane %v571_v1, 9  ;;  %v2544_v1 = vld [vmem:[%s2373_s6 + $0x14] sm:$0x1]  ;;  %v2551_v28 = vld [vmem:[%s2373_s6 + $0x1c] sm:$0x1] }
  0x28   : > { %v352_v53 = vrot.slane %v351_v30, 4  ;;  %v601_v44 = vsel %vm2498_vm7, %v1915_v39, %v600_v25  ;;  %2129 = vmatmul.mubr.msk.bf16.vlgmr.msra.gmra.mxu0 %vm385_vm3, %v1899_v40  ;;  %v605_v24 = vsel %vm2498_vm7, %v1916_v49, %v604_v48  ;;  %v1919_v57 = vrot.slane %v572_v63, 9  ;;  %v1946_v48 = vld [vmem:[%s2373_s6 + $0x8] sm:$0xf] }
  0x29   : > { %v366_v55 = vrot.slane %v365_v42, 4  ;;  %v1922_v16 = vcombine.low %v597_v45, %v601_v44  ;;  %2147 = vmatpush3.bf16.msra.mxu0 %v2363_v8  ;;  %v1907_v25 = vcombine.low %v2438_v46, %v2441_v51  ;;  %v609_v58 = vsel %vm2498_vm7, %v1917_v47, %v608_v18  ;;  %v2568_v42 = vld [vmem:[%s2373_s6 + $0x24] sm:$0x1]  ;;  %v2577_v47 = vld [vmem:[%s2373_s6 + $0x2c] sm:$0x1] }
  0x2a   : > { %v357_v17 = vsel %vm2430_vm4, %v352_v53, %v356_v21  ;;  %v613_v61 = vsel %vm2498_vm7, %v1918_v50, %v612_v59  ;;  %v1923_v8 = vcombine.low %v605_v24, %v609_v58  ;;  %2223 = vmatprep.subr.msk.bf16.mxu0 %vm398_vm0, %v2351_v5  ;;  %v617_v34 = vsel %vm2498_vm7, %v1919_v57, %v616_v60  ;;  %v1948_v59 = vld [vmem:[%s2373_s6 + $0x10] sm:$0xf]  ;;  %v1950_v21 = vld [vmem:[%s2373_s6 + $0x18] sm:$0xf] }
  0x2b   : > { %v371_v0 = vsel %vm2430_vm4, %v366_v55, %v370_v38  ;;  %2148 = vmatprep.mubr.msk.bf16.mxu0 %vm385_vm3, %v1922_v16  ;;  %v1920_v56 = vrot.slane %v573_v52, 9  ;;  %v1924_v3 = vcombine.low %v613_v61, %v617_v34  ;;  %v620_v18 = vrot.slane %v2471_v33, 5  ;;  %v1952_v38 = vld [vmem:[%s2373_s6 + $0x20] sm:$0xf]  ;;  %v1956_v50 = vld [vmem:[%s2373_s6 + $0x30] sm:$0xf] }
  0x2c   : > { %v1901_v2 = vcombine.low %v357_v17, %v371_v0  ;;  %v1921_v19 = vrot.slane %v574_v54, 9  ;;  %v624_v22 = vrot.slane %v2478_v43, 5  ;;  %v862_v23 = vshrl.u32 %v1946_v48, 16 }
  0x2d   : > { %v865_v5 = vshll.u32 %v1946_v48, 16  ;;  %v871_v35 = vshll.u32 %v2531_v62, 16  ;;  %v2556_v60 = vsel %vm2498_vm7, %v1920_v56, %v620_v18  ;;  %v876_v29 = vshrl.u32 %v1948_v59, 16 }
  0x2e   : > { %2133 = vmatmul.mubr.msk.bf16.vlgmr.msra.gmra.mxu1 %vm385_vm3, %v1901_v2  ;;  %v879_v33 = vshll.u32 %v1948_v59, 16  ;;  %v885_v30 = vshll.u32 %v2544_v1, 16  ;;  %v625_v43 = vsel %vm2498_vm7, %v1921_v19, %v624_v22  ;;  %v864_v39 = vrot.slane %v862_v23, 4  ;;  %v2604_v23 = vld [vmem:[%s2373_s6 + $0x3c] sm:$0x1] }
  0x2f   : > { %2137 = vmatpush3.bf16.msra.mxu1 %v2360_v7  ;;  %2138 = vmatprep.mubr.msk.bf16.mxu1 %vm385_vm3, %v1906_v36  ;;  %v867_v63 = vrot.slane %v865_v5, 5  ;;  %v873_v40 = vrot.slane %v871_v35, 5  ;;  %v1925_v7 = vcombine.low %v2556_v60, %v625_v43  ;;  %v878_v45 = vrot.slane %v876_v29, 4  ;;  %v1960_v29 = vld [vmem:[%s2373_s6 + $0x40] sm:$0xf] }
  0x30   : > { %2222 = vmatprep.subr.msk.bf16.mxu1 %vm398_vm0, %v2346_v4  ;;  %v881_v49 = vrot.slane %v879_v33, 5  ;;  %v887_v14 = vrot.slane %v885_v30, 5  ;;  %2149 = vmatmul.mubr.msk.bf16.vlgmr.msra.gmra.mxu0 %vm385_vm3, %v1923_v8  ;;  %v890_v52 = vshrl.u32 %v1950_v21, 16  ;;  %v893_v53 = vshll.u32 %v1950_v21, 16  ;;  %v1958_v21 = vld [vmem:[%s2373_s6 + $0x38] sm:$0xf] }
  0x31   : > { %v868_v36 = vor.u32 %v867_v63, %v864_v39  ;;  %v899_v44 = vshll.u32 %v2551_v28, 16  ;;  %2167 = vmatpush3.bf16.msra.mxu0 %v2381_v11  ;;  %2152 = vmatprep.mubr.msk.bf16.mxu0 %vm385_vm3, %v1924_v3  ;;  %v904_v54 = vshrl.u32 %v1952_v38, 16  ;;  %v907_v55 = vshll.u32 %v1952_v38, 16  ;;  %v2594_v3 = vld [vmem:[%s2373_s6 + $0x34] sm:$0x1] }
  0x32   : > { %v882_v4 = vor.u32 %v881_v49, %v878_v45  ;;  %v913_v16 = vshll.u32 %v2568_v42, 16  ;;  %v892_v57 = vrot.slane %v890_v52, 4  ;;  %v895_v17 = vrot.slane %v893_v53, 5  ;;  %2225 = vmatprep.subr.msk.bf16.mxu0 %vm398_vm0, %v2368_v9  ;;  %v2619_v43 = vld [vmem:[%s2373_s6 + $0x44] sm:$0x1] }
  0x33   : > { %v869_v24 = vrot.slane %v868_v36, 4  ;;  %v901_v58 = vrot.slane %v899_v44, 5  ;;  %v906_v48 = vrot.slane %v904_v54, 4  ;;  %v909_v0 = vrot.slane %v907_v55, 5  ;;  %v1970_v63 = vld [vmem:[%s2373_s6 + $0x8] sm:$0xe] }
  0x34   : > { %v883_v61 = vrot.slane %v882_v4, 4  ;;  %v915_v11 = vrot.slane %v913_v16, 5  ;;  %v896_v34 = vor.u32 %v895_v17, %v892_v57  ;;  %v918_v56 = vshrl.u32 %v1954_v15, 16  ;;  %v1971_v52 = vld [vmem:[%s2373_s6 + $0x10] sm:$0xe] }
  0x35   : > { %v874_v8 = vsel %vm2430_vm4, %v869_v24, %v873_v40  ;;  %v921_v59 = vshll.u32 %v1954_v15, 16  ;;  %v910_v9 = vor.u32 %v909_v0, %v906_v48  ;;  %v927_v18 = vshll.u32 %v2577_v47, 16  ;;  %v2257_v40 = vld [vmem:[%s2373_s6 + $0x8] ss:$8 sps:$4 sm:$0xff]   ;;  %v1477_v54 = vld [vmem:[%s2880_s1 + $0x1c] sm:$0xf] }
  0x36   : > { %2139 = vmatmul.mubr.msk.bf16.vlgmr.msra.gmra.mxu1 %vm385_vm3, %v1907_v25  ;;  %v888_v2 = vsel %vm2430_vm4, %v883_v61, %v887_v14  ;;  %v932_v19 = vshrl.u32 %v1956_v50, 16  ;;  %v897_v51 = vrot.slane %v896_v34, 4  ;;  %v920_v25 = vrot.slane %v918_v56, 4  ;;  %v1634_v17 = vld [vmem:[%s2880_s1 + $0x20] sm:$0xf] }
  0x37   : > { %2157 = vmatpush3.bf16.msra.mxu1 %v2377_v10  ;;  %2142 = vmatprep.mubr.msk.bf16.mxu1 %vm385_vm3, %v1908_v37  ;;  %v1962_v46 = vcombine.low %v874_v8, %v888_v2  ;;  %v923_v22 = vrot.slane %v921_v59, 5  ;;  %v911_v5 = vrot.slane %v910_v9, 4  ;;  %v929_v35 = vrot.slane %v927_v18, 5  ;;  %v2258_v8 = vld [vmem:[%s2373_s6 + $0x18] ss:$8 sps:$4 sm:$0xff]  }
  0x38   : > { %2224 = vmatprep.subr.msk.bf16.mxu1 %vm398_vm0, %v2357_v6  ;;  %v934_v10 = vrot.slane %v932_v19, 4  ;;  %v935_v60 = vshll.u32 %v1956_v50, 16  ;;  %2153 = vmatmul.mubr.msk.bf16.gmra.mxu0 %vm385_vm3, %v1925_v7  ;;  %v902_v26 = vsel %vm2430_vm4, %v897_v51, %v901_v58  ;;  %v941_v37 = vshll.u32 %v2594_v3, 16  ;;  %v1973_v59 = vld [vmem:[%s2373_s6 + $0x20] sm:$0xe] }
  0x39   : > { %v924_v31 = vor.u32 %v923_v22, %v920_v25  ;;  %v946_v33 = vshrl.u32 %v1958_v21, 16  ;;  %v1909_v30 = vcombine.low %v2461_v27, %v2468_v32  ;;  %2168 = vmatprep.mubr.msk.bf16.mxu0 %vm385_vm3, %v1962_v46  ;;  %v916_v6 = vsel %vm2430_vm4, %v911_v5, %v915_v11  ;;  %v1972_v11 = vld [vmem:[%s2373_s6 + $0x18] sm:$0xe]  ;;  %v2259_v2 = vld [vmem:[%s2373_s6 + $0x28] ss:$8 sps:$4 sm:$0xff]  }
  0x3a   : > { %v937_v38 = vrot.slane %v935_v60, 5  ;;  %v949_v39 = vshll.u32 %v1958_v21, 16  ;;  %v1963_v7 = vcombine.low %v902_v26, %v916_v6  ;;  %v955_v14 = vshll.u32 %v2604_v23, 16  ;;  %v1974_v19 = vld [vmem:[%s2373_s6 + $0x28] sm:$0xe] }
  0x3b   : > { %v925_v45 = vrot.slane %v924_v31, 4  ;;  %v948_v49 = vrot.slane %v946_v33, 4  ;;  %v943_v36 = vrot.slane %v941_v37, 5  ;;  %v960_v32 = vshrl.u32 %v1960_v29, 16  ;;  %v1975_v25 = vld [vmem:[%s2373_s6 + $0x30] sm:$0xe] }
  0x3c   : > { %v938_v15 = vor.u32 %v937_v38, %v934_v10  ;;  %v951_v27 = vrot.slane %v949_v39, 5  ;;  %v963_v44 = vshll.u32 %v1960_v29, 16  ;;  %v969_v50 = vshll.u32 %v2619_v43, 16  ;;  %v1976_v22 = vld [vmem:[%s2373_s6 + $0x38] sm:$0xe] }
  0x3d   : > { %v930_v53 = vsel %vm2430_vm4, %v925_v45, %v929_v35  ;;  %v1978_v4 = vrot.slane %v1970_v63, 9  ;;  %v962_v24 = vrot.slane %v960_v32, 4  ;;  %v1100_v57 = vrot.slane %v2531_v62, 5  ;;  %v1977_v60 = vld [vmem:[%s2373_s6 + $0x40] sm:$0xe] }
  0x3e   : > { %2143 = vmatmul.mubr.msk.bf16.gmra.mxu1 %vm385_vm3, %v1909_v30  ;;  %v939_v55 = vrot.slane %v938_v15, 4  ;;  %v952_v16 = vor.u32 %v951_v27, %v948_v49  ;;  %v957_v58 = vrot.slane %v955_v14, 5  ;;  %v965_v61 = vrot.slane %v963_v44, 5  ;;  %v2261_v29 = vld [vmem:[%s2373_s6 + $0x10] ss:$8 sps:$4 sm:$0xff]  }
  0x3f   : > { %2158 = vmatprep.mubr.msk.bf16.mxu1 %vm385_vm3, %v2257_v40  ;;  %v1979_v48 = vrot.slane %v1971_v52, 9  ;;  %v1104_v0 = vrot.slane %v2544_v1, 5  ;;  %v971_v56 = vrot.slane %v969_v50, 5  ;;  %v2649_v1 = vsel %vm2498_vm7, %v1978_v4, %v1100_v57  ;;  %v2010_v40 = vld [vmem:[%s2373_s6 + $0x10] sm:$0xf] }
  0x40   : > { %v944_v34 = vsel %vm2430_vm4, %v939_v55, %v943_v36  ;;  %v953_v62 = vrot.slane %v952_v16, 4  ;;  %2169 = vmatmul.mubr.msk.bf16.vlgmr.msra.gmra.mxu0 %vm385_vm3, %v1963_v7  ;;  %v966_v18 = vor.u32 %v965_v61, %v962_v24  ;;  %v1980_v46 = vrot.slane %v1972_v11, 9  ;;  %v2011_v7 = vld [vmem:[%s2373_s6 + $0x14] sm:$0x1]  ;;  %v2013_v49 = vld [vmem:[%s2373_s6 + $0x1c] sm:$0x1] }
  0x41   : > { %v1964_v9 = vcombine.low %v930_v53, %v944_v34  ;;  %2187 = vmatpush3.bf16.msra.mxu0 %v2389_v13  ;;  %v2653_v21 = vsel %vm2498_vm7, %v1979_v48, %v1104_v0  ;;  %v2656_v51 = vsel %vm398_vm0, %v1477_v54, 0  ;;  %v1108_v35 = vrot.slane %v2551_v28, 5  ;;  %v2034_v32 = vld [vmem:[%s2373_s6 + $0x10] sm:$0xe]  ;;  %v2035_v50 = vld [vmem:[%s2373_s6 + $0x18] sm:$0xe] }
  0x42   : > { %v958_v5 = vsel %vm2430_vm4, %v953_v62, %v957_v58  ;;  %v967_v13 = vrot.slane %v966_v18, 4  ;;  %v1981_v10 = vrot.slane %v1973_v59, 9  ;;  %2227 = vmatprep.subr.msk.bf16.mxu0 %vm398_vm0, %v1634_v17  ;;  %v1112_v26 = vrot.slane %v2568_v42, 5  ;;  %v2260_v4 = vld [vmem:[%s2373_s6 + $0x38] ss:$8 sps:$4 sm:$0xff]  }
  0x43   : > { %2172 = vmatprep.mubr.msk.bf16.mxu0 %vm385_vm3, %v1964_v9  ;;  %v2669_v31 = vsel %vm398_vm0, %v1634_v17, 0  ;;  %v1982_v37 = vrot.slane %v1974_v19, 9  ;;  %v1116_v33 = vrot.slane %v2577_v47, 5  ;;  %v1983_v28 = vrot.slane %v1975_v25, 9  ;;  %v2014_v57 = vld [vmem:[%s2373_s6 + $0x20] sm:$0xf] }
  0x44   : > { %v972_v30 = vsel %vm2430_vm4, %v967_v13, %v971_v56  ;;  %v1120_v6 = vrot.slane %v2594_v3, 5  ;;  %v1984_v38 = vrot.slane %v1976_v22, 9  ;;  %v1124_v42 = vrot.slane %v2604_v23, 5  ;;  %v2012_v23 = vld [vmem:[%s2373_s6 + $0x18] sm:$0xf] }
  0x45   : > { %v1965_v39 = vcombine.low %v958_v5, %v972_v30  ;;  %v1985_v63 = vrot.slane %v1977_v60, 9  ;;  %v1986_v47 = vcombine.low %v2649_v1, %v2653_v21  ;;  %v2685_v3 = vsel %vm2498_vm7, %v1980_v46, %v1108_v35  ;;  %v2015_v0 = vld [vmem:[%s2373_s6 + $0x24] sm:$0x1]  ;;  %v2016_v62 = vld [vmem:[%s2373_s6 + $0x28] sm:$0xf] }
  0x46   : > { %2159 = vmatmul.mubr.msk.bf16.vlgmr.msra.gmra.mxu1 %vm385_vm3, %v2258_v8  ;;  %v1128_v45 = vrot.slane %v2619_v43, 5  ;;  %v1366_v14 = vshrl.u32 %v2010_v40, 16  ;;  %v1369_v15 = vshll.u32 %v2010_v40, 16  ;;  %v1380_v36 = vshrl.u32 %v2012_v23, 16  ;;  %v2262_v59 = vld [vmem:[%s2373_s6 + $0x20] ss:$8 sps:$4 sm:$0xff]  }
  0x47   : > { %2177 = vmatpush3.bf16.msra.mxu1 %v2385_v12  ;;  %2162 = vmatprep.mubr.msk.bf16.mxu1 %vm385_vm3, %v2259_v2  ;;  %v2693_v12 = vsel %vm2498_vm7, %v1981_v10, %v1112_v26  ;;  %v1383_v27 = vshll.u32 %v2012_v23, 16  ;;  %v2699_v43 = vsel %vm2498_vm7, %v1982_v37, %v1116_v33  ;;  %v1375_v53 = vshll.u32 %v2011_v7, 16  ;;  %v2263_v1 = vld [vmem:[%s2373_s6 + $0x30] ss:$8 sps:$4 sm:$0xff]   ;;  %v2036_v60 = vld [vmem:[%s2373_s6 + $0x20] sm:$0xe] }
  0x48   : > { %2226 = vmatprep.subr.msk.bf16.mxu1 %vm398_vm0, %v1477_v54  ;;  %2173 = vmatmul.mubr.msk.bf16.gmra.mxu0 %vm385_vm3, %v1965_v39  ;;  %v1368_v52 = vrot.slane %v1366_v14, 4  ;;  %v1389_v44 = vshll.u32 %v2013_v49, 16  ;;  %v2706_v54 = vsel %vm2498_vm7, %v1983_v28, %v1120_v6  ;;  %v2710_v55 = vsel %vm2498_vm7, %v1984_v38, %v1124_v42  ;;  %v2017_v30 = vld [vmem:[%s2373_s6 + $0x2c] sm:$0x1]  ;;  %v2018_v6 = vld [vmem:[%s2373_s6 + $0x30] sm:$0xf] }
  0x49   : > { %2188 = vmatprep.mubr.msk.bf16.mxu0 %vm385_vm3, %v2261_v29  ;;  %v1371_v16 = vrot.slane %v1369_v15, 5  ;;  %v1382_v24 = vrot.slane %v1380_v36, 4  ;;  %v2715_v17 = vsel %vm2498_vm7, %v1985_v63, %v1128_v45  ;;  %v1385_v58 = vrot.slane %v1383_v27, 5  ;;  %v2037_v29 = vld [vmem:[%s2373_s6 + $0x28] sm:$0xe] }
  0x4a   : > { %v2042_v61 = vrot.slane %v2034_v32, 9  ;;  %v1604_v48 = vrot.slane %v2011_v7, 5  ;;  %v2043_v8 = vrot.slane %v2035_v50, 9  ;;  %v1608_v34 = vrot.slane %v2013_v49, 5  ;;  %v2020_v40 = vld [vmem:[%s2373_s6 + $0x38] sm:$0xf] }
  0x4b   : > { %v1372_v11 = vor.u32 %v1371_v16, %v1368_v52  ;;  %v1394_v56 = vshrl.u32 %v2014_v57, 16  ;;  %v1377_v2 = vrot.slane %v1375_v53, 5  ;;  %v1386_v9 = vor.u32 %v1385_v58, %v1382_v24  ;;  %v2264_v23 = vld [vmem:[%s2373_s6 + $0x40] ss:$8 sps:$4 sm:$0xff]   ;;  %v2019_v15 = vld [vmem:[%s2373_s6 + $0x34] sm:$0x1] }
  0x4c   : > { %v1391_v18 = vrot.slane %v1389_v44, 5  ;;  %v1397_v19 = vshll.u32 %v2014_v57, 16  ;;  %v1403_v25 = vshll.u32 %v2015_v0, 16  ;;  %v1408_v22 = vshrl.u32 %v2016_v62, 16  ;;  %v2038_v53 = vld [vmem:[%s2373_s6 + $0x30] sm:$0xe] }
  0x4d   : > { %v1373_v21 = vrot.slane %v1372_v11, 4  ;;  %v1396_v46 = vrot.slane %v1394_v56, 4  ;;  %v1987_v5 = vcombine.low %v2685_v3, %v2693_v12  ;;  %v1988_v13 = vcombine.low %v2699_v43, %v2706_v54  ;;  %v2021_v43 = vld [vmem:[%s2373_s6 + $0x3c] sm:$0x1]  ;;  %v2039_v16 = vld [vmem:[%s2373_s6 + $0x38] sm:$0xe] }
  0x4e   : > { %2163 = vmatmul.mubr.msk.bf16.gmra.mxu1 %vm385_vm3, %v2260_v4  ;;  %v1387_v35 = vrot.slane %v1386_v9, 4  ;;  %v1399_v10 = vrot.slane %v1397_v19, 5  ;;  %v1989_v26 = vcombine.low %v2710_v55, %v2715_v17  ;;  %v1605_v37 = vsel %vm2498_vm7, %v2042_v61, %v1604_v48  ;;  %v2024_v9 = vld [vmem:[%s2373_s6 + $0x48] sm:$0xf] }
  0x4f   : > { %2178 = vmatprep.mubr.msk.bf16.mxu1 %vm385_vm3, %v1986_v47  ;;  %v1609_v33 = vsel %vm2498_vm7, %v2043_v8, %v1608_v34  ;;  %v1411_v28 = vshll.u32 %v2016_v62, 16  ;;  %v1378_v38 = vsel %vm2430_vm4, %v1373_v21, %v1377_v2  ;;  %v1410_v63 = vrot.slane %v1408_v22, 4  ;;  %v2022_v34 = vld [vmem:[%s2373_s6 + $0x40] sm:$0xf] }
  0x50   : > { %2189 = vmatmul.mubr.msk.bf16.vlgmr.msra.gmra.mxu0 %vm385_vm3, %v2262_v59  ;;  %v1392_v39 = vsel %vm2430_vm4, %v1387_v35, %v1391_v18  ;;  %v1400_v42 = vor.u32 %v1399_v10, %v1396_v46  ;;  %v2044_v47 = vrot.slane %v2036_v60, 9  ;;  %v1612_v3 = vrot.slane %v2015_v0, 5  ;;  %v2025_v60 = vld [vmem:[%s2373_s6 + $0x4c] sm:$0x1] }
  0x51   : > { %2207 = vmatpush3.bf16.msra.mxu0 %v2669_v31  ;;  %2192 = vmatprep.mubr.msk.bf16.mxu0 %vm385_vm3, %v2263_v1  ;;  %v1413_v7 = vrot.slane %v1411_v28, 5  ;;  %v2045_v45 = vrot.slane %v2037_v29, 9  ;;  %v2746_v49 = vrot.slane %v1403_v25, 5  ;;  %v1417_v14 = vshll.u32 %v2017_v30, 16  ;;  %v2023_v25 = vld [vmem:[%s2373_s6 + $0x44] sm:$0x1] }
  0x52   : > { %v1616_v12 = vrot.slane %v2017_v30, 5  ;;  %v1422_v36 = vshrl.u32 %v2018_v6, 16  ;;  %v2026_v27 = vcombine.low %v1378_v38, %v1392_v39  ;;  %v2050_v32 = vcombine.low %v1605_v37, %v1609_v33  ;;  %v2040_v37 = vld [vmem:[%s2373_s6 + $0x40] sm:$0xe]  ;;  %v2041_v38 = vld [vmem:[%s2373_s6 + $0x48] sm:$0xe] }
  0x53   : > { %v1425_v52 = vshll.u32 %v2018_v6, 16  ;;  %v1436_v31 = vshrl.u32 %v2020_v40, 16  ;;  %v2751_v44 = vrot.slane %v1400_v42, 4  ;;  %v1414_v50 = vor.u32 %v1413_v7, %v1410_v63 }
  0x54   : > { %v1424_v4 = vrot.slane %v1422_v36, 4  ;;  %v1439_v54 = vshll.u32 %v2020_v40, 16  ;;  %v1613_v24 = vsel %vm2498_vm7, %v2044_v47, %v1612_v3  ;;  %v1617_v57 = vsel %vm2498_vm7, %v2045_v45, %v1616_v12 }
  0x55   : > { %v1427_v58 = vrot.slane %v1425_v52, 5  ;;  %v1431_v61 = vshll.u32 %v2019_v15, 16  ;;  %v1438_v48 = vrot.slane %v1436_v31, 4  ;;  %v1445_v11 = vshll.u32 %v2021_v43, 16 }
  0x56   : > { %2179 = vmatmul.mubr.msk.bf16.vlgmr.msra.gmra.mxu1 %vm385_vm3, %v1987_v5  ;;  %v1441_v0 = vrot.slane %v1439_v54, 5  ;;  %v2046_v8 = vrot.slane %v2038_v53, 9  ;;  %v1419_v62 = vrot.slane %v1417_v14, 5  ;;  %v1620_v59 = vrot.slane %v2019_v15, 5 }
  0x57   : > { %2197 = vmatpush3.bf16.msra.mxu1 %v2656_v51  ;;  %2182 = vmatprep.mubr.msk.bf16.mxu1 %vm385_vm3, %v1988_v13  ;;  %v1428_v56 = vor.u32 %v1427_v58, %v1424_v4  ;;  %v2047_v2 = vrot.slane %v2039_v16, 9  ;;  %v1406_v51 = vsel %vm2430_vm4, %v2751_v44, %v2746_v49  ;;  %v1415_v18 = vrot.slane %v1414_v50, 4 }
  0x58   : > { %2193 = vmatmul.mubr.msk.bf16.gmra.mxu0 %vm385_vm3, %v2264_v23  ;;  %v1442_v19 = vor.u32 %v1441_v0, %v1438_v48  ;;  %v1624_v1 = vrot.slane %v2021_v43, 5  ;;  %v2051_v21 = vcombine.low %v1613_v24, %v1617_v57  ;;  %v1433_v46 = vrot.slane %v1431_v61, 5 }
  0x59   : > { %2208 = vmatprep.mubr.msk.bf16.mxu0 %vm385_vm3, %v2050_v32  ;;  %v1450_v22 = vshrl.u32 %v2022_v34, 16  ;;  %v1453_v5 = vshll.u32 %v2022_v34, 16  ;;  %v1447_v13 = vrot.slane %v1445_v11, 5  ;;  %v1621_v35 = vsel %vm2498_vm7, %v2046_v8, %v1620_v59 }
  0x5a   : > { %v1625_v10 = vsel %vm2498_vm7, %v2047_v2, %v1624_v1  ;;  %v1464_v29 = vshrl.u32 %v2024_v9, 16  ;;  %v1429_v33 = vrot.slane %v1428_v56, 4  ;;  %v1443_v30 = vrot.slane %v1442_v19, 4 }
  0x5b   : > { %v1452_v28 = vrot.slane %v1450_v22, 4  ;;  %v1455_v6 = vrot.slane %v1453_v5, 5  ;;  %v1420_v39 = vsel %vm2430_vm4, %v1415_v18, %v1419_v62  ;;  %v1459_v42 = vshll.u32 %v2023_v25, 16 }
  0x5c   : > { %v1466_v63 = vrot.slane %v1464_v29, 4  ;;  %v1467_v40 = vshll.u32 %v2024_v9, 16  ;;  %v2052_v7 = vcombine.low %v1621_v35, %v1625_v10  ;;  %v1473_v3 = vshll.u32 %v2025_v60, 16 }
  0x5d   : > { %v1456_v47 = vor.u32 %v1455_v6, %v1452_v28  ;;  %v2048_v45 = vrot.slane %v2040_v37, 9  ;;  %v1628_v49 = vrot.slane %v2023_v25, 5  ;;  %v2049_v14 = vrot.slane %v2041_v38, 9 }
  0x5e   : > { %2183 = vmatmul.mubr.msk.bf16.gmra.mxu1 %vm385_vm3, %v1989_v26  ;;  %v1469_v23 = vrot.slane %v1467_v40, 5  ;;  %v1632_v12 = vrot.slane %v2025_v60, 5  ;;  %v1434_v15 = vsel %vm2430_vm4, %v1429_v33, %v1433_v46  ;;  %v1448_v36 = vsel %vm2430_vm4, %v1443_v30, %v1447_v13 }
  0x5f   : > { %2198 = vmatprep.mubr.msk.bf16.mxu1 %vm385_vm3, %v2026_v27  ;;  %v2027_v17 = vcombine.low %v1406_v51, %v1420_v39  ;;  %v1461_v26 = vrot.slane %v1459_v42, 5  ;;  %v1629_v27 = vsel %vm2498_vm7, %v2048_v45, %v1628_v49  ;;  %v2028_v43 = vcombine.low %v1434_v15, %v1448_v36 }
  0x60   : > { %2209 = vmatmul.mubr.msk.bf16.vlgmr.msra.gmra.mxu0 %vm385_vm3, %v2051_v21  ;;  %v1470_v55 = vor.u32 %v1469_v23, %v1466_v63  ;;  %v1633_v32 = vsel %vm2498_vm7, %v2049_v14, %v1632_v12  ;;  %v1457_v52 = vrot.slane %v1456_v47, 4  ;;  %v1475_v53 = vrot.slane %v1473_v3, 5 }
  0x61   : > { %2212 = vmatprep.mubr.msk.bf16.mxu0 %vm385_vm3, %v2052_v7  ;;  %v2053_v44 = vcombine.low %v1629_v27, %v1633_v32  ;;  %vm1767_vm8 = vcmask 60416  }
  0x62   : > { %v1471_v31 = vrot.slane %v1470_v55, 4  ;;  %v1462_v50 = vsel %vm2430_vm4, %v1457_v52, %v1461_v26 }
  0x64   : > { %v1476_v4 = vsel %vm2430_vm4, %v1471_v31, %v1475_v53 }
  0x65   : > { %v2029_v54 = vcombine.low %v1462_v50, %v1476_v4 }
  0x66   : > { %2199 = vmatmul.mubr.msk.bf16.vlgmr.msra.gmra.mxu1 %vm385_vm3, %v2027_v17 }
  0x67   : > { %2202 = vmatprep.mubr.msk.bf16.mxu1 %vm385_vm3, %v2028_v43 }
  0x68   : > { %2213 = vmatmul.mubr.msk.bf16.gmra.mxu0 %vm385_vm3, %v2053_v44 }
  0x6e   : > { %2203 = vmatmul.mubr.msk.bf16.gmra.mxu1 %vm385_vm3, %v2029_v54 }
  0xe8   : > { %v2130_v20 = vpop.f32.mrf.mxu0 }
  0xea   : > { %v436_v16 = vpop.f32.mrf.mxu0 }
  0xec   : > { %v2131_v24 = vpop.f32.mrf.mxu0 }
  0xee   : > { %v2134_v57 = vpop.f32.mrf.mxu1  ;;  %v439_v58 = vpop.f32.mrf.mxu0 }
  0xf0   : > { %v452_v61 = vpop.f32.mrf.mxu1  ;;  %v2150_v48 = vpop.f32.mrf.mxu0 }
  0xf2   : > { %v2135_v0 = vpop.f32.mrf.mxu1  ;;  %v688_v11 = vpop.f32.mrf.mxu0 }
  0xf4   : > { %v2802_v8 = vpop.f32.mrf.mxu1  ;;  %v2151_v34 = vpop.f32.mrf.mxu0 }
  0xf6   : > { %v2140_v62 = vpop.f32.mrf.mxu1  ;;  %v691_v41 = vpop.f32.mrf.mxu0 }
  0xf7   : > { %v545_v47 = vadd.f32 %v2140_v62, %v2130_v20 }
  0xf8   : > { %v536_v56 = vpop.f32.mrf.mxu1  ;;  %v2154_v59 = vpop.f32.mrf.mxu0 }
  0xf9   : > { %v537_v23 = vadd.f32 %v536_v56, %v436_v16  ;;  %v721_v12 = vadd.f32 %v2150_v48, %v545_v47 }
  0xfa   : > { %v2141_v2 = vpop.f32.mrf.mxu1  ;;  %v704_v9 = vpop.f32.mrf.mxu0 }
  0xfb   : > { %v548_v15 = vadd.f32 %v2141_v2, %v2131_v24  ;;  %v719_v17 = vadd.f32 %v688_v11, %v537_v23 }
  0xfc   : > { %v539_v51 = vpop.f32.mrf.mxu1  ;;  %v2804_v18 = vpop.f32.mrf.mxu0 }
  0xfd   : > { %v540_v26 = vadd.f32 %v539_v51, %v439_v58  ;;  %v722_v31 = vadd.f32 %v2151_v34, %v548_v15 }
  0xfe   : > { %v2144_v19 = vpop.f32.mrf.mxu1  ;;  %v2806_v1 = vpop.f32.mrf.mxu0 }
  0xff   : > { %v561_v43 = vadd.f32 %v2144_v19, %v2134_v57  ;;  %v720_v54 = vadd.f32 %v691_v41, %v540_v26 }
 0x100   : > { %v552_v21 = vpop.f32.mrf.mxu1  ;;  %v2170_v46 = vpop.f32.mrf.mxu0 }
 0x101   : > { %v553_v50 = vadd.f32 %v552_v21, %v452_v61  ;;  %v725_v48 = vadd.f32 %v2154_v59, %v561_v43 }
 0x102   : > { %v2145_v25 = vpop.f32.mrf.mxu1  ;;  %v1035_v22 = vpop.f32.mrf.mxu0 }
 0x103   : > { %v564_v58 = vadd.f32 %v2145_v25, %v2135_v0  ;;  %v723_v34 = vadd.f32 %v704_v9, %v553_v50 }
 0x104   : > { %v555_v5 = vpop.f32.mrf.mxu1  ;;  %v2171_v13 = vpop.f32.mrf.mxu0 }
 0x105   : > { %v556_v41 = vadd.f32 %v555_v5, %v2802_v8  ;;  %v726_v21 = vadd.f32 %v2804_v18, %v564_v58  ;;  %v2063_v5 = vld [vmem:[%s2830_s18] sm:$0xff]  }
 0x106   : > { %v2160_v35 = vpop.f32.mrf.mxu1  ;;  %v1038_v10 = vpop.f32.mrf.mxu0 }
 0x107   : > { %v839_v27 = vadd.f32 %v2160_v35, %v721_v12  ;;  %v724_v47 = vadd.f32 %v2806_v1, %v556_v41  ;;  %v2064_v1 = vunpack.c.l.bf16 %v2063_v5 }
 0x108   : > { %v806_v60 = vpop.f32.mrf.mxu1  ;;  %v2174_v29 = vpop.f32.mrf.mxu0 }
 0x109   : > { %v837_v53 = vadd.f32 %v806_v60, %v719_v17  ;;  %v1068_v20 = vadd.f32 %v2170_v46, %v839_v27 }
 0x10a   : > { %v2161_v37 = vpop.f32.mrf.mxu1  ;;  %v2808_v33 = vpop.f32.mrf.mxu0 }
 0x10b   : > { %v840_v16 = vadd.f32 %v2161_v37, %v722_v31  ;;  %v1066_v62 = vadd.f32 %v1035_v22, %v837_v53  ;;  %v2078_v22 = vld [vmem:[%s2830_s18 + $0x8] sm:$0xff]   ;;  %v2080_v31 = vld [vmem:[%s2830_s18 + $0x18] sm:$0xff]  }
 0x10c   : > { %v809_v30 = vpop.f32.mrf.mxu1  ;;  %v2810_v28 = vpop.f32.mrf.mxu0  ;;  %v2069_v26 = vunpack.c.h.bf16 %v2078_v22 }
 0x10d   : > { %v838_v56 = vadd.f32 %v809_v30, %v720_v54  ;;  %v1069_v59 = vadd.f32 %v2171_v13, %v840_v16 }
 0x10e   : > { %v2164_v6 = vpop.f32.mrf.mxu1  ;;  %v2812_v38 = vpop.f32.mrf.mxu0 }
 0x10f   : > { %v843_v2 = vadd.f32 %v2164_v6, %v725_v48  ;;  %v1067_v35 = vadd.f32 %v1038_v10, %v838_v56  ;;  %v2079_v48 = vld [vmem:[%s2830_s18 + $0x10] sm:$0xff]  }
 0x110   : > { %v822_v39 = vpop.f32.mrf.mxu1  ;;  %v2190_v42 = vpop.f32.mrf.mxu0 }
 0x111   : > { %v841_v46 = vadd.f32 %v822_v39, %v723_v34  ;;  %v1072_v9 = vadd.f32 %v2174_v29, %v843_v2 }
 0x112   : > { %v2165_v63 = vpop.f32.mrf.mxu1  ;;  %v1310_v40 = vpop.f32.mrf.mxu0 }
 0x113   : > { %v1070_v18 = vadd.f32 %v2808_v33, %v841_v46 }
 0x114   : > { %v825_v7 = vpop.f32.mrf.mxu1  ;;  %v2191_v3 = vpop.f32.mrf.mxu0 }
 0x115   : > { %v842_v39 = vadd.f32 %v825_v7, %v724_v47  ;;  %v2073_v47 = vunpack.c.h.bf16 %v2079_v48 }
 0x116   : > { %v2180_v45 = vpop.f32.mrf.mxu1  ;;  %v2814_v49 = vpop.f32.mrf.mxu0 }
 0x117   : > { %v1225_v57 = vadd.f32 %v2180_v45, %v1068_v20  ;;  %v844_v45 = vadd.f32 %v2165_v63, %v726_v21 }
 0x118   : > { %v1192_v14 = vpop.f32.mrf.mxu1  ;;  %v2816_v36 = vpop.f32.mrf.mxu0 }
 0x119   : > { %v1223_v0 = vadd.f32 %v1192_v14, %v1066_v62  ;;  %v1343_v60 = vadd.f32 %v2190_v42, %v1225_v57  ;;  %v2068_v14 = vunpack.c.l.bf16 %v2078_v22  ;;  %v1073_v29 = vadd.f32 %v2810_v28, %v844_v45 }
 0x11a   : > { %v2181_v55 = vpop.f32.mrf.mxu1  ;;  %v2818_v32 = vpop.f32.mrf.mxu0  ;;  %v2077_v22 = vunpack.c.h.bf16 %v2080_v31 }
 0x11b   : > { %v1226_v37 = vadd.f32 %v2181_v55, %v1069_v59  ;;  %v1341_v6 = vadd.f32 %v1310_v40, %v1223_v0 }
 0x11c   : > { %v1195_v52 = vpop.f32.mrf.mxu1  ;;  %v2820_v44 = vpop.f32.mrf.mxu0 }
 0x11d   : > { %v1224_v23 = vadd.f32 %v1195_v52, %v1067_v35  ;;  %v1344_v42 = vadd.f32 %v2191_v3, %v1226_v37  ;;  %v1071_v3 = vadd.f32 %v2812_v38, %v842_v39 }
 0x11e   : > { %v2184_v4 = vpop.f32.mrf.mxu1  ;;  %v2823_v24 = vpop.f32.mrf.mxu0 }
 0x11f   : > { %v1229_v15 = vadd.f32 %v2184_v4, %v1072_v9  ;;  %v1342_v43 = vadd.f32 %v2814_v49, %v1224_v23  ;;  %v2065_v4 = vunpack.c.h.bf16 %v2063_v5 }
 0x120   : > { %v1208_v11 = vpop.f32.mrf.mxu1  ;;  %v2210_v61 = vpop.f32.mrf.mxu0 }
 0x121   : > { %v1227_v63 = vadd.f32 %v1208_v11, %v1070_v18  ;;  %v1347_v53 = vadd.f32 %v2816_v36, %v1229_v15  ;;  %v2076_v11 = vunpack.c.l.bf16 %v2080_v31 }
 0x122   : > { %v2185_v51 = vpop.f32.mrf.mxu1  ;;  %v1696_v19 = vpop.f32.mrf.mxu0 }
 0x123   : > { %v1230_v50 = vadd.f32 %v2185_v51, %v1073_v29  ;;  %v1345_v38 = vadd.f32 %v2818_v32, %v1227_v63  ;;  %v2072_v51 = vunpack.c.l.bf16 %v2079_v48 }
 0x124   : > { %v1211_v25 = vpop.f32.mrf.mxu1  ;;  %v2211_v30 = vpop.f32.mrf.mxu0 }
 0x125   : > { %v1228_v58 = vadd.f32 %v1211_v25, %v1071_v3  ;;  %v1348_v41 = vadd.f32 %v2820_v44, %v1230_v50 }
 0x126   : > { %v2200_v8 = vpop.f32.mrf.mxu1  ;;  %v1699_v12 = vpop.f32.mrf.mxu0 }
 0x127   : > { %v1572_v13 = vadd.f32 %v2200_v8, %v1343_v60  ;;  %v1346_v21 = vadd.f32 %v2823_v24, %v1228_v58 }
 0x128   : > { %v1539_v10 = vpop.f32.mrf.mxu1  ;;  %v2214_v27 = vpop.f32.mrf.mxu0 }
 0x129   : > { %v1729_v55 = vadd.f32 %v2210_v61, %v1572_v13  ;;  %v1570_v17 = vadd.f32 %v1539_v10, %v1341_v6 }
 0x12a   : > { %v2201_v40 = vpop.f32.mrf.mxu1  ;;  %v1712_v62 = vpop.f32.mrf.mxu0 }
 0x12b   : > { %v1753_v33 = vadd.f32 %v2068_v14, %v1729_v55  ;;  %v1727_v7 = vadd.f32 %v1696_v19, %v1570_v17  ;;  %v1573_v52 = vadd.f32 %v2201_v40, %v1344_v42 }
 0x12c   : > { %v1542_v28 = vpop.f32.mrf.mxu1  ;;  %v2215_v25 = vpop.f32.mrf.mxu0 }
 0x12d   : > { %v1761_v54 = vpack.c.bf16 %v1753_v33, %v1753_v33  ;;  %v1751_v49 = vadd.f32 %v2064_v1, %v1727_v7  ;;  %v1730_v20 = vadd.f32 %v2211_v30, %v1573_v52  ;;  %v1571_v16 = vadd.f32 %v1542_v28, %v1342_v43 }
 0x12e   : > { %v2204_v36 = vpop.f32.mrf.mxu1  ;;  %v1715_v5 = vpop.f32.mrf.mxu0 }
 0x12f   : > { %1770 = vst.msk [vmem:[%s2848_s21 + $0x8] sm:$0xf] %vm1767_vm8, %v1761_v54  ;;  %v1759_v56 = vpack.c.bf16 %v1751_v49, %v1751_v49  ;;  %v1754_v57 = vadd.f32 %v2069_v26, %v1730_v20  ;;  %v1728_v61 = vadd.f32 %v1699_v12, %v1571_v16  ;;  %v1576_v34 = vadd.f32 %v2204_v36, %v1347_v53 }
 0x130   : > { %v1555_v2 = vpop.f32.mrf.mxu1 }
 0x131   : > { %1768 = vst.msk [vmem:[%s2848_s21] sm:$0xf] %vm1767_vm8, %v1759_v56  ;;  %v1762_v59 = vpack.c.bf16 %v1754_v57, %v1754_v57  ;;  %v1752_v32 = vadd.f32 %v2065_v4, %v1728_v61  ;;  %v1733_v0 = vadd.f32 %v2214_v27, %v1576_v34  ;;  %v1574_v19 = vadd.f32 %v1555_v2, %v1345_v38 }
 0x132   : > { %v2205_v46 = vpop.f32.mrf.mxu1 }
 0x133   : > { %1771 = vst.msk [vmem:[%s2848_s21 + $0xc] sm:$0xf] %vm1767_vm8, %v1762_v59  ;;  %v1760_v35 = vpack.c.bf16 %v1752_v32, %v1752_v32  ;;  %v1757_v44 = vadd.f32 %v2076_v11, %v1733_v0  ;;  %v1731_v60 = vadd.f32 %v1712_v62, %v1574_v19  ;;  %v1577_v37 = vadd.f32 %v2205_v46, %v1348_v41 }
 0x134   : > { %v1558_v30 = vpop.f32.mrf.mxu1 }
 0x135   : > { %1769 = vst.msk [vmem:[%s2848_s21 + $0x4] sm:$0xf] %vm1767_vm8, %v1760_v35  ;;  %v1765_v9 = vpack.c.bf16 %v1757_v44, %v1757_v44  ;;  %v1755_v45 = vadd.f32 %v2072_v51, %v1731_v60  ;;  %v1734_v24 = vadd.f32 %v2215_v25, %v1577_v37  ;;  %v1575_v8 = vadd.f32 %v1558_v30, %v1346_v21 }
 0x137   : > { %1774 = vst.msk [vmem:[%s2848_s21 + $0x18] sm:$0xf] %vm1767_vm8, %v1765_v9  ;;  %v1763_v6 = vpack.c.bf16 %v1755_v45, %v1755_v45  ;;  %v1758_v23 = vadd.f32 %v2077_v22, %v1734_v24  ;;  %v1732_v13 = vadd.f32 %v1715_v5, %v1575_v8 }
 0x139   : > { %1772 = vst.msk [vmem:[%s2848_s21 + $0x10] sm:$0xf] %vm1767_vm8, %v1763_v6  ;;  %v1766_v14 = vpack.c.bf16 %v1758_v23, %v1758_v23  ;;  %v1756_v12 = vadd.f32 %v2073_v47, %v1732_v13 }
 0x13b   : > { %1775 = vst.msk [vmem:[%s2848_s21 + $0x1c] sm:$0xf] %vm1767_vm8, %v1766_v14  ;;  %v1764_v18 = vpack.c.bf16 %v1756_v12, %v1756_v12 }
 0x13d   : > { %1773 = vst.msk [vmem:[%s2848_s21 + $0x14] sm:$0xf] %vm1767_vm8, %v1764_v18 }
 0x13e PF: > { %s13_s14 = sadd.s32 1, %s2287_s14   ;;  %s2887_s12 = smov %s2283_s13 }
 0x13f   : > { %p10_p5 = scmp.ge.s32.totalorder %s13_s14, 4   ;;  %s2888_s13 = smov %s2890_s15 }
 0x141   :  { %12 = sbr.rel (!%p10_p5) target bundleno = 2 (0x2), region = 70 }

// kernel: zhugo_forward.19
= control target key start
LH: loop header
LB: loop body
LE: loop exit
PB: predicated region body
PF: predicated region fallthrough
CT: control target
= control target key end

     0   :  { %s2182_s9 = smov 0   ;;  %s2184_s10 = smov 0   ;;  %s2739_s0 = inlined_call_operand.vmem [shape: bf16[2,10,10,8], index: 0, kind: input, shape index: {}]   ;;  %s2740_s1 = inlined_call_operand.vmem [shape: bf16[72,8], index: 1, kind: input, shape index: {}]   ;;  %s2741_s2 = inlined_call_operand.vmem [shape: bf16[2,8,8,8], index: 2, kind: output, shape index: {}]  }
   0x1   :  { %s2186_s11 = smov 0  }
   0x2 LB: > { %s24_s12 = sadd.s32 1, %s2161_s10  ;;  %p1792_p0 = scmp.ge.s32.totalorder %s2165_s11, 1  ;;  %s2165_s11 = sphi %s2186_s11, %s12_s11   ;;  %s2161_s10 = sphi %s2184_s10, %s2747_s10   ;;  %s2157_s9 = sphi %s2182_s9, %s2746_s9  }
   0x3   : > { %p26_p1 = scmp.ge.s32.totalorder %s24_s12, 2  ;;  %p135_p2 = scmp.lt.s32.totalorder %s2165_s11, 3 }
   0x5   : > { %s2749_s12 = smov (%p26_p1, %s24_s12), 0  ;;  %p136_p3 = pnand %p1792_p0, %p135_p2 }
   0x6   : > { %p164_p4 = scmp.lt.s32.totalorder (!%p136_p3), %s2157_s9, 1 }
   0x7   : > { %139 = sbr.rel (%p136_p3) target bundleno = 316 (0x13c), region = 28 }
   0xc   : > { %v314_v0 = vld [vmem:[%s2740_s1 + $0x4] sm:$0xf]  ;;  %vm340_vm0 = vcmask 1043456   ;;  %v190_v2 = vld [vmem:[%s2740_s1] sm:$0xf]  ;;  %s2751_s9 = smov (!%p164_p4, %s2157_s9), 1 }
   0xd   : > { %2097 = vmatprep.subr.msk.bf16.mxu1 %vm340_vm0, %v314_v0  ;;  %2096 = vmatprep.subr.msk.bf16.mxu0 %vm340_vm0, %v314_v0  ;;  %v342_v1 = vsel %vm340_vm0, %v314_v0, 0  ;;  %v568_v3 = vld [vmem:[%s2740_s1 + $0x8] sm:$0xf]  ;;  %v2219_v4 = vld [vmem:[%s2740_s1 + $0xc] sm:$0xf]  ;;  %s2106_s23 = smul.u32 80, %s2751_s9 }
   0xe   : > { %2095 = vmatpush3.bf16.msra.mxu1 %v342_v1  ;;  %2005 = vmatpush3.bf16.msra.mxu0 %v342_v1  ;;  %v2224_v5 = vld [vmem:[%s2740_s1 + $0x10] sm:$0xf]  ;;  %vm199_vm1 = vsmask.f32 3328  ;;  %v2230_v6 = vld [vmem:[%s2740_s1 + $0x14] sm:$0xf] }
   0xf   : > { %2098 = vmatprep.subr.msk.bf16.mxu1 %vm340_vm0, %v190_v2  ;;  %2099 = vmatprep.subr.msk.bf16.mxu0 %vm340_vm0, %v568_v3  ;;  %vm200_vm2 = vsmask.f32 7440  ;;  %v2233_v7 = vsel %vm340_vm0, %v190_v2, 0  ;;  %v2236_v8 = vsel %vm340_vm0, %v568_v3, 0  ;;  %v2241_v9 = vld [vmem:[%s2740_s1 + $0x18] sm:$0xf]  ;;  %s2246_s30 = scalar_lea.vmem %s2739_s0, %s2106_s23 }
  0x10   : > { %v2250_v10 = vsel %vm340_vm0, %v2219_v4, 0  ;;  %v2254_v11 = vsel %vm340_vm0, %v2224_v5, 0  ;;  %v2258_v12 = vsel %vm340_vm0, %v2230_v6, 0  ;;  %v2262_v13 = vsel %vm340_vm0, %v2241_v9, 0  ;;  %v2265_v14 = vld [vmem:[%s2246_s30] sm:$0xf]  ;;  %vm2303_vm4 = vmor %vm199_vm1, %vm200_vm2 }
  0x11   : > { %v2268_v15 = vld [vmem:[%s2246_s30 + $0x8] sm:$0xf]  ;;  %v2271_v16 = vld [vmem:[%s2246_s30 + $0x4] sm:$0x1]  ;;  %v2274_v17 = vld [vmem:[%s2246_s30 + $0xc] sm:$0x1] }
  0x12   : > { %v203_v18 = vshrl.u32 %v2265_v14, 16  ;;  %v206_v19 = vshll.u32 %v2265_v14, 16  ;;  %v212_v20 = vshll.u32 %v2271_v16, 16  ;;  %v217_v21 = vshrl.u32 %v2268_v15, 16  ;;  %v2285_v26 = vld [vmem:[%s2246_s30 + $0x20] sm:$0xf] }
  0x13   : > { %v220_v22 = vshll.u32 %v2268_v15, 16  ;;  %v226_v23 = vshll.u32 %v2274_v17, 16  ;;  %vm327_vm3 = vcmask 64512   ;;  %v538_v24 = vrot.slane %v2271_v16, 5  ;;  %v2288_v31 = vld [vmem:[%s2246_s30 + $0x28] sm:$0xf] }
  0x14   : > { %v542_v25 = vrot.slane %v2274_v17, 5  ;;  %v205_v27 = vrot.slane %v203_v18, 4  ;;  %v208_v28 = vrot.slane %v206_v19, 5  ;;  %v214_v29 = vrot.slane %v212_v20, 5  ;;  %v2291_v34 = vld [vmem:[%s2246_s30 + $0x24] sm:$0x1] }
  0x15   : > { %v219_v30 = vrot.slane %v217_v21, 4  ;;  %v222_v32 = vrot.slane %v220_v22, 5  ;;  %v228_v33 = vrot.slane %v226_v23, 5  ;;  %v2294_v35 = vld [vmem:[%s2246_s30 + $0x2c] sm:$0x1]  ;;  %v1804_v36 = vcombine.low %v2265_v14, %v2268_v15  ;;  %s1958_s7 = sshll.u32 %s2751_s9, 5 }
  0x16   : > { %v209_v37 = vor.u32 %v208_v28, %v205_v27  ;;  %v259_v38 = vshrl.u32 %v2285_v26, 16  ;;  %v262_v39 = vshll.u32 %v2285_v26, 16  ;;  %v268_v40 = vshll.u32 %v2291_v34, 16  ;;  %v2311_v46 = vld [vmem:[%s2246_s30 + $0x10] sm:$0xf]  ;;  %s2706_s14 = scalar_lea.vmem %s2741_s2, %s1958_s7 }
  0x17   : > { %v223_v42 = vor.u32 %v222_v32, %v219_v30  ;;  %v273_v43 = vshrl.u32 %v2288_v31, 16  ;;  %v276_v44 = vshll.u32 %v2288_v31, 16  ;;  %v282_v45 = vshll.u32 %v2294_v35, 16  ;;  %v2314_v51 = vld [vmem:[%s2246_s30 + $0x18] sm:$0xf] }
  0x18   : > { %v210_v47 = vrot.slane %v209_v37, 4  ;;  %v261_v48 = vrot.slane %v259_v38, 4  ;;  %v264_v49 = vrot.slane %v262_v39, 5  ;;  %v270_v50 = vrot.slane %v268_v40, 5  ;;  %v2317_v56 = vld [vmem:[%s2246_s30 + $0x14] sm:$0x1] }
  0x19   : > { %vm533_vm5 = vcmask 1042432   ;;  %vm534_vm6 = vcmask 1046532   ;;  %v224_v52 = vrot.slane %v223_v42, 4  ;;  %v275_v53 = vrot.slane %v273_v43, 4  ;;  %v2326_v63 = vld [vmem:[%s2246_s30 + $0x1c] sm:$0x1] }
  0x1a   : > { %v278_v54 = vrot.slane %v276_v44, 5  ;;  %v284_v55 = vrot.slane %v282_v45, 5  ;;  %v215_v57 = vsel %vm2303_vm4, %v210_v47, %v214_v29  ;;  %v265_v58 = vor.u32 %v264_v49, %v261_v48  ;;  %v2334_v27 = vld [vmem:[%s2246_s30 + $0x30] sm:$0xf]  ;;  %v2341_v32 = vld [vmem:[%s2246_s30 + $0x38] sm:$0xf]  ;;  %vm2371_vm7 = vmor %vm533_vm5, %vm534_vm6 }
  0x1b   : > { %v554_v59 = vrot.slane %v2291_v34, 5  ;;  %v558_v60 = vrot.slane %v2294_v35, 5  ;;  %v229_v61 = vsel %vm2303_vm4, %v224_v52, %v228_v33  ;;  %v231_v0 = vshrl.u32 %v2311_v46, 16  ;;  %v2344_v33 = vld [vmem:[%s2246_s30 + $0x34] sm:$0x1] }
  0x1c   : > { %v279_v62 = vor.u32 %v278_v54, %v275_v53  ;;  %v234_v1 = vshll.u32 %v2311_v46, 16  ;;  %v1796_v2 = vcombine.low %v215_v57, %v229_v61  ;;  %v266_v3 = vrot.slane %v265_v58, 4  ;;  %v2351_v43 = vld [vmem:[%s2246_s30 + $0x3c] sm:$0x1]  ;;  %v509_v44 = vld [vmem:[%s2246_s30] sm:$0xe] }
  0x1d   : > { %v240_v18 = vshll.u32 %v2317_v56, 16  ;;  %v245_v19 = vshrl.u32 %v2314_v51, 16  ;;  %v233_v21 = vrot.slane %v231_v0, 4  ;;  %v248_v23 = vshll.u32 %v2314_v51, 16  ;;  %v511_v57 = vld [vmem:[%s2246_s30 + $0x10] sm:$0xe] }
  0x1e   : > { %v280_v20 = vrot.slane %v279_v62, 4  ;;  %v236_v22 = vrot.slane %v234_v1, 5  ;;  %2006 = vmatprep.mubr.msk.bf16.mxu0 %vm327_vm3, %v1796_v2  ;;  %v271_v28 = vsel %vm2303_vm4, %v266_v3, %v270_v50  ;;  %v254_v30 = vshll.u32 %v2326_v63, 16  ;;  %v510_v50 = vld [vmem:[%s2246_s30 + $0x8] sm:$0xe] }
  0x1f   : > { %v247_v29 = vrot.slane %v245_v19, 4  ;;  %v1806_v37 = vcombine.low %v2285_v26, %v2288_v31  ;;  %v242_v40 = vrot.slane %v240_v18, 5  ;;  %v250_v42 = vrot.slane %v248_v23, 5  ;;  %v513_v1 = vld [vmem:[%s2246_s30 + $0x20] sm:$0xe] }
  0x20   : > { %v285_v38 = vsel %vm2303_vm4, %v280_v20, %v284_v55  ;;  %v237_v39 = vor.u32 %v236_v22, %v233_v21  ;;  %v256_v47 = vrot.slane %v254_v30, 5  ;;  %v546_v48 = vrot.slane %v2317_v56, 5  ;;  %v512_v56 = vld [vmem:[%s2246_s30 + $0x18] sm:$0xe]  ;;  %v1852_v15 = vld [vmem:[%s2246_s30 + $0x28] sm:$0xf] }
  0x21   : > { %v1798_v45 = vcombine.low %v271_v28, %v285_v38  ;;  %v287_v49 = vshrl.u32 %v2334_v27, 16  ;;  %v251_v53 = vor.u32 %v250_v42, %v247_v29  ;;  %v290_v54 = vshll.u32 %v2334_v27, 16 }
  0x22   : > { %v238_v52 = vrot.slane %v237_v39, 4  ;;  %v296_v55 = vshll.u32 %v2344_v33, 16  ;;  %v301_v61 = vshrl.u32 %v2341_v32, 16  ;;  %v304_v62 = vshll.u32 %v2341_v32, 16 }
  0x23   : > { %2010 = vmatprep.mubr.msk.bf16.mxu1 %vm327_vm3, %v1798_v45  ;;  %v289_v58 = vrot.slane %v287_v49, 4  ;;  %v310_v0 = vshll.u32 %v2351_v43, 16  ;;  %v252_v3 = vrot.slane %v251_v53, 4  ;;  %v550_v18 = vrot.slane %v2326_v63, 5  ;;  %v514_v63 = vld [vmem:[%s2246_s30 + $0x28] sm:$0xe] }
  0x24   : > { %v243_v2 = vsel %vm2303_vm4, %v238_v52, %v242_v40  ;;  %v292_v19 = vrot.slane %v290_v54, 5  ;;  %v298_v21 = vrot.slane %v296_v55, 5  ;;  %v303_v22 = vrot.slane %v301_v61, 4  ;;  %v515_v52 = vld [vmem:[%s2246_s30 + $0x30] sm:$0xe] }
  0x25   : > { %v306_v23 = vrot.slane %v304_v62, 5  ;;  %v1812_v28 = vrot.slane %v509_v44, 9  ;;  %v257_v29 = vsel %vm2303_vm4, %v252_v3, %v256_v47  ;;  %v312_v38 = vrot.slane %v310_v0, 5  ;;  %v516_v54 = vld [vmem:[%s2246_s30 + $0x38] sm:$0xe] }
  0x26   : > { %v293_v30 = vor.u32 %v292_v19, %v289_v58  ;;  %v1813_v39 = vrot.slane %v510_v50, 9  ;;  %v1797_v40 = vcombine.low %v243_v2, %v257_v29  ;;  %v1814_v49 = vrot.slane %v511_v57, 9  ;;  %v2404_v62 = vld [vmem:[%s2246_s30 + $0xc] sm:$0x1] }
  0x27   : > { %v307_v42 = vor.u32 %v306_v23, %v303_v22  ;;  %v539_v45 = vsel %vm2371_vm7, %v1812_v28, %v538_v24  ;;  %v1815_v47 = vrot.slane %v512_v56, 9  ;;  %v1816_v50 = vrot.slane %v513_v1, 9  ;;  %v2417_v1 = vld [vmem:[%s2246_s30 + $0x14] sm:$0x1]  ;;  %v2424_v28 = vld [vmem:[%s2246_s30 + $0x1c] sm:$0x1] }
  0x28   : > { %v294_v53 = vrot.slane %v293_v30, 4  ;;  %v543_v44 = vsel %vm2371_vm7, %v1813_v39, %v542_v25  ;;  %2007 = vmatmul.mubr.msk.bf16.vlgmr.msra.gmra.mxu0 %vm327_vm3, %v1797_v40  ;;  %v547_v24 = vsel %vm2371_vm7, %v1814_v49, %v546_v48  ;;  %v1817_v57 = vrot.slane %v514_v63, 9  ;;  %v1844_v48 = vld [vmem:[%s2246_s30 + $0x8] sm:$0xf] }
  0x29   : > { %v308_v55 = vrot.slane %v307_v42, 4  ;;  %v1820_v16 = vcombine.low %v539_v45, %v543_v44  ;;  %2025 = vmatpush3.bf16.msra.mxu0 %v2236_v8  ;;  %v1805_v25 = vcombine.low %v2311_v46, %v2314_v51  ;;  %v551_v58 = vsel %vm2371_vm7, %v1815_v47, %v550_v18  ;;  %v2441_v42 = vld [vmem:[%s2246_s30 + $0x24] sm:$0x1]  ;;  %v2450_v47 = vld [vmem:[%s2246_s30 + $0x2c] sm:$0x1] }
  0x2a   : > { %v299_v17 = vsel %vm2303_vm4, %v294_v53, %v298_v21  ;;  %v555_v61 = vsel %vm2371_vm7, %v1816_v50, %v554_v59  ;;  %v1821_v8 = vcombine.low %v547_v24, %v551_v58  ;;  %2101 = vmatprep.subr.msk.bf16.mxu0 %vm340_vm0, %v2224_v5  ;;  %v559_v34 = vsel %vm2371_vm7, %v1817_v57, %v558_v60  ;;  %v1846_v59 = vld [vmem:[%s2246_s30 + $0x10] sm:$0xf]  ;;  %v1848_v21 = vld [vmem:[%s2246_s30 + $0x18] sm:$0xf] }
  0x2b   : > { %v313_v0 = vsel %vm2303_vm4, %v308_v55, %v312_v38  ;;  %2026 = vmatprep.mubr.msk.bf16.mxu0 %vm327_vm3, %v1820_v16  ;;  %v1818_v56 = vrot.slane %v515_v52, 9  ;;  %v1822_v3 = vcombine.low %v555_v61, %v559_v34  ;;  %v562_v18 = vrot.slane %v2344_v33, 5  ;;  %v1850_v38 = vld [vmem:[%s2246_s30 + $0x20] sm:$0xf]  ;;  %v1854_v50 = vld [vmem:[%s2246_s30 + $0x30] sm:$0xf] }
  0x2c   : > { %v1799_v2 = vcombine.low %v299_v17, %v313_v0  ;;  %v1819_v19 = vrot.slane %v516_v54, 9  ;;  %v566_v22 = vrot.slane %v2351_v43, 5  ;;  %v804_v23 = vshrl.u32 %v1844_v48, 16 }
  0x2d   : > { %v807_v5 = vshll.u32 %v1844_v48, 16  ;;  %v813_v35 = vshll.u32 %v2404_v62, 16  ;;  %v2429_v60 = vsel %vm2371_vm7, %v1818_v56, %v562_v18  ;;  %v818_v29 = vshrl.u32 %v1846_v59, 16 }
  0x2e   : > { %2011 = vmatmul.mubr.msk.bf16.vlgmr.msra.gmra.mxu1 %vm327_vm3, %v1799_v2  ;;  %v821_v33 = vshll.u32 %v1846_v59, 16  ;;  %v827_v30 = vshll.u32 %v2417_v1, 16  ;;  %v567_v43 = vsel %vm2371_vm7, %v1819_v19, %v566_v22  ;;  %v806_v39 = vrot.slane %v804_v23, 4  ;;  %v2477_v23 = vld [vmem:[%s2246_s30 + $0x3c] sm:$0x1] }
  0x2f   : > { %2015 = vmatpush3.bf16.msra.mxu1 %v2233_v7  ;;  %2016 = vmatprep.mubr.msk.bf16.mxu1 %vm327_vm3, %v1804_v36  ;;  %v809_v63 = vrot.slane %v807_v5, 5  ;;  %v815_v40 = vrot.slane %v813_v35, 5  ;;  %v1823_v7 = vcombine.low %v2429_v60, %v567_v43  ;;  %v820_v45 = vrot.slane %v818_v29, 4  ;;  %v1858_v29 = vld [vmem:[%s2246_s30 + $0x40] sm:$0xf] }
  0x30   : > { %2100 = vmatprep.subr.msk.bf16.mxu1 %vm340_vm0, %v2219_v4  ;;  %v823_v49 = vrot.slane %v821_v33, 5  ;;  %v829_v14 = vrot.slane %v827_v30, 5  ;;  %2027 = vmatmul.mubr.msk.bf16.vlgmr.msra.gmra.mxu0 %vm327_vm3, %v1821_v8  ;;  %v832_v52 = vshrl.u32 %v1848_v21, 16  ;;  %v835_v53 = vshll.u32 %v1848_v21, 16  ;;  %v1856_v21 = vld [vmem:[%s2246_s30 + $0x38] sm:$0xf] }
  0x31   : > { %v810_v36 = vor.u32 %v809_v63, %v806_v39  ;;  %v841_v44 = vshll.u32 %v2424_v28, 16  ;;  %2045 = vmatpush3.bf16.msra.mxu0 %v2254_v11  ;;  %2030 = vmatprep.mubr.msk.bf16.mxu0 %vm327_vm3, %v1822_v3  ;;  %v846_v54 = vshrl.u32 %v1850_v38, 16  ;;  %v849_v55 = vshll.u32 %v1850_v38, 16  ;;  %v2467_v3 = vld [vmem:[%s2246_s30 + $0x34] sm:$0x1] }
  0x32   : > { %v824_v4 = vor.u32 %v823_v49, %v820_v45  ;;  %v855_v16 = vshll.u32 %v2441_v42, 16  ;;  %v834_v57 = vrot.slane %v832_v52, 4  ;;  %v837_v17 = vrot.slane %v835_v53, 5  ;;  %2103 = vmatprep.subr.msk.bf16.mxu0 %vm340_vm0, %v2241_v9  ;;  %v2492_v43 = vld [vmem:[%s2246_s30 + $0x44] sm:$0x1] }
  0x33   : > { %v811_v24 = vrot.slane %v810_v36, 4  ;;  %v843_v58 = vrot.slane %v841_v44, 5  ;;  %v848_v48 = vrot.slane %v846_v54, 4  ;;  %v851_v0 = vrot.slane %v849_v55, 5  ;;  %v1868_v63 = vld [vmem:[%s2246_s30 + $0x8] sm:$0xe] }
  0x34   : > { %v825_v61 = vrot.slane %v824_v4, 4  ;;  %v857_v11 = vrot.slane %v855_v16, 5  ;;  %v838_v34 = vor.u32 %v837_v17, %v834_v57  ;;  %v860_v56 = vshrl.u32 %v1852_v15, 16  ;;  %v1869_v52 = vld [vmem:[%s2246_s30 + $0x10] sm:$0xe] }
  0x35   : > { %v816_v8 = vsel %vm2303_vm4, %v811_v24, %v815_v40  ;;  %v863_v59 = vshll.u32 %v1852_v15, 16  ;;  %v852_v9 = vor.u32 %v851_v0, %v848_v48  ;;  %v869_v18 = vshll.u32 %v2450_v47, 16  ;;  %v2135_v40 = vld [vmem:[%s2246_s30 + $0x8] ss:$8 sps:$4 sm:$0xff]   ;;  %v1419_v54 = vld [vmem:[%s2740_s1 + $0x1c] sm:$0xf] }
  0x36   : > { %2017 = vmatmul.mubr.msk.bf16.vlgmr.msra.gmra.mxu1 %vm327_vm3, %v1805_v25  ;;  %v830_v2 = vsel %vm2303_vm4, %v825_v61, %v829_v14  ;;  %v874_v19 = vshrl.u32 %v1854_v50, 16  ;;  %v839_v51 = vrot.slane %v838_v34, 4  ;;  %v862_v25 = vrot.slane %v860_v56, 4  ;;  %v1576_v17 = vld [vmem:[%s2740_s1 + $0x20] sm:$0xf] }
  0x37   : > { %2035 = vmatpush3.bf16.msra.mxu1 %v2250_v10  ;;  %2020 = vmatprep.mubr.msk.bf16.mxu1 %vm327_vm3, %v1806_v37  ;;  %v1860_v46 = vcombine.low %v816_v8, %v830_v2  ;;  %v865_v22 = vrot.slane %v863_v59, 5  ;;  %v853_v5 = vrot.slane %v852_v9, 4  ;;  %v871_v35 = vrot.slane %v869_v18, 5  ;;  %v2136_v8 = vld [vmem:[%s2246_s30 + $0x18] ss:$8 sps:$4 sm:$0xff]  }
  0x38   : > { %2102 = vmatprep.subr.msk.bf16.mxu1 %vm340_vm0, %v2230_v6  ;;  %v876_v10 = vrot.slane %v874_v19, 4  ;;  %v877_v60 = vshll.u32 %v1854_v50, 16  ;;  %2031 = vmatmul.mubr.msk.bf16.gmra.mxu0 %vm327_vm3, %v1823_v7  ;;  %v844_v26 = vsel %vm2303_vm4, %v839_v51, %v843_v58  ;;  %v883_v37 = vshll.u32 %v2467_v3, 16  ;;  %v1871_v59 = vld [vmem:[%s2246_s30 + $0x20] sm:$0xe] }
  0x39   : > { %v866_v31 = vor.u32 %v865_v22, %v862_v25  ;;  %v888_v33 = vshrl.u32 %v1856_v21, 16  ;;  %v1807_v30 = vcombine.low %v2334_v27, %v2341_v32  ;;  %2046 = vmatprep.mubr.msk.bf16.mxu0 %vm327_vm3, %v1860_v46  ;;  %v858_v6 = vsel %vm2303_vm4, %v853_v5, %v857_v11  ;;  %v1870_v11 = vld [vmem:[%s2246_s30 + $0x18] sm:$0xe]  ;;  %v2137_v2 = vld [vmem:[%s2246_s30 + $0x28] ss:$8 sps:$4 sm:$0xff]  }
  0x3a   : > { %v879_v38 = vrot.slane %v877_v60, 5  ;;  %v891_v39 = vshll.u32 %v1856_v21, 16  ;;  %v1861_v7 = vcombine.low %v844_v26, %v858_v6  ;;  %v897_v14 = vshll.u32 %v2477_v23, 16  ;;  %v1872_v19 = vld [vmem:[%s2246_s30 + $0x28] sm:$0xe] }
  0x3b   : > { %v867_v45 = vrot.slane %v866_v31, 4  ;;  %v890_v49 = vrot.slane %v888_v33, 4  ;;  %v885_v36 = vrot.slane %v883_v37, 5  ;;  %v902_v32 = vshrl.u32 %v1858_v29, 16  ;;  %v1873_v25 = vld [vmem:[%s2246_s30 + $0x30] sm:$0xe] }
  0x3c   : > { %v880_v15 = vor.u32 %v879_v38, %v876_v10  ;;  %v893_v27 = vrot.slane %v891_v39, 5  ;;  %v905_v44 = vshll.u32 %v1858_v29, 16  ;;  %v911_v50 = vshll.u32 %v2492_v43, 16  ;;  %v1874_v22 = vld [vmem:[%s2246_s30 + $0x38] sm:$0xe] }
  0x3d   : > { %v872_v53 = vsel %vm2303_vm4, %v867_v45, %v871_v35  ;;  %v1876_v4 = vrot.slane %v1868_v63, 9  ;;  %v904_v24 = vrot.slane %v902_v32, 4  ;;  %v1042_v57 = vrot.slane %v2404_v62, 5  ;;  %v1875_v60 = vld [vmem:[%s2246_s30 + $0x40] sm:$0xe] }
  0x3e   : > { %2021 = vmatmul.mubr.msk.bf16.gmra.mxu1 %vm327_vm3, %v1807_v30  ;;  %v881_v55 = vrot.slane %v880_v15, 4  ;;  %v894_v16 = vor.u32 %v893_v27, %v890_v49  ;;  %v899_v58 = vrot.slane %v897_v14, 5  ;;  %v907_v61 = vrot.slane %v905_v44, 5  ;;  %v2139_v29 = vld [vmem:[%s2246_s30 + $0x10] ss:$8 sps:$4 sm:$0xff]  }
  0x3f   : > { %2036 = vmatprep.mubr.msk.bf16.mxu1 %vm327_vm3, %v2135_v40  ;;  %v1877_v48 = vrot.slane %v1869_v52, 9  ;;  %v1046_v0 = vrot.slane %v2417_v1, 5  ;;  %v913_v56 = vrot.slane %v911_v50, 5  ;;  %v2522_v1 = vsel %vm2371_vm7, %v1876_v4, %v1042_v57  ;;  %v1908_v40 = vld [vmem:[%s2246_s30 + $0x10] sm:$0xf] }
  0x40   : > { %v886_v34 = vsel %vm2303_vm4, %v881_v55, %v885_v36  ;;  %v895_v62 = vrot.slane %v894_v16, 4  ;;  %2047 = vmatmul.mubr.msk.bf16.vlgmr.msra.gmra.mxu0 %vm327_vm3, %v1861_v7  ;;  %v908_v18 = vor.u32 %v907_v61, %v904_v24  ;;  %v1878_v46 = vrot.slane %v1870_v11, 9  ;;  %v1909_v7 = vld [vmem:[%s2246_s30 + $0x14] sm:$0x1]  ;;  %v1911_v49 = vld [vmem:[%s2246_s30 + $0x1c] sm:$0x1] }
  0x41   : > { %v1862_v9 = vcombine.low %v872_v53, %v886_v34  ;;  %2065 = vmatpush3.bf16.msra.mxu0 %v2262_v13  ;;  %v2526_v21 = vsel %vm2371_vm7, %v1877_v48, %v1046_v0  ;;  %v2529_v51 = vsel %vm340_vm0, %v1419_v54, 0  ;;  %v1050_v35 = vrot.slane %v2424_v28, 5  ;;  %v1932_v32 = vld [vmem:[%s2246_s30 + $0x10] sm:$0xe]  ;;  %v1933_v50 = vld [vmem:[%s2246_s30 + $0x18] sm:$0xe] }
  0x42   : > { %v900_v5 = vsel %vm2303_vm4, %v895_v62, %v899_v58  ;;  %v909_v13 = vrot.slane %v908_v18, 4  ;;  %v1879_v10 = vrot.slane %v1871_v59, 9  ;;  %2105 = vmatprep.subr.msk.bf16.mxu0 %vm340_vm0, %v1576_v17  ;;  %v1054_v26 = vrot.slane %v2441_v42, 5  ;;  %v2138_v4 = vld [vmem:[%s2246_s30 + $0x38] ss:$8 sps:$4 sm:$0xff]  }
  0x43   : > { %2050 = vmatprep.mubr.msk.bf16.mxu0 %vm327_vm3, %v1862_v9  ;;  %v2542_v31 = vsel %vm340_vm0, %v1576_v17, 0  ;;  %v1880_v37 = vrot.slane %v1872_v19, 9  ;;  %v1058_v33 = vrot.slane %v2450_v47, 5  ;;  %v1881_v28 = vrot.slane %v1873_v25, 9  ;;  %v1912_v57 = vld [vmem:[%s2246_s30 + $0x20] sm:$0xf] }
  0x44   : > { %v914_v30 = vsel %vm2303_vm4, %v909_v13, %v913_v56  ;;  %v1062_v6 = vrot.slane %v2467_v3, 5  ;;  %v1882_v38 = vrot.slane %v1874_v22, 9  ;;  %v1066_v42 = vrot.slane %v2477_v23, 5  ;;  %v1910_v23 = vld [vmem:[%s2246_s30 + $0x18] sm:$0xf] }
  0x45   : > { %v1863_v39 = vcombine.low %v900_v5, %v914_v30  ;;  %v1883_v63 = vrot.slane %v1875_v60, 9  ;;  %v1884_v47 = vcombine.low %v2522_v1, %v2526_v21  ;;  %v2558_v3 = vsel %vm2371_vm7, %v1878_v46, %v1050_v35  ;;  %v1913_v0 = vld [vmem:[%s2246_s30 + $0x24] sm:$0x1]  ;;  %v1914_v62 = vld [vmem:[%s2246_s30 + $0x28] sm:$0xf] }
  0x46   : > { %2037 = vmatmul.mubr.msk.bf16.vlgmr.msra.gmra.mxu1 %vm327_vm3, %v2136_v8  ;;  %v1070_v45 = vrot.slane %v2492_v43, 5  ;;  %v1308_v14 = vshrl.u32 %v1908_v40, 16  ;;  %v1311_v15 = vshll.u32 %v1908_v40, 16  ;;  %v1322_v36 = vshrl.u32 %v1910_v23, 16  ;;  %v2140_v59 = vld [vmem:[%s2246_s30 + $0x20] ss:$8 sps:$4 sm:$0xff]  }
  0x47   : > { %2055 = vmatpush3.bf16.msra.mxu1 %v2258_v12  ;;  %2040 = vmatprep.mubr.msk.bf16.mxu1 %vm327_vm3, %v2137_v2  ;;  %v2566_v12 = vsel %vm2371_vm7, %v1879_v10, %v1054_v26  ;;  %v1325_v27 = vshll.u32 %v1910_v23, 16  ;;  %v2572_v43 = vsel %vm2371_vm7, %v1880_v37, %v1058_v33  ;;  %v1317_v53 = vshll.u32 %v1909_v7, 16  ;;  %v2141_v1 = vld [vmem:[%s2246_s30 + $0x30] ss:$8 sps:$4 sm:$0xff]   ;;  %v1934_v60 = vld [vmem:[%s2246_s30 + $0x20] sm:$0xe] }
  0x48   : > { %2104 = vmatprep.subr.msk.bf16.mxu1 %vm340_vm0, %v1419_v54  ;;  %2051 = vmatmul.mubr.msk.bf16.gmra.mxu0 %vm327_vm3, %v1863_v39  ;;  %v1310_v52 = vrot.slane %v1308_v14, 4  ;;  %v1331_v44 = vshll.u32 %v1911_v49, 16  ;;  %v2579_v54 = vsel %vm2371_vm7, %v1881_v28, %v1062_v6  ;;  %v2583_v55 = vsel %vm2371_vm7, %v1882_v38, %v1066_v42  ;;  %v1915_v30 = vld [vmem:[%s2246_s30 + $0x2c] sm:$0x1]  ;;  %v1916_v6 = vld [vmem:[%s2246_s30 + $0x30] sm:$0xf] }
  0x49   : > { %2066 = vmatprep.mubr.msk.bf16.mxu0 %vm327_vm3, %v2139_v29  ;;  %v1313_v16 = vrot.slane %v1311_v15, 5  ;;  %v1324_v24 = vrot.slane %v1322_v36, 4  ;;  %v2588_v17 = vsel %vm2371_vm7, %v1883_v63, %v1070_v45  ;;  %v1327_v58 = vrot.slane %v1325_v27, 5  ;;  %v1935_v29 = vld [vmem:[%s2246_s30 + $0x28] sm:$0xe] }
  0x4a   : > { %v1940_v61 = vrot.slane %v1932_v32, 9  ;;  %v1546_v48 = vrot.slane %v1909_v7, 5  ;;  %v1941_v8 = vrot.slane %v1933_v50, 9  ;;  %v1550_v34 = vrot.slane %v1911_v49, 5  ;;  %v1918_v40 = vld [vmem:[%s2246_s30 + $0x38] sm:$0xf] }
  0x4b   : > { %v1314_v11 = vor.u32 %v1313_v16, %v1310_v52  ;;  %v1336_v56 = vshrl.u32 %v1912_v57, 16  ;;  %v1319_v2 = vrot.slane %v1317_v53, 5  ;;  %v1328_v9 = vor.u32 %v1327_v58, %v1324_v24  ;;  %v2142_v23 = vld [vmem:[%s2246_s30 + $0x40] ss:$8 sps:$4 sm:$0xff]   ;;  %v1917_v15 = vld [vmem:[%s2246_s30 + $0x34] sm:$0x1] }
  0x4c   : > { %v1333_v18 = vrot.slane %v1331_v44, 5  ;;  %v1339_v19 = vshll.u32 %v1912_v57, 16  ;;  %v1345_v25 = vshll.u32 %v1913_v0, 16  ;;  %v1350_v22 = vshrl.u32 %v1914_v62, 16  ;;  %v1936_v53 = vld [vmem:[%s2246_s30 + $0x30] sm:$0xe] }
  0x4d   : > { %v1315_v21 = vrot.slane %v1314_v11, 4  ;;  %v1338_v46 = vrot.slane %v1336_v56, 4  ;;  %v1885_v5 = vcombine.low %v2558_v3, %v2566_v12  ;;  %v1886_v13 = vcombine.low %v2572_v43, %v2579_v54  ;;  %v1919_v43 = vld [vmem:[%s2246_s30 + $0x3c] sm:$0x1]  ;;  %v1937_v16 = vld [vmem:[%s2246_s30 + $0x38] sm:$0xe] }
  0x4e   : > { %2041 = vmatmul.mubr.msk.bf16.gmra.mxu1 %vm327_vm3, %v2138_v4  ;;  %v1329_v35 = vrot.slane %v1328_v9, 4  ;;  %v1341_v10 = vrot.slane %v1339_v19, 5  ;;  %v1887_v26 = vcombine.low %v2583_v55, %v2588_v17  ;;  %v1547_v37 = vsel %vm2371_vm7, %v1940_v61, %v1546_v48  ;;  %v1922_v9 = vld [vmem:[%s2246_s30 + $0x48] sm:$0xf] }
  0x4f   : > { %2056 = vmatprep.mubr.msk.bf16.mxu1 %vm327_vm3, %v1884_v47  ;;  %v1551_v33 = vsel %vm2371_vm7, %v1941_v8, %v1550_v34  ;;  %v1353_v28 = vshll.u32 %v1914_v62, 16  ;;  %v1320_v38 = vsel %vm2303_vm4, %v1315_v21, %v1319_v2  ;;  %v1352_v63 = vrot.slane %v1350_v22, 4  ;;  %v1920_v34 = vld [vmem:[%s2246_s30 + $0x40] sm:$0xf] }
  0x50   : > { %2067 = vmatmul.mubr.msk.bf16.vlgmr.msra.gmra.mxu0 %vm327_vm3, %v2140_v59  ;;  %v1334_v39 = vsel %vm2303_vm4, %v1329_v35, %v1333_v18  ;;  %v1342_v42 = vor.u32 %v1341_v10, %v1338_v46  ;;  %v1942_v47 = vrot.slane %v1934_v60, 9  ;;  %v1554_v3 = vrot.slane %v1913_v0, 5  ;;  %v1923_v60 = vld [vmem:[%s2246_s30 + $0x4c] sm:$0x1] }
  0x51   : > { %2085 = vmatpush3.bf16.msra.mxu0 %v2542_v31  ;;  %2070 = vmatprep.mubr.msk.bf16.mxu0 %vm327_vm3, %v2141_v1  ;;  %v1355_v7 = vrot.slane %v1353_v28, 5  ;;  %v1943_v45 = vrot.slane %v1935_v29, 9  ;;  %v2619_v49 = vrot.slane %v1345_v25, 5  ;;  %v1359_v14 = vshll.u32 %v1915_v30, 16  ;;  %v1921_v25 = vld [vmem:[%s2246_s30 + $0x44] sm:$0x1] }
  0x52   : > { %v1558_v12 = vrot.slane %v1915_v30, 5  ;;  %v1364_v36 = vshrl.u32 %v1916_v6, 16  ;;  %v1924_v27 = vcombine.low %v1320_v38, %v1334_v39  ;;  %v1948_v32 = vcombine.low %v1547_v37, %v1551_v33  ;;  %v1938_v37 = vld [vmem:[%s2246_s30 + $0x40] sm:$0xe]  ;;  %v1939_v38 = vld [vmem:[%s2246_s30 + $0x48] sm:$0xe] }
  0x53   : > { %v1367_v52 = vshll.u32 %v1916_v6, 16  ;;  %v1378_v31 = vshrl.u32 %v1918_v40, 16  ;;  %v2624_v44 = vrot.slane %v1342_v42, 4  ;;  %v1356_v50 = vor.u32 %v1355_v7, %v1352_v63 }
  0x54   : > { %v1366_v4 = vrot.slane %v1364_v36, 4  ;;  %v1381_v54 = vshll.u32 %v1918_v40, 16  ;;  %v1555_v24 = vsel %vm2371_vm7, %v1942_v47, %v1554_v3  ;;  %v1559_v57 = vsel %vm2371_vm7, %v1943_v45, %v1558_v12 }
  0x55   : > { %v1369_v58 = vrot.slane %v1367_v52, 5  ;;  %v1373_v61 = vshll.u32 %v1917_v15, 16  ;;  %v1380_v48 = vrot.slane %v1378_v31, 4  ;;  %v1387_v11 = vshll.u32 %v1919_v43, 16 }
  0x56   : > { %2057 = vmatmul.mubr.msk.bf16.vlgmr.msra.gmra.mxu1 %vm327_vm3, %v1885_v5  ;;  %v1383_v0 = vrot.slane %v1381_v54, 5  ;;  %v1944_v8 = vrot.slane %v1936_v53, 9  ;;  %v1361_v62 = vrot.slane %v1359_v14, 5  ;;  %v1562_v59 = vrot.slane %v1917_v15, 5 }
  0x57   : > { %2075 = vmatpush3.bf16.msra.mxu1 %v2529_v51  ;;  %2060 = vmatprep.mubr.msk.bf16.mxu1 %vm327_vm3, %v1886_v13  ;;  %v1370_v56 = vor.u32 %v1369_v58, %v1366_v4  ;;  %v1945_v2 = vrot.slane %v1937_v16, 9  ;;  %v1348_v51 = vsel %vm2303_vm4, %v2624_v44, %v2619_v49  ;;  %v1357_v18 = vrot.slane %v1356_v50, 4 }
  0x58   : > { %2071 = vmatmul.mubr.msk.bf16.gmra.mxu0 %vm327_vm3, %v2142_v23  ;;  %v1384_v19 = vor.u32 %v1383_v0, %v1380_v48  ;;  %v1566_v1 = vrot.slane %v1919_v43, 5  ;;  %v1949_v21 = vcombine.low %v1555_v24, %v1559_v57  ;;  %v1375_v46 = vrot.slane %v1373_v61, 5 }
  0x59   : > { %2086 = vmatprep.mubr.msk.bf16.mxu0 %vm327_vm3, %v1948_v32  ;;  %v1392_v22 = vshrl.u32 %v1920_v34, 16  ;;  %v1395_v5 = vshll.u32 %v1920_v34, 16  ;;  %v1389_v13 = vrot.slane %v1387_v11, 5  ;;  %v1563_v35 = vsel %vm2371_vm7, %v1944_v8, %v1562_v59 }
  0x5a   : > { %v1567_v10 = vsel %vm2371_vm7, %v1945_v2, %v1566_v1  ;;  %v1406_v29 = vshrl.u32 %v1922_v9, 16  ;;  %v1371_v33 = vrot.slane %v1370_v56, 4  ;;  %v1385_v30 = vrot.slane %v1384_v19, 4 }
  0x5b   : > { %v1394_v28 = vrot.slane %v1392_v22, 4  ;;  %v1397_v6 = vrot.slane %v1395_v5, 5  ;;  %v1362_v39 = vsel %vm2303_vm4, %v1357_v18, %v1361_v62  ;;  %v1401_v42 = vshll.u32 %v1921_v25, 16 }
  0x5c   : > { %v1408_v63 = vrot.slane %v1406_v29, 4  ;;  %v1409_v40 = vshll.u32 %v1922_v9, 16  ;;  %v1950_v7 = vcombine.low %v1563_v35, %v1567_v10  ;;  %v1415_v3 = vshll.u32 %v1923_v60, 16 }
  0x5d   : > { %v1398_v47 = vor.u32 %v1397_v6, %v1394_v28  ;;  %v1946_v45 = vrot.slane %v1938_v37, 9  ;;  %v1570_v49 = vrot.slane %v1921_v25, 5  ;;  %v1947_v14 = vrot.slane %v1939_v38, 9 }
  0x5e   : > { %2061 = vmatmul.mubr.msk.bf16.gmra.mxu1 %vm327_vm3, %v1887_v26  ;;  %v1411_v23 = vrot.slane %v1409_v40, 5  ;;  %v1574_v12 = vrot.slane %v1923_v60, 5  ;;  %v1376_v15 = vsel %vm2303_vm4, %v1371_v33, %v1375_v46  ;;  %v1390_v36 = vsel %vm2303_vm4, %v1385_v30, %v1389_v13 }
  0x5f   : > { %2076 = vmatprep.mubr.msk.bf16.mxu1 %vm327_vm3, %v1924_v27  ;;  %v1925_v17 = vcombine.low %v1348_v51, %v1362_v39  ;;  %v1403_v26 = vrot.slane %v1401_v42, 5  ;;  %v1571_v27 = vsel %vm2371_vm7, %v1946_v45, %v1570_v49  ;;  %v1926_v43 = vcombine.low %v1376_v15, %v1390_v36 }
  0x60   : > { %2087 = vmatmul.mubr.msk.bf16.vlgmr.msra.gmra.mxu0 %vm327_vm3, %v1949_v21  ;;  %v1412_v55 = vor.u32 %v1411_v23, %v1408_v63  ;;  %v1575_v32 = vsel %vm2371_vm7, %v1947_v14, %v1574_v12  ;;  %v1399_v52 = vrot.slane %v1398_v47, 4  ;;  %v1417_v53 = vrot.slane %v1415_v3, 5 }
  0x61   : > { %2090 = vmatprep.mubr.msk.bf16.mxu0 %vm327_vm3, %v1950_v7  ;;  %v1951_v44 = vcombine.low %v1571_v27, %v1575_v32  ;;  %vm1685_vm8 = vcmask 60416  }
  0x62   : > { %v1413_v31 = vrot.slane %v1412_v55, 4  ;;  %v1404_v50 = vsel %vm2303_vm4, %v1399_v52, %v1403_v26 }
  0x64   : > { %v1418_v4 = vsel %vm2303_vm4, %v1413_v31, %v1417_v53 }
  0x65   : > { %v1927_v54 = vcombine.low %v1404_v50, %v1418_v4 }
  0x66   : > { %2077 = vmatmul.mubr.msk.bf16.vlgmr.msra.gmra.mxu1 %vm327_vm3, %v1925_v17 }
  0x67   : > { %2080 = vmatprep.mubr.msk.bf16.mxu1 %vm327_vm3, %v1926_v43 }
  0x68   : > { %2091 = vmatmul.mubr.msk.bf16.gmra.mxu0 %vm327_vm3, %v1951_v44 }
  0x6e   : > { %2081 = vmatmul.mubr.msk.bf16.gmra.mxu1 %vm327_vm3, %v1927_v54 }
  0xe8   : > { %v2008_v20 = vpop.f32.mrf.mxu0 }
  0xea   : > { %v378_v16 = vpop.f32.mrf.mxu0 }
  0xec   : > { %v2009_v24 = vpop.f32.mrf.mxu0 }
  0xee   : > { %v2012_v57 = vpop.f32.mrf.mxu1  ;;  %v381_v58 = vpop.f32.mrf.mxu0 }
  0xf0   : > { %v394_v61 = vpop.f32.mrf.mxu1  ;;  %v2028_v48 = vpop.f32.mrf.mxu0 }
  0xf2   : > { %v2013_v0 = vpop.f32.mrf.mxu1  ;;  %v630_v11 = vpop.f32.mrf.mxu0 }
  0xf4   : > { %v2675_v8 = vpop.f32.mrf.mxu1  ;;  %v2029_v34 = vpop.f32.mrf.mxu0 }
  0xf6   : > { %v2018_v62 = vpop.f32.mrf.mxu1  ;;  %v633_v41 = vpop.f32.mrf.mxu0 }
  0xf7   : > { %v487_v47 = vadd.f32 %v2018_v62, %v2008_v20 }
  0xf8   : > { %v478_v56 = vpop.f32.mrf.mxu1  ;;  %v2032_v59 = vpop.f32.mrf.mxu0 }
  0xf9   : > { %v479_v23 = vadd.f32 %v478_v56, %v378_v16  ;;  %v663_v12 = vadd.f32 %v2028_v48, %v487_v47 }
  0xfa   : > { %v2019_v2 = vpop.f32.mrf.mxu1  ;;  %v646_v9 = vpop.f32.mrf.mxu0 }
  0xfb   : > { %v490_v15 = vadd.f32 %v2019_v2, %v2009_v24  ;;  %v661_v17 = vadd.f32 %v630_v11, %v479_v23 }
  0xfc   : > { %v481_v51 = vpop.f32.mrf.mxu1  ;;  %v2677_v18 = vpop.f32.mrf.mxu0 }
  0xfd   : > { %v482_v26 = vadd.f32 %v481_v51, %v381_v58  ;;  %v664_v31 = vadd.f32 %v2029_v34, %v490_v15 }
  0xfe   : > { %v2022_v19 = vpop.f32.mrf.mxu1  ;;  %v2679_v1 = vpop.f32.mrf.mxu0 }
  0xff   : > { %v503_v43 = vadd.f32 %v2022_v19, %v2012_v57  ;;  %v662_v54 = vadd.f32 %v633_v41, %v482_v26 }
 0x100   : > { %v494_v21 = vpop.f32.mrf.mxu1  ;;  %v2048_v46 = vpop.f32.mrf.mxu0 }
 0x101   : > { %v495_v50 = vadd.f32 %v494_v21, %v394_v61  ;;  %v667_v48 = vadd.f32 %v2032_v59, %v503_v43 }
 0x102   : > { %v2023_v25 = vpop.f32.mrf.mxu1  ;;  %v977_v22 = vpop.f32.mrf.mxu0 }
 0x103   : > { %v506_v62 = vadd.f32 %v2023_v25, %v2013_v0  ;;  %v665_v57 = vadd.f32 %v646_v9, %v495_v50 }
 0x104   : > { %v497_v5 = vpop.f32.mrf.mxu1  ;;  %v2049_v13 = vpop.f32.mrf.mxu0 }
 0x105   : > { %v498_v34 = vadd.f32 %v497_v5, %v2675_v8  ;;  %v668_v21 = vadd.f32 %v2677_v18, %v506_v62 }
 0x106   : > { %v2038_v35 = vpop.f32.mrf.mxu1  ;;  %v980_v10 = vpop.f32.mrf.mxu0 }
 0x107   : > { %v781_v27 = vadd.f32 %v2038_v35, %v663_v12 }
 0x108   : > { %v748_v60 = vpop.f32.mrf.mxu1  ;;  %v2052_v29 = vpop.f32.mrf.mxu0 }
 0x109   : > { %v779_v53 = vadd.f32 %v748_v60, %v661_v17  ;;  %v1010_v20 = vadd.f32 %v2048_v46, %v781_v27 }
 0x10a   : > { %v2039_v37 = vpop.f32.mrf.mxu1  ;;  %v2681_v33 = vpop.f32.mrf.mxu0 }
 0x10b   : > { %v782_v16 = vadd.f32 %v2039_v37, %v664_v31  ;;  %v1008_v58 = vadd.f32 %v977_v22, %v779_v53 }
 0x10c   : > { %v751_v30 = vpop.f32.mrf.mxu1  ;;  %v2683_v28 = vpop.f32.mrf.mxu0 }
 0x10d   : > { %v780_v56 = vadd.f32 %v751_v30, %v662_v54  ;;  %v1011_v60 = vadd.f32 %v2049_v13, %v782_v16  ;;  %v666_v30 = vadd.f32 %v2679_v1, %v498_v34 }
 0x10e   : > { %v2042_v6 = vpop.f32.mrf.mxu1  ;;  %v2685_v38 = vpop.f32.mrf.mxu0 }
 0x10f   : > { %v785_v19 = vadd.f32 %v2042_v6, %v667_v48  ;;  %v1009_v59 = vadd.f32 %v980_v10, %v780_v56 }
 0x110   : > { %v764_v39 = vpop.f32.mrf.mxu1  ;;  %v2068_v42 = vpop.f32.mrf.mxu0 }
 0x111   : > { %v783_v46 = vadd.f32 %v764_v39, %v665_v57  ;;  %v1014_v47 = vadd.f32 %v2052_v29, %v785_v19 }
 0x112   : > { %v2043_v63 = vpop.f32.mrf.mxu1  ;;  %v1252_v40 = vpop.f32.mrf.mxu0 }
 0x113   : > { %v786_v9 = vadd.f32 %v2043_v63, %v668_v21  ;;  %v1012_v23 = vadd.f32 %v2681_v33, %v783_v46 }
 0x114   : > { %v767_v7 = vpop.f32.mrf.mxu1  ;;  %v2069_v3 = vpop.f32.mrf.mxu0 }
 0x115   : > { %v1015_v15 = vadd.f32 %v2683_v28, %v786_v9 }
 0x116   : > { %v2058_v45 = vpop.f32.mrf.mxu1  ;;  %v2687_v49 = vpop.f32.mrf.mxu0 }
 0x117   : > { %v1167_v2 = vadd.f32 %v2058_v45, %v1010_v20 }
 0x118   : > { %v1134_v14 = vpop.f32.mrf.mxu1  ;;  %v2689_v36 = vpop.f32.mrf.mxu0 }
 0x119   : > { %v1165_v61 = vadd.f32 %v1134_v14, %v1008_v58  ;;  %v1285_v0 = vadd.f32 %v2068_v42, %v1167_v2  ;;  %v784_v14 = vadd.f32 %v767_v7, %v666_v30 }
 0x11a   : > { %v2059_v55 = vpop.f32.mrf.mxu1  ;;  %v2691_v32 = vpop.f32.mrf.mxu0 }
 0x11b   : > { %v1168_v25 = vadd.f32 %v2059_v55, %v1011_v60  ;;  %v1283_v8 = vadd.f32 %v1252_v40, %v1165_v61 }
 0x11c   : > { %v1137_v52 = vpop.f32.mrf.mxu1  ;;  %v2693_v44 = vpop.f32.mrf.mxu0 }
 0x11d   : > { %v1166_v5 = vadd.f32 %v1137_v52, %v1009_v59  ;;  %v1286_v12 = vadd.f32 %v2069_v3, %v1168_v25  ;;  %v1013_v3 = vadd.f32 %v2685_v38, %v784_v14 }
 0x11e   : > { %v2062_v4 = vpop.f32.mrf.mxu1  ;;  %v2695_v24 = vpop.f32.mrf.mxu0 }
 0x11f   : > { %v1171_v18 = vadd.f32 %v2062_v4, %v1014_v47  ;;  %v1284_v33 = vadd.f32 %v2687_v49, %v1166_v5 }
 0x120   : > { %v1150_v11 = vpop.f32.mrf.mxu1  ;;  %v2088_v51 = vpop.f32.mrf.mxu0 }
 0x121   : > { %v1169_v55 = vadd.f32 %v1150_v11, %v1012_v23  ;;  %v1289_v28 = vadd.f32 %v2689_v36, %v1171_v18 }
 0x122   : > { %v2063_v35 = vpop.f32.mrf.mxu1  ;;  %v1638_v41 = vpop.f32.mrf.mxu0 }
 0x123   : > { %v1172_v26 = vadd.f32 %v2063_v35, %v1015_v15  ;;  %v1287_v31 = vadd.f32 %v2691_v32, %v1169_v55 }
 0x124   : > { %v1153_v37 = vpop.f32.mrf.mxu1  ;;  %v2089_v22 = vpop.f32.mrf.mxu0 }
 0x125   : > { %v1170_v50 = vadd.f32 %v1153_v37, %v1013_v3  ;;  %v1290_v20 = vadd.f32 %v2693_v44, %v1172_v26 }
 0x126   : > { %v2078_v45 = vpop.f32.mrf.mxu1  ;;  %v1641_v13 = vpop.f32.mrf.mxu0 }
 0x127   : > { %v1514_v6 = vadd.f32 %v2078_v45, %v1285_v0  ;;  %v1288_v58 = vadd.f32 %v2695_v24, %v1170_v50 }
 0x128   : > { %v1481_v39 = vpop.f32.mrf.mxu1  ;;  %v2092_v29 = vpop.f32.mrf.mxu0 }
 0x129   : > { %v1671_v10 = vadd.f32 %v2088_v51, %v1514_v6  ;;  %v1512_v42 = vadd.f32 %v1481_v39, %v1283_v8 }
 0x12a   : > { %v2079_v1 = vpop.f32.mrf.mxu1  ;;  %v1654_v49 = vpop.f32.mrf.mxu0 }
 0x12b   : > { %v1679_v63 = vpack.c.bf16 %v1671_v10, %v1671_v10  ;;  %v1669_v40 = vadd.f32 %v1638_v41, %v1512_v42  ;;  %v1515_v7 = vadd.f32 %v2079_v1, %v1286_v12 }
 0x12c   : > { %v1484_v17 = vpop.f32.mrf.mxu1  ;;  %v2093_v11 = vpop.f32.mrf.mxu0 }
 0x12d   : > { %1688 = vst.msk [vmem:[%s2706_s14 + $0x8] sm:$0xf] %vm1685_vm8, %v1679_v63  ;;  %v1677_v27 = vpack.c.bf16 %v1669_v40, %v1669_v40  ;;  %v1672_v43 = vadd.f32 %v2089_v22, %v1515_v7  ;;  %v1513_v52 = vadd.f32 %v1484_v17, %v1284_v33 }
 0x12e   : > { %v2082_v53 = vpop.f32.mrf.mxu1  ;;  %v1657_v35 = vpop.f32.mrf.mxu0 }
 0x12f   : > { %1686 = vst.msk [vmem:[%s2706_s14] sm:$0xf] %vm1685_vm8, %v1677_v27  ;;  %v1680_v4 = vpack.c.bf16 %v1672_v43, %v1672_v43  ;;  %v1670_v38 = vadd.f32 %v1641_v13, %v1513_v52  ;;  %v1518_v36 = vadd.f32 %v2082_v53, %v1289_v28 }
 0x130   : > { %v1497_v54 = vpop.f32.mrf.mxu1 }
 0x131   : > { %1689 = vst.msk [vmem:[%s2706_s14 + $0xc] sm:$0xf] %vm1685_vm8, %v1680_v4  ;;  %v1678_v16 = vpack.c.bf16 %v1670_v38, %v1670_v38  ;;  %v1675_v48 = vadd.f32 %v2092_v29, %v1518_v36  ;;  %v1516_v62 = vadd.f32 %v1497_v54, %v1287_v31 }
 0x132   : > { %v2083_v32 = vpop.f32.mrf.mxu1 }
 0x133   : > { %1687 = vst.msk [vmem:[%s2706_s14 + $0x4] sm:$0xf] %vm1685_vm8, %v1678_v16  ;;  %v1683_v56 = vpack.c.bf16 %v1675_v48, %v1675_v48  ;;  %v1673_v2 = vadd.f32 %v1654_v49, %v1516_v62  ;;  %v1519_v51 = vadd.f32 %v2083_v32, %v1290_v20 }
 0x134   : > { %v1500_v57 = vpop.f32.mrf.mxu1 }
 0x135   : > { %1692 = vst.msk [vmem:[%s2706_s14 + $0x18] sm:$0xf] %vm1685_vm8, %v1683_v56  ;;  %v1681_v44 = vpack.c.bf16 %v1673_v2, %v1673_v2  ;;  %v1676_v34 = vadd.f32 %v2093_v11, %v1519_v51  ;;  %v1517_v19 = vadd.f32 %v1500_v57, %v1288_v58 }
 0x137   : > { %1690 = vst.msk [vmem:[%s2706_s14 + $0x10] sm:$0xf] %vm1685_vm8, %v1681_v44  ;;  %v1684_v60 = vpack.c.bf16 %v1676_v34, %v1676_v34  ;;  %v1674_v61 = vadd.f32 %v1657_v35, %v1517_v19 }
 0x139   : > { %1693 = vst.msk [vmem:[%s2706_s14 + $0x1c] sm:$0xf] %vm1685_vm8, %v1684_v60  ;;  %v1682_v24 = vpack.c.bf16 %v1674_v61, %v1674_v61 }
 0x13b   : > { %1691 = vst.msk [vmem:[%s2706_s14 + $0x14] sm:$0xf] %vm1685_vm8, %v1682_v24 }
 0x13c PF: > { %s12_s11 = sadd.s32 1, %s2165_s11   ;;  %s2746_s9 = smov %s2161_s10 }
 0x13d   : > { %p9_p5 = scmp.ge.s32.totalorder %s12_s11, 4   ;;  %s2747_s10 = smov %s2749_s12 }
 0x13f   :  { %11 = sbr.rel (!%p9_p5) target bundleno = 2 (0x2), region = 63 }

// kernel: zhugo_forward.18
= control target key start
LH: loop header
LB: loop body
LE: loop exit
PB: predicated region body
PF: predicated region fallthrough
CT: control target
= control target key end

     0   :  { %s5894_s9 = smov 0   ;;  %s5896_s10 = smov 0   ;;  %s7538_s0 = inlined_call_operand.vmem [shape: bf16[2,12,12,4], index: 0, kind: input, shape index: {}]   ;;  %s7539_s1 = inlined_call_operand.vmem [shape: bf16[100,16], index: 1, kind: input, shape index: {}]   ;;  %s7540_s2 = inlined_call_operand.vmem [shape: bf16[2,8,8,16], index: 2, kind: output, shape index: {}]  }
   0x1   :  { %s5898_s11 = smov 0  }
   0x2 LB: > { %s24_s12 = sadd.s32 1, %s5873_s10  ;;  %p4904_p0 = scmp.ge.s32.totalorder %s5877_s11, 1  ;;  %s5877_s11 = sphi %s5898_s11, %s12_s11   ;;  %s5873_s10 = sphi %s5896_s10, %s7628_s10   ;;  %s5869_s9 = sphi %s5894_s9, %s7627_s9  }
   0x3   : > { %p26_p1 = scmp.ge.s32.totalorder %s24_s12, 2  ;;  %p135_p2 = scmp.lt.s32.totalorder %s5877_s11, 3 }
   0x5   : > { %s7630_s12 = smov (%p26_p1, %s24_s12), 0  ;;  %p136_p3 = pnand %p4904_p0, %p135_p2 }
   0x7   : > { %139 = sbr.rel (%p136_p3) target bundleno = 528 (0x210), region = 28 }
   0xc   : > { %v5823_v0 = vld [vmem:[%s7539_s1] ss:$0 sps:$4 sm:$0xcc]   ;;  %vm344_vm0 = vcmask 1041408   ;;  %p164_p4 = scmp.lt.s32.totalorder %s5869_s9, 1  ;;  %vm331_vm3 = vcmask 31744  }
   0xd   : > { %v330_v1 = vrot.slane %v5823_v0, 2  ;;  %v190_v2 = vld [vmem:[%s7539_s1] sm:$0x3]  ;;  %v572_v3 = vld [vmem:[%s7539_s1 + $0x4] sm:$0x3]  ;;  %vm537_vm5 = vcmask 1042432  }
   0xe   : > { %s7632_s9 = smov (!%p164_p4, %s5869_s9), 1  ;;  %v5929_v5 = vld [vmem:[%s7539_s1 + $0x4] ss:$0 sps:$4 sm:$0xcc]   ;;  %v5934_v6 = vld [vmem:[%s7539_s1 + $0x8] sm:$0x3] }
   0xf   : > { %5773 = vmatprep.subr.msk.bf16.mxu1 %vm344_vm0, %v330_v1  ;;  %5772 = vmatprep.subr.msk.bf16.mxu0 %vm344_vm0, %v330_v1  ;;  %v346_v4 = vsel %vm344_vm0, %v330_v1, 0  ;;  %s5798_s23 = smul.u32 96, %s7632_s9  ;;  %vm199_vm1 = vsmask.f32 3328  ;;  %vm200_vm2 = vsmask.f32 7440 }
  0x10   : > { %5771 = vmatpush3.bf16.msra.mxu1 %v346_v4  ;;  %5521 = vmatpush3.bf16.msra.mxu0 %v346_v4  ;;  %v5939_v7 = vsel %vm344_vm0, %v190_v2, 0  ;;  %v5945_v8 = vld [vmem:[%s7539_s1 + $0xc] sm:$0x3]  ;;  %v5953_v9 = vsel %vm344_vm0, %v572_v3, 0  ;;  %v844_v10 = vrot.slane %v5929_v5, 2  ;;  %v5958_v11 = vsel %vm344_vm0, %v5934_v6, 0  ;;  %vm6005_vm4 = vmor %vm199_vm1, %vm200_vm2 }
  0x11   : > { %5774 = vmatprep.subr.msk.bf16.mxu1 %vm344_vm0, %v190_v2  ;;  %5775 = vmatprep.subr.msk.bf16.mxu0 %vm344_vm0, %v572_v3  ;;  %s5950_s28 = scalar_lea.vmem %s7538_s0, %s5798_s23  ;;  %v5962_v12 = vsel %vm344_vm0, %v5945_v8, 0  ;;  %vm538_vm6 = vcmask 1046532   ;;  %vm958_vm8 = vcmask 1045508   ;;  %vm681_vm9 = vsmask.f32 2304 }
  0x12   : > { %v5965_v13 = vld [vmem:[%s5950_s28] sm:$0xf]  ;;  %v5968_v14 = vld [vmem:[%s5950_s28 + $0x8] sm:$0xf]  ;;  %v5971_v15 = vld [vmem:[%s5950_s28 + $0x4] sm:$0x1] }
  0x13   : > { %v5974_v16 = vld [vmem:[%s5950_s28 + $0xc] sm:$0x1]  ;;  %v203_v17 = vshrl.u32 %v5965_v13, 16  ;;  %v206_v18 = vshll.u32 %v5965_v13, 16  ;;  %v212_v19 = vshll.u32 %v5971_v15, 16  ;;  %v217_v20 = vshrl.u32 %v5968_v14, 16  ;;  %vm6072_vm7 = vmor %vm537_vm5, %vm538_vm6 }
  0x14   : > { %v220_v21 = vshll.u32 %v5968_v14, 16  ;;  %v226_v22 = vshll.u32 %v5974_v16, 16  ;;  %v542_v23 = vrot.slane %v5971_v15, 5  ;;  %v546_v24 = vrot.slane %v5974_v16, 5  ;;  %v5985_v25 = vld [vmem:[%s5950_s28 + $0x20] sm:$0xf]  ;;  %vm6173_vm11 = vmor %vm344_vm0, %vm958_vm8 }
  0x15   : > { %v205_v26 = vrot.slane %v203_v17, 4  ;;  %v208_v27 = vrot.slane %v206_v18, 5  ;;  %v214_v28 = vrot.slane %v212_v19, 5  ;;  %v219_v29 = vrot.slane %v217_v20, 4  ;;  %v5988_v30 = vld [vmem:[%s5950_s28 + $0x28] sm:$0xf] }
  0x16   : > { %v222_v31 = vrot.slane %v220_v21, 5  ;;  %v228_v32 = vrot.slane %v226_v22, 5  ;;  %v5991_v33 = vld [vmem:[%s5950_s28 + $0x24] sm:$0x1]  ;;  %v5994_v34 = vld [vmem:[%s5950_s28 + $0x2c] sm:$0x1]  ;;  %v4917_v35 = vcombine.low %v5965_v13, %v5968_v14  ;;  %v4919_v36 = vcombine.low %v5985_v25, %v5988_v30 }
  0x17   : > { %v209_v37 = vor.u32 %v208_v27, %v205_v26  ;;  %v259_v38 = vshrl.u32 %v5985_v25, 16  ;;  %v262_v39 = vshll.u32 %v5985_v25, 16  ;;  %v268_v40 = vshll.u32 %v5991_v33, 16  ;;  %v6013_v46 = vld [vmem:[%s5950_s28 + $0x10] sm:$0xf] }
  0x18   : > { %v223_v42 = vor.u32 %v222_v31, %v219_v29  ;;  %v273_v43 = vshrl.u32 %v5988_v30, 16  ;;  %v276_v44 = vshll.u32 %v5988_v30, 16  ;;  %v282_v45 = vshll.u32 %v5994_v34, 16  ;;  %v6016_v51 = vld [vmem:[%s5950_s28 + $0x18] sm:$0xf] }
  0x19   : > { %v210_v47 = vrot.slane %v209_v37, 4  ;;  %v261_v48 = vrot.slane %v259_v38, 4  ;;  %v264_v49 = vrot.slane %v262_v39, 5  ;;  %v270_v50 = vrot.slane %v268_v40, 5  ;;  %v6019_v56 = vld [vmem:[%s5950_s28 + $0x14] sm:$0x1] }
  0x1a   : > { %v224_v52 = vrot.slane %v223_v42, 4  ;;  %v275_v53 = vrot.slane %v273_v43, 4  ;;  %v278_v54 = vrot.slane %v276_v44, 5  ;;  %v284_v55 = vrot.slane %v282_v45, 5  ;;  %v6028_v63 = vld [vmem:[%s5950_s28 + $0x1c] sm:$0x1] }
  0x1b   : > { %v215_v57 = vsel %vm6005_vm4, %v210_v47, %v214_v28  ;;  %v265_v58 = vor.u32 %v264_v49, %v261_v48  ;;  %v558_v59 = vrot.slane %v5991_v33, 5  ;;  %v562_v60 = vrot.slane %v5994_v34, 5  ;;  %v6036_v22 = vld [vmem:[%s5950_s28 + $0x30] sm:$0xf]  ;;  %v6043_v31 = vld [vmem:[%s5950_s28 + $0x34] sm:$0x1] }
  0x1c   : > { %v229_v61 = vsel %vm6005_vm4, %v224_v52, %v228_v32  ;;  %v279_v62 = vor.u32 %v278_v54, %v275_v53  ;;  %v231_v0 = vshrl.u32 %v6013_v46, 16  ;;  %v234_v1 = vshll.u32 %v6013_v46, 16  ;;  %v6049_v40 = vld [vmem:[%s5950_s28 + $0x38] sm:$0xf]  ;;  %v6052_v42 = vld [vmem:[%s5950_s28 + $0x3c] sm:$0x1] }
  0x1d   : > { %v4908_v2 = vcombine.low %v215_v57, %v229_v61  ;;  %v266_v3 = vrot.slane %v265_v58, 4  ;;  %v240_v4 = vshll.u32 %v6019_v56, 16  ;;  %v245_v17 = vshrl.u32 %v6016_v51, 16  ;;  %v6059_v53 = vld [vmem:[%s5950_s28] sm:$0xe] }
  0x1e   : > { %v280_v18 = vrot.slane %v279_v62, 4  ;;  %v233_v19 = vrot.slane %v231_v0, 4  ;;  %v236_v20 = vrot.slane %v234_v1, 5  ;;  %v248_v21 = vshll.u32 %v6016_v51, 16  ;;  %v6066_v58 = vld [vmem:[%s5950_s28 + $0x8] sm:$0xe] }
  0x1f   : > { %5522 = vmatprep.mubr.msk.bf16.mxu0 %vm331_vm3, %v4908_v2  ;;  %v271_v26 = vsel %vm6005_vm4, %v266_v3, %v270_v50  ;;  %v242_v27 = vrot.slane %v240_v4, 5  ;;  %v247_v28 = vrot.slane %v245_v17, 4  ;;  %v254_v29 = vshll.u32 %v6028_v63, 16  ;;  %v515_v2 = vld [vmem:[%s5950_s28 + $0x10] sm:$0xe] }
  0x20   : > { %v285_v32 = vsel %vm6005_vm4, %v280_v18, %v284_v55  ;;  %v237_v37 = vor.u32 %v236_v20, %v233_v19  ;;  %v250_v38 = vrot.slane %v248_v21, 5  ;;  %v550_v39 = vrot.slane %v6019_v56, 5  ;;  %v516_v19 = vld [vmem:[%s5950_s28 + $0x18] sm:$0xe]  ;;  %v5369_v1 = vld [vmem:[%s5950_s28 + $0x28] sm:$0xc] }
  0x21   : > { %v4910_v43 = vcombine.low %v271_v26, %v285_v32  ;;  %v256_v44 = vrot.slane %v254_v29, 5  ;;  %v554_v45 = vrot.slane %v6028_v63, 5  ;;  %v287_v47 = vshrl.u32 %v6036_v22, 16  ;;  %v5829_v5 = vld [vmem:[%s7539_s1 + $0x8] ss:$0 sps:$4 sm:$0xcc]  }
  0x22   : > { %v238_v48 = vrot.slane %v237_v37, 4  ;;  %v251_v49 = vor.u32 %v250_v38, %v247_v28  ;;  %v290_v50 = vshll.u32 %v6036_v22, 16  ;;  %v296_v52 = vshll.u32 %v6043_v31, 16 }
  0x23   : > { %5526 = vmatprep.mubr.msk.bf16.mxu1 %vm331_vm3, %v4910_v43  ;;  %v289_v54 = vrot.slane %v287_v47, 4  ;;  %v301_v55 = vshrl.u32 %v6049_v40, 16  ;;  %v304_v56 = vshll.u32 %v6049_v40, 16  ;;  %v310_v57 = vshll.u32 %v6052_v42, 16 }
  0x24   : > { %v243_v61 = vsel %vm6005_vm4, %v238_v48, %v242_v27  ;;  %v252_v62 = vrot.slane %v251_v49, 4  ;;  %v292_v63 = vrot.slane %v290_v50, 5  ;;  %v298_v0 = vrot.slane %v296_v52, 5  ;;  %v6096_v50 = vld [vmem:[%s5950_s28 + $0x20] sm:$0xe] }
  0x25   : > { %v303_v3 = vrot.slane %v301_v55, 4  ;;  %v306_v4 = vrot.slane %v304_v56, 5  ;;  %v312_v17 = vrot.slane %v310_v57, 5  ;;  %v4925_v18 = vrot.slane %v6059_v53, 9  ;;  %v6106_v55 = vld [vmem:[%s5950_s28 + $0x28] sm:$0xe] }
  0x26   : > { %v257_v20 = vsel %vm6005_vm4, %v252_v62, %v256_v44  ;;  %v293_v21 = vor.u32 %v292_v63, %v289_v54  ;;  %v4926_v26 = vrot.slane %v6066_v58, 9  ;;  %v4918_v27 = vcombine.low %v6013_v46, %v6016_v51 }
  0x27   : > { %v4909_v28 = vcombine.low %v243_v61, %v257_v20  ;;  %v307_v29 = vor.u32 %v306_v4, %v303_v3  ;;  %v543_v32 = vsel %vm6072_vm7, %v4925_v18, %v542_v23  ;;  %v4927_v37 = vrot.slane %v515_v2, 9  ;;  %v673_v3 = vld [vmem:[%s5950_s28 + $0x4] sm:$0x3] }
  0x28   : > { %v294_v38 = vrot.slane %v293_v21, 4  ;;  %v547_v43 = vsel %vm6072_vm7, %v4926_v26, %v546_v24  ;;  %v4928_v44 = vrot.slane %v516_v19, 9  ;;  %v721_v47 = vshrl.u32 %v515_v2, 16 }
  0x29   : > { %5523 = vmatmul.mubr.msk.bf16.vlgmr.msra.gmra.mxu0 %vm331_vm3, %v4909_v28  ;;  %v308_v48 = vrot.slane %v307_v29, 4  ;;  %v4933_v49 = vcombine.low %v543_v32, %v547_v43  ;;  %v551_v15 = vsel %vm6072_vm7, %v4927_v37, %v550_v39  ;;  %v724_v23 = vshll.u32 %v515_v2, 16  ;;  %v6109_v39 = vld [vmem:[%s5950_s28 + $0x30] sm:$0xe]  ;;  %v674_v28 = vld [vmem:[%s5950_s28 + $0xc] sm:$0x3] }
  0x2a   : > { %vm682_vm10 = vsmask.f32 6416  ;;  %v299_v16 = vsel %vm6005_vm4, %v294_v38, %v298_v0  ;;  %5541 = vmatpush3.bf16.msra.mxu0 %v5953_v9  ;;  %v555_v24 = vsel %vm6072_vm7, %v4928_v44, %v554_v45  ;;  %v6103_v52 = vrot.slane %v721_v47, 5  ;;  %v6119_v45 = vld [vmem:[%s5950_s28 + $0x38] sm:$0xe] }
  0x2b   : > { %v739_v54 = vshrl.u32 %v516_v19, 16  ;;  %v313_v56 = vsel %vm6005_vm4, %v308_v48, %v312_v17  ;;  %5542 = vmatprep.mubr.msk.bf16.mxu0 %vm331_vm3, %v4933_v49  ;;  %v4934_v57 = vcombine.low %v551_v15, %v555_v24  ;;  %v6114_v61 = vrot.slane %v724_v23, 6  ;;  %5777 = vmatprep.subr.msk.bf16.mxu0 %vm344_vm0, %v5934_v6  ;;  %v934_v44 = vld [vmem:[%s5950_s28 + $0x8] sm:$0xc]  ;;  %vm6181_vm12 = vmor %vm681_vm9, %vm682_vm10 }
  0x2c   : > { %v742_v9 = vshll.u32 %v516_v19, 16  ;;  %v4911_v62 = vcombine.low %v299_v16, %v313_v56  ;;  %v858_v0 = vsel %vm344_vm0, %v844_v10, 0  ;;  %v4929_v2 = vrot.slane %v6096_v50, 9  ;;  %v675_v56 = vld [vmem:[%s5950_s28 + $0x14] sm:$0x3] }
  0x2d   : > { %v6121_v63 = vrot.slane %v739_v54, 5  ;;  %v4930_v17 = vrot.slane %v6106_v55, 9  ;;  %v4920_v6 = vcombine.low %v6036_v22, %v6049_v40  ;;  %v4931_v18 = vrot.slane %v6109_v39, 9 }
  0x2e   : > { %v6128_v4 = vrot.slane %v742_v9, 6  ;;  %5527 = vmatmul.mubr.msk.bf16.vlgmr.msra.gmra.mxu1 %vm331_vm3, %v4911_v62  ;;  %v559_v19 = vsel %vm6072_vm7, %v4929_v2, %v558_v59  ;;  %v566_v20 = vrot.slane %v6043_v31, 5  ;;  %v4932_v21 = vrot.slane %v6119_v45, 9 }
  0x2f   : > { %v570_v26 = vrot.slane %v6052_v42, 5  ;;  %5531 = vmatpush3.bf16.msra.mxu1 %v5939_v7  ;;  %5532 = vmatprep.mubr.msk.bf16.mxu1 %vm331_vm3, %v4917_v35  ;;  %v563_v33 = vsel %vm6072_vm7, %v4930_v17, %v562_v60  ;;  %v685_v59 = vshrl.u32 %v6059_v53, 16  ;;  %v688_v31 = vshll.u32 %v6059_v53, 16  ;;  %v933_v35 = vld [vmem:[%s5950_s28] sm:$0xc] }
  0x30   : > { %v694_v29 = vshrl.u32 %v673_v3, 16  ;;  %5776 = vmatprep.subr.msk.bf16.mxu1 %vm344_vm0, %v844_v10  ;;  %v4935_v7 = vcombine.low %v559_v19, %v563_v33  ;;  %v567_v13 = vsel %vm6072_vm7, %v4931_v18, %v566_v20  ;;  %v697_v34 = vshll.u32 %v673_v3, 16  ;;  %v936_v33 = vld [vmem:[%s5950_s28 + $0x18] sm:$0xc] }
  0x31   : > { %v571_v14 = vsel %vm6072_vm7, %v4932_v21, %v570_v26  ;;  %5543 = vmatmul.mubr.msk.bf16.vlgmr.msra.gmra.mxu0 %vm331_vm3, %v4934_v57  ;;  %v687_v42 = vrot.slane %v685_v59, 5  ;;  %v690_v53 = vrot.slane %v688_v31, 6  ;;  %v703_v37 = vshrl.u32 %v6066_v58, 16 }
  0x32   : > { %v4936_v60 = vcombine.low %v567_v13, %v571_v14  ;;  %v696_v32 = vrot.slane %v694_v29, 5  ;;  %5561 = vmatpush3.bf16.msra.mxu0 %v5958_v11  ;;  %5546 = vmatprep.mubr.msk.bf16.mxu0 %vm331_vm3, %v4935_v7  ;;  %v699_v10 = vrot.slane %v697_v34, 6  ;;  %v706_v38 = vshll.u32 %v6066_v58, 16  ;;  %v677_v13 = vld [vmem:[%s5950_s28 + $0x24] sm:$0x3] }
  0x33   : > { %v712_v43 = vshrl.u32 %v674_v28, 16  ;;  %v691_v48 = vor.u32 %v690_v53, %v687_v42  ;;  %v715_v49 = vshll.u32 %v674_v28, 16  ;;  %v4950_v11 = vrot.slane %v933_v35, 10  ;;  %5779 = vmatprep.subr.msk.bf16.mxu0 %vm344_vm0, %v5945_v8 }
  0x34   : > { %v962_v15 = vrot.slane %v673_v3, 6  ;;  %v700_v23 = vor.u32 %v699_v10, %v696_v32  ;;  %v705_v16 = vrot.slane %v703_v37, 5  ;;  %v708_v24 = vrot.slane %v706_v38, 6  ;;  %v676_v3 = vld [vmem:[%s5950_s28 + $0x1c] sm:$0x3] }
  0x35   : > { %v714_v54 = vrot.slane %v712_v43, 5  ;;  %v692_v57 = vrot.slane %v691_v48, 4  ;;  %v717_v9 = vrot.slane %v715_v49, 6  ;;  %v4951_v2 = vrot.slane %v934_v44, 10  ;;  %v678_v10 = vld [vmem:[%s5950_s28 + $0x2c] sm:$0x3] }
  0x36   : > { %v963_v62 = vsel %vm6173_vm11, %v4950_v11, %v962_v15  ;;  %5533 = vmatmul.mubr.msk.bf16.vlgmr.msra.gmra.mxu1 %vm331_vm3, %v4918_v27  ;;  %v709_v8 = vor.u32 %v708_v24, %v705_v16  ;;  %v966_v17 = vrot.slane %v674_v28, 6  ;;  %v1126_v18 = vrot.slane %v5829_v5, 2  ;;  %v935_v27 = vld [vmem:[%s5950_s28 + $0x10] sm:$0xc]  ;;  %v937_v43 = vld [vmem:[%s5950_s28 + $0x20] sm:$0xc] }
  0x37   : > { %v727_v19 = vor.u32 %v6114_v61, %v6103_v52  ;;  %5551 = vmatpush3.bf16.msra.mxu1 %v858_v0  ;;  %5536 = vmatprep.mubr.msk.bf16.mxu1 %vm331_vm3, %v4919_v36  ;;  %v701_v20 = vsel %vm6181_vm12, %v692_v57, %v700_v23  ;;  %v718_v21 = vor.u32 %v717_v9, %v714_v54  ;;  %v730_v46 = vshrl.u32 %v675_v56, 16  ;;  %v938_v15 = vld [vmem:[%s5950_s28 + $0x28] sm:$0xc]  ;;  %v6232_v23 = vld [vmem:[%s7539_s1 + $0x10] sm:$0x3] }
  0x38   : > { %v733_v51 = vshll.u32 %v675_v56, 16  ;;  %v710_v26 = vrot.slane %v709_v8, 4  ;;  %v967_v28 = vsel %vm6173_vm11, %v4951_v2, %v966_v17  ;;  %5778 = vmatprep.subr.msk.bf16.mxu1 %vm344_vm0, %v1126_v18  ;;  %v745_v25 = vor.u32 %v6128_v4, %v6121_v63 }
  0x39   : > { %v728_v52 = vrot.slane %v727_v19, 4  ;;  %5547 = vmatmul.mubr.msk.bf16.gmra.mxu0 %vm331_vm3, %v4936_v60  ;;  %v4958_v30 = vcombine.low %v963_v62, %v967_v28  ;;  %v732_v36 = vrot.slane %v730_v46, 5  ;;  %v748_v0 = vshrl.u32 %v676_v3, 16  ;;  %v679_v19 = vld [vmem:[%s5950_s28 + $0x34] sm:$0x3] }
  0x3a   : > { %v735_v61 = vrot.slane %v733_v51, 6  ;;  %v719_v59 = vsel %vm6181_vm12, %v710_v26, %v718_v21  ;;  %v746_v31 = vrot.slane %v745_v25, 4  ;;  %v751_v29 = vshll.u32 %v676_v3, 16  ;;  %v680_v25 = vld [vmem:[%s5950_s28 + $0x3c] sm:$0x3] }
  0x3b   : > { %v4952_v7 = vrot.slane %v935_v27, 10  ;;  %v4941_v14 = vcombine.low %v701_v20, %v719_v59  ;;  %5562 = vmatprep.mubr.msk.bf16.mxu0 %vm331_vm3, %v4958_v30  ;;  %v750_v4 = vrot.slane %v748_v0, 5  ;;  %v970_v34 = vrot.slane %v675_v56, 6 }
  0x3c   : > { %v736_v63 = vor.u32 %v735_v61, %v732_v36  ;;  %v753_v35 = vrot.slane %v751_v29, 6  ;;  %v4953_v60 = vrot.slane %v936_v33, 10  ;;  %v974_v42 = vrot.slane %v676_v3, 6 }
  0x3d   : > { %v1140_v53 = vsel %vm344_vm0, %v1126_v18, 0  ;;  %v971_v5 = vsel %vm6173_vm11, %v4952_v7, %v970_v34  ;;  %v757_v37 = vshrl.u32 %v6096_v50, 16  ;;  %v760_v38 = vshll.u32 %v6096_v50, 16 }
  0x3e   : > { %v737_v32 = vsel %vm6181_vm12, %v728_v52, %v736_v63  ;;  %5537 = vmatmul.mubr.msk.bf16.gmra.mxu1 %vm331_vm3, %v4920_v6  ;;  %v754_v44 = vor.u32 %v753_v35, %v750_v4  ;;  %v975_v48 = vsel %vm6173_vm11, %v4953_v60, %v974_v42  ;;  %v766_v49 = vshrl.u32 %v677_v13, 16 }
  0x3f   : > { %v769_v11 = vshll.u32 %v677_v13, 16  ;;  %5552 = vmatprep.mubr.msk.bf16.mxu1 %vm331_vm3, %v4941_v14  ;;  %v4959_v50 = vcombine.low %v971_v5, %v975_v48  ;;  %v759_v16 = vrot.slane %v757_v37, 5  ;;  %v762_v24 = vrot.slane %v760_v38, 6  ;;  %v4983_v5 = vld [vmem:[%s5950_s28 + $0x8] sm:$0xf] }
  0x40   : > { %v775_v22 = vshrl.u32 %v6106_v55, 16  ;;  %v755_v40 = vsel %vm6181_vm12, %v746_v31, %v754_v44  ;;  %v768_v6 = vrot.slane %v766_v49, 5  ;;  %v778_v56 = vshll.u32 %v6106_v55, 16  ;;  %v939_v31 = vld [vmem:[%s5950_s28 + $0x30] sm:$0xc] }
  0x41   : > { %v771_v54 = vrot.slane %v769_v11, 6  ;;  %v4942_v57 = vcombine.low %v737_v32, %v755_v40  ;;  %5563 = vmatmul.mubr.msk.bf16.vlgmr.msra.gmra.mxu0 %vm331_vm3, %v4959_v50  ;;  %v763_v9 = vor.u32 %v762_v24, %v759_v16  ;;  %v784_v2 = vshrl.u32 %v678_v10, 16  ;;  %v940_v32 = vld [vmem:[%s5950_s28 + $0x38] sm:$0xc]  ;;  %v6263_v44 = vld [vmem:[%s5950_s28 + $0xc] sm:$0x1] }
  0x42   : > { %v777_v62 = vrot.slane %v775_v22, 5  ;;  %5581 = vmatpush3.bf16.msra.mxu0 %v5962_v12  ;;  %v780_v8 = vrot.slane %v778_v56, 6  ;;  %v787_v17 = vshll.u32 %v678_v10, 16  ;;  %v4954_v18 = vrot.slane %v937_v43, 10 }
  0x43   : > { %v772_v3 = vor.u32 %v771_v54, %v768_v6  ;;  %v764_v20 = vrot.slane %v763_v9, 4  ;;  %v786_v21 = vrot.slane %v784_v2, 5  ;;  %v978_v46 = vrot.slane %v677_v13, 6  ;;  %5781 = vmatprep.subr.msk.bf16.mxu0 %vm344_vm0, %v6232_v23  ;;  %v5831_v40 = vld [vmem:[%s7539_s1 + $0xc] ss:$0 sps:$4 sm:$0xcc]  }
  0x44   : > { %v4955_v51 = vrot.slane %v938_v15, 10  ;;  %v781_v55 = vor.u32 %v780_v8, %v777_v62  ;;  %v789_v27 = vrot.slane %v787_v17, 6  ;;  %v982_v26 = vrot.slane %v678_v10, 6  ;;  %v4985_v15 = vld [vmem:[%s5950_s28 + $0x10] sm:$0xf] }
  0x45   : > { %v793_v28 = vshrl.u32 %v6109_v39, 16  ;;  %v773_v12 = vsel %vm6181_vm12, %v764_v20, %v772_v3  ;;  %v979_v52 = vsel %vm6173_vm11, %v4954_v18, %v978_v46  ;;  %v796_v30 = vshll.u32 %v6109_v39, 16  ;;  %v5830_v3 = vld [vmem:[%s5950_s28 + $0x8] ss:$8 sps:$4 sm:$0xff]   ;;  %v4987_v18 = vld [vmem:[%s5950_s28 + $0x18] sm:$0xf] }
  0x46   : > { %v802_v36 = vshrl.u32 %v679_v19, 16  ;;  %5553 = vmatmul.mubr.msk.bf16.vlgmr.msra.gmra.mxu1 %vm331_vm3, %v4942_v57  ;;  %v782_v61 = vrot.slane %v781_v55, 4  ;;  %v790_v0 = vor.u32 %v789_v27, %v786_v21  ;;  %v983_v33 = vsel %vm6173_vm11, %v4955_v51, %v982_v26  ;;  %v6275_v57 = vld [vmem:[%s5950_s28 + $0x14] sm:$0x1]  ;;  %v6283_v51 = vld [vmem:[%s5950_s28 + $0x1c] sm:$0x1] }
  0x47   : > { %v795_v59 = vrot.slane %v793_v28, 5  ;;  %5571 = vmatpush3.bf16.msra.mxu1 %v1140_v53  ;;  %v4960_v29 = vcombine.low %v979_v52, %v983_v33  ;;  %v798_v7 = vrot.slane %v796_v30, 6  ;;  %v805_v14 = vshll.u32 %v679_v19, 16 }
  0x48   : > { %v804_v13 = vrot.slane %v802_v36, 5  ;;  %v791_v39 = vsel %vm6181_vm12, %v782_v61, %v790_v0  ;;  %v811_v63 = vshrl.u32 %v6119_v45, 16  ;;  %v814_v4 = vshll.u32 %v6119_v45, 16  ;;  %v6291_v61 = vld [vmem:[%s5950_s28 + $0x24] sm:$0x1] }
  0x49   : > { %v820_v34 = vshrl.u32 %v680_v25, 16  ;;  %v4943_v35 = vcombine.low %v773_v12, %v791_v39  ;;  %5566 = vmatprep.mubr.msk.bf16.mxu0 %vm331_vm3, %v4960_v29  ;;  %v799_v60 = vor.u32 %v798_v7, %v795_v59  ;;  %v807_v42 = vrot.slane %v805_v14, 6  ;;  %v4989_v12 = vld [vmem:[%s5950_s28 + $0x20] sm:$0xf]  ;;  %v4991_v29 = vld [vmem:[%s5950_s28 + $0x28] sm:$0xf] }
  0x4a   : > { %v823_v53 = vshll.u32 %v680_v25, 16  ;;  %v813_v10 = vrot.slane %v811_v63, 5  ;;  %v816_v37 = vrot.slane %v814_v4, 6  ;;  %v4956_v43 = vrot.slane %v939_v31, 10  ;;  %v6298_v63 = vld [vmem:[%s5950_s28 + $0x2c] sm:$0x1] }
  0x4b   : > { %v822_v38 = vrot.slane %v820_v34, 5  ;;  %5556 = vmatprep.mubr.msk.bf16.mxu1 %vm331_vm3, %v4943_v35  ;;  %v800_v45 = vrot.slane %v799_v60, 4  ;;  %v808_v48 = vor.u32 %v807_v42, %v804_v13  ;;  %v986_v11 = vrot.slane %v679_v19, 6  ;;  %v4993_v42 = vld [vmem:[%s5950_s28 + $0x30] sm:$0xf] }
  0x4c   : > { %v825_v49 = vrot.slane %v823_v53, 6  ;;  %v817_v50 = vor.u32 %v816_v37, %v813_v10  ;;  %v4957_v16 = vrot.slane %v940_v32, 10  ;;  %v990_v24 = vrot.slane %v680_v25, 6 }
  0x4d   : > { %v1232_v22 = vshrl.u32 %v4983_v5, 16  ;;  %v809_v6 = vsel %vm6181_vm12, %v800_v45, %v808_v48  ;;  %v987_v56 = vsel %vm6173_vm11, %v4956_v43, %v986_v11  ;;  %v1235_v9 = vshll.u32 %v4983_v5, 16  ;;  %v5832_v5 = vld [vmem:[%s5950_s28 + $0x18] ss:$8 sps:$4 sm:$0xff]   ;;  %v5833_v11 = vld [vmem:[%s5950_s28 + $0x28] ss:$8 sps:$4 sm:$0xff]  }
  0x4e   : > { %v826_v54 = vor.u32 %v825_v49, %v822_v38  ;;  %v818_v62 = vrot.slane %v817_v50, 4  ;;  %v991_v2 = vsel %vm6173_vm11, %v4957_v16, %v990_v24  ;;  %v1241_v17 = vshll.u32 %v6263_v44, 16  ;;  %v6307_v38 = vld [vmem:[%s5950_s28 + $0x34] sm:$0x1] }
  0x4f   : > { %v1234_v8 = vrot.slane %v1232_v22, 4  ;;  %v4961_v19 = vcombine.low %v987_v56, %v991_v2  ;;  %v1237_v20 = vrot.slane %v1235_v9, 5  ;;  %v1246_v21 = vshrl.u32 %v4985_v15, 16  ;;  %v4995_v22 = vld [vmem:[%s5950_s28 + $0x38] sm:$0xf] }
  0x50   : > { %v1249_v46 = vshll.u32 %v4985_v15, 16  ;;  %v827_v55 = vsel %vm6181_vm12, %v818_v62, %v826_v54  ;;  %v1243_v27 = vrot.slane %v1241_v17, 5  ;;  %v1255_v26 = vshll.u32 %v6275_v57, 16  ;;  %v6318_v9 = vld [vmem:[%s5950_s28 + $0x3c] sm:$0x1] }
  0x51   : > { %v1516_v28 = vrot.slane %v5831_v40, 2  ;;  %v4944_v52 = vcombine.low %v809_v6, %v827_v55  ;;  %5567 = vmatmul.mubr.msk.bf16.gmra.mxu0 %vm331_vm3, %v4961_v19  ;;  %v1238_v25 = vor.u32 %v1237_v20, %v1234_v8  ;;  %v1248_v30 = vrot.slane %v1246_v21, 4  ;;  %v4997_v8 = vld [vmem:[%s5950_s28 + $0x40] sm:$0xf]  ;;  %v6326_v21 = vld [vmem:[%s5950_s28 + $0x44] sm:$0x1] }
  0x52   : > { %v1251_v36 = vrot.slane %v1249_v46, 5  ;;  %v1257_v0 = vrot.slane %v1255_v26, 5  ;;  %v1260_v33 = vshrl.u32 %v4987_v18, 16  ;;  %v1263_v59 = vshll.u32 %v4987_v18, 16 }
  0x53   : > { %5780 = vmatprep.subr.msk.bf16.mxu1 %vm344_vm0, %v1516_v28  ;;  %v1269_v31 = vshll.u32 %v6283_v51, 16  ;;  %5557 = vmatmul.mubr.msk.bf16.gmra.mxu1 %vm331_vm3, %v4944_v52  ;;  %v1239_v7 = vrot.slane %v1238_v25, 4  ;;  %v1274_v14 = vshrl.u32 %v4989_v12, 16  ;;  %v1277_v39 = vshll.u32 %v4989_v12, 16 }
  0x54   : > { %v1252_v13 = vor.u32 %v1251_v36, %v1248_v30  ;;  %5572 = vmatprep.mubr.msk.bf16.mxu1 %vm331_vm3, %v5830_v3  ;;  %v1262_v4 = vrot.slane %v1260_v33, 4  ;;  %v1265_v34 = vrot.slane %v1263_v59, 5  ;;  %v1283_v60 = vshll.u32 %v6291_v61, 16  ;;  %v5007_v30 = vld [vmem:[%s5950_s28 + $0x8] sm:$0xe] }
  0x55   : > { %v1271_v35 = vrot.slane %v1269_v31, 5  ;;  %v1244_v53 = vsel %vm6005_vm4, %v1239_v7, %v1243_v27  ;;  %v1276_v10 = vrot.slane %v1274_v14, 4  ;;  %v1279_v37 = vrot.slane %v1277_v39, 5  ;;  %v5834_v33 = vld [vmem:[%s5950_s28 + $0x38] ss:$8 sps:$4 sm:$0xff]  }
  0x56   : > { %v1253_v32 = vrot.slane %v1252_v13, 4  ;;  %v1266_v43 = vor.u32 %v1265_v34, %v1262_v4  ;;  %v1285_v45 = vrot.slane %v1283_v60, 5  ;;  %v1530_v48 = vsel %vm344_vm0, %v1516_v28, 0  ;;  %v5008_v4 = vld [vmem:[%s5950_s28 + $0x10] sm:$0xe] }
  0x57   : > { %v1783_v49 = vsel %vm344_vm0, %v6232_v23, 0  ;;  %v1280_v50 = vor.u32 %v1279_v37, %v1276_v10  ;;  %v1288_v16 = vshrl.u32 %v4991_v29, 16  ;;  %v1291_v24 = vshll.u32 %v4991_v29, 16  ;;  %v6338_v29 = vld [vmem:[%s7539_s1 + $0x14] sm:$0x3] }
  0x58   : > { %v1258_v15 = vsel %vm6005_vm4, %v1253_v32, %v1257_v0  ;;  %v1267_v6 = vrot.slane %v1266_v43, 4  ;;  %v1297_v54 = vshll.u32 %v6298_v63, 16  ;;  %v1302_v56 = vshrl.u32 %v4993_v42, 16 }
  0x59   : > { %v4999_v40 = vcombine.low %v1244_v53, %v1258_v15  ;;  %v1281_v62 = vrot.slane %v1280_v50, 4  ;;  %v1290_v2 = vrot.slane %v1288_v16, 4  ;;  %v1293_v23 = vrot.slane %v1291_v24, 5  ;;  %v6346_v53 = vld [vmem:[%s5950_s28 + $0xc] sm:$0x3] }
  0x5a   : > { %v1305_v3 = vshll.u32 %v4993_v42, 16  ;;  %v1272_v17 = vsel %vm6005_vm4, %v1267_v6, %v1271_v35  ;;  %v1299_v18 = vrot.slane %v1297_v54, 5  ;;  %v1304_v19 = vrot.slane %v1302_v56, 4  ;;  %v6357_v24 = vld [vmem:[%s5950_s28 + $0x14] sm:$0x3] }
  0x5b   : > { %5582 = vmatprep.mubr.msk.bf16.mxu0 %vm331_vm3, %v4999_v40  ;;  %v1311_v20 = vshll.u32 %v6307_v38, 16  ;;  %5573 = vmatmul.mubr.msk.bf16.vlgmr.msra.gmra.mxu1 %vm331_vm3, %v5832_v5  ;;  %v1286_v46 = vsel %vm6005_vm4, %v1281_v62, %v1285_v45  ;;  %v1294_v55 = vor.u32 %v1293_v23, %v1290_v2  ;;  %v1316_v26 = vshrl.u32 %v4995_v22, 16 }
  0x5c   : > { %v1307_v27 = vrot.slane %v1305_v3, 5  ;;  %v5000_v28 = vcombine.low %v1272_v17, %v1286_v46  ;;  %5591 = vmatpush3.bf16.msra.mxu1 %v1530_v48  ;;  %5576 = vmatprep.mubr.msk.bf16.mxu1 %vm331_vm3, %v5833_v11  ;;  %v1319_v52 = vshll.u32 %v4995_v22, 16  ;;  %v1325_v25 = vshll.u32 %v6318_v9, 16 }
  0x5d   : > { %v1313_v12 = vrot.slane %v1311_v20, 5  ;;  %v1295_v36 = vrot.slane %v1294_v55, 4  ;;  %v1318_v59 = vrot.slane %v1316_v26, 4  ;;  %v1330_v31 = vshrl.u32 %v4997_v8, 16 }
  0x5e   : > { %v1308_v0 = vor.u32 %v1307_v27, %v1304_v19  ;;  %5583 = vmatmul.mubr.msk.bf16.vlgmr.msra.gmra.mxu0 %vm331_vm3, %v5000_v28  ;;  %v1321_v7 = vrot.slane %v1319_v52, 5  ;;  %v1327_v13 = vrot.slane %v1325_v25, 5  ;;  %v1333_v14 = vshll.u32 %v4997_v8, 16 }
  0x5f   : > { %v1339_v39 = vshll.u32 %v6326_v21, 16  ;;  %5601 = vmatpush3.bf16.msra.mxu0 %v1783_v49  ;;  %v1300_v34 = vsel %vm6005_vm4, %v1295_v36, %v1299_v18  ;;  %v1332_v60 = vrot.slane %v1330_v31, 4  ;;  %v5015_v42 = vrot.slane %v5007_v30, 9 }
  0x60   : > { %v1309_v35 = vrot.slane %v1308_v0, 4  ;;  %v1322_v32 = vor.u32 %v1321_v7, %v1318_v59  ;;  %v1335_v5 = vrot.slane %v1333_v14, 5  ;;  %v1470_v37 = vrot.slane %v6263_v44, 5  ;;  %5783 = vmatprep.subr.msk.bf16.mxu0 %vm344_vm0, %v6338_v29  ;;  %v5010_v0 = vld [vmem:[%s5950_s28 + $0x20] sm:$0xe] }
  0x61   : > { %v1341_v10 = vrot.slane %v1339_v39, 5  ;;  %v5016_v45 = vrot.slane %v5008_v4, 9  ;;  %v1474_v48 = vrot.slane %v6275_v57, 5  ;;  %v1614_v49 = vshrl.u32 %v5007_v30, 16 }
  0x62   : > { %v1314_v43 = vsel %vm6005_vm4, %v1309_v35, %v1313_v12  ;;  %v1323_v15 = vrot.slane %v1322_v32, 4  ;;  %v1336_v50 = vor.u32 %v1335_v5, %v1332_v60  ;;  %v1471_v16 = vsel %vm6072_vm7, %v5015_v42, %v1470_v37  ;;  %v6366_v57 = vld [vmem:[%s7539_s1 + $0x10] ss:$0 sps:$4 sm:$0xcc]   ;;  %v5009_v12 = vld [vmem:[%s5950_s28 + $0x18] sm:$0xe] }
  0x63   : > { %v5001_v11 = vcombine.low %v1300_v34, %v1314_v43  ;;  %5577 = vmatmul.mubr.msk.bf16.gmra.mxu1 %vm331_vm3, %v5834_v33  ;;  %v1475_v44 = vsel %vm6072_vm7, %v5016_v45, %v1474_v48  ;;  %v1616_v22 = vrot.slane %v1614_v49, 5  ;;  %v1617_v40 = vshll.u32 %v5007_v30, 16  ;;  %v6394_v5 = vld [vmem:[%s5950_s28 + $0x24] sm:$0x3] }
  0x64   : > { %v1623_v6 = vshrl.u32 %v6346_v53, 16  ;;  %v1328_v54 = vsel %vm6005_vm4, %v1323_v15, %v1327_v13  ;;  %v1337_v56 = vrot.slane %v1336_v50, 4  ;;  %v5023_v62 = vcombine.low %v1471_v16, %v1475_v44  ;;  %v6383_v13 = vld [vmem:[%s5950_s28 + $0x1c] sm:$0x3] }
  0x65   : > { %5586 = vmatprep.mubr.msk.bf16.mxu0 %vm331_vm3, %v5001_v11  ;;  %v1626_v2 = vshll.u32 %v6346_v53, 16  ;;  %v1619_v23 = vrot.slane %v1617_v40, 6  ;;  %v1632_v8 = vshrl.u32 %v5008_v4, 16  ;;  %v1635_v17 = vshll.u32 %v5008_v4, 16 }
  0x66   : > { %v1625_v3 = vrot.slane %v1623_v6, 5  ;;  %v1342_v18 = vsel %vm6005_vm4, %v1337_v56, %v1341_v10  ;;  %5592 = vmatprep.mubr.msk.bf16.mxu1 %vm331_vm3, %v5023_v62  ;;  %v1641_v20 = vshrl.u32 %v6357_v24, 16  ;;  %v1644_v46 = vshll.u32 %v6357_v24, 16 }
  0x67   : > { %v1628_v19 = vrot.slane %v1626_v2, 6  ;;  %v5002_v55 = vcombine.low %v1328_v54, %v1342_v18  ;;  %v1620_v27 = vor.u32 %v1619_v23, %v1616_v22  ;;  %v1634_v26 = vrot.slane %v1632_v8, 5  ;;  %v5012_v23 = vld [vmem:[%s5950_s28 + $0x30] sm:$0xe] }
  0x68   : > { %v1637_v28 = vrot.slane %v1635_v17, 6  ;;  %v1643_v25 = vrot.slane %v1641_v20, 5  ;;  %v1646_v30 = vrot.slane %v1644_v46, 6  ;;  %v1930_v36 = vrot.slane %v6366_v57, 2  ;;  %v5011_v57 = vld [vmem:[%s5950_s28 + $0x28] sm:$0xe] }
  0x69   : > { %v1629_v52 = vor.u32 %v1628_v19, %v1625_v3  ;;  %5587 = vmatmul.mubr.msk.bf16.gmra.mxu0 %vm331_vm3, %v5002_v55  ;;  %v1621_v33 = vrot.slane %v1620_v27, 4  ;;  %v5017_v31 = vrot.slane %v5009_v12, 9  ;;  %v1478_v7 = vrot.slane %v6283_v51, 5  ;;  %v6410_v19 = vld [vmem:[%s5950_s28 + $0x2c] sm:$0x3] }
  0x6a   : > { %v1638_v59 = vor.u32 %v1637_v28, %v1634_v26  ;;  %v1647_v14 = vor.u32 %v1646_v30, %v1643_v25  ;;  %5782 = vmatprep.subr.msk.bf16.mxu1 %vm344_vm0, %v1930_v36  ;;  %v5018_v39 = vrot.slane %v5010_v0, 9  ;;  %v1482_v4 = vrot.slane %v6291_v61, 5 }
  0x6b   : > { %v1650_v34 = vshrl.u32 %v5009_v12, 16  ;;  %v1630_v35 = vsel %vm6181_vm12, %v1621_v33, %v1629_v52  ;;  %v1479_v42 = vsel %vm6072_vm7, %v5017_v31, %v1478_v7  ;;  %v1653_v32 = vshll.u32 %v5009_v12, 16 }
  0x6c   : > { %v1639_v60 = vrot.slane %v1638_v59, 4  ;;  %v1483_v51 = vsel %vm6072_vm7, %v5018_v39, %v1482_v4  ;;  %v1659_v37 = vshrl.u32 %v6383_v13, 16  ;;  %v1662_v61 = vshll.u32 %v6383_v13, 16 }
  0x6d   : > { %v1652_v10 = vrot.slane %v1650_v34, 5  ;;  %v5024_v45 = vcombine.low %v1479_v42, %v1483_v51  ;;  %v1655_v48 = vrot.slane %v1653_v32, 6  ;;  %v1668_v49 = vshrl.u32 %v5010_v0, 16  ;;  %v5013_v42 = vld [vmem:[%s5950_s28 + $0x38] sm:$0xe] }
  0x6e   : > { %v1648_v43 = vsel %vm6181_vm12, %v1639_v60, %v1647_v14  ;;  %v1661_v15 = vrot.slane %v1659_v37, 5  ;;  %v1664_v50 = vrot.slane %v1662_v61, 6  ;;  %v1671_v16 = vshll.u32 %v5010_v0, 16  ;;  %v5014_v32 = vld [vmem:[%s5950_s28 + $0x40] sm:$0xe] }
  0x6f   : > { %v5040_v11 = vcombine.low %v1630_v35, %v1648_v43  ;;  %5593 = vmatmul.mubr.msk.bf16.vlgmr.msra.gmra.mxu1 %vm331_vm3, %v5024_v45  ;;  %v1656_v44 = vor.u32 %v1655_v48, %v1652_v10  ;;  %v1670_v22 = vrot.slane %v1668_v49, 5  ;;  %v1677_v40 = vshrl.u32 %v6394_v5, 16  ;;  %v6435_v43 = vld [vmem:[%s7539_s1 + $0x18] sm:$0x3] }
  0x70   : > { %v1680_v6 = vshll.u32 %v6394_v5, 16  ;;  %v1665_v54 = vor.u32 %v1664_v50, %v1661_v15  ;;  %v1673_v56 = vrot.slane %v1671_v16, 6  ;;  %v1944_v62 = vsel %vm344_vm0, %v1930_v36, 0  ;;  %v6421_v36 = vld [vmem:[%s5950_s28 + $0x34] sm:$0x3] }
  0x71   : > { %5602 = vmatprep.mubr.msk.bf16.mxu0 %vm331_vm3, %v5040_v11  ;;  %v2062_v2 = vsel %vm344_vm0, %v6338_v29, 0  ;;  %v1657_v3 = vrot.slane %v1656_v44, 4  ;;  %v1679_v8 = vrot.slane %v1677_v40, 5  ;;  %5611 = vmatpush3.bf16.msra.mxu1 %v1944_v62  ;;  %v5019_v18 = vrot.slane %v5011_v57, 9  ;;  %v6440_v15 = vld [vmem:[%s5950_s28 + $0x3c] sm:$0x3] }
  0x72   : > { %v1682_v17 = vrot.slane %v1680_v6, 6  ;;  %v1674_v20 = vor.u32 %v1673_v56, %v1670_v22  ;;  %v1486_v46 = vrot.slane %v6298_v63, 5  ;;  %v5020_v55 = vrot.slane %v5012_v23, 9 }
  0x73   : > { %v1490_v27 = vrot.slane %v6307_v38, 5  ;;  %v1666_v26 = vsel %vm6181_vm12, %v1657_v3, %v1665_v54  ;;  %v1686_v29 = vshrl.u32 %v5011_v57, 16  ;;  %v1689_v12 = vshll.u32 %v5011_v57, 16 }
  0x74   : > { %v1683_v28 = vor.u32 %v1682_v17, %v1679_v8  ;;  %v1675_v52 = vrot.slane %v1674_v20, 4  ;;  %v1487_v25 = vsel %vm6072_vm7, %v5019_v18, %v1486_v46  ;;  %v1695_v63 = vshrl.u32 %v6410_v19, 16 }
  0x75   : > { %v1491_v30 = vsel %vm6072_vm7, %v5020_v55, %v1490_v27  ;;  %v1688_v0 = vrot.slane %v1686_v29, 5  ;;  %v1691_v33 = vrot.slane %v1689_v12, 6  ;;  %v1698_v59 = vshll.u32 %v6410_v19, 16 }
  0x76   : > { %v5025_v38 = vcombine.low %v1487_v25, %v1491_v30  ;;  %v1684_v31 = vsel %vm6181_vm12, %v1675_v52, %v1683_v28  ;;  %v1697_v7 = vrot.slane %v1695_v63, 5  ;;  %v1704_v14 = vshrl.u32 %v5012_v23, 16  ;;  %v5837_v25 = vld [vmem:[%s7539_s1 + $0x14] ss:$0 sps:$4 sm:$0xcc]  }
  0x77   : > { %v1707_v39 = vshll.u32 %v5012_v23, 16  ;;  %v5041_v4 = vcombine.low %v1666_v26, %v1684_v31  ;;  %v1692_v34 = vor.u32 %v1691_v33, %v1688_v0  ;;  %v1700_v35 = vrot.slane %v1698_v59, 6  ;;  %v5048_v23 = vld [vmem:[%s5950_s28 + $0x8] sm:$0xc]  ;;  %v5049_v26 = vld [vmem:[%s5950_s28 + $0x10] sm:$0xc] }
  0x78   : > { %5596 = vmatprep.mubr.msk.bf16.mxu1 %vm331_vm3, %v5025_v38  ;;  %v1713_v60 = vshrl.u32 %v6421_v36, 16  ;;  %v1706_v51 = vrot.slane %v1704_v14, 5  ;;  %v1716_v37 = vshll.u32 %v6421_v36, 16  ;;  %v5021_v61 = vrot.slane %v5013_v42, 9  ;;  %v5050_v33 = vld [vmem:[%s5950_s28 + $0x18] sm:$0xc] }
  0x79   : > { %v1709_v10 = vrot.slane %v1707_v39, 6  ;;  %5603 = vmatmul.mubr.msk.bf16.vlgmr.msra.gmra.mxu0 %vm331_vm3, %v5041_v4  ;;  %v1693_v45 = vrot.slane %v1692_v34, 4  ;;  %v1701_v48 = vor.u32 %v1700_v35, %v1697_v7  ;;  %v1494_v11 = vrot.slane %v6318_v9, 5 }
  0x7a   : > { %v1715_v49 = vrot.slane %v1713_v60, 5  ;;  %5621 = vmatpush3.bf16.msra.mxu0 %v2062_v2  ;;  %v1718_v16 = vrot.slane %v1716_v37, 6  ;;  %v5022_v44 = vrot.slane %v5014_v32, 9  ;;  %v1498_v22 = vrot.slane %v6326_v21, 5  ;;  %v6452_v2 = vld [vmem:[%s5950_s28 + $0x44] sm:$0x3] }
  0x7b   : > { %v1710_v50 = vor.u32 %v1709_v10, %v1706_v51  ;;  %v1702_v40 = vsel %vm6181_vm12, %v1693_v45, %v1701_v48  ;;  %v1495_v6 = vsel %vm6072_vm7, %v5021_v61, %v1494_v11  ;;  %v1722_v57 = vshrl.u32 %v5013_v42, 16  ;;  %5785 = vmatprep.subr.msk.bf16.mxu0 %vm344_vm0, %v6435_v43  ;;  %v5051_v60 = vld [vmem:[%s5950_s28 + $0x20] sm:$0xc]  ;;  %v5052_v37 = vld [vmem:[%s5950_s28 + $0x28] sm:$0xc] }
  0x7c   : > { %v1725_v54 = vshll.u32 %v5013_v42, 16  ;;  %v1719_v56 = vor.u32 %v1718_v16, %v1715_v49  ;;  %v1499_v62 = vsel %vm6072_vm7, %v5022_v44, %v1498_v22  ;;  %v1731_v21 = vshrl.u32 %v6440_v15, 16  ;;  %v5836_v48 = vld [vmem:[%s5950_s28 + $0x10] ss:$8 sps:$4 sm:$0xff]  }
  0x7d   : > { %v1711_v9 = vrot.slane %v1710_v50, 4  ;;  %v5026_v3 = vcombine.low %v1495_v6, %v1499_v62  ;;  %v1724_v8 = vrot.slane %v1722_v57, 5  ;;  %v1734_v18 = vshll.u32 %v6440_v15, 16  ;;  %v5053_v49 = vld [vmem:[%s5950_s28 + $0x30] sm:$0xc] }
  0x7e   : > { %v1727_v17 = vrot.slane %v1725_v54, 6  ;;  %v1733_v46 = vrot.slane %v1731_v21, 5  ;;  %v1740_v55 = vshrl.u32 %v5014_v32, 16  ;;  %v1743_v27 = vshll.u32 %v5014_v32, 16  ;;  %v5054_v11 = vld [vmem:[%s5950_s28 + $0x38] sm:$0xc] }
  0x7f   : > { %v1720_v20 = vsel %vm6181_vm12, %v1711_v9, %v1719_v56  ;;  %5597 = vmatmul.mubr.msk.bf16.gmra.mxu1 %vm331_vm3, %v5026_v3  ;;  %v1736_v12 = vrot.slane %v1734_v18, 6  ;;  %v1749_v52 = vshrl.u32 %v6452_v2, 16  ;;  %v1752_v38 = vshll.u32 %v6452_v2, 16  ;;  %v5089_v9 = vld [vmem:[%s5950_s28 + $0x10] sm:$0xf] }
  0x80   : > { %v5042_v28 = vcombine.low %v1702_v40, %v1720_v20  ;;  %v1728_v29 = vor.u32 %v1727_v17, %v1724_v8  ;;  %v1742_v30 = vrot.slane %v1740_v55, 5  ;;  %v1745_v63 = vrot.slane %v1743_v27, 6  ;;  %v5055_v40 = vld [vmem:[%s5950_s28 + $0x40] sm:$0xc]  ;;  %v5090_v56 = vld [vmem:[%s5950_s28 + $0x14] sm:$0x1] }
  0x81   : > { %v5056_v0 = vrot.slane %v5048_v23, 10  ;;  %v1737_v31 = vor.u32 %v1736_v12, %v1733_v46  ;;  %v1751_v7 = vrot.slane %v1749_v52, 5  ;;  %v1884_v14 = vrot.slane %v6346_v53, 6  ;;  %v5091_v3 = vld [vmem:[%s5950_s28 + $0x18] sm:$0xf] }
  0x82   : > { %5606 = vmatprep.mubr.msk.bf16.mxu0 %vm331_vm3, %v5042_v28  ;;  %v1729_v59 = vrot.slane %v1728_v29, 4  ;;  %v1746_v39 = vor.u32 %v1745_v63, %v1742_v30  ;;  %v1754_v4 = vrot.slane %v1752_v38, 6  ;;  %v5057_v34 = vrot.slane %v5049_v26, 10  ;;  %v5092_v20 = vld [vmem:[%s5950_s28 + $0x1c] sm:$0x1] }
  0x83   : > { %v1888_v35 = vrot.slane %v6357_v24, 6  ;;  %v1885_v32 = vsel %vm6173_vm11, %v5056_v0, %v1884_v14  ;;  %v2281_v51 = vrot.slane %v5837_v25, 2  ;;  %v5058_v10 = vrot.slane %v5050_v33, 10  ;;  %v6509_v26 = vld [vmem:[%s5950_s28 + $0x10] sm:$0xe] }
  0x84   : > { %v1738_v42 = vsel %vm6181_vm12, %v1729_v59, %v1737_v31  ;;  %v1747_v61 = vrot.slane %v1746_v39, 4  ;;  %v1755_v53 = vor.u32 %v1754_v4, %v1751_v7  ;;  %v1892_v24 = vrot.slane %v6383_v13, 6  ;;  %v6518_v12 = vld [vmem:[%s5950_s28 + $0x18] sm:$0xe]  ;;  %v5838_v52 = vld [vmem:[%s5950_s28 + $0x20] ss:$8 sps:$4 sm:$0xff]  }
  0x85   : > { %v1889_v45 = vsel %vm6173_vm11, %v5057_v34, %v1888_v35  ;;  %5784 = vmatprep.subr.msk.bf16.mxu1 %vm344_vm0, %v2281_v51  ;;  %v5059_v16 = vrot.slane %v5051_v60, 10  ;;  %v1896_v44 = vrot.slane %v6394_v5, 6  ;;  %v2295_v22 = vsel %vm344_vm0, %v2281_v51, 0  ;;  %v5841_v0 = vld [vmem:[%s7539_s1 + $0x18] ss:$0 sps:$4 sm:$0xcc]  }
  0x86   : > { %v5064_v50 = vcombine.low %v1885_v32, %v1889_v45  ;;  %v1756_v6 = vsel %vm6181_vm12, %v1747_v61, %v1755_v53  ;;  %v1893_v57 = vsel %vm6173_vm11, %v5058_v10, %v1892_v24  ;;  %v6492_v13 = vsel %vm344_vm0, %v6435_v43, 0  ;;  %v5839_v33 = vld [vmem:[%s5950_s28 + $0x30] ss:$8 sps:$4 sm:$0xff]   ;;  %v5094_v39 = vld [vmem:[%s5950_s28 + $0x24] sm:$0x1] }
  0x87   : > { %v5060_v54 = vrot.slane %v5052_v37, 10  ;;  %v5043_v62 = vcombine.low %v1738_v42, %v1756_v6  ;;  %v1897_v5 = vsel %vm6173_vm11, %v5059_v16, %v1896_v44  ;;  %v1900_v21 = vrot.slane %v6410_v19, 6  ;;  %v5095_v4 = vld [vmem:[%s5950_s28 + $0x28] sm:$0xf]  ;;  %v5096_v61 = vld [vmem:[%s5950_s28 + $0x2c] sm:$0x1] }
  0x88   : > { %5612 = vmatprep.mubr.msk.bf16.mxu1 %vm331_vm3, %v5064_v50  ;;  %v5061_v23 = vrot.slane %v5053_v49, 10  ;;  %v5065_v8 = vcombine.low %v1893_v57, %v1897_v5  ;;  %v1904_v17 = vrot.slane %v6421_v36, 6  ;;  %v5062_v43 = vrot.slane %v5054_v11, 10  ;;  %v6541_v44 = vld [vmem:[%s5950_s28 + $0x20] sm:$0xe] }
  0x89   : > { %v1908_v18 = vrot.slane %v6440_v15, 6  ;;  %5607 = vmatmul.mubr.msk.bf16.gmra.mxu0 %vm331_vm3, %v5043_v62  ;;  %v1901_v46 = vsel %vm6173_vm11, %v5060_v54, %v1900_v21  ;;  %v5063_v55 = vrot.slane %v5055_v40, 10  ;;  %v1912_v19 = vrot.slane %v6452_v2, 6  ;;  %v5093_v2 = vld [vmem:[%s5950_s28 + $0x20] sm:$0xf] }
  0x8a   : > { %v2154_v27 = vshrl.u32 %v5089_v9, 16  ;;  %5622 = vmatprep.mubr.msk.bf16.mxu0 %vm331_vm3, %v5836_v48  ;;  %5613 = vmatmul.mubr.msk.bf16.vlgmr.msra.gmra.mxu1 %vm331_vm3, %v5065_v8  ;;  %v1905_v36 = vsel %vm6173_vm11, %v5061_v23, %v1904_v17  ;;  %v2157_v28 = vshll.u32 %v5089_v9, 16  ;;  %v2163_v29 = vshll.u32 %v5090_v56, 16  ;;  %v6554_v21 = vld [vmem:[%s5950_s28 + $0x28] sm:$0xe] }
  0x8b   : > { %v1909_v15 = vsel %vm6173_vm11, %v5062_v43, %v1908_v18  ;;  %5631 = vmatpush3.bf16.msra.mxu1 %v2295_v22  ;;  %v5066_v25 = vcombine.low %v1901_v46, %v1905_v36  ;;  %v1913_v30 = vsel %vm6173_vm11, %v5063_v55, %v1912_v19  ;;  %v2168_v38 = vshrl.u32 %v5091_v3, 16  ;;  %v2840_v22 = vld [vmem:[%s7539_s1 + $0x1c] sm:$0x3]  ;;  %v5840_v23 = vld [vmem:[%s5950_s28 + $0x40] ss:$8 sps:$4 sm:$0xff]  }
  0x8c   : > { %v2156_v63 = vrot.slane %v2154_v27, 4  ;;  %v5067_v59 = vcombine.low %v1909_v15, %v1913_v30  ;;  %v2159_v31 = vrot.slane %v2157_v28, 5  ;;  %v2165_v7 = vrot.slane %v2163_v29, 5  ;;  %v5098_v19 = vld [vmem:[%s5950_s28 + $0x34] sm:$0x1] }
  0x8d   : > { %v2171_v14 = vshll.u32 %v5091_v3, 16  ;;  %5616 = vmatprep.mubr.msk.bf16.mxu1 %vm331_vm3, %v5066_v25  ;;  %v2170_v34 = vrot.slane %v2168_v38, 4  ;;  %v2177_v35 = vshll.u32 %v5092_v20, 16  ;;  %v5122_v60 = vrot.slane %v6509_v26, 9  ;;  %v5099_v30 = vld [vmem:[%s5950_s28 + $0x38] sm:$0xf] }
  0x8e   : > { %v2396_v42 = vrot.slane %v5090_v56, 5  ;;  %v2160_v32 = vor.u32 %v2159_v31, %v2156_v63  ;;  %v5123_v10 = vrot.slane %v6518_v12, 9  ;;  %v2400_v37 = vrot.slane %v5092_v20, 5  ;;  %v5100_v63 = vld [vmem:[%s5950_s28 + $0x3c] sm:$0x1] }
  0x8f   : > { %v2173_v51 = vrot.slane %v2171_v14, 5  ;;  %v2179_v53 = vrot.slane %v2177_v35, 5  ;;  %v2695_v48 = vrot.slane %v5841_v0, 2  ;;  %v2182_v24 = vshrl.u32 %v5093_v2, 16  ;;  %v6575_v31 = vld [vmem:[%s5950_s28 + $0x30] sm:$0xe] }
  0x90   : > { %v6536_v45 = vsel %vm6072_vm7, %v5122_v60, %v2396_v42  ;;  %v2161_v49 = vrot.slane %v2160_v32, 4  ;;  %v2401_v50 = vsel %vm6072_vm7, %v5123_v10, %v2400_v37  ;;  %v2185_v16 = vshll.u32 %v5093_v2, 16  ;;  %v5101_v35 = vld [vmem:[%s5950_s28 + $0x40] sm:$0xf] }
  0x91   : > { %v2174_v11 = vor.u32 %v2173_v51, %v2170_v34  ;;  %5623 = vmatmul.mubr.msk.bf16.vlgmr.msra.gmra.mxu0 %vm331_vm3, %v5838_v52  ;;  %v5130_v40 = vcombine.low %v6536_v45, %v2401_v50  ;;  %5786 = vmatprep.subr.msk.bf16.mxu1 %vm344_vm0, %v2695_v48  ;;  %v2184_v6 = vrot.slane %v2182_v24, 4  ;;  %v2191_v57 = vshll.u32 %v5094_v39, 16  ;;  %v6580_v34 = vld [vmem:[%s5950_s28 + $0x38] sm:$0xe]  ;;  %v5103_v50 = vld [vmem:[%s5950_s28 + $0x48] sm:$0xf] }
  0x92   : > { %v2196_v54 = vshrl.u32 %v5095_v4, 16  ;;  %5641 = vmatpush3.bf16.msra.mxu0 %v6492_v13  ;;  %5626 = vmatprep.mubr.msk.bf16.mxu0 %vm331_vm3, %v5839_v33  ;;  %v2166_v9 = vsel %vm6005_vm4, %v2161_v49, %v2165_v7  ;;  %v2187_v62 = vrot.slane %v2185_v16, 5  ;;  %v2199_v5 = vshll.u32 %v5095_v4, 16  ;;  %v5097_v13 = vld [vmem:[%s5950_s28 + $0x30] sm:$0xf] }
  0x93   : > { %v2175_v56 = vrot.slane %v2174_v11, 4  ;;  %5617 = vmatmul.mubr.msk.bf16.gmra.mxu1 %vm331_vm3, %v5067_v59  ;;  %v2193_v3 = vrot.slane %v2191_v57, 5  ;;  %v2205_v17 = vshll.u32 %v5096_v61, 16  ;;  %v5124_v43 = vrot.slane %v6541_v44, 9  ;;  %5787 = vmatprep.subr.msk.bf16.mxu0 %vm344_vm0, %v2840_v22  ;;  %v5102_v11 = vld [vmem:[%s5950_s28 + $0x44] sm:$0x1] }
  0x94   : > { %v2198_v8 = vrot.slane %v2196_v54, 4  ;;  %v2188_v20 = vor.u32 %v2187_v62, %v2184_v6  ;;  %v2201_v46 = vrot.slane %v2199_v5, 5  ;;  %v2404_v55 = vrot.slane %v5094_v39, 5 }
  0x95   : > { %v2180_v18 = vsel %vm6005_vm4, %v2175_v56, %v2179_v53  ;;  %v2207_v36 = vrot.slane %v2205_v17, 5  ;;  %v5125_v15 = vrot.slane %v6554_v21, 9  ;;  %v2408_v28 = vrot.slane %v5096_v61, 5  ;;  %v6598_v17 = vld [vmem:[%s5950_s28 + $0x40] sm:$0xe] }
  0x96   : > { %v5105_v27 = vcombine.low %v2166_v9, %v2180_v18  ;;  %v2189_v29 = vrot.slane %v2188_v20, 4  ;;  %v2202_v2 = vor.u32 %v2201_v46, %v2198_v8  ;;  %v2405_v52 = vsel %vm6072_vm7, %v5124_v43, %v2404_v55  ;;  %v6603_v46 = vld [vmem:[%s5950_s28 + $0x48] sm:$0xe]  ;;  %v6606_v55 = vld [vmem:[%s5950_s28 + $0x14] sm:$0x3] }
  0x97   : > { %v2709_v25 = vsel %vm344_vm0, %v2695_v48, 0  ;;  %v2409_v38 = vsel %vm6072_vm7, %v5125_v15, %v2408_v28  ;;  %v2866_v0 = vsel %vm344_vm0, %v2840_v22, 0  ;;  %v2210_v33 = vshrl.u32 %v5097_v13, 16  ;;  %v6611_v28 = vld [vmem:[%s7539_s1 + $0x20] sm:$0x3] }
  0x98   : > { %5632 = vmatprep.mubr.msk.bf16.mxu1 %vm331_vm3, %v5105_v27  ;;  %v2213_v59 = vshll.u32 %v5097_v13, 16  ;;  %v2194_v7 = vsel %vm6005_vm4, %v2189_v29, %v2193_v3  ;;  %v2203_v14 = vrot.slane %v2202_v2, 4  ;;  %v5131_v39 = vcombine.low %v2405_v52, %v2409_v38 }
  0x99   : > { %v2219_v4 = vshll.u32 %v5098_v19, 16  ;;  %5627 = vmatmul.mubr.msk.bf16.gmra.mxu0 %vm331_vm3, %v5840_v23  ;;  %v2212_v60 = vrot.slane %v2210_v33, 4  ;;  %v2224_v32 = vshrl.u32 %v5099_v30, 16  ;;  %v2227_v51 = vshll.u32 %v5099_v30, 16  ;;  %v5104_v23 = vld [vmem:[%s5950_s28 + $0x4c] sm:$0x1] }
  0x9a   : > { %v2215_v42 = vrot.slane %v2213_v59, 5  ;;  %5642 = vmatprep.mubr.msk.bf16.mxu0 %vm331_vm3, %v5130_v40  ;;  %v2208_v10 = vsel %vm6005_vm4, %v2203_v14, %v2207_v36  ;;  %v2233_v61 = vshll.u32 %v5100_v63, 16  ;;  %v5126_v53 = vrot.slane %v6575_v31, 9 }
  0x9b   : > { %v2221_v37 = vrot.slane %v2219_v4, 5  ;;  %v5106_v45 = vcombine.low %v2194_v7, %v2208_v10  ;;  %v2226_v24 = vrot.slane %v2224_v32, 4  ;;  %v2229_v49 = vrot.slane %v2227_v51, 5 }
  0x9c   : > { %v2216_v48 = vor.u32 %v2215_v42, %v2212_v60  ;;  %v2235_v16 = vrot.slane %v2233_v61, 5  ;;  %v2412_v22 = vrot.slane %v5098_v19, 5  ;;  %v5127_v6 = vrot.slane %v6580_v34, 9  ;;  %v5155_v61 = vld [vmem:[%s5950_s28 + $0x10] sm:$0xc] }
  0x9d   : > { %v2416_v40 = vrot.slane %v5100_v63, 5  ;;  %5633 = vmatmul.mubr.msk.bf16.vlgmr.msra.gmra.mxu1 %vm331_vm3, %v5106_v45  ;;  %v2230_v54 = vor.u32 %v2229_v49, %v2226_v24  ;;  %v2238_v9 = vshrl.u32 %v5101_v35, 16  ;;  %v2241_v56 = vshll.u32 %v5101_v35, 16  ;;  %v5139_v35 = vld [vmem:[%s5950_s28 + $0x1c] sm:$0x3] }
  0x9e   : > { %v2217_v57 = vrot.slane %v2216_v48, 4  ;;  %5651 = vmatpush3.bf16.msra.mxu1 %v2709_v25  ;;  %v2413_v62 = vsel %vm6072_vm7, %v5126_v53, %v2412_v22  ;;  %v2247_v3 = vshll.u32 %v5102_v11, 16  ;;  %v2252_v8 = vshrl.u32 %v5103_v50, 16 }
  0x9f   : > { %v2417_v5 = vsel %vm6072_vm7, %v5127_v6, %v2416_v40  ;;  %v2231_v13 = vrot.slane %v2230_v54, 4  ;;  %v2240_v20 = vrot.slane %v2238_v9, 4  ;;  %v2243_v19 = vrot.slane %v2241_v56, 5  ;;  %v5156_v54 = vld [vmem:[%s5950_s28 + $0x18] sm:$0xc] }
  0xa0   : > { %v2222_v43 = vsel %vm6005_vm4, %v2217_v57, %v2221_v37  ;;  %v5132_v18 = vcombine.low %v2413_v62, %v2417_v5  ;;  %v2249_v27 = vrot.slane %v2247_v3, 5  ;;  %v2254_v36 = vrot.slane %v2252_v8, 4 }
  0xa1   : > { %v2255_v15 = vshll.u32 %v5103_v50, 16  ;;  %5643 = vmatmul.mubr.msk.bf16.vlgmr.msra.gmra.mxu0 %vm331_vm3, %v5131_v39  ;;  %v2236_v29 = vsel %vm6005_vm4, %v2231_v13, %v2235_v16  ;;  %v2261_v2 = vshll.u32 %v5104_v23, 16  ;;  %v5128_v52 = vrot.slane %v6598_v17, 9 }
  0xa2   : > { %v2420_v25 = vrot.slane %v5102_v11, 5  ;;  %5661 = vmatpush3.bf16.msra.mxu0 %v2866_v0  ;;  %v5107_v30 = vcombine.low %v2222_v43, %v2236_v29  ;;  %5646 = vmatprep.mubr.msk.bf16.mxu0 %vm331_vm3, %v5132_v18  ;;  %v2244_v63 = vor.u32 %v2243_v19, %v2240_v20  ;;  %v5129_v33 = vrot.slane %v6603_v46, 9  ;;  %v5140_v43 = vld [vmem:[%s5950_s28 + $0x24] sm:$0x3]  ;;  %v5141_v29 = vld [vmem:[%s5950_s28 + $0x2c] sm:$0x3] }
  0xa3   : > { %v2257_v38 = vrot.slane %v2255_v15, 5  ;;  %v2263_v59 = vrot.slane %v2261_v2, 5  ;;  %v2424_v14 = vrot.slane %v5104_v23, 5  ;;  %v2536_v39 = vshrl.u32 %v6509_v26, 16  ;;  %5789 = vmatprep.subr.msk.bf16.mxu0 %vm344_vm0, %v6611_v28 }
  0xa4   : > { %v2421_v7 = vsel %vm6072_vm7, %v5128_v52, %v2420_v25  ;;  %5636 = vmatprep.mubr.msk.bf16.mxu1 %vm331_vm3, %v5107_v30  ;;  %v2245_v0 = vrot.slane %v2244_v63, 4  ;;  %v2539_v60 = vshll.u32 %v6509_v26, 16  ;;  %v2545_v42 = vshrl.u32 %v6606_v55, 16  ;;  %v6638_v26 = vld [vmem:[%s7539_s1 + $0x1c] ss:$0 sps:$4 sm:$0xcc]  }
  0xa5   : > { %v2258_v4 = vor.u32 %v2257_v38, %v2254_v36  ;;  %v2425_v32 = vsel %vm6072_vm7, %v5129_v33, %v2424_v14  ;;  %v2538_v51 = vrot.slane %v2536_v39, 5  ;;  %v2548_v10 = vshll.u32 %v6606_v55, 16  ;;  %v5158_v38 = vld [vmem:[%s5950_s28 + $0x28] sm:$0xc] }
  0xa6   : > { %v2554_v37 = vshrl.u32 %v6518_v12, 16  ;;  %v2250_v53 = vsel %vm6005_vm4, %v2245_v0, %v2249_v27  ;;  %v5133_v48 = vcombine.low %v2421_v7, %v2425_v32  ;;  %v2541_v24 = vrot.slane %v2539_v60, 6 }
  0xa7   : > { %v2259_v45 = vrot.slane %v2258_v4, 4  ;;  %v2547_v49 = vrot.slane %v2545_v42, 5  ;;  %v2550_v11 = vrot.slane %v2548_v10, 6  ;;  %v2557_v16 = vshll.u32 %v6518_v12, 16 }
  0xa8   : > { %v2556_v50 = vrot.slane %v2554_v37, 5  ;;  %v2542_v6 = vor.u32 %v2541_v24, %v2538_v51  ;;  %v2563_v40 = vshrl.u32 %v5139_v35, 16  ;;  %v2566_v57 = vshll.u32 %v5139_v35, 16 }
  0xa9   : > { %v2264_v22 = vsel %vm6005_vm4, %v2259_v45, %v2263_v59  ;;  %5647 = vmatmul.mubr.msk.bf16.gmra.mxu0 %vm331_vm3, %v5133_v48  ;;  %v2551_v56 = vor.u32 %v2550_v11, %v2547_v49  ;;  %v2559_v62 = vrot.slane %v2557_v16, 6  ;;  %v5163_v5 = vrot.slane %v5155_v61, 10 }
  0xaa   : > { %v5108_v9 = vcombine.low %v2250_v53, %v2264_v22  ;;  %v2543_v23 = vrot.slane %v2542_v6, 4  ;;  %v2565_v3 = vrot.slane %v2563_v40, 5  ;;  %v2568_v8 = vrot.slane %v2566_v57, 6  ;;  %v5143_v40 = vld [vmem:[%s5950_s28 + $0x3c] sm:$0x3] }
  0xab   : > { %v2810_v12 = vrot.slane %v6606_v55, 6  ;;  %v2560_v13 = vor.u32 %v2559_v62, %v2556_v50  ;;  %v5164_v18 = vrot.slane %v5156_v54, 10  ;;  %v2814_v20 = vrot.slane %v5139_v35, 6  ;;  %v5157_v55 = vld [vmem:[%s5950_s28 + $0x20] sm:$0xc] }
  0xac   : > { %5637 = vmatmul.mubr.msk.bf16.gmra.mxu1 %vm331_vm3, %v5108_v9  ;;  %v2974_v19 = vrot.slane %v6638_v26, 2  ;;  %v2552_v27 = vsel %vm6181_vm12, %v2543_v23, %v2551_v56  ;;  %v2569_v36 = vor.u32 %v2568_v8, %v2565_v3  ;;  %v2572_v2 = vshrl.u32 %v6541_v44, 16  ;;  %v5142_v50 = vld [vmem:[%s5950_s28 + $0x34] sm:$0x3] }
  0xad   : > { %v2811_v15 = vsel %vm6173_vm11, %v5163_v5, %v2810_v12  ;;  %v2561_v52 = vrot.slane %v2560_v13, 4  ;;  %v2815_v25 = vsel %vm6173_vm11, %v5164_v18, %v2814_v20  ;;  %v2575_v30 = vshll.u32 %v6541_v44, 16  ;;  %v5159_v12 = vld [vmem:[%s5950_s28 + $0x30] sm:$0xc]  ;;  %v6688_v20 = vld [vmem:[%s7539_s1 + $0x24] sm:$0x3] }
  0xae   : > { %5788 = vmatprep.subr.msk.bf16.mxu1 %vm344_vm0, %v2974_v19  ;;  %v2581_v63 = vshrl.u32 %v5140_v43, 16  ;;  %v5171_v33 = vcombine.low %v2811_v15, %v2815_v25  ;;  %v2574_v59 = vrot.slane %v2572_v2, 5  ;;  %v2584_v7 = vshll.u32 %v5140_v43, 16  ;;  %v5160_v15 = vld [vmem:[%s5950_s28 + $0x38] sm:$0xc] }
  0xaf   : > { %v2590_v14 = vshrl.u32 %v6554_v21, 16  ;;  %v2570_v39 = vsel %vm6181_vm12, %v2561_v52, %v2569_v36  ;;  %v2577_v0 = vrot.slane %v2575_v30, 6  ;;  %v2593_v35 = vshll.u32 %v6554_v21, 16  ;;  %v5144_v25 = vld [vmem:[%s5950_s28 + $0x44] sm:$0x3] }
  0xb0   : > { %v2583_v4 = vrot.slane %v2581_v63, 5  ;;  %v5146_v60 = vcombine.low %v2552_v27, %v2570_v39  ;;  %5662 = vmatprep.mubr.msk.bf16.mxu0 %vm331_vm3, %v5171_v33  ;;  %v2586_v42 = vrot.slane %v2584_v7, 6  ;;  %v2599_v32 = vshrl.u32 %v5141_v29, 16 }
  0xb1   : > { %v2592_v44 = vrot.slane %v2590_v14, 5  ;;  %v2578_v51 = vor.u32 %v2577_v0, %v2574_v59  ;;  %v2595_v10 = vrot.slane %v2593_v35, 6  ;;  %v2602_v37 = vshll.u32 %v5141_v29, 16  ;;  %v5145_v35 = vld [vmem:[%s5950_s28 + $0x4c] sm:$0x3] }
  0xb2   : > { %v5165_v61 = vrot.slane %v5157_v55, 10  ;;  %5652 = vmatprep.mubr.msk.bf16.mxu1 %vm331_vm3, %v5146_v60  ;;  %v2587_v53 = vor.u32 %v2586_v42, %v2583_v4  ;;  %v2601_v45 = vrot.slane %v2599_v32, 5  ;;  %v2818_v48 = vrot.slane %v5140_v43, 6 }
  0xb3   : > { %v5166_v24 = vrot.slane %v5158_v38, 10  ;;  %v2579_v26 = vrot.slane %v2578_v51, 4  ;;  %v2596_v21 = vor.u32 %v2595_v10, %v2592_v44  ;;  %v2604_v49 = vrot.slane %v2602_v37, 6  ;;  %v5161_v10 = vld [vmem:[%s5950_s28 + $0x40] sm:$0xc] }
  0xb4   : > { %v2822_v11 = vrot.slane %v5141_v29, 6  ;;  %v2819_v16 = vsel %vm6173_vm11, %v5165_v61, %v2818_v48  ;;  %v2988_v22 = vsel %vm344_vm0, %v2974_v19, 0  ;;  %v3217_v6 = vsel %vm344_vm0, %v6611_v28, 0 }
  0xb5   : > { %v2608_v57 = vshrl.u32 %v6575_v31, 16  ;;  %v2588_v54 = vsel %vm6181_vm12, %v2579_v26, %v2587_v53  ;;  %v2597_v9 = vrot.slane %v2596_v21, 4  ;;  %v2605_v56 = vor.u32 %v2604_v49, %v2601_v45  ;;  %v5162_v49 = vld [vmem:[%s5950_s28 + $0x48] sm:$0xc] }
  0xb6   : > { %v2823_v62 = vsel %vm6173_vm11, %v5166_v24, %v2822_v11  ;;  %v2611_v3 = vshll.u32 %v6575_v31, 16  ;;  %v2617_v8 = vshrl.u32 %v5142_v50, 16  ;;  %v2620_v43 = vshll.u32 %v5142_v50, 16 }
  0xb7   : > { %v5172_v5 = vcombine.low %v2819_v16, %v2823_v62  ;;  %v2610_v23 = vrot.slane %v2608_v57, 5  ;;  %v2606_v28 = vsel %vm6181_vm12, %v2597_v9, %v2605_v56  ;;  %v2626_v13 = vshrl.u32 %v6580_v34, 16  ;;  %v6714_v9 = vld [vmem:[%s5950_s28 + $0x1c] sm:$0x1] }
  0xb8   : > { %v2629_v18 = vshll.u32 %v6580_v34, 16  ;;  %v5147_v19 = vcombine.low %v2588_v54, %v2606_v28  ;;  %v2613_v31 = vrot.slane %v2611_v3, 6  ;;  %v2619_v27 = vrot.slane %v2617_v8, 5 }
  0xb9   : > { %5663 = vmatmul.mubr.msk.bf16.vlgmr.msra.gmra.mxu0 %vm331_vm3, %v5172_v5  ;;  %v2635_v36 = vshrl.u32 %v5143_v40, 16  ;;  %v2622_v29 = vrot.slane %v2620_v43, 6  ;;  %v2628_v2 = vrot.slane %v2626_v13, 5  ;;  %v2638_v52 = vshll.u32 %v5143_v40, 16  ;;  %v5198_v43 = vld [vmem:[%s5950_s28 + $0x20] sm:$0xf] }
  0xba   : > { %5681 = vmatpush3.bf16.msra.mxu0 %v3217_v6  ;;  %v2631_v55 = vrot.slane %v2629_v18, 6  ;;  %5653 = vmatmul.mubr.msk.bf16.vlgmr.msra.gmra.mxu1 %vm331_vm3, %v5147_v19  ;;  %v2614_v34 = vor.u32 %v2613_v31, %v2610_v23  ;;  %v5167_v63 = vrot.slane %v5159_v12, 10  ;;  %v2826_v38 = vrot.slane %v5142_v50, 6 }
  0xbb   : > { %v2637_v30 = vrot.slane %v2635_v36, 5  ;;  %5791 = vmatprep.subr.msk.bf16.mxu0 %vm344_vm0, %v6688_v20  ;;  %5671 = vmatpush3.bf16.msra.mxu1 %v2988_v22  ;;  %v2623_v33 = vor.u32 %v2622_v29, %v2619_v27  ;;  %v2640_v7 = vrot.slane %v2638_v52, 6  ;;  %v5168_v14 = vrot.slane %v5160_v15, 10  ;;  %v5196_v22 = vld [vmem:[%s5950_s28 + $0x18] sm:$0xf] }
  0xbc   : > { %v2632_v59 = vor.u32 %v2631_v55, %v2628_v2  ;;  %v2615_v39 = vrot.slane %v2614_v34, 4  ;;  %v2827_v0 = vsel %vm6173_vm11, %v5167_v63, %v2826_v38  ;;  %v2830_v4 = vrot.slane %v5143_v40, 6  ;;  %v6726_v15 = vld [vmem:[%s5950_s28 + $0x24] sm:$0x1]  ;;  %v5200_v55 = vld [vmem:[%s5950_s28 + $0x28] sm:$0xf] }
  0xbd   : > { %v2644_v60 = vshrl.u32 %v6598_v17, 16  ;;  %v2641_v44 = vor.u32 %v2640_v7, %v2637_v30  ;;  %v2647_v32 = vshll.u32 %v6598_v17, 16  ;;  %v2653_v51 = vshrl.u32 %v5144_v25, 16  ;;  %v6733_v63 = vld [vmem:[%s5950_s28 + $0x2c] sm:$0x1] }
  0xbe   : > { %v2633_v42 = vrot.slane %v2632_v59, 4  ;;  %v2624_v37 = vsel %vm6181_vm12, %v2615_v39, %v2623_v33  ;;  %v2831_v61 = vsel %vm6173_vm11, %v5168_v14, %v2830_v4  ;;  %v2656_v45 = vshll.u32 %v5144_v25, 16  ;;  %v5202_v14 = vld [vmem:[%s5950_s28 + $0x30] sm:$0xf] }
  0xbf   : > { %v2646_v53 = vrot.slane %v2644_v60, 5  ;;  %v5173_v24 = vcombine.low %v2827_v0, %v2831_v61  ;;  %v2649_v26 = vrot.slane %v2647_v32, 6  ;;  %v2655_v21 = vrot.slane %v2653_v51, 5  ;;  %v5843_v0 = vld [vmem:[%s5950_s28 + $0x18] ss:$8 sps:$4 sm:$0xff]  }
  0xc0   : > { %v2642_v48 = vsel %vm6181_vm12, %v2633_v42, %v2641_v44  ;;  %v2658_v11 = vrot.slane %v2656_v45, 6  ;;  %v2662_v50 = vshrl.u32 %v6603_v46, 16  ;;  %v2665_v16 = vshll.u32 %v6603_v46, 16  ;;  %v5844_v46 = vld [vmem:[%s7539_s1 + $0x20] ss:$0 sps:$4 sm:$0xcc]  }
  0xc1   : > { %v5148_v17 = vcombine.low %v2624_v37, %v2642_v48  ;;  %5666 = vmatprep.mubr.msk.bf16.mxu0 %vm331_vm3, %v5173_v24  ;;  %v2650_v6 = vor.u32 %v2649_v26, %v2646_v53  ;;  %v2671_v40 = vshrl.u32 %v5145_v35, 16  ;;  %v2674_v57 = vshll.u32 %v5145_v35, 16  ;;  %v6742_v51 = vld [vmem:[%s5950_s28 + $0x34] sm:$0x1] }
  0xc2   : > { %v5169_v54 = vrot.slane %v5161_v10, 10  ;;  %v2659_v56 = vor.u32 %v2658_v11, %v2655_v21  ;;  %v2664_v62 = vrot.slane %v2662_v50, 5  ;;  %v2667_v5 = vrot.slane %v2665_v16, 6 }
  0xc3   : > { %5656 = vmatprep.mubr.msk.bf16.mxu1 %vm331_vm3, %v5148_v17  ;;  %v2834_v23 = vrot.slane %v5144_v25, 6  ;;  %v2651_v3 = vrot.slane %v2650_v6, 4  ;;  %v2673_v8 = vrot.slane %v2671_v40, 5  ;;  %v2676_v12 = vrot.slane %v2674_v57, 6 }
  0xc4   : > { %v5170_v28 = vrot.slane %v5162_v49, 10  ;;  %v2668_v13 = vor.u32 %v2667_v5, %v2664_v62  ;;  %v2838_v19 = vrot.slane %v5145_v35, 6  ;;  %v3080_v31 = vshrl.u32 %v5196_v22, 16  ;;  %v5204_v49 = vld [vmem:[%s5950_s28 + $0x38] sm:$0xf] }
  0xc5   : > { %v2835_v18 = vsel %vm6173_vm11, %v5169_v54, %v2834_v23  ;;  %v2660_v27 = vsel %vm6181_vm12, %v2651_v3, %v2659_v56  ;;  %v2677_v36 = vor.u32 %v2676_v12, %v2673_v8  ;;  %v3083_v29 = vshll.u32 %v5196_v22, 16  ;;  %v6751_v22 = vld [vmem:[%s5950_s28 + $0x3c] sm:$0x1]  ;;  %v5206_v56 = vld [vmem:[%s5950_s28 + $0x40] sm:$0xf] }
  0xc6   : > { %v3089_v2 = vshll.u32 %v6714_v9, 16  ;;  %v2669_v52 = vrot.slane %v2668_v13, 4  ;;  %v2839_v25 = vsel %vm6173_vm11, %v5170_v28, %v2838_v19  ;;  %v3082_v34 = vrot.slane %v3080_v31, 4  ;;  %v5845_v62 = vld [vmem:[%s5950_s28 + $0x28] ss:$8 sps:$4 sm:$0xff]  }
  0xc7   : > { %v3094_v30 = vshrl.u32 %v5198_v43, 16  ;;  %v5174_v38 = vcombine.low %v2835_v18, %v2839_v25  ;;  %v3085_v33 = vrot.slane %v3083_v29, 5  ;;  %v3097_v7 = vshll.u32 %v5198_v43, 16  ;;  %v6763_v28 = vld [vmem:[%s5950_s28 + $0x44] sm:$0x1] }
  0xc8   : > { %v3091_v59 = vrot.slane %v3089_v2, 5  ;;  %v2678_v39 = vsel %vm6181_vm12, %v2669_v52, %v2677_v36  ;;  %v3103_v35 = vshll.u32 %v6726_v15, 16  ;;  %v3364_v60 = vrot.slane %v5844_v46, 2  ;;  %v5208_v18 = vld [vmem:[%s5950_s28 + $0x48] sm:$0xf] }
  0xc9   : > { %v3096_v4 = vrot.slane %v3094_v30, 4  ;;  %v5149_v42 = vcombine.low %v2660_v27, %v2678_v39  ;;  %5667 = vmatmul.mubr.msk.bf16.gmra.mxu0 %vm331_vm3, %v5174_v38  ;;  %v3086_v44 = vor.u32 %v3085_v33, %v3082_v34  ;;  %v3099_v32 = vrot.slane %v3097_v7, 5  ;;  %v5846_v27 = vld [vmem:[%s5950_s28 + $0x38] ss:$8 sps:$4 sm:$0xff]   ;;  %v6769_v25 = vld [vmem:[%s5950_s28 + $0x4c] sm:$0x1] }
  0xca   : > { %v3108_v10 = vshrl.u32 %v5200_v55, 16  ;;  %v3105_v37 = vrot.slane %v3103_v35, 5  ;;  %5790 = vmatprep.subr.msk.bf16.mxu1 %vm344_vm0, %v3364_v60  ;;  %v3111_v61 = vshll.u32 %v5200_v55, 16  ;;  %v3117_v53 = vshll.u32 %v6733_v63, 16  ;;  %v5210_v33 = vld [vmem:[%s5950_s28 + $0x50] sm:$0xf] }
  0xcb   : > { %v3122_v45 = vshrl.u32 %v5202_v14, 16  ;;  %5657 = vmatmul.mubr.msk.bf16.gmra.mxu1 %vm331_vm3, %v5149_v42  ;;  %v3087_v48 = vrot.slane %v3086_v44, 4  ;;  %v3100_v24 = vor.u32 %v3099_v32, %v3096_v4  ;;  %v3125_v21 = vshll.u32 %v5202_v14, 16  ;;  %v5220_v32 = vld [vmem:[%s5950_s28 + $0x18] sm:$0xe] }
  0xcc   : > { %v3110_v26 = vrot.slane %v3108_v10, 4  ;;  %5672 = vmatprep.mubr.msk.bf16.mxu1 %vm331_vm3, %v5843_v0  ;;  %v3113_v17 = vrot.slane %v3111_v61, 5  ;;  %v3119_v11 = vrot.slane %v3117_v53, 5  ;;  %v3131_v16 = vshll.u32 %v6742_v51, 16  ;;  %v6780_v0 = vld [vmem:[%s5950_s28 + $0x54] sm:$0x1] }
  0xcd   : > { %v3124_v50 = vrot.slane %v3122_v45, 4  ;;  %v3092_v6 = vsel %vm6005_vm4, %v3087_v48, %v3091_v59  ;;  %v3101_v40 = vrot.slane %v3100_v24, 4  ;;  %v3127_v57 = vrot.slane %v3125_v21, 5  ;;  %v6788_v45 = vld [vmem:[%s7539_s1 + $0x28] sm:$0x3] }
  0xce   : > { %v3378_v54 = vsel %vm344_vm0, %v3364_v60, 0  ;;  %v3114_v5 = vor.u32 %v3113_v17, %v3110_v26  ;;  %v3133_v23 = vrot.slane %v3131_v16, 5  ;;  %v3631_v46 = vsel %vm344_vm0, %v6688_v20, 0 }
  0xcf   : > { %v3136_v3 = vshrl.u32 %v5204_v49, 16  ;;  %v3106_v8 = vsel %vm6005_vm4, %v3101_v40, %v3105_v37  ;;  %v3128_v12 = vor.u32 %v3127_v57, %v3124_v50  ;;  %v3139_v43 = vshll.u32 %v5204_v49, 16 }
  0xd0   : > { %v3145_v13 = vshll.u32 %v6751_v22, 16  ;;  %v5212_v19 = vcombine.low %v3092_v6, %v3106_v8  ;;  %v3115_v31 = vrot.slane %v3114_v5, 4  ;;  %v3150_v29 = vshrl.u32 %v5206_v56, 16  ;;  %v5221_v6 = vld [vmem:[%s5950_s28 + $0x20] sm:$0xe] }
  0xd1   : > { %v3138_v36 = vrot.slane %v3136_v3, 4  ;;  %v3129_v20 = vrot.slane %v3128_v12, 4  ;;  %v3141_v2 = vrot.slane %v3139_v43, 5  ;;  %v3153_v52 = vshll.u32 %v5206_v56, 16 }
  0xd2   : > { %v3147_v55 = vrot.slane %v3145_v13, 5  ;;  %5682 = vmatprep.mubr.msk.bf16.mxu0 %vm331_vm3, %v5212_v19  ;;  %v3120_v34 = vsel %vm6005_vm4, %v3115_v31, %v3119_v11  ;;  %v3152_v30 = vrot.slane %v3150_v29, 4  ;;  %v3159_v38 = vshll.u32 %v6763_v28, 16  ;;  %v5847_v11 = vld [vmem:[%s5950_s28 + $0x48] ss:$8 sps:$4 sm:$0xff]  }
  0xd3   : > { %v3164_v59 = vshrl.u32 %v5208_v18, 16  ;;  %5673 = vmatmul.mubr.msk.bf16.vlgmr.msra.gmra.mxu1 %vm331_vm3, %v5845_v62  ;;  %v3134_v7 = vsel %vm6005_vm4, %v3129_v20, %v3133_v23  ;;  %v3142_v14 = vor.u32 %v3141_v2, %v3138_v36  ;;  %v3155_v39 = vrot.slane %v3153_v52, 5  ;;  %v6798_v62 = vld [vmem:[%s5950_s28 + $0x1c] sm:$0x3]  ;;  %v6808_v13 = vld [vmem:[%s5950_s28 + $0x24] sm:$0x3] }
  0xd4   : > { %v3167_v4 = vshll.u32 %v5208_v18, 16  ;;  %v5213_v35 = vcombine.low %v3120_v34, %v3134_v7  ;;  %5691 = vmatpush3.bf16.msra.mxu1 %v3378_v54  ;;  %5676 = vmatprep.mubr.msk.bf16.mxu1 %vm331_vm3, %v5846_v27  ;;  %v3161_v60 = vrot.slane %v3159_v38, 5  ;;  %v3173_v44 = vshll.u32 %v6769_v25, 16  ;;  %v5848_v2 = vld [vmem:[%s7539_s1 + $0x24] ss:$0 sps:$4 sm:$0xcc]  }
  0xd5   : > { %v3166_v42 = vrot.slane %v3164_v59, 4  ;;  %v3143_v10 = vrot.slane %v3142_v14, 4  ;;  %v3156_v37 = vor.u32 %v3155_v39, %v3152_v30  ;;  %v3178_v53 = vshrl.u32 %v5210_v33, 16  ;;  %v5222_v14 = vld [vmem:[%s5950_s28 + $0x28] sm:$0xe] }
  0xd6   : > { %v3169_v61 = vrot.slane %v3167_v4, 5  ;;  %5683 = vmatmul.mubr.msk.bf16.vlgmr.msra.gmra.mxu0 %vm331_vm3, %v5213_v35  ;;  %v3175_v48 = vrot.slane %v3173_v44, 5  ;;  %v3181_v24 = vshll.u32 %v5210_v33, 16  ;;  %v3187_v26 = vshll.u32 %v6780_v0, 16 }
  0xd7   : > { %v5228_v21 = vrot.slane %v5220_v32, 9  ;;  %5701 = vmatpush3.bf16.msra.mxu0 %v3631_v46  ;;  %v3148_v49 = vsel %vm6005_vm4, %v3143_v10, %v3147_v55  ;;  %v3157_v17 = vrot.slane %v3156_v37, 4  ;;  %v3180_v16 = vrot.slane %v3178_v53, 4 }
  0xd8   : > { %v3170_v50 = vor.u32 %v3169_v61, %v3166_v42  ;;  %v3183_v40 = vrot.slane %v3181_v24, 5  ;;  %v3189_v57 = vrot.slane %v3187_v26, 5  ;;  %v3318_v54 = vrot.slane %v6714_v9, 5  ;;  %5793 = vmatprep.subr.msk.bf16.mxu0 %vm344_vm0, %v6788_v45  ;;  %v5223_v42 = vld [vmem:[%s5950_s28 + $0x30] sm:$0xe] }
  0xd9   : > { %v5229_v56 = vrot.slane %v5221_v6, 9  ;;  %v3162_v5 = vsel %vm6005_vm4, %v3157_v17, %v3161_v60  ;;  %v3322_v46 = vrot.slane %v6726_v15, 5  ;;  %v3462_v3 = vshrl.u32 %v5220_v32, 16  ;;  %v6829_v61 = vld [vmem:[%s5950_s28 + $0x2c] sm:$0x3] }
  0xda   : > { %v3171_v23 = vrot.slane %v3170_v50, 4  ;;  %v5214_v8 = vcombine.low %v3148_v49, %v3162_v5  ;;  %v3184_v12 = vor.u32 %v3183_v40, %v3180_v16  ;;  %v3319_v43 = vsel %vm6072_vm7, %v5228_v21, %v3318_v54 }
  0xdb   : > { %v3465_v9 = vshll.u32 %v5220_v32, 16  ;;  %5677 = vmatmul.mubr.msk.bf16.gmra.mxu1 %vm331_vm3, %v5847_v11  ;;  %v3323_v19 = vsel %vm6072_vm7, %v5229_v56, %v3322_v46  ;;  %v3464_v31 = vrot.slane %v3462_v3, 5  ;;  %v3471_v15 = vshrl.u32 %v6798_v62, 16 }
  0xdc   : > { %v3176_v18 = vsel %vm6005_vm4, %v3171_v23, %v3175_v48  ;;  %5686 = vmatprep.mubr.msk.bf16.mxu0 %vm331_vm3, %v5214_v8  ;;  %v3185_v27 = vrot.slane %v3184_v12, 4  ;;  %v5236_v36 = vcombine.low %v3319_v43, %v3323_v19  ;;  %v3474_v20 = vshll.u32 %v6798_v62, 16 }
  0xdd   : > { %v3467_v29 = vrot.slane %v3465_v9, 6  ;;  %v3473_v55 = vrot.slane %v3471_v15, 5  ;;  %v3480_v52 = vshrl.u32 %v5221_v6, 16  ;;  %v3483_v34 = vshll.u32 %v5221_v6, 16 }
  0xde   : > { %v3489_v30 = vshrl.u32 %v6808_v13, 16  ;;  %v3190_v38 = vsel %vm6005_vm4, %v3185_v27, %v3189_v57  ;;  %5692 = vmatprep.mubr.msk.bf16.mxu1 %vm331_vm3, %v5236_v36  ;;  %v3476_v59 = vrot.slane %v3474_v20, 6  ;;  %v3492_v7 = vshll.u32 %v6808_v13, 16  ;;  %v6843_v57 = vld [vmem:[%s5950_s28 + $0x34] sm:$0x3] }
  0xdf   : > { %v3468_v33 = vor.u32 %v3467_v29, %v3464_v31  ;;  %v5215_v39 = vcombine.low %v3176_v18, %v3190_v38  ;;  %v3482_v4 = vrot.slane %v3480_v52, 5  ;;  %v3485_v35 = vrot.slane %v3483_v34, 6  ;;  %v5224_v27 = vld [vmem:[%s5950_s28 + $0x38] sm:$0xe] }
  0xe0   : > { %v3491_v60 = vrot.slane %v3489_v30, 5  ;;  %v3477_v32 = vor.u32 %v3476_v59, %v3473_v55  ;;  %v3494_v10 = vrot.slane %v3492_v7, 6  ;;  %v3778_v37 = vrot.slane %v5848_v2, 2  ;;  %v5225_v2 = vld [vmem:[%s5950_s28 + $0x40] sm:$0xe] }
  0xe1   : > { %v3469_v44 = vrot.slane %v3468_v33, 4  ;;  %5687 = vmatmul.mubr.msk.bf16.gmra.mxu0 %vm331_vm3, %v5215_v39  ;;  %v3486_v53 = vor.u32 %v3485_v35, %v3482_v4  ;;  %v5230_v48 = vrot.slane %v5222_v14, 9  ;;  %v3326_v24 = vrot.slane %v6733_v63, 5  ;;  %v6859_v33 = vld [vmem:[%s5950_s28 + $0x3c] sm:$0x3] }
  0xe2   : > { %v5231_v26 = vrot.slane %v5223_v42, 9  ;;  %v3495_v49 = vor.u32 %v3494_v10, %v3491_v60  ;;  %5792 = vmatprep.subr.msk.bf16.mxu1 %vm344_vm0, %v3778_v37  ;;  %v3330_v17 = vrot.slane %v6742_v51, 5  ;;  %v3498_v11 = vshrl.u32 %v5222_v14, 16 }
  0xe3   : > { %v3478_v21 = vsel %vm6181_vm12, %v3469_v44, %v3477_v32  ;;  %v3487_v50 = vrot.slane %v3486_v53, 4  ;;  %v3327_v16 = vsel %vm6072_vm7, %v5230_v48, %v3326_v24  ;;  %v3501_v6 = vshll.u32 %v5222_v14, 16 }
  0xe4   : > { %v3507_v40 = vshrl.u32 %v6829_v61, 16  ;;  %v3331_v63 = vsel %vm6072_vm7, %v5231_v26, %v3330_v17  ;;  %v3500_v54 = vrot.slane %v3498_v11, 5  ;;  %v3510_v56 = vshll.u32 %v6829_v61, 16 }
  0xe5   : > { %v3516_v5 = vshrl.u32 %v5223_v42, 16  ;;  %v3496_v51 = vsel %vm6181_vm12, %v3487_v50, %v3495_v49  ;;  %v5237_v23 = vcombine.low %v3327_v16, %v3331_v63  ;;  %v3503_v46 = vrot.slane %v3501_v6, 6  ;;  %v5226_v16 = vld [vmem:[%s5950_s28 + $0x48] sm:$0xe] }
  0xe6   : > { %v3509_v3 = vrot.slane %v3507_v40, 5  ;;  %v5253_v8 = vcombine.low %v3478_v21, %v3496_v51  ;;  %v3512_v12 = vrot.slane %v3510_v56, 6  ;;  %v3519_v9 = vshll.u32 %v5223_v42, 16  ;;  %v6869_v42 = vld [vmem:[%s5950_s28 + $0x44] sm:$0x3] }
  0xe7   : > { %v3518_v43 = vrot.slane %v3516_v5, 5  ;;  %5693 = vmatmul.mubr.msk.bf16.vlgmr.msra.gmra.mxu1 %vm331_vm3, %v5237_v23  ;;  %v3504_v18 = vor.u32 %v3503_v46, %v3500_v54  ;;  %v3525_v19 = vshrl.u32 %v6843_v57, 16  ;;  %v3528_v31 = vshll.u32 %v6843_v57, 16  ;;  %v5227_v5 = vld [vmem:[%s5950_s28 + $0x50] sm:$0xe] }
  0xe8   : > { %v3792_v15 = vsel %vm344_vm0, %v3778_v37, 0  ;;  %5702 = vmatprep.mubr.msk.bf16.mxu0 %vm331_vm3, %v5253_v8  ;;  %v3513_v36 = vor.u32 %v3512_v12, %v3509_v3  ;;  %v3521_v29 = vrot.slane %v3519_v9, 6  ;;  %v3910_v20 = vsel %vm344_vm0, %v6788_v45, 0  ;;  %v6888_v51 = vld [vmem:[%s5950_s28 + $0x4c] sm:$0x3] }
  0xe9   : > { %5711 = vmatpush3.bf16.msra.mxu1 %v3792_v15  ;;  %v5232_v55 = vrot.slane %v5224_v27, 9  ;;  %v3505_v52 = vrot.slane %v3504_v18, 4  ;;  %v3527_v34 = vrot.slane %v3525_v19, 5  ;;  %v3530_v30 = vrot.slane %v3528_v31, 6  ;;  %v6861_v59 = vpop.f32.mrf.mxu0 }
  0xea   : > { %v3334_v38 = vrot.slane %v6751_v22, 5  ;;  %v3522_v7 = vor.u32 %v3521_v29, %v3518_v43  ;;  %v5233_v14 = vrot.slane %v5225_v2, 9  ;;  %v3338_v39 = vrot.slane %v6763_v28, 5  ;;  %v6896_v43 = vld [vmem:[%s7539_s1 + $0x2c] sm:$0x3] }
  0xeb   : > { %v3534_v4 = vshrl.u32 %v5224_v27, 16  ;;  %v3514_v45 = vsel %vm6181_vm12, %v3505_v52, %v3513_v36  ;;  %v3531_v35 = vor.u32 %v3530_v30, %v3527_v34  ;;  %v3537_v22 = vshll.u32 %v5224_v27, 16  ;;  %v6871_v44 = vpop.f32.mrf.mxu0 }
  0xec   : > { %v3335_v60 = vsel %vm6072_vm7, %v5232_v55, %v3334_v38  ;;  %v3523_v32 = vrot.slane %v3522_v7, 4  ;;  %v3339_v10 = vsel %vm6072_vm7, %v5233_v14, %v3338_v39  ;;  %v3543_v28 = vshrl.u32 %v6859_v33, 16  ;;  %v6912_v38 = vld [vmem:[%s5950_s28 + $0x54] sm:$0x3] }
  0xed   : > { %v3536_v37 = vrot.slane %v3534_v4, 5  ;;  %v5238_v53 = vcombine.low %v3335_v60, %v3339_v10  ;;  %v3539_v48 = vrot.slane %v3537_v22, 6  ;;  %v3546_v24 = vshll.u32 %v6859_v33, 16  ;;  %v6877_v21 = vpop.f32.mrf.mxu0  ;;  %v5261_v10 = vld [vmem:[%s5950_s28 + $0x18] sm:$0xc] }
  0xee   : > { %v3552_v26 = vshrl.u32 %v5225_v2, 16  ;;  %v3532_v49 = vsel %vm6181_vm12, %v3523_v32, %v3531_v35  ;;  %v3545_v17 = vrot.slane %v3543_v28, 5  ;;  %v3555_v11 = vshll.u32 %v5225_v2, 16  ;;  %v6883_v6 = vpop.f32.mrf.mxu1 }
  0xef   : > { %v3561_v50 = vshrl.u32 %v6869_v42, 16  ;;  %v5254_v40 = vcombine.low %v3514_v45, %v3532_v49  ;;  %5696 = vmatprep.mubr.msk.bf16.mxu1 %vm331_vm3, %v5238_v53  ;;  %v3540_v63 = vor.u32 %v3539_v48, %v3536_v37  ;;  %v3548_v54 = vrot.slane %v3546_v24, 6  ;;  %v6890_v23 = vpop.f32.mrf.mxu0 }
  0xf0   : > { %v3554_v56 = vrot.slane %v3552_v26, 5  ;;  %v3557_v46 = vrot.slane %v3555_v11, 6  ;;  %v3564_v8 = vshll.u32 %v6869_v42, 16  ;;  %v5234_v12 = vrot.slane %v5226_v16, 9  ;;  %v6898_v9 = vpop.f32.mrf.mxu1 }
  0xf1   : > { %v3563_v3 = vrot.slane %v3561_v50, 5  ;;  %5703 = vmatmul.mubr.msk.bf16.vlgmr.msra.gmra.mxu0 %vm331_vm3, %v5254_v40  ;;  %v3541_v18 = vrot.slane %v3540_v63, 4  ;;  %v3549_v19 = vor.u32 %v3548_v54, %v3545_v17  ;;  %v3342_v31 = vrot.slane %v6769_v25, 5  ;;  %v6902_v27 = vpop.f32.mrf.mxu0  ;;  %v5850_v26 = vld [vmem:[%s7539_s1 + $0x28] ss:$0 sps:$4 sm:$0xcc]  }
  0xf2   : > { %v5235_v15 = vrot.slane %v5227_v5, 9  ;;  %5721 = vmatpush3.bf16.msra.mxu0 %v3910_v20  ;;  %v3558_v36 = vor.u32 %v3557_v46, %v3554_v56  ;;  %v3566_v29 = vrot.slane %v3564_v8, 6  ;;  %v3346_v2 = vrot.slane %v6780_v0, 5  ;;  %v6905_v52 = vpop.f32.mrf.mxu1  ;;  %v5262_v40 = vld [vmem:[%s5950_s28 + $0x20] sm:$0xc] }
  0xf3   : > { %v3570_v55 = vshrl.u32 %v5226_v16, 16  ;;  %v3550_v34 = vsel %vm6181_vm12, %v3541_v18, %v3549_v19  ;;  %v3343_v30 = vsel %vm6072_vm7, %v5234_v12, %v3342_v31  ;;  %v3573_v25 = vshll.u32 %v5226_v16, 16  ;;  %5795 = vmatprep.subr.msk.bf16.mxu0 %vm344_vm0, %v6896_v43  ;;  %v6917_v20 = vpop.f32.mrf.mxu0 }
  0xf4   : > { %v3579_v7 = vshrl.u32 %v6888_v51, 16  ;;  %v3559_v0 = vrot.slane %v3558_v36, 4  ;;  %v3567_v14 = vor.u32 %v3566_v29, %v3563_v3  ;;  %v3347_v39 = vsel %vm6072_vm7, %v5235_v15, %v3346_v2  ;;  %v6921_v45 = vpop.f32.mrf.mxu1  ;;  %v5263_v3 = vld [vmem:[%s5950_s28 + $0x28] sm:$0xc]  ;;  %v5264_v15 = vld [vmem:[%s5950_s28 + $0x30] sm:$0xc] }
  0xf5   : > { %v3572_v4 = vrot.slane %v3570_v55, 5  ;;  %v5239_v35 = vcombine.low %v3343_v30, %v3347_v39  ;;  %v3575_v60 = vrot.slane %v3573_v25, 6  ;;  %v3582_v32 = vshll.u32 %v6888_v51, 16  ;;  %v6925_v37 = vpop.f32.mrf.mxu0 }
  0xf6   : > { %v3581_v22 = vrot.slane %v3579_v7, 5  ;;  %v3568_v28 = vsel %vm6181_vm12, %v3559_v0, %v3567_v14  ;;  %v3588_v53 = vshrl.u32 %v5227_v5, 16  ;;  %v3591_v48 = vshll.u32 %v5227_v5, 16  ;;  %v6933_v49 = vpop.f32.mrf.mxu1  ;;  %v5265_v14 = vld [vmem:[%s5950_s28 + $0x38] sm:$0xc] }
  0xf7   : > { %v3597_v24 = vshrl.u32 %v6912_v38, 16  ;;  %v5255_v17 = vcombine.low %v3550_v34, %v3568_v28  ;;  %5697 = vmatmul.mubr.msk.bf16.gmra.mxu1 %vm331_vm3, %v5239_v35  ;;  %v3576_v11 = vor.u32 %v3575_v60, %v3572_v4  ;;  %v3584_v50 = vrot.slane %v3582_v32, 6  ;;  %v6938_v63 = vpop.f32.mrf.mxu0  ;;  %v5266_v32 = vld [vmem:[%s5950_s28 + $0x40] sm:$0xc] }
  0xf8   : > { %v3600_v16 = vshll.u32 %v6912_v38, 16  ;;  %v3590_v54 = vrot.slane %v3588_v53, 5  ;;  %v3593_v56 = vrot.slane %v3591_v48, 6  ;;  %v5269_v46 = vrot.slane %v5261_v10, 10  ;;  %v6941_v8 = vpop.f32.mrf.mxu1 }
  0xf9   : > { %v3599_v5 = vrot.slane %v3597_v24, 5  ;;  %5706 = vmatprep.mubr.msk.bf16.mxu0 %vm331_vm3, %v5255_v17  ;;  %v3577_v12 = vrot.slane %v3576_v11, 4  ;;  %v3585_v18 = vor.u32 %v3584_v50, %v3581_v22  ;;  %v3732_v31 = vrot.slane %v6798_v62, 6  ;;  %v6946_v36 = vpop.f32.mrf.mxu0 }
  0xfa   : > { %v3602_v19 = vrot.slane %v3600_v16, 6  ;;  %v3594_v29 = vor.u32 %v3593_v56, %v3590_v54  ;;  %v5270_v2 = vrot.slane %v5262_v40, 10  ;;  %v3736_v55 = vrot.slane %v6808_v13, 6  ;;  %v6949_v30 = vpop.f32.mrf.mxu1  ;;  %v5849_v13 = vld [vmem:[%s5950_s28 + $0x20] ss:$8 sps:$4 sm:$0xff]  }
  0xfb   : > { %v4129_v34 = vrot.slane %v5850_v26, 2  ;;  %v3586_v25 = vsel %vm6181_vm12, %v3577_v12, %v3585_v18  ;;  %v3733_v0 = vsel %vm6173_vm11, %v5269_v46, %v3732_v31  ;;  %v5271_v62 = vrot.slane %v5263_v3, 10  ;;  %v6956_v39 = vpop.f32.mrf.mxu0  ;;  %v5267_v26 = vld [vmem:[%s5950_s28 + $0x48] sm:$0xc]  ;;  %v5268_v16 = vld [vmem:[%s5950_s28 + $0x50] sm:$0xc] }
  0xfc   : > { %v3603_v7 = vor.u32 %v3602_v19, %v3599_v5  ;;  %v3595_v4 = vrot.slane %v3594_v29, 4  ;;  %v3737_v35 = vsel %vm6173_vm11, %v5270_v2, %v3736_v55  ;;  %v3740_v60 = vrot.slane %v6829_v61, 6  ;;  %v6964_v10 = vpop.f32.mrf.mxu1  ;;  %v5302_v40 = vld [vmem:[%s5950_s28 + $0x20] sm:$0xf]  ;;  %v5303_v3 = vld [vmem:[%s5950_s28 + $0x24] sm:$0x1] }
  0xfd   : > { %5794 = vmatprep.subr.msk.bf16.mxu1 %vm344_vm0, %v4129_v34  ;;  %v5272_v22 = vrot.slane %v5264_v15, 10  ;;  %v5277_v28 = vcombine.low %v3733_v0, %v3737_v35  ;;  %v3744_v53 = vrot.slane %v6843_v57, 6  ;;  %v4143_v48 = vsel %vm344_vm0, %v4129_v34, 0  ;;  %v6973_v17 = vpop.f32.mrf.mxu0  ;;  %v5304_v15 = vld [vmem:[%s5950_s28 + $0x28] sm:$0xf] }
  0xfe   : > { %v6970_v24 = vsel %vm344_vm0, %v6896_v43, 0  ;;  %v3604_v61 = vsel %vm6181_vm12, %v3595_v4, %v3603_v7  ;;  %v3741_v11 = vsel %vm6173_vm11, %v5271_v62, %v3740_v60  ;;  %v5273_v50 = vrot.slane %v5265_v14, 10  ;;  %v6982_v54 = vpop.f32.mrf.mxu1  ;;  %v5305_v34 = vld [vmem:[%s5950_s28 + $0x2c] sm:$0x1]  ;;  %v7009_v4 = vld [vmem:[%s5950_s28 + $0x20] sm:$0xe] }
  0xff   : > { %v3748_v57 = vrot.slane %v6859_v33, 6  ;;  %v5256_v56 = vcombine.low %v3586_v25, %v3604_v61  ;;  %5712 = vmatprep.mubr.msk.bf16.mxu1 %vm331_vm3, %v5277_v28  ;;  %v3745_v43 = vsel %vm6173_vm11, %v5272_v22, %v3744_v53  ;;  %v5274_v5 = vrot.slane %v5266_v32, 10  ;;  %v6989_v12 = vpop.f32.mrf.mxu0  ;;  %v7012_v35 = vld [vmem:[%s5950_s28 + $0x28] sm:$0xe]  ;;  %v5851_v60 = vld [vmem:[%s5950_s28 + $0x30] ss:$8 sps:$4 sm:$0xff]  }
 0x100   : > { %v3752_v46 = vrot.slane %v6869_v42, 6  ;;  %v5278_v18 = vcombine.low %v3741_v11, %v3745_v43  ;;  %v5275_v19 = vrot.slane %v5267_v26, 10  ;;  %v3756_v31 = vrot.slane %v6888_v51, 6  ;;  %v6995_v29 = vpop.f32.mrf.mxu1  ;;  %v7022_v53 = vld [vmem:[%s7539_s1 + $0x2c] ss:$0 sps:$4 sm:$0xcc]  }
 0x101   : > { %v3749_v33 = vsel %vm6173_vm11, %v5273_v50, %v3748_v57  ;;  %5707 = vmatmul.mubr.msk.bf16.gmra.mxu0 %vm331_vm3, %v5256_v56  ;;  %v5276_v2 = vrot.slane %v5268_v16, 10  ;;  %v3760_v55 = vrot.slane %v6912_v38, 6  ;;  %v4002_v25 = vshrl.u32 %v5302_v40, 16  ;;  %v7002_v7 = vpop.f32.mrf.mxu0  ;;  %v5852_v26 = vld [vmem:[%s5950_s28 + $0x40] ss:$8 sps:$4 sm:$0xff]  }
 0x102   : > { %v3753_v42 = vsel %vm6173_vm11, %v5274_v5, %v3752_v46  ;;  %7549 = vst [vmem:[#allocation2_spill] sm:$0xff] %v7002_v7  ;;  %5722 = vmatprep.mubr.msk.bf16.mxu0 %vm331_vm3, %v5849_v13  ;;  %5713 = vmatmul.mubr.msk.bf16.vlgmr.msra.gmra.mxu1 %vm331_vm3, %v5278_v18  ;;  %v3757_v0 = vsel %vm6173_vm11, %v5275_v19, %v3756_v31  ;;  %v4005_v62 = vshll.u32 %v5302_v40, 16  ;;  %v4011_v14 = vshll.u32 %v5303_v3, 16  ;;  %v7014_v38 = vpop.f32.mrf.mxu1  ;;  %v5306_v57 = vld [vmem:[%s5950_s28 + $0x30] sm:$0xf] }
 0x103   : > { %v5279_v51 = vcombine.low %v3749_v33, %v3753_v42  ;;  %5731 = vmatpush3.bf16.msra.mxu1 %v4143_v48  ;;  %v3761_v13 = vsel %vm6173_vm11, %v5276_v2, %v3760_v55  ;;  %v4004_v22 = vrot.slane %v4002_v25, 4  ;;  %v4016_v32 = vshrl.u32 %v5304_v15, 16  ;;  %v5307_v46 = vld [vmem:[%s5950_s28 + $0x34] sm:$0x1]  ;;  %v7031_v18 = vpop.f32.mrf.mxu0  ;;  %v5308_v42 = vld [vmem:[%s5950_s28 + $0x38] sm:$0xf] }
 0x104   : > { %v4019_v28 = vshll.u32 %v5304_v15, 16  ;;  %v5280_v61 = vcombine.low %v3757_v0, %v3761_v13  ;;  %v4007_v11 = vrot.slane %v4005_v62, 5  ;;  %v4013_v50 = vrot.slane %v4011_v14, 5  ;;  %v7027_v16 = vpop.f32.mrf.mxu1  ;;  %7550 = vst [vmem:[#allocation3_spill] sm:$0xff] %v7031_v18  ;;  %v5309_v0 = vld [vmem:[%s5950_s28 + $0x3c] sm:$0x1] }
 0x105   : > { %5716 = vmatprep.mubr.msk.bf16.mxu1 %vm331_vm3, %v5279_v51  ;;  %v4025_v48 = vshll.u32 %v5305_v34, 16  ;;  %v4018_v40 = vrot.slane %v4016_v32, 4  ;;  %v5335_v43 = vrot.slane %v7009_v4, 9  ;;  %v4244_v5 = vrot.slane %v5303_v3, 5  ;;  %v7044_v62 = vld [vmem:[%s5950_s28 + $0x30] sm:$0xe] }
 0x106   : > { %v4021_v56 = vrot.slane %v4019_v28, 5  ;;  %v4008_v33 = vor.u32 %v4007_v11, %v4004_v22  ;;  %v5336_v31 = vrot.slane %v7012_v35, 9  ;;  %v4248_v15 = vrot.slane %v5305_v34, 5  ;;  %v7035_v2 = vpop.f32.mrf.mxu1  ;;  %v4688_v32 = vld [vmem:[%s7539_s1 + $0x30] sm:$0x3] }
 0x107   : > { %v4027_v19 = vrot.slane %v4025_v48, 5  ;;  %v7039_v25 = vsel %vm6072_vm7, %v5335_v43, %v4244_v5  ;;  %v4543_v51 = vrot.slane %v7022_v53, 2  ;;  %v4030_v3 = vshrl.u32 %v5306_v57, 16  ;;  %v5314_v18 = vld [vmem:[%s5950_s28 + $0x50] sm:$0xf] }
 0x108   : > { %v4022_v55 = vor.u32 %v4021_v56, %v4018_v40  ;;  %v4009_v14 = vrot.slane %v4008_v33, 4  ;;  %v7048_v13 = vsel %vm6072_vm7, %v5336_v31, %v4248_v15  ;;  %v4033_v34 = vshll.u32 %v5306_v57, 16  ;;  %v7053_v28 = vpop.f32.mrf.mxu1  ;;  %v7059_v57 = vpop.f32.mrf.mxu0  ;;  %v7066_v33 = vld [vmem:[%s5950_s28 + $0x38] sm:$0xe] }
 0x109   : > { %v4039_v22 = vshll.u32 %v5307_v46, 16  ;;  %7551 = vst [vmem:[#allocation4_spill] sm:$0xff] %v7053_v28  ;;  %5723 = vmatmul.mubr.msk.bf16.vlgmr.msra.gmra.mxu0 %vm331_vm3, %v5851_v60  ;;  %v5343_v11 = vcombine.low %v7039_v25, %v7048_v13  ;;  %5796 = vmatprep.subr.msk.bf16.mxu1 %vm344_vm0, %v4543_v51  ;;  %v4032_v48 = vrot.slane %v4030_v3, 4  ;;  %v4044_v40 = vshrl.u32 %v5308_v42, 16  ;;  %7552 = vst [vmem:[#allocation5_spill] sm:$0xff] %v7059_v57 }
 0x10a   : > { %v4023_v53 = vrot.slane %v4022_v55, 4  ;;  %5741 = vmatpush3.bf16.msra.mxu0 %v6970_v24  ;;  %5726 = vmatprep.mubr.msk.bf16.mxu0 %vm331_vm3, %v5852_v26  ;;  %v4014_v56 = vsel %vm6005_vm4, %v4009_v14, %v4013_v50  ;;  %v4035_v43 = vrot.slane %v4033_v34, 5  ;;  %v4047_v5 = vshll.u32 %v5308_v42, 16  ;;  %v5853_v31 = vld [vmem:[%s5950_s28 + $0x50] ss:$8 sps:$4 sm:$0xff]   ;;  %v7074_v50 = vpop.f32.mrf.mxu1  ;;  %v7081_v57 = vpop.f32.mrf.mxu0 }
 0x10b   : > { %v4041_v60 = vrot.slane %v4039_v22, 5  ;;  %5717 = vmatmul.mubr.msk.bf16.gmra.mxu1 %vm331_vm3, %v5280_v61  ;;  %v4046_v24 = vrot.slane %v4044_v40, 4  ;;  %v4053_v55 = vshll.u32 %v5309_v0, 16  ;;  %v5337_v26 = vrot.slane %v7044_v62, 9  ;;  %5797 = vmatprep.subr.msk.bf16.mxu0 %vm344_vm0, %v4688_v32  ;;  %7553 = vst [vmem:[#allocation6_spill] sm:$0xff] %v7074_v50  ;;  %7554 = vst [vmem:[#allocation7_spill] sm:$0xff] %v7081_v57 }
 0x10c   : > { %v4028_v15 = vsel %vm6005_vm4, %v4023_v53, %v4027_v19  ;;  %v4036_v3 = vor.u32 %v4035_v43, %v4032_v48  ;;  %v4049_v42 = vrot.slane %v4047_v5, 5  ;;  %v4252_v14 = vrot.slane %v5307_v46, 5  ;;  %v5310_v13 = vld [vmem:[%s5950_s28 + $0x40] sm:$0xf]  ;;  %v5311_v61 = vld [vmem:[%s5950_s28 + $0x44] sm:$0x1] }
 0x10d   : > { %v5318_v25 = vcombine.low %v4014_v56, %v4028_v15  ;;  %v4055_v34 = vrot.slane %v4053_v55, 5  ;;  %v5338_v19 = vrot.slane %v7066_v33, 9  ;;  %v4256_v22 = vrot.slane %v5309_v0, 5  ;;  %v5312_v40 = vld [vmem:[%s5950_s28 + $0x48] sm:$0xf] }
 0x10e   : > { %v4557_v53 = vsel %vm344_vm0, %v4543_v51, 0  ;;  %v4037_v56 = vrot.slane %v4036_v3, 4  ;;  %v4050_v48 = vor.u32 %v4049_v42, %v4046_v24  ;;  %v7086_v46 = vsel %vm6072_vm7, %v5337_v26, %v4252_v14  ;;  %v5313_v5 = vld [vmem:[%s5950_s28 + $0x4c] sm:$0x1]  ;;  %v7095_v57 = vld [vmem:[%s5950_s28 + $0x40] sm:$0xe] }
 0x10f   : > { %5732 = vmatprep.mubr.msk.bf16.mxu1 %vm331_vm3, %v5318_v25  ;;  %v7089_v43 = vsel %vm344_vm0, %v4688_v32, 0  ;;  %v4257_v0 = vsel %vm6072_vm7, %v5338_v19, %v4256_v22  ;;  %v4058_v51 = vshrl.u32 %v5310_v13, 16  ;;  %v4061_v15 = vshll.u32 %v5310_v13, 16  ;;  %v7097_v25 = vpop.f32.mrf.mxu1  ;;  %v7103_v42 = vld [vmem:[%s5950_s28 + $0x48] sm:$0xe] }
 0x110   : > { %v4067_v55 = vshll.u32 %v5311_v61, 16  ;;  %7555 = vst [vmem:[#allocation8_spill] sm:$0xff] %v7097_v25  ;;  %v4042_v24 = vsel %vm6005_vm4, %v4037_v56, %v4041_v60  ;;  %v4051_v26 = vrot.slane %v4050_v48, 4  ;;  %v5344_v3 = vcombine.low %v7086_v46, %v4257_v0 }
 0x111   : > { %v4072_v32 = vshrl.u32 %v5312_v40, 16  ;;  %5727 = vmatmul.mubr.msk.bf16.gmra.mxu0 %vm331_vm3, %v5853_v31  ;;  %v4060_v14 = vrot.slane %v4058_v51, 4  ;;  %v4063_v13 = vrot.slane %v4061_v15, 5  ;;  %v4075_v22 = vshll.u32 %v5312_v40, 16  ;;  %v7107_v50 = vpop.f32.mrf.mxu0  ;;  %v5315_v15 = vld [vmem:[%s5950_s28 + $0x54] sm:$0x1] }
 0x112   : > { %v4069_v19 = vrot.slane %v4067_v55, 5  ;;  %7556 = vst [vmem:[#allocation9_spill] sm:$0xff] %v7107_v50  ;;  %5742 = vmatprep.mubr.msk.bf16.mxu0 %vm331_vm3, %v5343_v11  ;;  %v4056_v60 = vsel %vm6005_vm4, %v4051_v26, %v4055_v34  ;;  %v4081_v48 = vshll.u32 %v5313_v5, 16  ;;  %v5339_v46 = vrot.slane %v7095_v57, 9  ;;  %v5316_v55 = vld [vmem:[%s5950_s28 + $0x58] sm:$0xf] }
 0x113   : > { %v4074_v56 = vrot.slane %v4072_v32, 4  ;;  %v5319_v0 = vcombine.low %v4042_v24, %v4056_v60  ;;  %v4064_v31 = vor.u32 %v4063_v13, %v4060_v14  ;;  %v4077_v51 = vrot.slane %v4075_v22, 5  ;;  %v7115_v40 = vpop.f32.mrf.mxu1  ;;  %v7117_v7 = vpop.f32.mrf.mxu0  ;;  %v5317_v14 = vld [vmem:[%s5950_s28 + $0x5c] sm:$0x1] }
 0x114   : > { %v4260_v25 = vrot.slane %v5311_v61, 5  ;;  %7557 = vst [vmem:[#allocation10_spill] sm:$0xff] %v7115_v40  ;;  %7558 = vst [vmem:[#allocation11_spill] sm:$0xff] %v7117_v7  ;;  %v4083_v50 = vrot.slane %v4081_v48, 5  ;;  %v5340_v11 = vrot.slane %v7103_v42, 9  ;;  %v4264_v34 = vrot.slane %v5313_v5, 5 }
 0x115   : > { %v4086_v26 = vshrl.u32 %v5314_v18, 16  ;;  %5733 = vmatmul.mubr.msk.bf16.vlgmr.msra.gmra.mxu1 %vm331_vm3, %v5319_v0  ;;  %v4065_v32 = vrot.slane %v4064_v31, 4  ;;  %v4078_v24 = vor.u32 %v4077_v51, %v4074_v56  ;;  %v4089_v13 = vshll.u32 %v5314_v18, 16  ;;  %v7124_v22 = vpop.f32.mrf.mxu1  ;;  %v7129_v40 = vld [vmem:[%s5950_s28 + $0x50] sm:$0xe]  ;;  %v7131_v0 = vpop.f32.mrf.mxu0 }
 0x116   : > { %v4261_v61 = vsel %vm6072_vm7, %v5339_v46, %v4260_v25  ;;  %7559 = vst [vmem:[#allocation12_spill] sm:$0xff] %v7124_v22  ;;  %5751 = vmatpush3.bf16.msra.mxu1 %v4557_v53  ;;  %v4265_v60 = vsel %vm6072_vm7, %v5340_v11, %v4264_v34  ;;  %v4095_v7 = vshll.u32 %v5315_v15, 16  ;;  %v4100_v5 = vshrl.u32 %v5316_v55, 16  ;;  %7560 = vst [vmem:[#allocation13_spill] sm:$0xff] %v7131_v0  ;;  %v7136_v31 = vld [vmem:[%s5950_s28 + $0x58] sm:$0xe] }
 0x117   : > { %v4088_v48 = vrot.slane %v4086_v26, 4  ;;  %v4070_v56 = vsel %vm6005_vm4, %v4065_v32, %v4069_v19  ;;  %v4079_v25 = vrot.slane %v4078_v24, 4  ;;  %v5345_v46 = vcombine.low %v4261_v61, %v4265_v60  ;;  %v7138_v53 = vpop.f32.mrf.mxu1  ;;  %v7145_v32 = vld [vmem:[%s5950_s28 + $0x24] sm:$0x3] }
 0x118   : > { %v4091_v18 = vrot.slane %v4089_v13, 5  ;;  %v4097_v51 = vrot.slane %v4095_v7, 5  ;;  %v4102_v11 = vrot.slane %v4100_v5, 4  ;;  %v4103_v34 = vshll.u32 %v5316_v55, 16  ;;  %v7152_v13 = vpop.f32.mrf.mxu0 }
 0x119   : > { %v4109_v26 = vshll.u32 %v5317_v14, 16  ;;  %5743 = vmatmul.mubr.msk.bf16.vlgmr.msra.gmra.mxu0 %vm331_vm3, %v5344_v3  ;;  %v4084_v0 = vsel %vm6005_vm4, %v4079_v25, %v4083_v50  ;;  %v5341_v28 = vrot.slane %v7129_v40, 9  ;;  %v4268_v19 = vrot.slane %v5315_v15, 5  ;;  %v7147_v24 = vpop.f32.mrf.mxu1  ;;  %7561 = vst [vmem:[#allocation14_spill] sm:$0xff] %v7152_v13 }
 0x11a   : > { %v4092_v22 = vor.u32 %v4091_v18, %v4088_v48  ;;  %5761 = vmatpush3.bf16.msra.mxu0 %v7089_v43  ;;  %v5320_v7 = vcombine.low %v4070_v56, %v4084_v0  ;;  %5746 = vmatprep.mubr.msk.bf16.mxu0 %vm331_vm3, %v5345_v46  ;;  %v4105_v55 = vrot.slane %v4103_v34, 5  ;;  %v5342_v3 = vrot.slane %v7136_v31, 9  ;;  %v5352_v0 = vld [vmem:[%s5950_s28 + $0x2c] sm:$0x3]  ;;  %v5368_v34 = vld [vmem:[%s5950_s28 + $0x20] sm:$0xc] }
 0x11b   : > { %v4111_v61 = vrot.slane %v4109_v26, 5  ;;  %v4269_v15 = vsel %vm6072_vm7, %v5341_v28, %v4268_v19  ;;  %v4272_v60 = vrot.slane %v5317_v14, 5  ;;  %v4384_v48 = vshrl.u32 %v7009_v4, 16  ;;  %v7157_v5 = vpop.f32.mrf.mxu1 }
 0x11c   : > { %v4093_v50 = vrot.slane %v4092_v22, 4  ;;  %7562 = vst [vmem:[#allocation15_spill] sm:$0xff] %v7157_v5  ;;  %5736 = vmatprep.mubr.msk.bf16.mxu1 %vm331_vm3, %v5320_v7  ;;  %v4106_v43 = vor.u32 %v4105_v55, %v4102_v11  ;;  %v4387_v56 = vshll.u32 %v7009_v4, 16  ;;  %v4393_v25 = vshrl.u32 %v7145_v32, 16 }
 0x11d   : > { %v4396_v46 = vshll.u32 %v7145_v32, 16  ;;  %v4273_v28 = vsel %vm6072_vm7, %v5342_v3, %v4272_v60  ;;  %v4386_v14 = vrot.slane %v4384_v48, 5  ;;  %v4402_v18 = vshrl.u32 %v7012_v35, 16  ;;  %v7170_v26 = vpop.f32.mrf.mxu1 }
 0x11e   : > { %v4098_v22 = vsel %vm6005_vm4, %v4093_v50, %v4097_v51  ;;  %7563 = vst [vmem:[#allocation16_spill] sm:$0xff] %v7170_v26  ;;  %v4107_v11 = vrot.slane %v4106_v43, 4  ;;  %v5346_v19 = vcombine.low %v4269_v15, %v4273_v28  ;;  %v4389_v4 = vrot.slane %v4387_v56, 6  ;;  %v7172_v55 = vpop.f32.mrf.mxu0 }
 0x11f   : > { %v4395_v7 = vrot.slane %v4393_v25, 5  ;;  %7564 = vst [vmem:[#allocation17_spill] sm:$0xff] %v7172_v55  ;;  %v4398_v13 = vrot.slane %v4396_v46, 6  ;;  %v4404_v5 = vrot.slane %v4402_v18, 5  ;;  %v4405_v51 = vshll.u32 %v7012_v35, 16  ;;  %v7176_v3 = vpop.f32.mrf.mxu1 }
 0x120   : > { %v4411_v50 = vshrl.u32 %v5352_v0, 16  ;;  %7565 = vst [vmem:[#allocation18_spill] sm:$0xff] %v7176_v3  ;;  %v4112_v60 = vsel %vm6005_vm4, %v4107_v11, %v4111_v61  ;;  %v4390_v48 = vor.u32 %v4389_v4, %v4386_v14  ;;  %v4414_v26 = vshll.u32 %v5352_v0, 16  ;;  %v7180_v15 = vpop.f32.mrf.mxu0  ;;  %v5353_v18 = vld [vmem:[%s5950_s28 + $0x34] sm:$0x3] }
 0x121   : > { %v5376_v43 = vrot.slane %v5368_v34, 10  ;;  %v5321_v56 = vcombine.low %v4098_v22, %v4112_v60  ;;  %5747 = vmatmul.mubr.msk.bf16.gmra.mxu0 %vm331_vm3, %v5346_v19  ;;  %v4399_v25 = vor.u32 %v4398_v13, %v4395_v7  ;;  %v4407_v46 = vrot.slane %v4405_v51, 6  ;;  %v7184_v35 = vpop.f32.mrf.mxu1  ;;  %v5354_v7 = vld [vmem:[%s5950_s28 + $0x3c] sm:$0x3] }
 0x122   : > { %v4413_v28 = vrot.slane %v4411_v50, 5  ;;  %v4391_v55 = vrot.slane %v4390_v48, 4  ;;  %v4416_v3 = vrot.slane %v4414_v26, 6  ;;  %v4658_v41 = vrot.slane %v7145_v32, 6  ;;  %v7187_v14 = vpop.f32.mrf.mxu0 }
 0x123   : > { %v5377_v61 = vrot.slane %v5369_v1, 10  ;;  %7566 = vst [vmem:[#allocation19_spill] sm:$0xff] %v7187_v14  ;;  %5737 = vmatmul.mubr.msk.bf16.gmra.mxu1 %vm331_vm3, %v5321_v56  ;;  %v4408_v34 = vor.u32 %v4407_v46, %v4404_v5  ;;  %v4662_v22 = vrot.slane %v5352_v0, 6  ;;  %v4420_v11 = vshrl.u32 %v7044_v62, 16  ;;  %v7192_v19 = vpop.f32.mrf.mxu1 }
 0x124   : > { %v4423_v13 = vshll.u32 %v7044_v62, 16  ;;  %v4400_v4 = vsel %vm6181_vm12, %v4391_v55, %v4399_v25  ;;  %v4417_v26 = vor.u32 %v4416_v3, %v4413_v28  ;;  %v4659_v32 = vsel %vm6173_vm11, %v5376_v43, %v4658_v41  ;;  %v7201_v62 = vpop.f32.mrf.mxu0  ;;  %v5370_v25 = vld [vmem:[%s5950_s28 + $0x30] sm:$0xc] }
 0x125   : > { %v4429_v51 = vshrl.u32 %v5353_v18, 16  ;;  %v4409_v50 = vrot.slane %v4408_v34, 4  ;;  %v4663_v5 = vsel %vm6173_vm11, %v5377_v61, %v4662_v22  ;;  %v4422_v0 = vrot.slane %v4420_v11, 5  ;;  %7567 = vst [vmem:[#allocation20_spill] sm:$0xff] %v7201_v62  ;;  %v7203_v60 = vpop.f32.mrf.mxu1  ;;  %v5371_v61 = vld [vmem:[%s5950_s28 + $0x38] sm:$0xc] }
 0x126   : > { %v4425_v1 = vrot.slane %v4423_v13, 6  ;;  %7568 = vst [vmem:[#allocation21_spill] sm:$0xff] %v7203_v60  ;;  %v5384_v48 = vcombine.low %v4659_v32, %v4663_v5  ;;  %v4432_v55 = vshll.u32 %v5353_v18, 16  ;;  %v4438_v3 = vshrl.u32 %v7066_v33, 16  ;;  %v5355_v60 = vld [vmem:[%s5950_s28 + $0x44] sm:$0x3] }
 0x127   : > { %v4431_v56 = vrot.slane %v4429_v51, 5  ;;  %v4418_v43 = vsel %vm6181_vm12, %v4409_v50, %v4417_v26  ;;  %v4441_v28 = vshll.u32 %v7066_v33, 16  ;;  %v4447_v41 = vshrl.u32 %v5354_v7, 16  ;;  %v7211_v34 = vpop.f32.mrf.mxu1 }
 0x128   : > { %v4426_v46 = vor.u32 %v4425_v1, %v4422_v0  ;;  %v5359_v22 = vcombine.low %v4400_v4, %v4418_v43  ;;  %5762 = vmatprep.mubr.msk.bf16.mxu0 %vm331_vm3, %v5384_v48  ;;  %v4434_v11 = vrot.slane %v4432_v55, 6  ;;  %v4440_v13 = vrot.slane %v4438_v3, 5 }
 0x129   : > { %v4450_v32 = vshll.u32 %v5354_v7, 16  ;;  %v4443_v5 = vrot.slane %v4441_v28, 6  ;;  %v4449_v62 = vrot.slane %v4447_v41, 5  ;;  %v5378_v14 = vrot.slane %v5370_v25, 10  ;;  %v7215_v26 = vpop.f32.mrf.mxu0  ;;  %v7220_v3 = vpop.f32.mrf.mxu1 }
 0x12a   : > { %v4427_v51 = vrot.slane %v4426_v46, 4  ;;  %7569 = vst [vmem:[#allocation22_spill] sm:$0xff] %v7215_v26  ;;  %5752 = vmatprep.mubr.msk.bf16.mxu1 %vm331_vm3, %v5359_v22  ;;  %v4435_v33 = vor.u32 %v4434_v11, %v4431_v56  ;;  %v4666_v0 = vrot.slane %v5353_v18, 6  ;;  %v5379_v1 = vrot.slane %v5371_v61, 10  ;;  %v5356_v56 = vld [vmem:[%s5950_s28 + $0x4c] sm:$0x3] }
 0x12b   : > { %v4452_v50 = vrot.slane %v4450_v32, 6  ;;  %v4444_v4 = vor.u32 %v4443_v5, %v4440_v13  ;;  %v4670_v43 = vrot.slane %v5354_v7, 6  ;;  %v4456_v48 = vshrl.u32 %v7095_v57, 16  ;;  %v5357_v26 = vld [vmem:[%s5950_s28 + $0x54] sm:$0x3] }
 0x12c   : > { %v4459_v55 = vshll.u32 %v7095_v57, 16  ;;  %v4436_v25 = vsel %vm6181_vm12, %v4427_v51, %v4435_v33  ;;  %v4667_v28 = vsel %vm6173_vm11, %v5378_v14, %v4666_v0  ;;  %v4465_v18 = vshrl.u32 %v5355_v60, 16  ;;  %v7229_v57 = vpop.f32.mrf.mxu0  ;;  %v5373_v0 = vld [vmem:[%s5950_s28 + $0x48] sm:$0xc] }
 0x12d   : > { %v4453_v46 = vor.u32 %v4452_v50, %v4449_v62  ;;  %v4445_v41 = vrot.slane %v4444_v4, 4  ;;  %v4671_v7 = vsel %vm6173_vm11, %v5379_v1, %v4670_v43  ;;  %v4458_v61 = vrot.slane %v4456_v48, 5  ;;  %7570 = vst [vmem:[#allocation23_spill] sm:$0xff] %v7229_v57  ;;  %v5372_v62 = vld [vmem:[%s5950_s28 + $0x40] sm:$0xc] }
 0x12e   : > { %v4461_v22 = vrot.slane %v4459_v55, 6  ;;  %v5385_v11 = vcombine.low %v4667_v28, %v4671_v7  ;;  %v4467_v13 = vrot.slane %v4465_v18, 5  ;;  %v4468_v32 = vshll.u32 %v5355_v60, 16 }
 0x12f   : > { %v4474_v51 = vshrl.u32 %v7103_v42, 16  ;;  %v4454_v14 = vsel %vm6181_vm12, %v4445_v41, %v4453_v46  ;;  %v4477_v33 = vshll.u32 %v7103_v42, 16  ;;  %v4483_v50 = vshrl.u32 %v5356_v56, 16  ;;  %v7237_v1 = vpop.f32.mrf.mxu1  ;;  %v7241_v46 = vpop.f32.mrf.mxu0 }
 0x130   : > { %v4462_v5 = vor.u32 %v4461_v22, %v4458_v61  ;;  %v5360_v4 = vcombine.low %v4436_v25, %v4454_v14  ;;  %5763 = vmatmul.mubr.msk.bf16.vlgmr.msra.gmra.mxu0 %vm331_vm3, %v5385_v11  ;;  %v4470_v43 = vrot.slane %v4468_v32, 6  ;;  %v4486_v55 = vshll.u32 %v5356_v56, 16 }
 0x131   : > { %v4476_v48 = vrot.slane %v4474_v51, 5  ;;  %v4479_v18 = vrot.slane %v4477_v33, 6  ;;  %v4485_v7 = vrot.slane %v4483_v50, 5  ;;  %v5380_v57 = vrot.slane %v5372_v62, 10  ;;  %v7246_v51 = vpop.f32.mrf.mxu1 }
 0x132   : > { %v4463_v28 = vrot.slane %v4462_v5, 4  ;;  %5753 = vmatmul.mubr.msk.bf16.vlgmr.msra.gmra.mxu1 %vm331_vm3, %v5360_v4  ;;  %v4471_v42 = vor.u32 %v4470_v43, %v4467_v13  ;;  %v4488_v41 = vrot.slane %v4486_v55, 6  ;;  %v4674_v61 = vrot.slane %v5355_v60, 6  ;;  %7571 = vst [vmem:[#allocation24_spill] sm:$0xff] %v7246_v51  ;;  %v5358_v13 = vld [vmem:[%s5950_s28 + $0x5c] sm:$0x3] }
 0x133   : > { %v5381_v22 = vrot.slane %v5373_v0, 10  ;;  %v4480_v25 = vor.u32 %v4479_v18, %v4476_v48  ;;  %v4678_v14 = vrot.slane %v5356_v56, 6  ;;  %v4492_v11 = vshrl.u32 %v7129_v40, 16  ;;  %v5374_v18 = vld [vmem:[%s5950_s28 + $0x50] sm:$0xc] }
 0x134   : > { %v4495_v32 = vshll.u32 %v7129_v40, 16  ;;  %v4472_v62 = vsel %vm6181_vm12, %v4463_v28, %v4471_v42  ;;  %v4489_v5 = vor.u32 %v4488_v41, %v4485_v7  ;;  %v4675_v33 = vsel %vm6173_vm11, %v5380_v57, %v4674_v61  ;;  %v7255_v40 = vpop.f32.mrf.mxu0  ;;  %v5375_v61 = vld [vmem:[%s5950_s28 + $0x58] sm:$0xc]  ;;  %s5394_s28 = sshll.u32 %s7632_s9, 5 }
 0x135   : > { %v4501_v60 = vshrl.u32 %v5357_v26, 16  ;;  %v4481_v50 = vrot.slane %v4480_v25, 4  ;;  %v4679_v56 = vsel %vm6173_vm11, %v5381_v22, %v4678_v14  ;;  %v4494_v0 = vrot.slane %v4492_v11, 5  ;;  %7572 = vst [vmem:[#allocation25_spill] sm:$0xff] %v7255_v40  ;;  %v7263_v25 = vpop.f32.mrf.mxu1  ;;  %s7493_s9 = scalar_lea.vmem %s7540_s2, %s5394_s28 }
 0x136   : > { %v4497_v4 = vrot.slane %v4495_v32, 6  ;;  %v5386_v43 = vcombine.low %v4675_v33, %v4679_v56  ;;  %v4504_v55 = vshll.u32 %v5357_v26, 16  ;;  %v4510_v28 = vshrl.u32 %v7136_v31, 16  ;;  %7573 = vst [vmem:[#allocation26_spill] sm:$0xff] %v7263_v25 }
 0x137   : > { %v4503_v48 = vrot.slane %v4501_v60, 5  ;;  %v4490_v57 = vsel %vm6181_vm12, %v4481_v50, %v4489_v5  ;;  %v4513_v42 = vshll.u32 %v7136_v31, 16  ;;  %v4519_v41 = vshrl.u32 %v5358_v13, 16 }
 0x138   : > { %v4498_v7 = vor.u32 %v4497_v4, %v4494_v0  ;;  %v5361_v22 = vcombine.low %v4472_v62, %v4490_v57  ;;  %5766 = vmatprep.mubr.msk.bf16.mxu0 %vm331_vm3, %v5386_v43  ;;  %v4506_v14 = vrot.slane %v4504_v55, 6  ;;  %v4512_v11 = vrot.slane %v4510_v28, 5  ;;  %v7273_v55 = vpop.f32.mrf.mxu1 }
 0x139   : > { %v4522_v32 = vshll.u32 %v5358_v13, 16  ;;  %v4515_v60 = vrot.slane %v4513_v42, 6  ;;  %v4521_v56 = vrot.slane %v4519_v41, 5  ;;  %v5382_v51 = vrot.slane %v5374_v18, 10  ;;  %v7266_v40 = vpop.f32.mrf.mxu0 }
 0x13a   : > { %v4499_v33 = vrot.slane %v4498_v7, 4  ;;  %5756 = vmatprep.mubr.msk.bf16.mxu1 %vm331_vm3, %v5361_v22  ;;  %v4507_v5 = vor.u32 %v4506_v14, %v4503_v48  ;;  %v4682_v50 = vrot.slane %v5357_v26, 6  ;;  %v5383_v0 = vrot.slane %v5375_v61, 10  ;;  %v7576_v61 = vld [vmem:[#allocation6_spill] sm:$0xff]  ;;  %v7579_v14 = vld [vmem:[#allocation3_spill] sm:$0xff] }
 0x13b   : > { %v4524_v31 = vrot.slane %v4522_v32, 6  ;;  %v4516_v4 = vor.u32 %v4515_v60, %v4512_v11  ;;  %v4686_v25 = vrot.slane %v5358_v13, 6  ;;  %v491_v62 = vadd.f32 %v6933_v49, %v6861_v59  ;;  %v7285_v49 = vpop.f32.mrf.mxu0  ;;  %v7578_v22 = vld [vmem:[#allocation10_spill] sm:$0xff]  ;;  %v7580_v11 = vld [vmem:[#allocation12_spill] sm:$0xff]  ;;  %v7581_v60 = vld [vmem:[#allocation5_spill] sm:$0xff] }
 0x13c   : > { %v483_v43 = vadd.f32 %v6941_v8, %v6871_v44  ;;  %v4508_v28 = vsel %vm6181_vm12, %v4499_v33, %v4507_v5  ;;  %v4683_v48 = vsel %vm6173_vm11, %v5382_v51, %v4682_v50  ;;  %v494_v26 = vadd.f32 %v6949_v30, %v6877_v21  ;;  %v7582_v5 = vld [vmem:[#allocation7_spill] sm:$0xff]  ;;  %v7583_v50 = vld [vmem:[#allocation9_spill] sm:$0xff] }
 0x13d   : > { %v4525_v18 = vor.u32 %v4524_v31, %v4521_v56  ;;  %v4517_v57 = vrot.slane %v4516_v4, 4  ;;  %v4687_v13 = vsel %vm6173_vm11, %v5383_v0, %v4686_v25  ;;  %v667_v59 = vadd.f32 %v6902_v27, %v491_v62  ;;  %v7577_v25 = vld [vmem:[#allocation8_spill] sm:$0xff]  ;;  %v7584_v4 = vld [vmem:[#allocation15_spill] sm:$0xff] }
 0x13e   : > { %v665_v44 = vadd.f32 %v6917_v20, %v483_v43  ;;  %v5387_v8 = vcombine.low %v4683_v48, %v4687_v13  ;;  %v668_v7 = vadd.f32 %v6925_v37, %v494_v26  ;;  %v486_v42 = vadd.f32 %v6964_v10, %v6890_v23  ;;  %v7585_v43 = vld [vmem:[#allocation11_spill] sm:$0xff]  ;;  %v7587_v26 = vld [vmem:[#allocation14_spill] sm:$0xff]  ;;  %v7588_v13 = vld [vmem:[#allocation16_spill] sm:$0xff] }
 0x13f   : > { %v507_v51 = vadd.f32 %v6982_v54, %v6883_v6  ;;  %v4526_v21 = vsel %vm6181_vm12, %v4517_v57, %v4525_v18  ;;  %v499_v47 = vadd.f32 %v6995_v29, %v6898_v9  ;;  %v510_v27 = vadd.f32 %v7014_v38, %v6905_v52  ;;  %v5598_v30 = vpop.f32.mrf.mxu1  ;;  %v7574_v52 = vld [vmem:[#allocation4_spill] sm:$0xff]  ;;  %v5605_v38 = vpop.f32.mrf.mxu0  ;;  %v7586_v18 = vld [vmem:[#allocation13_spill] sm:$0xff] }
 0x140   : > { %v502_v20 = vadd.f32 %v7027_v16, %v6921_v45  ;;  %v5362_v37 = vcombine.low %v4508_v28, %v4526_v21  ;;  %5767 = vmatmul.mubr.msk.bf16.gmra.mxu0 %vm331_vm3, %v5387_v8  ;;  %v666_v23 = vadd.f32 %v6938_v63, %v486_v42  ;;  %v927_v58 = vadd.f32 %v7035_v2, %v667_v59  ;;  %v7575_v16 = vld [vmem:[#allocation2_spill] sm:$0xff] }
 0x141   : > { %v671_v6 = vadd.f32 %v6946_v36, %v507_v51  ;;  %v669_v10 = vadd.f32 %v6956_v39, %v499_v47  ;;  %v672_v9 = vadd.f32 %v6973_v17, %v510_v27  ;;  %v925_v29 = vadd.f32 %v7574_v52, %v665_v44  ;;  %v1582_v45 = vpop.f32.mrf.mxu1  ;;  %v7589_v44 = vld [vmem:[#allocation17_spill] sm:$0xff]  ;;  %v7590_v8 = vld [vmem:[#allocation18_spill] sm:$0xff] }
 0x142   : > { %v670_v54 = vadd.f32 %v6989_v12, %v502_v20  ;;  %5757 = vmatmul.mubr.msk.bf16.gmra.mxu1 %vm331_vm3, %v5362_v37  ;;  %v1087_v41 = vadd.f32 %v7575_v16, %v927_v58  ;;  %v928_v63 = vadd.f32 %v7576_v61, %v668_v7  ;;  %v926_v36 = vadd.f32 %v7577_v25, %v666_v23  ;;  %v7591_v27 = vld [vmem:[#allocation21_spill] sm:$0xff]  ;;  %v7597_v61 = vld [vmem:[#allocation24_spill] sm:$0xff] }
 0x143   : > { %v931_v2 = vadd.f32 %v7578_v22, %v671_v6  ;;  %v1085_v39 = vadd.f32 %v7579_v14, %v925_v29  ;;  %v929_v17 = vadd.f32 %v7580_v11, %v669_v10  ;;  %v932_v12 = vadd.f32 %v7138_v53, %v672_v9  ;;  %v5599_v33 = vpop.f32.mrf.mxu1  ;;  %v1822_v53 = vpop.f32.mrf.mxu0  ;;  %v7592_v6 = vld [vmem:[#allocation19_spill] sm:$0xff]  ;;  %v7593_v10 = vld [vmem:[#allocation20_spill] sm:$0xff] }
 0x144   : > { %v930_v32 = vadd.f32 %v7147_v24, %v670_v54  ;;  %v1088_v56 = vadd.f32 %v7581_v60, %v928_v63  ;;  %v1086_v31 = vadd.f32 %v7582_v5, %v926_v36  ;;  %v1209_v62 = vadd.f32 %v7584_v4, %v1087_v41  ;;  %v7594_v54 = vld [vmem:[#allocation22_spill] sm:$0xff]  ;;  %v7596_v41 = vld [vmem:[#allocation25_spill] sm:$0xff] }
 0x145   : > { %v1091_v0 = vadd.f32 %v7583_v50, %v931_v2  ;;  %v1089_v28 = vadd.f32 %v7585_v43, %v929_v17  ;;  %v1092_v48 = vadd.f32 %v7586_v18, %v932_v12  ;;  %v1207_v59 = vadd.f32 %v7588_v13, %v1085_v39  ;;  %v1585_v21 = vpop.f32.mrf.mxu1 }
 0x146   : > { %v1090_v57 = vadd.f32 %v7587_v26, %v930_v32  ;;  %v1438_v24 = vadd.f32 %v7589_v44, %v1209_v62  ;;  %v1210_v7 = vadd.f32 %v7590_v8, %v1088_v56  ;;  %v1208_v42 = vadd.f32 %v7184_v35, %v1086_v31  ;;  %v7595_v35 = vld [vmem:[#allocation23_spill] sm:$0xff] }
 0x147   : > { %v1213_v51 = vadd.f32 %v7192_v19, %v1091_v0  ;;  %v1436_v47 = vadd.f32 %v7180_v15, %v1207_v59  ;;  %v1211_v20 = vadd.f32 %v7591_v27, %v1089_v28  ;;  %v1214_v37 = vadd.f32 %v7211_v34, %v1092_v48 }
 0x148   : > { %v1212_v23 = vadd.f32 %v7220_v3, %v1090_v57  ;;  %v1439_v58 = vadd.f32 %v7592_v6, %v1210_v7  ;;  %v1437_v9 = vadd.f32 %v7593_v10, %v1208_v42  ;;  %v1599_v29 = vadd.f32 %v7237_v1, %v1438_v24  ;;  %v7598_v3 = vld [vmem:[#allocation26_spill] sm:$0xff] }
 0x149   : > { %v1442_v52 = vadd.f32 %v7594_v54, %v1213_v51  ;;  %v1440_v16 = vadd.f32 %v7595_v35, %v1211_v20  ;;  %v1443_v19 = vadd.f32 %v7241_v46, %v1214_v37  ;;  %v1597_v63 = vadd.f32 %v7597_v61, %v1436_v47  ;;  %v5608_v25 = vpop.f32.mrf.mxu0 }
 0x14a   : > { %v1441_v15 = vadd.f32 %v7596_v41, %v1212_v23  ;;  %v1852_v34 = vadd.f32 %v7266_v40, %v1599_v29  ;;  %v1600_v36 = vadd.f32 %v7598_v3, %v1439_v58  ;;  %v1598_v22 = vadd.f32 %v7273_v55, %v1437_v9  ;;  %v5614_v14 = vpop.f32.mrf.mxu1 }
 0x14b   : > { %v1603_v2 = vadd.f32 %v5598_v30, %v1442_v52  ;;  %v1850_v39 = vadd.f32 %v7285_v49, %v1597_v63  ;;  %v1601_v1 = vadd.f32 %v1582_v45, %v1440_v16  ;;  %v1835_v11 = vpop.f32.mrf.mxu0  ;;  %v1604_v17 = vadd.f32 %v5599_v33, %v1443_v19 }
 0x14c   : > { %v1602_v12 = vadd.f32 %v1585_v21, %v1441_v15  ;;  %v1853_v46 = vadd.f32 %v5605_v38, %v1600_v36  ;;  %v1851_v32 = vadd.f32 %v1822_v53, %v1598_v22  ;;  %v2013_v56 = vadd.f32 %v5614_v14, %v1852_v34  ;;  %v1980_v5 = vpop.f32.mrf.mxu1 }
 0x14d   : > { %v1856_v60 = vadd.f32 %v5608_v25, %v1603_v2  ;;  %v1854_v31 = vadd.f32 %v1835_v11, %v1601_v1  ;;  %v5609_v50 = vpop.f32.mrf.mxu0  ;;  %v2011_v40 = vadd.f32 %v1980_v5, %v1850_v39  ;;  %vm4797_vm13 = vcmask 125952  }
 0x14e   : > { %v1857_v0 = vadd.f32 %v5609_v50, %v1604_v17  ;;  %v5615_v4 = vpop.f32.mrf.mxu1 }
 0x14f   : > { %v1838_v62 = vpop.f32.mrf.mxu0  ;;  %v2014_v55 = vadd.f32 %v5615_v4, %v1853_v46 }
 0x150   : > { %v1855_v30 = vadd.f32 %v1838_v62, %v1602_v12  ;;  %v1983_v43 = vpop.f32.mrf.mxu1 }
 0x151   : > { %v5624_v28 = vpop.f32.mrf.mxu0  ;;  %v2012_v49 = vadd.f32 %v1983_v43, %v1851_v32 }
 0x152   : > { %v2131_v45 = vadd.f32 %v5624_v28, %v2013_v56 }
 0x153   : > { %v2098_v18 = vpop.f32.mrf.mxu0  ;;  %v5618_v33 = vpop.f32.mrf.mxu1 }
 0x154   : > { %v2129_v48 = vadd.f32 %v2098_v18, %v2011_v40  ;;  %v2017_v38 = vadd.f32 %v5618_v33, %v1856_v60 }
 0x155   : > { %v5625_v26 = vpop.f32.mrf.mxu0  ;;  %v1996_v57 = vpop.f32.mrf.mxu1 }
 0x156   : > { %v2132_v13 = vadd.f32 %v5625_v26, %v2014_v55  ;;  %v2015_v59 = vadd.f32 %v1996_v57, %v1854_v31 }
 0x157   : > { %v2101_v53 = vpop.f32.mrf.mxu0  ;;  %v5619_v44 = vpop.f32.mrf.mxu1 }
 0x158   : > { %v2130_v24 = vadd.f32 %v2101_v53, %v2012_v49  ;;  %v2018_v8 = vadd.f32 %v5619_v44, %v1857_v0 }
 0x159   : > { %v5628_v7 = vpop.f32.mrf.mxu0  ;;  %v1999_v42 = vpop.f32.mrf.mxu1 }
 0x15a   : > { %v2135_v51 = vadd.f32 %v5628_v7, %v2017_v38  ;;  %v2016_v21 = vadd.f32 %v1999_v42, %v1855_v30 }
 0x15b   : > { %v2114_v47 = vpop.f32.mrf.mxu0 }
 0x15c   : > { %v2133_v27 = vadd.f32 %v2114_v47, %v2015_v59 }
 0x15d   : > { %v5629_v20 = vpop.f32.mrf.mxu0  ;;  %v5634_v37 = vpop.f32.mrf.mxu1 }
 0x15e   : > { %v2136_v23 = vadd.f32 %v5629_v20, %v2018_v8  ;;  %v2364_v6 = vadd.f32 %v5634_v37, %v2131_v45 }
 0x15f   : > { %v2117_v58 = vpop.f32.mrf.mxu0  ;;  %v2331_v10 = vpop.f32.mrf.mxu1 }
 0x160   : > { %v2134_v9 = vadd.f32 %v2117_v58, %v2016_v21  ;;  %v2362_v54 = vadd.f32 %v2331_v10, %v2129_v48 }
 0x161   : > { %v5644_v52 = vpop.f32.mrf.mxu0  ;;  %v5635_v29 = vpop.f32.mrf.mxu1 }
 0x162   : > { %v7345_v35 = vadd.f32 %v5644_v52, %v2364_v6  ;;  %v2365_v16 = vadd.f32 %v5635_v29, %v2132_v13 }
 0x163   : > { %v2488_v19 = vpop.f32.mrf.mxu0  ;;  %v2334_v41 = vpop.f32.mrf.mxu1 }
 0x164   : > { %v7347_v15 = vadd.f32 %v2488_v19, %v2362_v54  ;;  %v2363_v61 = vadd.f32 %v2334_v41, %v2130_v24 }
 0x165   : > { %v5645_v63 = vpop.f32.mrf.mxu0 }
 0x166   : > { %v7349_v25 = vadd.f32 %v5645_v63, %v2365_v16 }
 0x167   : > { %v2491_v34 = vpop.f32.mrf.mxu0 }
 0x168   : > { %v7351_v3 = vadd.f32 %v2491_v34, %v2363_v61 }
 0x169   : > { %v5648_v36 = vpop.f32.mrf.mxu0 }
 0x16b   : > { %v2504_v2 = vpop.f32.mrf.mxu0 }
 0x16c   : > { %v5638_v22 = vpop.f32.mrf.mxu1 }
 0x16d   : > { %v2368_v14 = vadd.f32 %v5638_v22, %v2135_v51  ;;  %v5649_v12 = vpop.f32.mrf.mxu0 }
 0x16e   : > { %v2347_v39 = vpop.f32.mrf.mxu1 }
 0x16f   : > { %v2525_v1 = vadd.f32 %v5648_v36, %v2368_v14  ;;  %v2366_v11 = vadd.f32 %v2347_v39, %v2133_v27  ;;  %v2507_v31 = vpop.f32.mrf.mxu0 }
 0x170   : > { %v5639_v17 = vpop.f32.mrf.mxu1 }
 0x171   : > { %v2523_v46 = vadd.f32 %v2504_v2, %v2366_v11  ;;  %v2369_v32 = vadd.f32 %v5639_v17, %v2136_v23 }
 0x172   : > { %v2350_v60 = vpop.f32.mrf.mxu1 }
 0x173   : > { %v2526_v56 = vadd.f32 %v5649_v12, %v2369_v32  ;;  %v2367_v5 = vadd.f32 %v2350_v60, %v2134_v9 }
 0x175   : > { %v2524_v50 = vadd.f32 %v2507_v31, %v2367_v5 }
 0x179   : > { %v7353_v40 = vpop.f32.mrf.mxu0 }
 0x17a   : > { %v7355_v0 = vpop.f32.mrf.mxu1 }
 0x17b   : > { %v7357_v4 = vpop.f32.mrf.mxu0 }
 0x17c   : > { %v7359_v62 = vpop.f32.mrf.mxu1 }
 0x17d   : > { %v7361_v55 = vpop.f32.mrf.mxu0 }
 0x17e   : > { %v7363_v30 = vpop.f32.mrf.mxu1 }
 0x17f   : > { %v7365_v43 = vpop.f32.mrf.mxu0 }
 0x180   : > { %v7367_v28 = vpop.f32.mrf.mxu1 }
 0x189   : > { %v5668_v49 = vpop.f32.mrf.mxu0 }
 0x18b   : > { %v5658_v45 = vpop.f32.mrf.mxu1  ;;  %v2918_v18 = vpop.f32.mrf.mxu0 }
 0x18c   : > { %v2782_v33 = vadd.f32 %v5658_v45, %v2525_v1 }
 0x18d   : > { %v2761_v48 = vpop.f32.mrf.mxu1  ;;  %v5669_v57 = vpop.f32.mrf.mxu0 }
 0x18e   : > { %v7369_v38 = vadd.f32 %v5668_v49, %v2782_v33  ;;  %v2780_v26 = vadd.f32 %v2761_v48, %v2523_v46 }
 0x18f   : > { %v5659_v13 = vpop.f32.mrf.mxu1  ;;  %v2921_v7 = vpop.f32.mrf.mxu0 }
 0x190   : > { %v7371_v59 = vadd.f32 %v2918_v18, %v2780_v26  ;;  %v2783_v53 = vadd.f32 %v5659_v13, %v2526_v56 }
 0x191   : > { %v2764_v44 = vpop.f32.mrf.mxu1 }
 0x192   : > { %v7373_v24 = vadd.f32 %v5669_v57, %v2783_v53  ;;  %v2781_v8 = vadd.f32 %v2764_v44, %v2524_v50 }
 0x193   : > { %v5674_v42 = vpop.f32.mrf.mxu1 }
 0x194   : > { %v7375_v51 = vadd.f32 %v2921_v7, %v2781_v8  ;;  %v2778_v8 = vadd.f32 %v7355_v0, %v7345_v35  ;;  %v2777_v35 = vadd.f32 %v7367_v28, %v7351_v3 }
 0x195   : > { %v3024_v21 = vpop.f32.mrf.mxu1 }
 0x196   : > { %v5684_v47 = vpop.f32.mrf.mxu0 }
 0x197   : > { %v5675_v27 = vpop.f32.mrf.mxu1 }
 0x198   : > { %v7377_v20 = vpop.f32.mrf.mxu0 }
 0x199   : > { %v7379_v37 = vpop.f32.mrf.mxu1 }
 0x19a   : > { %v7381_v23 = vpop.f32.mrf.mxu0 }
 0x19b   : > { %v7383_v6 = vpop.f32.mrf.mxu1 }
 0x19c   : > { %v7385_v58 = vpop.f32.mrf.mxu0 }
 0x19d   : > { %v7387_v10 = vpop.f32.mrf.mxu1 }
 0x19f   : > { %v7389_v9 = vpop.f32.mrf.mxu1 }
 0x1a1   : > { %v7391_v54 = vpop.f32.mrf.mxu0  ;;  %v7393_v52 = vpop.f32.mrf.mxu1 }
 0x1a3   : > { %v7395_v29 = vpop.f32.mrf.mxu0 }
 0x1a5   : > { %v7397_v19 = vpop.f32.mrf.mxu0 }
 0x1a7   : > { %v5694_v16 = vpop.f32.mrf.mxu1  ;;  %v7399_v61 = vpop.f32.mrf.mxu0 }
 0x1a9   : > { %v3414_v41 = vpop.f32.mrf.mxu1 }
 0x1ab   : > { %v5695_v63 = vpop.f32.mrf.mxu1 }
 0x1ad   : > { %v3417_v36 = vpop.f32.mrf.mxu1 }
 0x1b1   : > { %v5704_v34 = vpop.f32.mrf.mxu0 }
 0x1b3   : > { %v3667_v22 = vpop.f32.mrf.mxu0 }
 0x1b5   : > { %v5705_v14 = vpop.f32.mrf.mxu0 }
 0x1b7   : > { %v7401_v2 = vpop.f32.mrf.mxu1  ;;  %v3670_v11 = vpop.f32.mrf.mxu0 }
 0x1b9   : > { %v7403_v39 = vpop.f32.mrf.mxu1 }
 0x1bb   : > { %v7405_v1 = vpop.f32.mrf.mxu1 }
 0x1bc   : > { %7599 = vst [vmem:[#allocation4_spill] sm:$0xff] %v7405_v1 }
 0x1bd   : > { %v7407_v17 = vpop.f32.mrf.mxu1 }
 0x1be   : > { %7600 = vst [vmem:[#allocation2_spill] sm:$0xff] %v7407_v17 }
 0x1c1   : > { %v7409_v12 = vpop.f32.mrf.mxu0 }
 0x1c2   : > { %7601 = vst [vmem:[#allocation6_spill] sm:$0xff] %v7409_v12  ;;  %v5714_v46 = vpop.f32.mrf.mxu1 }
 0x1c3   : > { %v7411_v32 = vpop.f32.mrf.mxu0 }
 0x1c4   : > { %7602 = vst [vmem:[#allocation8_spill] sm:$0xff] %v7411_v32  ;;  %v3828_v60 = vpop.f32.mrf.mxu1 }
 0x1c5   : > { %v7413_v56 = vpop.f32.mrf.mxu0 }
 0x1c6   : > { %7603 = vst [vmem:[#allocation10_spill] sm:$0xff] %v7413_v56  ;;  %v5715_v5 = vpop.f32.mrf.mxu1  ;;  %v2776_v56 = vadd.f32 %v7359_v62, %v7347_v15 }
 0x1c7   : > { %v7415_v31 = vpop.f32.mrf.mxu0 }
 0x1c8   : > { %7604 = vst [vmem:[#allocation3_spill] sm:$0xff] %v7415_v31  ;;  %v3831_v50 = vpop.f32.mrf.mxu1 }
 0x1c9   : > { %v5724_v49 = vpop.f32.mrf.mxu0 }
 0x1cb   : > { %v3946_v45 = vpop.f32.mrf.mxu0  ;;  %v7417_v18 = vpop.f32.mrf.mxu1 }
 0x1cc   : > { %7605 = vst [vmem:[#allocation12_spill] sm:$0xff] %v7417_v18 }
 0x1cd   : > { %v5725_v33 = vpop.f32.mrf.mxu0  ;;  %v7419_v48 = vpop.f32.mrf.mxu1 }
 0x1ce   : > { %7606 = vst [vmem:[#allocation5_spill] sm:$0xff] %v7419_v48 }
 0x1cf   : > { %v7421_v26 = vpop.f32.mrf.mxu0  ;;  %v7423_v57 = vpop.f32.mrf.mxu1 }
 0x1d0   : > { %7607 = vst [vmem:[#allocation7_spill] sm:$0xff] %v7423_v57  ;;  %v2935_v57 = vadd.f32 %v7353_v40, %v2778_v8 }
 0x1d1   : > { %v7425_v13 = vpop.f32.mrf.mxu0  ;;  %v7427_v53 = vpop.f32.mrf.mxu1 }
 0x1d2   : > { %7608 = vst [vmem:[#allocation9_spill] sm:$0xff] %v7425_v13  ;;  %7609 = vst [vmem:[#allocation15_spill] sm:$0xff] %v7427_v53  ;;  %v2779_v13 = vadd.f32 %v7363_v30, %v7349_v25  ;;  %v3057_v0 = vadd.f32 %v5674_v42, %v2935_v57 }
 0x1d3   : > { %v7429_v44 = vpop.f32.mrf.mxu0 }
 0x1d4   : > { %7610 = vst [vmem:[#allocation11_spill] sm:$0xff] %v7429_v44  ;;  %v2933_v44 = vadd.f32 %v7357_v4, %v2776_v56  ;;  %v2936_v32 = vadd.f32 %v7361_v55, %v2779_v13  ;;  %v3286_v1 = vadd.f32 %v5684_v47, %v3057_v0 }
 0x1d5   : > { %v7433_v7 = vpop.f32.mrf.mxu0  ;;  %v5734_v31 = vpop.f32.mrf.mxu1 }
 0x1d6   : > { %7611 = vst [vmem:[#allocation13_spill] sm:$0xff] %v7433_v7  ;;  %v3055_v15 = vadd.f32 %v3024_v21, %v2933_v44  ;;  %v3058_v40 = vadd.f32 %v5675_v27, %v2936_v32  ;;  %v3447_v30 = vadd.f32 %v5694_v16, %v3286_v1 }
 0x1d7   : > { %v7437_v48 = vpop.f32.mrf.mxu0  ;;  %v4179_v18 = vpop.f32.mrf.mxu1 }
 0x1d8   : > { %7612 = vst [vmem:[#allocation14_spill] sm:$0xff] %v7437_v48  ;;  %v2934_v48 = vadd.f32 %v7365_v43, %v2777_v35  ;;  %v3284_v25 = vadd.f32 %v7377_v20, %v3055_v15  ;;  %v3287_v28 = vadd.f32 %v7381_v23, %v3058_v40  ;;  %v3700_v47 = vadd.f32 %v5704_v34, %v3447_v30  ;;  %v7615_v40 = vld [vmem:[#allocation8_spill] sm:$0xff] }
 0x1d9   : > { %v5744_v53 = vpop.f32.mrf.mxu0  ;;  %v5735_v17 = vpop.f32.mrf.mxu1  ;;  %v3061_v23 = vadd.f32 %v7383_v6, %v7369_v38 }
 0x1da   : > { %v3056_v4 = vadd.f32 %v7379_v37, %v2934_v48  ;;  %v3445_v42 = vadd.f32 %v3414_v41, %v3284_v25  ;;  %v3448_v27 = vadd.f32 %v5695_v63, %v3287_v28  ;;  %v3861_v57 = vadd.f32 %v5714_v46, %v3700_v47  ;;  %v7616_v25 = vld [vmem:[#allocation2_spill] sm:$0xff] }
 0x1db   : > { %v4336_v7 = vpop.f32.mrf.mxu0  ;;  %v4182_v8 = vpop.f32.mrf.mxu1  ;;  %v3290_v46 = vadd.f32 %v7391_v54, %v3061_v23  ;;  %v7620_v23 = vld [vmem:[#allocation3_spill] sm:$0xff] }
 0x1dc   : > { %v3285_v43 = vadd.f32 %v7385_v58, %v3056_v4  ;;  %v3698_v56 = vadd.f32 %v3667_v22, %v3445_v42  ;;  %v3701_v16 = vadd.f32 %v5705_v14, %v3448_v27  ;;  %v3979_v13 = vadd.f32 %v5724_v49, %v3861_v57  ;;  %v7617_v4 = vld [vmem:[#allocation12_spill] sm:$0xff] }
 0x1dd   : > { %v5745_v62 = vpop.f32.mrf.mxu0  ;;  %v3059_v58 = vadd.f32 %v7387_v10, %v7371_v59  ;;  %v3062_v14 = vadd.f32 %v7389_v9, %v7373_v24  ;;  %v3060_v59 = vadd.f32 %v7393_v52, %v7375_v51  ;;  %v3451_v10 = vadd.f32 %v7401_v2, %v3290_v46  ;;  %v7613_v51 = vld [vmem:[#allocation6_spill] sm:$0xff]  ;;  %v7614_v2 = vld [vmem:[#allocation4_spill] sm:$0xff]  ;;  %v7623_v46 = vld [vmem:[#allocation11_spill] sm:$0xff] }
 0x1de   : > { %v3446_v20 = vadd.f32 %v3417_v36, %v3285_v43  ;;  %v3859_v1 = vadd.f32 %v3828_v60, %v3698_v56  ;;  %v3862_v44 = vadd.f32 %v5715_v5, %v3701_v16  ;;  %v4212_v22 = vadd.f32 %v5734_v31, %v3979_v13  ;;  %v7618_v43 = vld [vmem:[#allocation10_spill] sm:$0xff]  ;;  %v7619_v56 = vld [vmem:[#allocation5_spill] sm:$0xff] }
 0x1df   : > { %v7447_v12 = vpop.f32.mrf.mxu0  ;;  %v3291_v49 = vadd.f32 %v7397_v19, %v3062_v14  ;;  %v3704_v52 = vadd.f32 %v7613_v51, %v3451_v10  ;;  %v7625_v10 = vld [vmem:[#allocation13_spill] sm:$0xff] }
 0x1e0   : > { %v3699_v48 = vadd.f32 %v3670_v11, %v3446_v20  ;;  %v3977_v34 = vadd.f32 %v3946_v45, %v3859_v1  ;;  %v3980_v38 = vadd.f32 %v5725_v33, %v3862_v44  ;;  %v3288_v11 = vadd.f32 %v7395_v29, %v3059_v58  ;;  %v7621_v44 = vld [vmem:[#allocation9_spill] sm:$0xff]  ;;  %v7622_v58 = vld [vmem:[#allocation7_spill] sm:$0xff] }
 0x1e1   : > { %v7451_v3 = vpop.f32.mrf.mxu0  ;;  %v3289_v29 = vadd.f32 %v7399_v61, %v3060_v59  ;;  %v3452_v0 = vadd.f32 %v7614_v2, %v3291_v49  ;;  %v3865_v30 = vadd.f32 %v7617_v4, %v3704_v52 }
 0x1e2   : > { %v3860_v36 = vadd.f32 %v3831_v50, %v3699_v48  ;;  %v4210_v6 = vadd.f32 %v4179_v18, %v3977_v34  ;;  %v4369_v50 = vadd.f32 %v5744_v53, %v4212_v22  ;;  %v4213_v54 = vadd.f32 %v5735_v17, %v3980_v38  ;;  %v7624_v38 = vld [vmem:[#allocation15_spill] sm:$0xff] }
 0x1e3   : > { %v7454_v55 = vpop.f32.mrf.mxu1  ;;  %v7456_v21 = vpop.f32.mrf.mxu0  ;;  %v3449_v24 = vadd.f32 %v7403_v39, %v3288_v11  ;;  %v3450_v39 = vadd.f32 %v7616_v25, %v3289_v29  ;;  %v3705_v47 = vadd.f32 %v7618_v43, %v3452_v0 }
 0x1e4   : > { %v3978_v31 = vadd.f32 %v7421_v26, %v3860_v36  ;;  %v4367_v33 = vadd.f32 %v4336_v7, %v4210_v6  ;;  %v4370_v26 = vadd.f32 %v5745_v62, %v4213_v54  ;;  %v7626_v54 = vld [vmem:[#allocation14_spill] sm:$0xff] }
 0x1e5   : > { %v7459_v32 = vpop.f32.mrf.mxu1  ;;  %v7461_v37 = vpop.f32.mrf.mxu0  ;;  %v3702_v19 = vadd.f32 %v7615_v40, %v3449_v24  ;;  %v3703_v48 = vadd.f32 %v7620_v23, %v3450_v39  ;;  %v3866_v34 = vadd.f32 %v7622_v58, %v3705_v47 }
 0x1e6   : > { %v4211_v18 = vadd.f32 %v4182_v8, %v3978_v31 }
 0x1e7   : > { %v7465_v41 = vpop.f32.mrf.mxu1  ;;  %v7469_v63 = vpop.f32.mrf.mxu0  ;;  %v3863_v20 = vadd.f32 %v7619_v56, %v3702_v19  ;;  %v3864_v6 = vadd.f32 %v7624_v38, %v3703_v48 }
 0x1e8   : > { %v4368_v62 = vadd.f32 %v7447_v12, %v4211_v18  ;;  %v3983_v12 = vadd.f32 %v7621_v44, %v3865_v30 }
 0x1e9   : > { %v7474_v60 = vpop.f32.mrf.mxu1  ;;  %v3981_v14 = vadd.f32 %v7623_v46, %v3863_v20  ;;  %v3982_v49 = vadd.f32 %v7626_v54, %v3864_v6 }
 0x1ea   : > { %v4216_v11 = vadd.f32 %v7454_v55, %v3983_v12 }
 0x1eb   : > { %v4214_v31 = vadd.f32 %v7459_v32, %v3981_v14  ;;  %v4215_v18 = vadd.f32 %v7474_v60, %v3982_v49 }
 0x1ec   : > { %v4373_v24 = vadd.f32 %v7451_v3, %v4216_v11 }
 0x1ed   : > { %v4371_v55 = vadd.f32 %v7456_v21, %v4214_v31  ;;  %v4372_v3 = vadd.f32 %v7469_v63, %v4215_v18 }
 0x1f0   : > { %v5764_v5 = vpop.f32.mrf.mxu0 }
 0x1f2   : > { %v5754_v9 = vpop.f32.mrf.mxu1  ;;  %v4750_v45 = vpop.f32.mrf.mxu0 }
 0x1f3   : > { %v4626_v35 = vadd.f32 %v5754_v9, %v4369_v50 }
 0x1f4   : > { %v4593_v15 = vpop.f32.mrf.mxu1  ;;  %v5765_v7 = vpop.f32.mrf.mxu0 }
 0x1f5   : > { %v4783_v53 = vadd.f32 %v5764_v5, %v4626_v35  ;;  %v4624_v17 = vadd.f32 %v4593_v15, %v4367_v33  ;;  %v3984_v5 = vadd.f32 %v7625_v10, %v3866_v34 }
 0x1f6   : > { %v5755_v61 = vpop.f32.mrf.mxu1  ;;  %v4753_v13 = vpop.f32.mrf.mxu0 }
 0x1f7   : > { %v4791_v8 = vpack.c.bf16 %v4783_v53, %v4783_v53  ;;  %v4781_v28 = vadd.f32 %v4750_v45, %v4624_v17  ;;  %v4627_v42 = vadd.f32 %v5755_v61, %v4370_v26  ;;  %v4217_v9 = vadd.f32 %v7465_v41, %v3984_v5 }
 0x1f8   : > { %v4596_v27 = vpop.f32.mrf.mxu1 }
 0x1f9   : > { %4800 = vst.msk [vmem:[%s7493_s9 + $0x8] sm:$0xf] %vm4797_vm13, %v4791_v8  ;;  %v4789_v57 = vpack.c.bf16 %v4781_v28, %v4781_v28  ;;  %v4784_v16 = vadd.f32 %v5765_v7, %v4627_v42  ;;  %v4625_v1 = vadd.f32 %v4596_v27, %v4368_v62  ;;  %v4374_v32 = vadd.f32 %v7461_v37, %v4217_v9 }
 0x1fb   : > { %4798 = vst.msk [vmem:[%s7493_s9] sm:$0xf] %vm4797_vm13, %v4789_v57  ;;  %v4792_v36 = vpack.c.bf16 %v4784_v16, %v4784_v16  ;;  %v4782_v22 = vadd.f32 %v4753_v13, %v4625_v1 }
 0x1fd   : > { %4801 = vst.msk [vmem:[%s7493_s9 + $0xc] sm:$0xf] %vm4797_vm13, %v4792_v36  ;;  %v4790_v59 = vpack.c.bf16 %v4782_v22, %v4782_v22 }
 0x1ff   : > { %4799 = vst.msk [vmem:[%s7493_s9 + $0x4] sm:$0xf] %vm4797_vm13, %v4790_v59 }
 0x200   : > { %v5768_v50 = vpop.f32.mrf.mxu0 }
 0x202   : > { %v5758_v45 = vpop.f32.mrf.mxu1  ;;  %v4766_v33 = vpop.f32.mrf.mxu0 }
 0x203   : > { %v4630_v35 = vadd.f32 %v5758_v45, %v4373_v24 }
 0x204   : > { %v4609_v29 = vpop.f32.mrf.mxu1  ;;  %v5769_v0 = vpop.f32.mrf.mxu0 }
 0x205   : > { %v4787_v51 = vadd.f32 %v5768_v50, %v4630_v35  ;;  %v4628_v52 = vadd.f32 %v4609_v29, %v4371_v55 }
 0x206   : > { %v5759_v2 = vpop.f32.mrf.mxu1  ;;  %v4769_v40 = vpop.f32.mrf.mxu0 }
 0x207   : > { %v4795_v41 = vpack.c.bf16 %v4787_v51, %v4787_v51  ;;  %v4785_v15 = vadd.f32 %v4766_v33, %v4628_v52  ;;  %v4631_v26 = vadd.f32 %v5759_v2, %v4374_v32 }
 0x208   : > { %v4612_v53 = vpop.f32.mrf.mxu1 }
 0x209   : > { %4804 = vst.msk [vmem:[%s7493_s9 + $0x18] sm:$0xf] %vm4797_vm13, %v4795_v41  ;;  %v4793_v21 = vpack.c.bf16 %v4785_v15, %v4785_v15  ;;  %v4788_v60 = vadd.f32 %v5769_v0, %v4631_v26  ;;  %v4629_v17 = vadd.f32 %v4612_v53, %v4372_v3 }
 0x20b   : > { %4802 = vst.msk [vmem:[%s7493_s9 + $0x10] sm:$0xf] %vm4797_vm13, %v4793_v21  ;;  %v4796_v37 = vpack.c.bf16 %v4788_v60, %v4788_v60  ;;  %v4786_v19 = vadd.f32 %v4769_v40, %v4629_v17 }
 0x20d   : > { %4805 = vst.msk [vmem:[%s7493_s9 + $0x1c] sm:$0xf] %vm4797_vm13, %v4796_v37  ;;  %v4794_v25 = vpack.c.bf16 %v4786_v19, %v4786_v19 }
 0x20f   : > { %4803 = vst.msk [vmem:[%s7493_s9 + $0x14] sm:$0xf] %vm4797_vm13, %v4794_v25 }
 0x210 PF: > { %s12_s11 = sadd.s32 1, %s5877_s11   ;;  %s7627_s9 = smov %s5873_s10 }
 0x211   : > { %p9_p5 = scmp.ge.s32.totalorder %s12_s11, 4   ;;  %s7628_s10 = smov %s7630_s12 }
 0x213   :  { %11 = sbr.rel (!%p9_p5) target bundleno = 2 (0x2), region = 65 }

// kernel: zhugo_forward.23
= control target key start
LH: loop header
LB: loop body
LE: loop exit
PB: predicated region body
PF: predicated region fallthrough
CT: control target
= control target key end

     0   :  { %s2225_s9 = smov 0   ;;  %s2227_s10 = smov 0   ;;  %s2757_s0 = inlined_call_operand.vmem [shape: bf16[2,10,10,16], index: 0, kind: input, shape index: {}]   ;;  %s2758_s1 = inlined_call_operand.vmem [shape: bf16[144,32], index: 1, kind: input, shape index: {}]   ;;  %s2759_s2 = inlined_call_operand.vmem [shape: bf16[2,8,8,32], index: 2, kind: output, shape index: {}]  }
   0x1   :  { %s2229_s11 = smov 0  }
   0x2 LB: > { %s24_s12 = sadd.s32 1, %s2204_s10  ;;  %p1827_p0 = scmp.ge.s32.totalorder %s2208_s11, 1  ;;  %s2208_s11 = sphi %s2229_s11, %s12_s11   ;;  %s2204_s10 = sphi %s2227_s10, %s2765_s10   ;;  %s2200_s9 = sphi %s2225_s9, %s2764_s9  }
   0x3   : > { %p26_p1 = scmp.ge.s32.totalorder %s24_s12, 2  ;;  %p135_p2 = scmp.lt.s32.totalorder %s2208_s11, 3 }
   0x5   : > { %s2767_s12 = smov (%p26_p1, %s24_s12), 0  ;;  %p136_p3 = pnand %p1827_p0, %p135_p2 }
   0x6   : > { %p164_p4 = scmp.lt.s32.totalorder (!%p136_p3), %s2200_s9, 1 }
   0x7   : > { %139 = sbr.rel (%p136_p3) target bundleno = 314 (0x13a), region = 28 }
   0xc   : > { %v2165_v0 = vld [vmem:[%s2758_s1 + $0x8] sm:$0xff]   ;;  %v2249_v1 = vld [vmem:[%s2758_s1] sm:$0xff]   ;;  %s2769_s9 = smov (!%p164_p4, %s2200_s9), 1  ;;  %v2256_v2 = vld [vmem:[%s2758_s1 + $0x10] sm:$0xff]   ;;  %vm200_vm0 = vsmask.f32 3328 }
   0xd   : > { %2138 = vmatprep.subr.bf16.mxu1 %v2165_v0  ;;  %2048 = vmatprep.subr.bf16.mxu0 %v2165_v0  ;;  %s2140_s19 = smul.u32 80, %s2769_s9  ;;  %vm201_vm1 = vsmask.f32 7440  ;;  %vm335_vm2 = vcmask 130048   ;;  %vm540_vm4 = vcmask 1042432   ;;  %vm541_vm5 = vcmask 1046532  }
   0xe   : > { %2139 = vmatpush3.bf16.msra.mxu1 %v2165_v0  ;;  %2049 = vmatpush3.bf16.msra.mxu0 %v2165_v0  ;;  %vm2307_vm3 = vmor %vm200_vm0, %vm201_vm1  ;;  %s2002_s7 = sshll.u32 %s2769_s9, 5  ;;  %vm1720_vm7 = vcmask 257024  }
   0xf   : > { %2058 = vmatprep.subr.bf16.mxu1 %v2249_v1  ;;  %2068 = vmatprep.subr.bf16.mxu0 %v2256_v2  ;;  %s2264_s22 = scalar_lea.vmem %s2757_s0, %s2140_s19  ;;  %vm2373_vm6 = vmor %vm540_vm4, %vm541_vm5  ;;  %s2724_s14 = scalar_lea.vmem %s2759_s2, %s2002_s7 }
  0x10   : > { %v2267_v3 = vld [vmem:[%s2264_s22] sm:$0xf]  ;;  %v2270_v4 = vld [vmem:[%s2264_s22 + $0x8] sm:$0xf]  ;;  %v2273_v5 = vld [vmem:[%s2264_s22 + $0x4] sm:$0x1] }
  0x11   : > { %v2276_v6 = vld [vmem:[%s2264_s22 + $0xc] sm:$0x1]  ;;  %v204_v7 = vshrl.u32 %v2267_v3, 16  ;;  %v207_v8 = vshll.u32 %v2267_v3, 16  ;;  %v213_v9 = vshll.u32 %v2273_v5, 16  ;;  %v218_v10 = vshrl.u32 %v2270_v4, 16 }
  0x12   : > { %v221_v11 = vshll.u32 %v2270_v4, 16  ;;  %v227_v12 = vshll.u32 %v2276_v6, 16  ;;  %v545_v13 = vrot.slane %v2273_v5, 5  ;;  %v549_v14 = vrot.slane %v2276_v6, 5  ;;  %v2287_v15 = vld [vmem:[%s2264_s22 + $0x20] sm:$0xf] }
  0x13   : > { %v206_v16 = vrot.slane %v204_v7, 4  ;;  %v209_v17 = vrot.slane %v207_v8, 5  ;;  %v215_v18 = vrot.slane %v213_v9, 5  ;;  %v220_v19 = vrot.slane %v218_v10, 4  ;;  %v2290_v20 = vld [vmem:[%s2264_s22 + $0x28] sm:$0xf] }
  0x14   : > { %v223_v21 = vrot.slane %v221_v11, 5  ;;  %v229_v22 = vrot.slane %v227_v12, 5  ;;  %v2293_v23 = vld [vmem:[%s2264_s22 + $0x24] sm:$0x1]  ;;  %v2296_v24 = vld [vmem:[%s2264_s22 + $0x2c] sm:$0x1]  ;;  %v1840_v25 = vcombine.low %v2267_v3, %v2270_v4  ;;  %v1842_v26 = vcombine.low %v2287_v15, %v2290_v20 }
  0x15   : > { %v210_v27 = vor.u32 %v209_v17, %v206_v16  ;;  %v260_v28 = vshrl.u32 %v2287_v15, 16  ;;  %v263_v29 = vshll.u32 %v2287_v15, 16  ;;  %v269_v30 = vshll.u32 %v2293_v23, 16  ;;  %v2315_v36 = vld [vmem:[%s2264_s22 + $0x10] sm:$0xf] }
  0x16   : > { %v224_v32 = vor.u32 %v223_v21, %v220_v19  ;;  %v274_v33 = vshrl.u32 %v2290_v20, 16  ;;  %v277_v34 = vshll.u32 %v2290_v20, 16  ;;  %v283_v35 = vshll.u32 %v2296_v24, 16  ;;  %v2318_v41 = vld [vmem:[%s2264_s22 + $0x18] sm:$0xf] }
  0x17   : > { %v211_v37 = vrot.slane %v210_v27, 4  ;;  %v262_v38 = vrot.slane %v260_v28, 4  ;;  %v265_v39 = vrot.slane %v263_v29, 5  ;;  %v271_v40 = vrot.slane %v269_v30, 5  ;;  %v2321_v46 = vld [vmem:[%s2264_s22 + $0x14] sm:$0x1] }
  0x18   : > { %v225_v42 = vrot.slane %v224_v32, 4  ;;  %v276_v43 = vrot.slane %v274_v33, 4  ;;  %v279_v44 = vrot.slane %v277_v34, 5  ;;  %v285_v45 = vrot.slane %v283_v35, 5  ;;  %v2330_v53 = vld [vmem:[%s2264_s22 + $0x1c] sm:$0x1] }
  0x19   : > { %v216_v47 = vsel %vm2307_vm3, %v211_v37, %v215_v18  ;;  %v266_v48 = vor.u32 %v265_v39, %v262_v38  ;;  %v561_v49 = vrot.slane %v2293_v23, 5  ;;  %v565_v50 = vrot.slane %v2296_v24, 5  ;;  %v2337_v60 = vld [vmem:[%s2264_s22 + $0x30] sm:$0xf]  ;;  %v2341_v7 = vld [vmem:[%s2264_s22 + $0x38] sm:$0xf] }
  0x1a   : > { %v230_v51 = vsel %vm2307_vm3, %v225_v42, %v229_v22  ;;  %v280_v52 = vor.u32 %v279_v44, %v276_v43  ;;  %v232_v54 = vshrl.u32 %v2315_v36, 16  ;;  %v235_v55 = vshll.u32 %v2315_v36, 16  ;;  %v2348_v12 = vld [vmem:[%s2264_s22 + $0x34] sm:$0x1]  ;;  %v2354_v21 = vld [vmem:[%s2264_s22 + $0x3c] sm:$0x1] }
  0x1b   : > { %v1831_v56 = vcombine.low %v216_v47, %v230_v51  ;;  %v267_v57 = vrot.slane %v266_v48, 4  ;;  %v241_v58 = vshll.u32 %v2321_v46, 16  ;;  %v246_v59 = vshrl.u32 %v2318_v41, 16  ;;  %v516_v22 = vld [vmem:[%s2264_s22] sm:$0xe] }
  0x1c   : > { %v281_v61 = vrot.slane %v280_v52, 4  ;;  %v234_v62 = vrot.slane %v232_v54, 4  ;;  %v237_v63 = vrot.slane %v235_v55, 5  ;;  %v249_v0 = vshll.u32 %v2318_v41, 16  ;;  %v517_v32 = vld [vmem:[%s2264_s22 + $0x8] sm:$0xe] }
  0x1d   : > { %2050 = vmatprep.mubr.msk.bf16.mxu0 %vm335_vm2, %v1831_v56  ;;  %v272_v8 = vsel %vm2307_vm3, %v267_v57, %v271_v40  ;;  %v243_v9 = vrot.slane %v241_v58, 5  ;;  %v248_v10 = vrot.slane %v246_v59, 4  ;;  %v255_v11 = vshll.u32 %v2330_v53, 16  ;;  %v518_v38 = vld [vmem:[%s2264_s22 + $0x10] sm:$0xe] }
  0x1e   : > { %v286_v16 = vsel %vm2307_vm3, %v281_v61, %v285_v45  ;;  %v238_v17 = vor.u32 %v237_v63, %v234_v62  ;;  %v251_v18 = vrot.slane %v249_v0, 5  ;;  %v553_v19 = vrot.slane %v2321_v46, 5  ;;  %v519_v44 = vld [vmem:[%s2264_s22 + $0x18] sm:$0xe]  ;;  %v520_v45 = vld [vmem:[%s2264_s22 + $0x20] sm:$0xe] }
  0x1f   : > { %v1833_v27 = vcombine.low %v272_v8, %v286_v16  ;;  %v257_v28 = vrot.slane %v255_v11, 5  ;;  %v557_v29 = vrot.slane %v2330_v53, 5  ;;  %v288_v30 = vshrl.u32 %v2337_v60, 16  ;;  %v521_v62 = vld [vmem:[%s2264_s22 + $0x28] sm:$0xe] }
  0x20   : > { %v239_v33 = vrot.slane %v238_v17, 4  ;;  %v252_v34 = vor.u32 %v251_v18, %v248_v10  ;;  %v291_v35 = vshll.u32 %v2337_v60, 16  ;;  %v297_v37 = vshll.u32 %v2348_v12, 16  ;;  %v2171_v10 = vld [vmem:[%s2758_s1 + $0x20] sm:$0xff]   ;;  %v522_v11 = vld [vmem:[%s2264_s22 + $0x30] sm:$0xe] }
  0x21   : > { %2054 = vmatprep.mubr.msk.bf16.mxu1 %vm335_vm2, %v1833_v27  ;;  %v290_v39 = vrot.slane %v288_v30, 4  ;;  %v302_v40 = vshrl.u32 %v2341_v7, 16  ;;  %v305_v42 = vshll.u32 %v2341_v7, 16  ;;  %v311_v43 = vshll.u32 %v2354_v21, 16  ;;  %v523_v5 = vld [vmem:[%s2264_s22 + $0x38] sm:$0xe] }
  0x22   : > { %v244_v46 = vsel %vm2307_vm3, %v239_v33, %v243_v9  ;;  %v253_v47 = vrot.slane %v252_v34, 4  ;;  %v293_v48 = vrot.slane %v291_v35, 5  ;;  %v299_v51 = vrot.slane %v297_v37, 5  ;;  %v2411_v34 = vld [vmem:[%s2264_s22 + $0xc] sm:$0x1] }
  0x23   : > { %v304_v53 = vrot.slane %v302_v40, 4  ;;  %v307_v54 = vrot.slane %v305_v42, 5  ;;  %v313_v55 = vrot.slane %v311_v43, 5  ;;  %v1849_v56 = vrot.slane %v516_v22, 9  ;;  %v1885_v37 = vld [vmem:[%s2264_s22 + $0x10] sm:$0xf] }
  0x24   : > { %v258_v57 = vsel %vm2307_vm3, %v253_v47, %v257_v28  ;;  %v294_v58 = vor.u32 %v293_v48, %v290_v39  ;;  %v1850_v59 = vrot.slane %v517_v32, 9  ;;  %v1841_v61 = vcombine.low %v2315_v36, %v2318_v41  ;;  %v2174_v15 = vld [vmem:[%s2264_s22 + $0x8] ss:$8 sps:$4 sm:$0xff]  }
  0x25   : > { %v1832_v63 = vcombine.low %v244_v46, %v258_v57  ;;  %v308_v0 = vor.u32 %v307_v54, %v304_v53  ;;  %v546_v8 = vsel %vm2373_vm6, %v1849_v56, %v545_v13  ;;  %v1851_v9 = vrot.slane %v518_v38, 9  ;;  %v2427_v38 = vld [vmem:[%s2264_s22 + $0x14] sm:$0x1] }
  0x26   : > { %v295_v16 = vrot.slane %v294_v58, 4  ;;  %v550_v17 = vsel %vm2373_vm6, %v1850_v59, %v549_v14  ;;  %v1852_v18 = vrot.slane %v519_v44, 9  ;;  %v1853_v22 = vrot.slane %v520_v45, 9  ;;  %v1887_v44 = vld [vmem:[%s2264_s22 + $0x18] sm:$0xf]  ;;  %v2456_v59 = vld [vmem:[%s2758_s1 + $0x30] sm:$0xff]  }
  0x27   : > { %2051 = vmatmul.mubr.msk.bf16.vlgmr.msra.gmra.mxu0 %vm335_vm2, %v1832_v63  ;;  %v309_v13 = vrot.slane %v308_v0, 4  ;;  %v1857_v27 = vcombine.low %v546_v8, %v550_v17  ;;  %v554_v28 = vsel %vm2373_vm6, %v1851_v9, %v553_v19  ;;  %v1854_v30 = vrot.slane %v521_v62, 9  ;;  %v1883_v19 = vld [vmem:[%s2264_s22 + $0x8] sm:$0xf]  ;;  %v2432_v45 = vld [vmem:[%s2264_s22 + $0x1c] sm:$0x1] }
  0x28   : > { %v300_v6 = vsel %vm2307_vm3, %v295_v16, %v299_v51  ;;  %2069 = vmatpush3.bf16.msra.mxu0 %v2256_v2  ;;  %v558_v14 = vsel %vm2373_vm6, %v1852_v18, %v557_v29  ;;  %v562_v32 = vsel %vm2373_vm6, %v1853_v22, %v561_v49  ;;  %v1843_v33 = vcombine.low %v2337_v60, %v2341_v7  ;;  %v2419_v2 = vld [vmem:[%s2758_s1 + $0x18] sm:$0xff]   ;;  %v2451_v58 = vld [vmem:[%s2264_s22 + $0x24] sm:$0x1]  ;;  %v1891_v9 = vld [vmem:[%s2264_s22 + $0x28] sm:$0xf] }
  0x29   : > { %v314_v35 = vsel %vm2307_vm3, %v309_v13, %v313_v55  ;;  %2070 = vmatprep.mubr.msk.bf16.mxu0 %vm335_vm2, %v1857_v27  ;;  %v1858_v23 = vcombine.low %v554_v28, %v558_v14  ;;  %2088 = vmatprep.subr.bf16.mxu0 %v2171_v10  ;;  %v566_v49 = vsel %vm2373_vm6, %v1854_v30, %v565_v50  ;;  %v1855_v29 = vrot.slane %v522_v11, 9  ;;  %v1889_v50 = vld [vmem:[%s2264_s22 + $0x20] sm:$0xf]  ;;  %v2467_v16 = vld [vmem:[%s2758_s1 + $0x28] sm:$0xff]   ;;  %v1910_v7 = vld [vmem:[%s2264_s22 + $0x18] sm:$0xe] }
  0x2a   : > { %v1834_v39 = vcombine.low %v300_v6, %v314_v35  ;;  %v1859_v40 = vcombine.low %v562_v32, %v566_v49  ;;  %v569_v42 = vrot.slane %v2348_v12, 5  ;;  %v1856_v43 = vrot.slane %v523_v5, 9  ;;  %v2471_v5 = vld [vmem:[%s2264_s22 + $0x2c] sm:$0x1] }
  0x2b   : > { %v573_v46 = vrot.slane %v2354_v21, 5  ;;  %v819_v47 = vshrl.u32 %v1883_v19, 16  ;;  %v822_v24 = vshll.u32 %v1883_v19, 16  ;;  %v828_v48 = vshll.u32 %v2411_v34, 16 }
  0x2c   : > { %2055 = vmatmul.mubr.msk.bf16.vlgmr.msra.gmra.mxu1 %vm335_vm2, %v1834_v39  ;;  %v2440_v51 = vsel %vm2373_vm6, %v1855_v29, %v569_v42  ;;  %v833_v53 = vshrl.u32 %v1885_v37, 16  ;;  %v836_v12 = vshll.u32 %v1885_v37, 16  ;;  %v842_v54 = vshll.u32 %v2427_v38, 16 }
  0x2d   : > { %2059 = vmatpush3.bf16.msra.mxu1 %v2249_v1  ;;  %2060 = vmatprep.mubr.msk.bf16.mxu1 %vm335_vm2, %v1840_v25  ;;  %v574_v21 = vsel %vm2373_vm6, %v1856_v43, %v573_v46  ;;  %v821_v55 = vrot.slane %v819_v47, 4  ;;  %v824_v56 = vrot.slane %v822_v24, 5  ;;  %v830_v57 = vrot.slane %v828_v48, 5  ;;  %v2494_v47 = vld [vmem:[%s2264_s22 + $0x3c] sm:$0x1] }
  0x2e   : > { %2078 = vmatprep.subr.bf16.mxu1 %v2419_v2  ;;  %v1860_v1 = vcombine.low %v2440_v51, %v574_v21  ;;  %v835_v3 = vrot.slane %v833_v53, 4  ;;  %v838_v4 = vrot.slane %v836_v12, 5  ;;  %v844_v25 = vrot.slane %v842_v54, 5  ;;  %v1897_v53 = vld [vmem:[%s2264_s22 + $0x40] sm:$0xf] }
  0x2f   : > { %2071 = vmatmul.mubr.msk.bf16.vlgmr.msra.gmra.mxu0 %vm335_vm2, %v1858_v23  ;;  %v825_v62 = vor.u32 %v824_v56, %v821_v55  ;;  %v847_v63 = vshrl.u32 %v1887_v44, 16  ;;  %v850_v0 = vshll.u32 %v1887_v44, 16  ;;  %v856_v8 = vshll.u32 %v2432_v45, 16  ;;  %v1895_v44 = vld [vmem:[%s2264_s22 + $0x38] sm:$0xf] }
  0x30   : > { %2089 = vmatpush3.bf16.msra.mxu0 %v2171_v10  ;;  %2074 = vmatprep.mubr.msk.bf16.mxu0 %vm335_vm2, %v1859_v40  ;;  %v839_v11 = vor.u32 %v838_v4, %v835_v3  ;;  %v861_v17 = vshrl.u32 %v1889_v50, 16  ;;  %v864_v18 = vshll.u32 %v1889_v50, 16  ;;  %v870_v22 = vshll.u32 %v2451_v58, 16  ;;  %v1893_v10 = vld [vmem:[%s2264_s22 + $0x30] sm:$0xf] }
  0x31   : > { %v826_v13 = vrot.slane %v825_v62, 4  ;;  %v849_v27 = vrot.slane %v847_v63, 4  ;;  %v852_v28 = vrot.slane %v850_v0, 5  ;;  %v858_v30 = vrot.slane %v856_v8, 5  ;;  %2108 = vmatprep.subr.bf16.mxu0 %v2456_v59  ;;  %v2484_v40 = vld [vmem:[%s2264_s22 + $0x34] sm:$0x1] }
  0x32   : > { %v840_v6 = vrot.slane %v839_v11, 4  ;;  %v863_v14 = vrot.slane %v861_v17, 4  ;;  %v866_v32 = vrot.slane %v864_v18, 5  ;;  %v872_v19 = vrot.slane %v870_v22, 5  ;;  %v2504_v12 = vld [vmem:[%s2264_s22 + $0x44] sm:$0x1] }
  0x33   : > { %v831_v35 = vsel %vm2307_vm3, %v826_v13, %v830_v57  ;;  %v853_v23 = vor.u32 %v852_v28, %v849_v27  ;;  %v875_v49 = vshrl.u32 %v1891_v9, 16  ;;  %v878_v29 = vshll.u32 %v1891_v9, 16  ;;  %v1909_v9 = vld [vmem:[%s2264_s22 + $0x10] sm:$0xe] }
  0x34   : > { %2061 = vmatmul.mubr.msk.bf16.vlgmr.msra.gmra.mxu1 %vm335_vm2, %v1841_v61  ;;  %v845_v37 = vsel %vm2307_vm3, %v840_v6, %v844_v25  ;;  %v867_v39 = vor.u32 %v866_v32, %v863_v14  ;;  %v884_v42 = vshll.u32 %v2471_v5, 16  ;;  %v889_v43 = vshrl.u32 %v1893_v10, 16  ;;  %v1908_v25 = vld [vmem:[%s2264_s22 + $0x8] sm:$0xe] }
  0x35   : > { %2079 = vmatpush3.bf16.msra.mxu1 %v2419_v2  ;;  %2064 = vmatprep.mubr.msk.bf16.mxu1 %vm335_vm2, %v1842_v26  ;;  %v1899_v36 = vcombine.low %v831_v35, %v845_v37  ;;  %v854_v41 = vrot.slane %v853_v23, 4  ;;  %v877_v61 = vrot.slane %v875_v49, 4  ;;  %v880_v46 = vrot.slane %v878_v29, 5  ;;  %v1911_v23 = vld [vmem:[%s2264_s22 + $0x20] sm:$0xe] }
  0x36   : > { %2098 = vmatprep.subr.bf16.mxu1 %v2467_v16  ;;  %v868_v24 = vrot.slane %v867_v39, 4  ;;  %v886_v48 = vrot.slane %v884_v42, 5  ;;  %v891_v50 = vrot.slane %v889_v43, 4  ;;  %v892_v51 = vshll.u32 %v1893_v10, 16  ;;  %v2522_v10 = vld [vmem:[%s2758_s1 + $0x40] sm:$0xff]  }
  0x37   : > { %2075 = vmatmul.mubr.msk.bf16.gmra.mxu0 %vm335_vm2, %v1860_v1  ;;  %v859_v20 = vsel %vm2307_vm3, %v854_v41, %v858_v30  ;;  %v881_v26 = vor.u32 %v880_v46, %v877_v61  ;;  %v898_v2 = vshll.u32 %v2484_v40, 16  ;;  %v903_v54 = vshrl.u32 %v1895_v44, 16  ;;  %v2178_v29 = vld [vmem:[%s2264_s22 + $0x28] ss:$8 sps:$4 sm:$0xff]  }
  0x38   : > { %2090 = vmatprep.mubr.msk.bf16.mxu0 %vm335_vm2, %v1899_v36  ;;  %v873_v21 = vsel %vm2307_vm3, %v868_v24, %v872_v19  ;;  %v894_v55 = vrot.slane %v892_v51, 5  ;;  %v906_v56 = vshll.u32 %v1895_v44, 16  ;;  %v912_v57 = vshll.u32 %v2494_v47, 16  ;;  %v2180_v46 = vld [vmem:[%s2264_s22 + $0x10] ss:$8 sps:$4 sm:$0xff]  }
  0x39   : > { %v1900_v1 = vcombine.low %v859_v20, %v873_v21  ;;  %v882_v3 = vrot.slane %v881_v26, 4  ;;  %v905_v4 = vrot.slane %v903_v54, 4  ;;  %v900_v63 = vrot.slane %v898_v2, 5  ;;  %v1914_v2 = vld [vmem:[%s2264_s22 + $0x38] sm:$0xe] }
  0x3a   : > { %v895_v62 = vor.u32 %v894_v55, %v891_v50  ;;  %v908_v0 = vrot.slane %v906_v56, 5  ;;  %v917_v8 = vshrl.u32 %v1897_v53, 16  ;;  %v914_v17 = vrot.slane %v912_v57, 5  ;;  %v1915_v54 = vld [vmem:[%s2264_s22 + $0x40] sm:$0xe] }
  0x3b   : > { %v887_v11 = vsel %vm2307_vm3, %v882_v3, %v886_v48  ;;  %v920_v18 = vshll.u32 %v1897_v53, 16  ;;  %v926_v22 = vshll.u32 %v2504_v12, 16  ;;  %v1916_v30 = vrot.slane %v1908_v25, 9  ;;  %v1950_v3 = vld [vmem:[%s2264_s22 + $0x10] sm:$0xf] }
  0x3c   : > { %2065 = vmatmul.mubr.msk.bf16.gmra.mxu1 %vm335_vm2, %v1843_v33  ;;  %v896_v13 = vrot.slane %v895_v62, 4  ;;  %v909_v27 = vor.u32 %v908_v0, %v905_v4  ;;  %v919_v28 = vrot.slane %v917_v8, 4  ;;  %v1061_v14 = vrot.slane %v2411_v34, 5  ;;  %v2176_v33 = vld [vmem:[%s2264_s22 + $0x18] ss:$8 sps:$4 sm:$0xff]  }
  0x3d   : > { %2080 = vmatprep.mubr.msk.bf16.mxu1 %vm335_vm2, %v2174_v15  ;;  %v922_v6 = vrot.slane %v920_v18, 5  ;;  %v1917_v32 = vrot.slane %v1909_v9, 9  ;;  %v1065_v60 = vrot.slane %v2427_v38, 5  ;;  %v1918_v49 = vrot.slane %v1910_v7, 9  ;;  %v1952_v25 = vld [vmem:[%s2264_s22 + $0x18] sm:$0xf] }
  0x3e   : > { %v901_v19 = vsel %vm2307_vm3, %v896_v13, %v900_v63  ;;  %v910_v35 = vrot.slane %v909_v27, 4  ;;  %v928_v34 = vrot.slane %v926_v22, 5  ;;  %v1069_v42 = vrot.slane %v2432_v45, 5  ;;  %v2547_v45 = vld [vmem:[%s2758_s1 + $0x38] sm:$0xff]   ;;  %v1975_v18 = vld [vmem:[%s2264_s22 + $0x10] sm:$0xe] }
  0x3f   : > { %2091 = vmatmul.mubr.msk.bf16.vlgmr.msra.gmra.mxu0 %vm335_vm2, %v1900_v1  ;;  %v1901_v37 = vcombine.low %v887_v11, %v901_v19  ;;  %v923_v39 = vor.u32 %v922_v6, %v919_v28  ;;  %v1919_v38 = vrot.slane %v1911_v23, 9  ;;  %v1073_v43 = vrot.slane %v2451_v58, 5  ;;  %v1912_v58 = vld [vmem:[%s2264_s22 + $0x28] sm:$0xe]  ;;  %v1953_v62 = vld [vmem:[%s2264_s22 + $0x1c] sm:$0x1] }
  0x40   : > { %2109 = vmatpush3.bf16.msra.mxu0 %v2456_v59  ;;  %v915_v44 = vsel %vm2307_vm3, %v910_v35, %v914_v17  ;;  %v2542_v41 = vsel %vm2373_vm6, %v1916_v30, %v1061_v14  ;;  %v1913_v59 = vld [vmem:[%s2264_s22 + $0x30] sm:$0xe]  ;;  %v2554_v61 = vsel %vm2373_vm6, %v1917_v32, %v1065_v60  ;;  %v2559_v24 = vsel %vm2373_vm6, %v1918_v49, %v1069_v42  ;;  %v2182_v22 = vld [vmem:[%s2264_s22 + $0x20] ss:$8 sps:$4 sm:$0xff]   ;;  %v1976_v30 = vld [vmem:[%s2264_s22 + $0x18] sm:$0xe] }
  0x41   : > { %2094 = vmatprep.mubr.msk.bf16.mxu0 %vm335_vm2, %v1901_v37  ;;  %v924_v36 = vrot.slane %v923_v39, 4  ;;  %2128 = vmatprep.subr.bf16.mxu0 %v2522_v10  ;;  %v1920_v48 = vrot.slane %v1912_v58, 9  ;;  %v1077_v50 = vrot.slane %v2471_v5, 5  ;;  %v2566_v15 = vsel %vm2373_vm6, %v1919_v38, %v1073_v43  ;;  %v2184_v14 = vld [vmem:[%s2264_s22 + $0x30] ss:$8 sps:$4 sm:$0xff]  }
  0x42   : > { %v1921_v20 = vrot.slane %v1913_v59, 9  ;;  %v1081_v26 = vrot.slane %v2484_v40, 5  ;;  %v1922_v21 = vrot.slane %v1914_v2, 9  ;;  %v1085_v5 = vrot.slane %v2494_v47, 5  ;;  %v2179_v40 = vld [vmem:[%s2264_s22 + $0x38] ss:$8 sps:$4 sm:$0xff]  }
  0x43   : > { %v929_v51 = vsel %vm2307_vm3, %v924_v36, %v928_v34  ;;  %v1923_v55 = vrot.slane %v1915_v54, 9  ;;  %v1089_v56 = vrot.slane %v2504_v12, 5  ;;  %v1924_v57 = vcombine.low %v2542_v41, %v2554_v61  ;;  %v1951_v47 = vld [vmem:[%s2264_s22 + $0x14] sm:$0x1]  ;;  %v1954_v19 = vld [vmem:[%s2264_s22 + $0x20] sm:$0xf] }
  0x44   : > { %2081 = vmatmul.mubr.msk.bf16.vlgmr.msra.gmra.mxu1 %vm335_vm2, %v2176_v33  ;;  %v1902_v53 = vcombine.low %v915_v44, %v929_v51  ;;  %v1925_v1 = vcombine.low %v2559_v24, %v2566_v15  ;;  %v2591_v12 = vsel %vm2373_vm6, %v1921_v20, %v1081_v26  ;;  %v2595_v4 = vsel %vm2373_vm6, %v1922_v21, %v1085_v5  ;;  %v1955_v37 = vld [vmem:[%s2264_s22 + $0x24] sm:$0x1]  ;;  %v1956_v42 = vld [vmem:[%s2264_s22 + $0x28] sm:$0xf]  ;;  %v1957_v38 = vld [vmem:[%s2264_s22 + $0x2c] sm:$0x1] }
  0x45   : > { %2099 = vmatpush3.bf16.msra.mxu1 %v2467_v16  ;;  %2084 = vmatprep.mubr.msk.bf16.mxu1 %vm335_vm2, %v2178_v29  ;;  %v2584_v16 = vsel %vm2373_vm6, %v1920_v48, %v1077_v50  ;;  %v1335_v63 = vshrl.u32 %v1950_v3, 16  ;;  %v1338_v0 = vshll.u32 %v1950_v3, 16  ;;  %v2602_v8 = vsel %vm2373_vm6, %v1923_v55, %v1089_v56  ;;  %v1977_v61 = vld [vmem:[%s2264_s22 + $0x20] sm:$0xe]  ;;  %v1978_v20 = vld [vmem:[%s2264_s22 + $0x28] sm:$0xe] }
  0x46   : > { %2118 = vmatprep.subr.bf16.mxu1 %v2547_v45  ;;  %v1344_v9 = vshll.u32 %v1951_v47, 16  ;;  %v1349_v11 = vshrl.u32 %v1952_v25, 16  ;;  %v1352_v17 = vshll.u32 %v1952_v25, 16  ;;  %v1358_v28 = vshll.u32 %v1953_v62, 16  ;;  %v1958_v21 = vld [vmem:[%s2264_s22 + $0x30] sm:$0xf] }
  0x47   : > { %2095 = vmatmul.mubr.msk.bf16.gmra.mxu0 %vm335_vm2, %v1902_v53  ;;  %v1337_v13 = vrot.slane %v1335_v63, 4  ;;  %v1340_v27 = vrot.slane %v1338_v0, 5  ;;  %v1983_v6 = vrot.slane %v1975_v18, 9  ;;  %v1577_v33 = vrot.slane %v1951_v47, 5  ;;  %v1960_v25 = vld [vmem:[%s2264_s22 + $0x38] sm:$0xf] }
  0x48   : > { %2110 = vmatprep.mubr.msk.bf16.mxu0 %vm335_vm2, %v2180_v46  ;;  %v1346_v32 = vrot.slane %v1344_v9, 5  ;;  %v1351_v60 = vrot.slane %v1349_v11, 4  ;;  %v1354_v7 = vrot.slane %v1352_v17, 5  ;;  %v1360_v23 = vrot.slane %v1358_v28, 5  ;;  %v1961_v18 = vld [vmem:[%s2264_s22 + $0x3c] sm:$0x1] }
  0x49   : > { %v1341_v35 = vor.u32 %v1340_v27, %v1337_v13  ;;  %v1984_v49 = vrot.slane %v1976_v30, 9  ;;  %v1581_v29 = vrot.slane %v1953_v62, 5  ;;  %v1926_v39 = vcombine.low %v2584_v16, %v2591_v12  ;;  %v2185_v62 = vld [vmem:[%s2264_s22 + $0x40] ss:$8 sps:$4 sm:$0xff]   ;;  %v1979_v27 = vld [vmem:[%s2264_s22 + $0x30] sm:$0xe] }
  0x4a   : > { %v1355_v34 = vor.u32 %v1354_v7, %v1351_v60  ;;  %v1363_v43 = vshrl.u32 %v1954_v19, 16  ;;  %v1366_v44 = vshll.u32 %v1954_v19, 16  ;;  %v1927_v36 = vcombine.low %v2595_v4, %v2602_v8 }
  0x4b   : > { %v1342_v41 = vrot.slane %v1341_v35, 4  ;;  %v1372_v58 = vshll.u32 %v1955_v37, 16  ;;  %v1377_v59 = vshrl.u32 %v1956_v42, 16  ;;  %v1578_v48 = vsel %vm2373_vm6, %v1983_v6, %v1577_v33 }
  0x4c   : > { %2085 = vmatmul.mubr.msk.bf16.gmra.mxu1 %vm335_vm2, %v2179_v40  ;;  %v1356_v46 = vrot.slane %v1355_v34, 4  ;;  %v1365_v50 = vrot.slane %v1363_v43, 4  ;;  %v1368_v51 = vrot.slane %v1366_v44, 5  ;;  %v1582_v2 = vsel %vm2373_vm6, %v1984_v49, %v1581_v29  ;;  %v1963_v44 = vld [vmem:[%s2264_s22 + $0x44] sm:$0x1] }
  0x4d   : > { %2100 = vmatprep.mubr.msk.bf16.mxu1 %vm335_vm2, %v1924_v57  ;;  %v1347_v26 = vsel %vm2307_vm3, %v1342_v41, %v1346_v32  ;;  %v1379_v53 = vrot.slane %v1377_v59, 4  ;;  %v1380_v54 = vshll.u32 %v1956_v42, 16  ;;  %v1386_v56 = vshll.u32 %v1957_v38, 16  ;;  %v1959_v57 = vld [vmem:[%s2264_s22 + $0x34] sm:$0x1] }
  0x4e   : > { %v1361_v5 = vsel %vm2307_vm3, %v1356_v46, %v1360_v23  ;;  %v1369_v55 = vor.u32 %v1368_v51, %v1365_v50  ;;  %v1985_v40 = vrot.slane %v1977_v61, 9  ;;  %v2633_v16 = vrot.slane %v1372_v58, 5  ;;  %v1980_v32 = vld [vmem:[%s2264_s22 + $0x38] sm:$0xe]  ;;  %v1962_v23 = vld [vmem:[%s2264_s22 + $0x40] sm:$0xf] }
  0x4f   : > { %2111 = vmatmul.mubr.msk.bf16.vlgmr.msra.gmra.mxu0 %vm335_vm2, %v2182_v22  ;;  %v1382_v3 = vrot.slane %v1380_v54, 5  ;;  %v1585_v47 = vrot.slane %v1955_v37, 5  ;;  %v1986_v12 = vrot.slane %v1978_v20, 9  ;;  %v1589_v0 = vrot.slane %v1957_v38, 5  ;;  %v1965_v51 = vld [vmem:[%s2264_s22 + $0x4c] sm:$0x1] }
  0x50   : > { %2129 = vmatpush3.bf16.msra.mxu0 %v2522_v10  ;;  %2114 = vmatprep.mubr.msk.bf16.mxu0 %vm335_vm2, %v2184_v14  ;;  %v1991_v10 = vcombine.low %v1578_v48, %v1582_v2  ;;  %v2637_v63 = vrot.slane %v1369_v55, 4  ;;  %v1391_v9 = vshrl.u32 %v1958_v21, 16  ;;  %v1966_v11 = vcombine.low %v1347_v26, %v1361_v5  ;;  %v1981_v26 = vld [vmem:[%s2264_s22 + $0x40] sm:$0xe]  ;;  %v1982_v5 = vld [vmem:[%s2264_s22 + $0x48] sm:$0xe] }
  0x51   : > { %v1383_v17 = vor.u32 %v1382_v3, %v1379_v53  ;;  %v1394_v22 = vshll.u32 %v1958_v21, 16  ;;  %v1400_v13 = vshll.u32 %v1959_v57, 16  ;;  %v1388_v28 = vrot.slane %v1386_v56, 5 }
  0x52   : > { %v1586_v30 = vsel %vm2373_vm6, %v1985_v40, %v1585_v47  ;;  %v1393_v6 = vrot.slane %v1391_v9, 4  ;;  %v1405_v14 = vshrl.u32 %v1960_v25, 16  ;;  %v1375_v24 = vsel %vm2307_vm3, %v2637_v63, %v2633_v16 }
  0x53   : > { %v1384_v15 = vrot.slane %v1383_v17, 4  ;;  %v1396_v60 = vrot.slane %v1394_v22, 5  ;;  %v1408_v33 = vshll.u32 %v1960_v25, 16  ;;  %v1414_v19 = vshll.u32 %v1961_v18, 16 }
  0x54   : > { %2101 = vmatmul.mubr.msk.bf16.vlgmr.msra.gmra.mxu1 %vm335_vm2, %v1925_v1  ;;  %v1590_v1 = vsel %vm2373_vm6, %v1986_v12, %v1589_v0  ;;  %v1407_v7 = vrot.slane %v1405_v14, 4  ;;  %v1987_v35 = vrot.slane %v1979_v27, 9  ;;  %v1402_v49 = vrot.slane %v1400_v13, 5 }
  0x55   : > { %2119 = vmatpush3.bf16.msra.mxu1 %v2547_v45  ;;  %2104 = vmatprep.mubr.msk.bf16.mxu1 %vm335_vm2, %v1926_v39  ;;  %v1397_v45 = vor.u32 %v1396_v60, %v1393_v6  ;;  %v1593_v29 = vrot.slane %v1959_v57, 5  ;;  %v1988_v37 = vrot.slane %v1980_v32, 9  ;;  %v1964_v39 = vld [vmem:[%s2264_s22 + $0x48] sm:$0xf]  ;;  %v1389_v34 = vsel %vm2307_vm3, %v1384_v15, %v1388_v28 }
  0x56   : > { %v1992_v42 = vcombine.low %v1586_v30, %v1590_v1  ;;  %v1410_v38 = vrot.slane %v1408_v33, 5  ;;  %v1597_v43 = vrot.slane %v1961_v18, 5  ;;  %v1419_v59 = vshrl.u32 %v1962_v23, 16 }
  0x57   : > { %2115 = vmatmul.mubr.msk.bf16.gmra.mxu0 %vm335_vm2, %v2185_v62  ;;  %v1398_v41 = vrot.slane %v1397_v45, 4  ;;  %v1594_v58 = vsel %vm2373_vm6, %v1987_v35, %v1593_v29  ;;  %v1422_v61 = vshll.u32 %v1962_v23, 16  ;;  %v1416_v48 = vrot.slane %v1414_v19, 5 }
  0x58   : > { %2130 = vmatprep.mubr.msk.bf16.mxu0 %vm335_vm2, %v1991_v10  ;;  %v1411_v46 = vor.u32 %v1410_v38, %v1407_v7  ;;  %v1598_v50 = vsel %vm2373_vm6, %v1988_v37, %v1597_v43  ;;  %v1433_v20 = vshrl.u32 %v1964_v39, 16  ;;  %v1421_v53 = vrot.slane %v1419_v59, 4 }
  0x59   : > { %v1403_v2 = vsel %vm2307_vm3, %v1398_v41, %v1402_v49  ;;  %v1424_v54 = vrot.slane %v1422_v61, 5  ;;  %v1428_v21 = vshll.u32 %v1963_v44, 16  ;;  %v1993_v56 = vcombine.low %v1594_v58, %v1598_v50 }
  0x5a   : > { %v1412_v55 = vrot.slane %v1411_v46, 4  ;;  %v1435_v40 = vrot.slane %v1433_v20, 4  ;;  %v1436_v57 = vshll.u32 %v1964_v39, 16  ;;  %v1442_v3 = vshll.u32 %v1965_v51, 16 }
  0x5b   : > { %v1425_v16 = vor.u32 %v1424_v54, %v1421_v53  ;;  %v1989_v47 = vrot.slane %v1981_v26, 9  ;;  %v1601_v12 = vrot.slane %v1963_v44, 5  ;;  %v1990_v10 = vrot.slane %v1982_v5, 9 }
  0x5c   : > { %2105 = vmatmul.mubr.msk.bf16.gmra.mxu1 %vm335_vm2, %v1927_v36  ;;  %v1417_v25 = vsel %vm2307_vm3, %v1412_v55, %v1416_v48  ;;  %v1438_v62 = vrot.slane %v1436_v57, 5  ;;  %v1605_v63 = vrot.slane %v1965_v51, 5  ;;  %v1967_v4 = vcombine.low %v1375_v24, %v1389_v34 }
  0x5d   : > { %2120 = vmatprep.mubr.msk.bf16.mxu1 %vm335_vm2, %v1966_v11  ;;  %v1602_v36 = vsel %vm2373_vm6, %v1989_v47, %v1601_v12  ;;  %v1968_v9 = vcombine.low %v1403_v2, %v1417_v25  ;;  %v1426_v11 = vrot.slane %v1425_v16, 4  ;;  %v1430_v17 = vrot.slane %v1428_v21, 5 }
  0x5e   : > { %v1439_v8 = vor.u32 %v1438_v62, %v1435_v40  ;;  %v1606_v0 = vsel %vm2373_vm6, %v1990_v10, %v1605_v63  ;;  %v1444_v18 = vrot.slane %v1442_v3, 5 }
  0x5f   : > { %2131 = vmatmul.mubr.msk.bf16.vlgmr.msra.gmra.mxu0 %vm335_vm2, %v1992_v42  ;;  %v1994_v13 = vcombine.low %v1602_v36, %v1606_v0  ;;  %v1431_v27 = vsel %vm2307_vm3, %v1426_v11, %v1430_v17 }
  0x60   : > { %2134 = vmatprep.mubr.msk.bf16.mxu0 %vm335_vm2, %v1993_v56  ;;  %v1440_v22 = vrot.slane %v1439_v8, 4 }
  0x62   : > { %v1445_v28 = vsel %vm2307_vm3, %v1440_v22, %v1444_v18 }
  0x63   : > { %v1969_v52 = vcombine.low %v1431_v27, %v1445_v28 }
  0x64   : > { %2121 = vmatmul.mubr.msk.bf16.vlgmr.msra.gmra.mxu1 %vm335_vm2, %v1967_v4 }
  0x65   : > { %2124 = vmatprep.mubr.msk.bf16.mxu1 %vm335_vm2, %v1968_v9 }
  0x67   : > { %2135 = vmatmul.mubr.msk.bf16.gmra.mxu0 %vm335_vm2, %v1994_v13 }
  0x6c   : > { %2125 = vmatmul.mubr.msk.bf16.gmra.mxu1 %vm335_vm2, %v1969_v52 }
  0xe7   : > { %v2052_v30 = vpop.f32.mrf.mxu0 }
  0xe9   : > { %v382_v6 = vpop.f32.mrf.mxu0 }
  0xeb   : > { %v2053_v14 = vpop.f32.mrf.mxu0 }
  0xec   : > { %v2056_v32 = vpop.f32.mrf.mxu1 }
  0xed   : > { %v385_v24 = vpop.f32.mrf.mxu0 }
  0xee   : > { %v398_v15 = vpop.f32.mrf.mxu1 }
  0xef   : > { %v2072_v1 = vpop.f32.mrf.mxu0 }
  0xf0   : > { %v2057_v60 = vpop.f32.mrf.mxu1 }
  0xf1   : > { %v641_v7 = vpop.f32.mrf.mxu0 }
  0xf2   : > { %v2693_v33 = vpop.f32.mrf.mxu1 }
  0xf3   : > { %v2073_v19 = vpop.f32.mrf.mxu0 }
  0xf4   : > { %v2062_v35 = vpop.f32.mrf.mxu1 }
  0xf5   : > { %v644_v31 = vpop.f32.mrf.mxu0  ;;  %v494_v57 = vadd.f32 %v2062_v35, %v2052_v30 }
  0xf6   : > { %v485_v23 = vpop.f32.mrf.mxu1 }
  0xf7   : > { %v2076_v45 = vpop.f32.mrf.mxu0  ;;  %v486_v47 = vadd.f32 %v485_v23, %v382_v6  ;;  %v674_v62 = vadd.f32 %v2072_v1, %v494_v57 }
  0xf8   : > { %v2063_v49 = vpop.f32.mrf.mxu1 }
  0xf9   : > { %v657_v29 = vpop.f32.mrf.mxu0  ;;  %v497_v10 = vadd.f32 %v2063_v49, %v2053_v14  ;;  %v672_v8 = vadd.f32 %v641_v7, %v486_v47 }
  0xfa   : > { %v488_v37 = vpop.f32.mrf.mxu1 }
  0xfb   : > { %v2695_v39 = vpop.f32.mrf.mxu0  ;;  %v489_v36 = vadd.f32 %v488_v37, %v385_v24  ;;  %v675_v18 = vadd.f32 %v2073_v19, %v497_v10 }
  0xfc   : > { %v2066_v34 = vpop.f32.mrf.mxu1 }
  0xfd   : > { %v2697_v42 = vpop.f32.mrf.mxu0  ;;  %v510_v11 = vadd.f32 %v2066_v34, %v2056_v32  ;;  %v673_v52 = vadd.f32 %v644_v31, %v489_v36 }
  0xfe   : > { %v501_v38 = vpop.f32.mrf.mxu1 }
  0xff   : > { %v2092_v43 = vpop.f32.mrf.mxu0  ;;  %v502_v27 = vadd.f32 %v501_v38, %v398_v15  ;;  %v678_v1 = vadd.f32 %v2076_v45, %v510_v11 }
 0x100   : > { %v2067_v44 = vpop.f32.mrf.mxu1 }
 0x101   : > { %v996_v41 = vpop.f32.mrf.mxu0  ;;  %v513_v35 = vadd.f32 %v2067_v44, %v2057_v60  ;;  %v676_v32 = vadd.f32 %v657_v29, %v502_v27 }
 0x102   : > { %v504_v58 = vpop.f32.mrf.mxu1 }
 0x103   : > { %v2093_v59 = vpop.f32.mrf.mxu0  ;;  %v505_v19 = vadd.f32 %v504_v58, %v2693_v33  ;;  %v679_v38 = vadd.f32 %v2695_v39, %v513_v35 }
 0x104   : > { %v2082_v61 = vpop.f32.mrf.mxu1 }
 0x105   : > { %v999_v46 = vpop.f32.mrf.mxu0  ;;  %v796_v0 = vadd.f32 %v2082_v61, %v674_v62 }
 0x106   : > { %v763_v48 = vpop.f32.mrf.mxu1 }
 0x107   : > { %v2096_v50 = vpop.f32.mrf.mxu0  ;;  %v794_v22 = vadd.f32 %v763_v48, %v672_v8  ;;  %v1029_v30 = vadd.f32 %v2092_v43, %v796_v0 }
 0x108   : > { %v2083_v51 = vpop.f32.mrf.mxu1 }
 0x109   : > { %v2699_v20 = vpop.f32.mrf.mxu0  ;;  %v797_v6 = vadd.f32 %v2083_v51, %v675_v18  ;;  %v1027_v24 = vadd.f32 %v996_v41, %v794_v22 }
 0x10a   : > { %v766_v26 = vpop.f32.mrf.mxu1 }
 0x10b   : > { %v2701_v2 = vpop.f32.mrf.mxu0  ;;  %v795_v23 = vadd.f32 %v766_v26, %v673_v52  ;;  %v1030_v48 = vadd.f32 %v2093_v59, %v797_v6  ;;  %v677_v26 = vadd.f32 %v2697_v42, %v505_v19 }
 0x10c   : > { %v2086_v53 = vpop.f32.mrf.mxu1 }
 0x10d   : > { %v2703_v54 = vpop.f32.mrf.mxu0  ;;  %v800_v34 = vadd.f32 %v2086_v53, %v678_v1  ;;  %v1028_v45 = vadd.f32 %v999_v46, %v795_v23 }
 0x10e   : > { %v779_v21 = vpop.f32.mrf.mxu1 }
 0x10f   : > { %v2112_v5 = vpop.f32.mrf.mxu0  ;;  %v798_v43 = vadd.f32 %v779_v21, %v676_v32  ;;  %v1033_v57 = vadd.f32 %v2096_v50, %v800_v34 }
 0x110   : > { %v2087_v55 = vpop.f32.mrf.mxu1 }
 0x111   : > { %v1279_v56 = vpop.f32.mrf.mxu0  ;;  %v801_v29 = vadd.f32 %v2087_v55, %v679_v38  ;;  %v1031_v47 = vadd.f32 %v2699_v20, %v798_v43 }
 0x112   : > { %v782_v40 = vpop.f32.mrf.mxu1 }
 0x113   : > { %v2113_v16 = vpop.f32.mrf.mxu0  ;;  %v1034_v10 = vadd.f32 %v2701_v2, %v801_v29 }
 0x114   : > { %v2102_v3 = vpop.f32.mrf.mxu1 }
 0x115   : > { %v2705_v12 = vpop.f32.mrf.mxu0  ;;  %v1190_v49 = vadd.f32 %v2102_v3, %v1029_v30 }
 0x116   : > { %v1157_v25 = vpop.f32.mrf.mxu1 }
 0x117   : > { %v2707_v63 = vpop.f32.mrf.mxu0  ;;  %v1188_v15 = vadd.f32 %v1157_v25, %v1027_v24  ;;  %v1312_v60 = vadd.f32 %v2112_v5, %v1190_v49  ;;  %v799_v25 = vadd.f32 %v782_v40, %v677_v26 }
 0x118   : > { %v2103_v4 = vpop.f32.mrf.mxu1 }
 0x119   : > { %v2709_v9 = vpop.f32.mrf.mxu0  ;;  %v1191_v44 = vadd.f32 %v2103_v4, %v1030_v48  ;;  %v1310_v33 = vadd.f32 %v1279_v56, %v1188_v15 }
 0x11a   : > { %v1160_v17 = vpop.f32.mrf.mxu1 }
 0x11b   : > { %v2711_v13 = vpop.f32.mrf.mxu0  ;;  %v1189_v58 = vadd.f32 %v1160_v17, %v1028_v45  ;;  %v1313_v62 = vadd.f32 %v2113_v16, %v1191_v44  ;;  %v1032_v16 = vadd.f32 %v2703_v54, %v799_v25 }
 0x11c   : > { %v2106_v28 = vpop.f32.mrf.mxu1 }
 0x11d   : > { %v2713_v14 = vpop.f32.mrf.mxu0  ;;  %v1194_v39 = vadd.f32 %v2106_v28, %v1033_v57  ;;  %v1311_v20 = vadd.f32 %v2705_v12, %v1189_v58 }
 0x11e   : > { %v1173_v7 = vpop.f32.mrf.mxu1 }
 0x11f   : > { %v2132_v37 = vpop.f32.mrf.mxu0  ;;  %v1192_v4 = vadd.f32 %v1173_v7, %v1031_v47  ;;  %v1316_v2 = vadd.f32 %v2707_v63, %v1194_v39 }
 0x120   : > { %v2107_v61 = vpop.f32.mrf.mxu1 }
 0x121   : > { %v1673_v31 = vpop.f32.mrf.mxu0  ;;  %v1195_v36 = vadd.f32 %v2107_v61, %v1034_v10  ;;  %v1314_v18 = vadd.f32 %v2709_v9, %v1192_v4 }
 0x122   : > { %v1176_v51 = vpop.f32.mrf.mxu1 }
 0x123   : > { %v2133_v41 = vpop.f32.mrf.mxu0  ;;  %v1193_v27 = vadd.f32 %v1176_v51, %v1032_v16  ;;  %v1317_v30 = vadd.f32 %v2711_v13, %v1195_v36 }
 0x124   : > { %v2122_v3 = vpop.f32.mrf.mxu1 }
 0x125   : > { %v1545_v53 = vadd.f32 %v2122_v3, %v1312_v60  ;;  %v1676_v59 = vpop.f32.mrf.mxu0  ;;  %v1315_v24 = vadd.f32 %v2713_v14, %v1193_v27 }
 0x126   : > { %v1512_v21 = vpop.f32.mrf.mxu1 }
 0x127   : > { %v1706_v46 = vadd.f32 %v2132_v37, %v1545_v53  ;;  %v1543_v5 = vadd.f32 %v1512_v21, %v1310_v33  ;;  %v2136_v50 = vpop.f32.mrf.mxu0 }
 0x128   : > { %v2123_v42 = vpop.f32.mrf.mxu1 }
 0x129   : > { %v1714_v55 = vpack.c.bf16 %v1706_v46, %v1706_v46  ;;  %v1704_v56 = vadd.f32 %v1673_v31, %v1543_v5  ;;  %v1546_v40 = vadd.f32 %v2123_v42, %v1313_v62  ;;  %v1689_v12 = vpop.f32.mrf.mxu0 }
 0x12a   : > { %v1515_v8 = vpop.f32.mrf.mxu1 }
 0x12b   : > { %1723 = vst.msk [vmem:[%s2724_s14 + $0x8] sm:$0xf] %vm1720_vm7, %v1714_v55  ;;  %v1712_v0 = vpack.c.bf16 %v1704_v56, %v1704_v56  ;;  %v1707_v11 = vadd.f32 %v2133_v41, %v1546_v40  ;;  %v1544_v17 = vadd.f32 %v1515_v8, %v1311_v20  ;;  %v2137_v7 = vpop.f32.mrf.mxu0 }
 0x12c   : > { %v2126_v22 = vpop.f32.mrf.mxu1 }
 0x12d   : > { %1721 = vst.msk [vmem:[%s2724_s14] sm:$0xf] %vm1720_vm7, %v1712_v0  ;;  %v1715_v28 = vpack.c.bf16 %v1707_v11, %v1707_v11  ;;  %v1705_v54 = vadd.f32 %v1676_v59, %v1544_v17  ;;  %v1549_v63 = vadd.f32 %v2126_v22, %v1316_v2  ;;  %v1692_v61 = vpop.f32.mrf.mxu0 }
 0x12e   : > { %v1528_v52 = vpop.f32.mrf.mxu1 }
 0x12f   : > { %1724 = vst.msk [vmem:[%s2724_s14 + $0xc] sm:$0xf] %vm1720_vm7, %v1715_v28  ;;  %v1713_v6 = vpack.c.bf16 %v1705_v54, %v1705_v54  ;;  %v1710_v1 = vadd.f32 %v2136_v50, %v1549_v63  ;;  %v1547_v35 = vadd.f32 %v1528_v52, %v1314_v18 }
 0x130   : > { %v2127_v9 = vpop.f32.mrf.mxu1 }
 0x131   : > { %1722 = vst.msk [vmem:[%s2724_s14 + $0x4] sm:$0xf] %vm1720_vm7, %v1713_v6  ;;  %v1718_v23 = vpack.c.bf16 %v1710_v1, %v1710_v1  ;;  %v1708_v49 = vadd.f32 %v1689_v12, %v1547_v35  ;;  %v1550_v37 = vadd.f32 %v2127_v9, %v1317_v30 }
 0x132   : > { %v1531_v32 = vpop.f32.mrf.mxu1 }
 0x133   : > { %1727 = vst.msk [vmem:[%s2724_s14 + $0x18] sm:$0xf] %vm1720_vm7, %v1718_v23  ;;  %v1716_v13 = vpack.c.bf16 %v1708_v49, %v1708_v49  ;;  %v1711_v19 = vadd.f32 %v2137_v7, %v1550_v37  ;;  %v1548_v34 = vadd.f32 %v1531_v32, %v1315_v24 }
 0x135   : > { %1725 = vst.msk [vmem:[%s2724_s14 + $0x10] sm:$0xf] %vm1720_vm7, %v1716_v13  ;;  %v1719_v48 = vpack.c.bf16 %v1711_v19, %v1711_v19  ;;  %v1709_v15 = vadd.f32 %v1692_v61, %v1548_v34 }
 0x137   : > { %1728 = vst.msk [vmem:[%s2724_s14 + $0x1c] sm:$0xf] %vm1720_vm7, %v1719_v48  ;;  %v1717_v14 = vpack.c.bf16 %v1709_v15, %v1709_v15 }
 0x139   : > { %1726 = vst.msk [vmem:[%s2724_s14 + $0x14] sm:$0xf] %vm1720_vm7, %v1717_v14 }
 0x13a PF: > { %s12_s11 = sadd.s32 1, %s2208_s11   ;;  %s2764_s9 = smov %s2204_s10 }
 0x13b   : > { %p9_p5 = scmp.ge.s32.totalorder %s12_s11, 4   ;;  %s2765_s10 = smov %s2767_s12 }
 0x13d   :  { %11 = sbr.rel (!%p9_p5) target bundleno = 2 (0x2), region = 63 }

// kernel: zhugo_forward.24
= control target key start
LH: loop header
LB: loop body
LE: loop exit
PB: predicated region body
PF: predicated region fallthrough
CT: control target
= control target key end

     0   :  { %s2225_s9 = smov 0   ;;  %s2227_s10 = smov 0   ;;  %s2757_s0 = inlined_call_operand.vmem [shape: bf16[2,10,10,16], index: 0, kind: input, shape index: {}]   ;;  %s2758_s1 = inlined_call_operand.vmem [shape: bf16[144,16], index: 1, kind: input, shape index: {}]   ;;  %s2759_s2 = inlined_call_operand.vmem [shape: bf16[2,8,8,16], index: 2, kind: output, shape index: {}]  }
   0x1   :  { %s2229_s11 = smov 0  }
   0x2 LB: > { %s24_s12 = sadd.s32 1, %s2204_s10  ;;  %p1827_p0 = scmp.ge.s32.totalorder %s2208_s11, 1  ;;  %s2208_s11 = sphi %s2229_s11, %s12_s11   ;;  %s2204_s10 = sphi %s2227_s10, %s2765_s10   ;;  %s2200_s9 = sphi %s2225_s9, %s2764_s9  }
   0x3   : > { %p26_p1 = scmp.ge.s32.totalorder %s24_s12, 2  ;;  %p135_p2 = scmp.lt.s32.totalorder %s2208_s11, 3 }
   0x5   : > { %s2767_s12 = smov (%p26_p1, %s24_s12), 0  ;;  %p136_p3 = pnand %p1827_p0, %p135_p2 }
   0x6   : > { %p164_p4 = scmp.lt.s32.totalorder (!%p136_p3), %s2200_s9, 1 }
   0x7   : > { %139 = sbr.rel (%p136_p3) target bundleno = 314 (0x13a), region = 28 }
   0xc   : > { %v2165_v0 = vld [vmem:[%s2758_s1 + $0x8] sm:$0xff]   ;;  %v2249_v1 = vld [vmem:[%s2758_s1] sm:$0xff]   ;;  %s2769_s9 = smov (!%p164_p4, %s2200_s9), 1  ;;  %v2256_v2 = vld [vmem:[%s2758_s1 + $0x10] sm:$0xff]   ;;  %vm200_vm0 = vsmask.f32 3328 }
   0xd   : > { %2138 = vmatprep.subr.bf16.mxu1 %v2165_v0  ;;  %2048 = vmatprep.subr.bf16.mxu0 %v2165_v0  ;;  %s2140_s19 = smul.u32 80, %s2769_s9  ;;  %vm201_vm1 = vsmask.f32 7440  ;;  %vm335_vm2 = vcmask 130048   ;;  %vm540_vm4 = vcmask 1042432   ;;  %vm541_vm5 = vcmask 1046532  }
   0xe   : > { %2139 = vmatpush3.bf16.msra.mxu1 %v2165_v0  ;;  %2049 = vmatpush3.bf16.msra.mxu0 %v2165_v0  ;;  %vm2307_vm3 = vmor %vm200_vm0, %vm201_vm1  ;;  %s2002_s7 = sshll.u32 %s2769_s9, 5  ;;  %vm1720_vm7 = vcmask 125952  }
   0xf   : > { %2058 = vmatprep.subr.bf16.mxu1 %v2249_v1  ;;  %2068 = vmatprep.subr.bf16.mxu0 %v2256_v2  ;;  %s2264_s22 = scalar_lea.vmem %s2757_s0, %s2140_s19  ;;  %vm2373_vm6 = vmor %vm540_vm4, %vm541_vm5  ;;  %s2724_s14 = scalar_lea.vmem %s2759_s2, %s2002_s7 }
  0x10   : > { %v2267_v3 = vld [vmem:[%s2264_s22] sm:$0xf]  ;;  %v2270_v4 = vld [vmem:[%s2264_s22 + $0x8] sm:$0xf]  ;;  %v2273_v5 = vld [vmem:[%s2264_s22 + $0x4] sm:$0x1] }
  0x11   : > { %v2276_v6 = vld [vmem:[%s2264_s22 + $0xc] sm:$0x1]  ;;  %v204_v7 = vshrl.u32 %v2267_v3, 16  ;;  %v207_v8 = vshll.u32 %v2267_v3, 16  ;;  %v213_v9 = vshll.u32 %v2273_v5, 16  ;;  %v218_v10 = vshrl.u32 %v2270_v4, 16 }
  0x12   : > { %v221_v11 = vshll.u32 %v2270_v4, 16  ;;  %v227_v12 = vshll.u32 %v2276_v6, 16  ;;  %v545_v13 = vrot.slane %v2273_v5, 5  ;;  %v549_v14 = vrot.slane %v2276_v6, 5  ;;  %v2287_v15 = vld [vmem:[%s2264_s22 + $0x20] sm:$0xf] }
  0x13   : > { %v206_v16 = vrot.slane %v204_v7, 4  ;;  %v209_v17 = vrot.slane %v207_v8, 5  ;;  %v215_v18 = vrot.slane %v213_v9, 5  ;;  %v220_v19 = vrot.slane %v218_v10, 4  ;;  %v2290_v20 = vld [vmem:[%s2264_s22 + $0x28] sm:$0xf] }
  0x14   : > { %v223_v21 = vrot.slane %v221_v11, 5  ;;  %v229_v22 = vrot.slane %v227_v12, 5  ;;  %v2293_v23 = vld [vmem:[%s2264_s22 + $0x24] sm:$0x1]  ;;  %v2296_v24 = vld [vmem:[%s2264_s22 + $0x2c] sm:$0x1]  ;;  %v1840_v25 = vcombine.low %v2267_v3, %v2270_v4  ;;  %v1842_v26 = vcombine.low %v2287_v15, %v2290_v20 }
  0x15   : > { %v210_v27 = vor.u32 %v209_v17, %v206_v16  ;;  %v260_v28 = vshrl.u32 %v2287_v15, 16  ;;  %v263_v29 = vshll.u32 %v2287_v15, 16  ;;  %v269_v30 = vshll.u32 %v2293_v23, 16  ;;  %v2315_v36 = vld [vmem:[%s2264_s22 + $0x10] sm:$0xf] }
  0x16   : > { %v224_v32 = vor.u32 %v223_v21, %v220_v19  ;;  %v274_v33 = vshrl.u32 %v2290_v20, 16  ;;  %v277_v34 = vshll.u32 %v2290_v20, 16  ;;  %v283_v35 = vshll.u32 %v2296_v24, 16  ;;  %v2318_v41 = vld [vmem:[%s2264_s22 + $0x18] sm:$0xf] }
  0x17   : > { %v211_v37 = vrot.slane %v210_v27, 4  ;;  %v262_v38 = vrot.slane %v260_v28, 4  ;;  %v265_v39 = vrot.slane %v263_v29, 5  ;;  %v271_v40 = vrot.slane %v269_v30, 5  ;;  %v2321_v46 = vld [vmem:[%s2264_s22 + $0x14] sm:$0x1] }
  0x18   : > { %v225_v42 = vrot.slane %v224_v32, 4  ;;  %v276_v43 = vrot.slane %v274_v33, 4  ;;  %v279_v44 = vrot.slane %v277_v34, 5  ;;  %v285_v45 = vrot.slane %v283_v35, 5  ;;  %v2330_v53 = vld [vmem:[%s2264_s22 + $0x1c] sm:$0x1] }
  0x19   : > { %v216_v47 = vsel %vm2307_vm3, %v211_v37, %v215_v18  ;;  %v266_v48 = vor.u32 %v265_v39, %v262_v38  ;;  %v561_v49 = vrot.slane %v2293_v23, 5  ;;  %v565_v50 = vrot.slane %v2296_v24, 5  ;;  %v2337_v60 = vld [vmem:[%s2264_s22 + $0x30] sm:$0xf]  ;;  %v2341_v7 = vld [vmem:[%s2264_s22 + $0x38] sm:$0xf] }
  0x1a   : > { %v230_v51 = vsel %vm2307_vm3, %v225_v42, %v229_v22  ;;  %v280_v52 = vor.u32 %v279_v44, %v276_v43  ;;  %v232_v54 = vshrl.u32 %v2315_v36, 16  ;;  %v235_v55 = vshll.u32 %v2315_v36, 16  ;;  %v2348_v12 = vld [vmem:[%s2264_s22 + $0x34] sm:$0x1]  ;;  %v2354_v21 = vld [vmem:[%s2264_s22 + $0x3c] sm:$0x1] }
  0x1b   : > { %v1831_v56 = vcombine.low %v216_v47, %v230_v51  ;;  %v267_v57 = vrot.slane %v266_v48, 4  ;;  %v241_v58 = vshll.u32 %v2321_v46, 16  ;;  %v246_v59 = vshrl.u32 %v2318_v41, 16  ;;  %v516_v22 = vld [vmem:[%s2264_s22] sm:$0xe] }
  0x1c   : > { %v281_v61 = vrot.slane %v280_v52, 4  ;;  %v234_v62 = vrot.slane %v232_v54, 4  ;;  %v237_v63 = vrot.slane %v235_v55, 5  ;;  %v249_v0 = vshll.u32 %v2318_v41, 16  ;;  %v517_v32 = vld [vmem:[%s2264_s22 + $0x8] sm:$0xe] }
  0x1d   : > { %2050 = vmatprep.mubr.msk.bf16.mxu0 %vm335_vm2, %v1831_v56  ;;  %v272_v8 = vsel %vm2307_vm3, %v267_v57, %v271_v40  ;;  %v243_v9 = vrot.slane %v241_v58, 5  ;;  %v248_v10 = vrot.slane %v246_v59, 4  ;;  %v255_v11 = vshll.u32 %v2330_v53, 16  ;;  %v518_v38 = vld [vmem:[%s2264_s22 + $0x10] sm:$0xe] }
  0x1e   : > { %v286_v16 = vsel %vm2307_vm3, %v281_v61, %v285_v45  ;;  %v238_v17 = vor.u32 %v237_v63, %v234_v62  ;;  %v251_v18 = vrot.slane %v249_v0, 5  ;;  %v553_v19 = vrot.slane %v2321_v46, 5  ;;  %v519_v44 = vld [vmem:[%s2264_s22 + $0x18] sm:$0xe]  ;;  %v520_v45 = vld [vmem:[%s2264_s22 + $0x20] sm:$0xe] }
  0x1f   : > { %v1833_v27 = vcombine.low %v272_v8, %v286_v16  ;;  %v257_v28 = vrot.slane %v255_v11, 5  ;;  %v557_v29 = vrot.slane %v2330_v53, 5  ;;  %v288_v30 = vshrl.u32 %v2337_v60, 16  ;;  %v521_v62 = vld [vmem:[%s2264_s22 + $0x28] sm:$0xe] }
  0x20   : > { %v239_v33 = vrot.slane %v238_v17, 4  ;;  %v252_v34 = vor.u32 %v251_v18, %v248_v10  ;;  %v291_v35 = vshll.u32 %v2337_v60, 16  ;;  %v297_v37 = vshll.u32 %v2348_v12, 16  ;;  %v2171_v10 = vld [vmem:[%s2758_s1 + $0x20] sm:$0xff]   ;;  %v522_v11 = vld [vmem:[%s2264_s22 + $0x30] sm:$0xe] }
  0x21   : > { %2054 = vmatprep.mubr.msk.bf16.mxu1 %vm335_vm2, %v1833_v27  ;;  %v290_v39 = vrot.slane %v288_v30, 4  ;;  %v302_v40 = vshrl.u32 %v2341_v7, 16  ;;  %v305_v42 = vshll.u32 %v2341_v7, 16  ;;  %v311_v43 = vshll.u32 %v2354_v21, 16  ;;  %v523_v5 = vld [vmem:[%s2264_s22 + $0x38] sm:$0xe] }
  0x22   : > { %v244_v46 = vsel %vm2307_vm3, %v239_v33, %v243_v9  ;;  %v253_v47 = vrot.slane %v252_v34, 4  ;;  %v293_v48 = vrot.slane %v291_v35, 5  ;;  %v299_v51 = vrot.slane %v297_v37, 5  ;;  %v2411_v34 = vld [vmem:[%s2264_s22 + $0xc] sm:$0x1] }
  0x23   : > { %v304_v53 = vrot.slane %v302_v40, 4  ;;  %v307_v54 = vrot.slane %v305_v42, 5  ;;  %v313_v55 = vrot.slane %v311_v43, 5  ;;  %v1849_v56 = vrot.slane %v516_v22, 9  ;;  %v1885_v37 = vld [vmem:[%s2264_s22 + $0x10] sm:$0xf] }
  0x24   : > { %v258_v57 = vsel %vm2307_vm3, %v253_v47, %v257_v28  ;;  %v294_v58 = vor.u32 %v293_v48, %v290_v39  ;;  %v1850_v59 = vrot.slane %v517_v32, 9  ;;  %v1841_v61 = vcombine.low %v2315_v36, %v2318_v41  ;;  %v2174_v15 = vld [vmem:[%s2264_s22 + $0x8] ss:$8 sps:$4 sm:$0xff]  }
  0x25   : > { %v1832_v63 = vcombine.low %v244_v46, %v258_v57  ;;  %v308_v0 = vor.u32 %v307_v54, %v304_v53  ;;  %v546_v8 = vsel %vm2373_vm6, %v1849_v56, %v545_v13  ;;  %v1851_v9 = vrot.slane %v518_v38, 9  ;;  %v2427_v38 = vld [vmem:[%s2264_s22 + $0x14] sm:$0x1] }
  0x26   : > { %v295_v16 = vrot.slane %v294_v58, 4  ;;  %v550_v17 = vsel %vm2373_vm6, %v1850_v59, %v549_v14  ;;  %v1852_v18 = vrot.slane %v519_v44, 9  ;;  %v1853_v22 = vrot.slane %v520_v45, 9  ;;  %v1887_v44 = vld [vmem:[%s2264_s22 + $0x18] sm:$0xf]  ;;  %v2456_v59 = vld [vmem:[%s2758_s1 + $0x30] sm:$0xff]  }
  0x27   : > { %2051 = vmatmul.mubr.msk.bf16.vlgmr.msra.gmra.mxu0 %vm335_vm2, %v1832_v63  ;;  %v309_v13 = vrot.slane %v308_v0, 4  ;;  %v1857_v27 = vcombine.low %v546_v8, %v550_v17  ;;  %v554_v28 = vsel %vm2373_vm6, %v1851_v9, %v553_v19  ;;  %v1854_v30 = vrot.slane %v521_v62, 9  ;;  %v1883_v19 = vld [vmem:[%s2264_s22 + $0x8] sm:$0xf]  ;;  %v2432_v45 = vld [vmem:[%s2264_s22 + $0x1c] sm:$0x1] }
  0x28   : > { %v300_v6 = vsel %vm2307_vm3, %v295_v16, %v299_v51  ;;  %2069 = vmatpush3.bf16.msra.mxu0 %v2256_v2  ;;  %v558_v14 = vsel %vm2373_vm6, %v1852_v18, %v557_v29  ;;  %v562_v32 = vsel %vm2373_vm6, %v1853_v22, %v561_v49  ;;  %v1843_v33 = vcombine.low %v2337_v60, %v2341_v7  ;;  %v2419_v2 = vld [vmem:[%s2758_s1 + $0x18] sm:$0xff]   ;;  %v2451_v58 = vld [vmem:[%s2264_s22 + $0x24] sm:$0x1]  ;;  %v1891_v9 = vld [vmem:[%s2264_s22 + $0x28] sm:$0xf] }
  0x29   : > { %v314_v35 = vsel %vm2307_vm3, %v309_v13, %v313_v55  ;;  %2070 = vmatprep.mubr.msk.bf16.mxu0 %vm335_vm2, %v1857_v27  ;;  %v1858_v23 = vcombine.low %v554_v28, %v558_v14  ;;  %2088 = vmatprep.subr.bf16.mxu0 %v2171_v10  ;;  %v566_v49 = vsel %vm2373_vm6, %v1854_v30, %v565_v50  ;;  %v1855_v29 = vrot.slane %v522_v11, 9  ;;  %v1889_v50 = vld [vmem:[%s2264_s22 + $0x20] sm:$0xf]  ;;  %v2467_v16 = vld [vmem:[%s2758_s1 + $0x28] sm:$0xff]   ;;  %v1910_v7 = vld [vmem:[%s2264_s22 + $0x18] sm:$0xe] }
  0x2a   : > { %v1834_v39 = vcombine.low %v300_v6, %v314_v35  ;;  %v1859_v40 = vcombine.low %v562_v32, %v566_v49  ;;  %v569_v42 = vrot.slane %v2348_v12, 5  ;;  %v1856_v43 = vrot.slane %v523_v5, 9  ;;  %v2471_v5 = vld [vmem:[%s2264_s22 + $0x2c] sm:$0x1] }
  0x2b   : > { %v573_v46 = vrot.slane %v2354_v21, 5  ;;  %v819_v47 = vshrl.u32 %v1883_v19, 16  ;;  %v822_v24 = vshll.u32 %v1883_v19, 16  ;;  %v828_v48 = vshll.u32 %v2411_v34, 16 }
  0x2c   : > { %2055 = vmatmul.mubr.msk.bf16.vlgmr.msra.gmra.mxu1 %vm335_vm2, %v1834_v39  ;;  %v2440_v51 = vsel %vm2373_vm6, %v1855_v29, %v569_v42  ;;  %v833_v53 = vshrl.u32 %v1885_v37, 16  ;;  %v836_v12 = vshll.u32 %v1885_v37, 16  ;;  %v842_v54 = vshll.u32 %v2427_v38, 16 }
  0x2d   : > { %2059 = vmatpush3.bf16.msra.mxu1 %v2249_v1  ;;  %2060 = vmatprep.mubr.msk.bf16.mxu1 %vm335_vm2, %v1840_v25  ;;  %v574_v21 = vsel %vm2373_vm6, %v1856_v43, %v573_v46  ;;  %v821_v55 = vrot.slane %v819_v47, 4  ;;  %v824_v56 = vrot.slane %v822_v24, 5  ;;  %v830_v57 = vrot.slane %v828_v48, 5  ;;  %v2494_v47 = vld [vmem:[%s2264_s22 + $0x3c] sm:$0x1] }
  0x2e   : > { %2078 = vmatprep.subr.bf16.mxu1 %v2419_v2  ;;  %v1860_v1 = vcombine.low %v2440_v51, %v574_v21  ;;  %v835_v3 = vrot.slane %v833_v53, 4  ;;  %v838_v4 = vrot.slane %v836_v12, 5  ;;  %v844_v25 = vrot.slane %v842_v54, 5  ;;  %v1897_v53 = vld [vmem:[%s2264_s22 + $0x40] sm:$0xf] }
  0x2f   : > { %2071 = vmatmul.mubr.msk.bf16.vlgmr.msra.gmra.mxu0 %vm335_vm2, %v1858_v23  ;;  %v825_v62 = vor.u32 %v824_v56, %v821_v55  ;;  %v847_v63 = vshrl.u32 %v1887_v44, 16  ;;  %v850_v0 = vshll.u32 %v1887_v44, 16  ;;  %v856_v8 = vshll.u32 %v2432_v45, 16  ;;  %v1895_v44 = vld [vmem:[%s2264_s22 + $0x38] sm:$0xf] }
  0x30   : > { %2089 = vmatpush3.bf16.msra.mxu0 %v2171_v10  ;;  %2074 = vmatprep.mubr.msk.bf16.mxu0 %vm335_vm2, %v1859_v40  ;;  %v839_v11 = vor.u32 %v838_v4, %v835_v3  ;;  %v861_v17 = vshrl.u32 %v1889_v50, 16  ;;  %v864_v18 = vshll.u32 %v1889_v50, 16  ;;  %v870_v22 = vshll.u32 %v2451_v58, 16  ;;  %v1893_v10 = vld [vmem:[%s2264_s22 + $0x30] sm:$0xf] }
  0x31   : > { %v826_v13 = vrot.slane %v825_v62, 4  ;;  %v849_v27 = vrot.slane %v847_v63, 4  ;;  %v852_v28 = vrot.slane %v850_v0, 5  ;;  %v858_v30 = vrot.slane %v856_v8, 5  ;;  %2108 = vmatprep.subr.bf16.mxu0 %v2456_v59  ;;  %v2484_v40 = vld [vmem:[%s2264_s22 + $0x34] sm:$0x1] }
  0x32   : > { %v840_v6 = vrot.slane %v839_v11, 4  ;;  %v863_v14 = vrot.slane %v861_v17, 4  ;;  %v866_v32 = vrot.slane %v864_v18, 5  ;;  %v872_v19 = vrot.slane %v870_v22, 5  ;;  %v2504_v12 = vld [vmem:[%s2264_s22 + $0x44] sm:$0x1] }
  0x33   : > { %v831_v35 = vsel %vm2307_vm3, %v826_v13, %v830_v57  ;;  %v853_v23 = vor.u32 %v852_v28, %v849_v27  ;;  %v875_v49 = vshrl.u32 %v1891_v9, 16  ;;  %v878_v29 = vshll.u32 %v1891_v9, 16  ;;  %v1909_v9 = vld [vmem:[%s2264_s22 + $0x10] sm:$0xe] }
  0x34   : > { %2061 = vmatmul.mubr.msk.bf16.vlgmr.msra.gmra.mxu1 %vm335_vm2, %v1841_v61  ;;  %v845_v37 = vsel %vm2307_vm3, %v840_v6, %v844_v25  ;;  %v867_v39 = vor.u32 %v866_v32, %v863_v14  ;;  %v884_v42 = vshll.u32 %v2471_v5, 16  ;;  %v889_v43 = vshrl.u32 %v1893_v10, 16  ;;  %v1908_v25 = vld [vmem:[%s2264_s22 + $0x8] sm:$0xe] }
  0x35   : > { %2079 = vmatpush3.bf16.msra.mxu1 %v2419_v2  ;;  %2064 = vmatprep.mubr.msk.bf16.mxu1 %vm335_vm2, %v1842_v26  ;;  %v1899_v36 = vcombine.low %v831_v35, %v845_v37  ;;  %v854_v41 = vrot.slane %v853_v23, 4  ;;  %v877_v61 = vrot.slane %v875_v49, 4  ;;  %v880_v46 = vrot.slane %v878_v29, 5  ;;  %v1911_v23 = vld [vmem:[%s2264_s22 + $0x20] sm:$0xe] }
  0x36   : > { %2098 = vmatprep.subr.bf16.mxu1 %v2467_v16  ;;  %v868_v24 = vrot.slane %v867_v39, 4  ;;  %v886_v48 = vrot.slane %v884_v42, 5  ;;  %v891_v50 = vrot.slane %v889_v43, 4  ;;  %v892_v51 = vshll.u32 %v1893_v10, 16  ;;  %v2522_v10 = vld [vmem:[%s2758_s1 + $0x40] sm:$0xff]  }
  0x37   : > { %2075 = vmatmul.mubr.msk.bf16.gmra.mxu0 %vm335_vm2, %v1860_v1  ;;  %v859_v20 = vsel %vm2307_vm3, %v854_v41, %v858_v30  ;;  %v881_v26 = vor.u32 %v880_v46, %v877_v61  ;;  %v898_v2 = vshll.u32 %v2484_v40, 16  ;;  %v903_v54 = vshrl.u32 %v1895_v44, 16  ;;  %v2178_v29 = vld [vmem:[%s2264_s22 + $0x28] ss:$8 sps:$4 sm:$0xff]  }
  0x38   : > { %2090 = vmatprep.mubr.msk.bf16.mxu0 %vm335_vm2, %v1899_v36  ;;  %v873_v21 = vsel %vm2307_vm3, %v868_v24, %v872_v19  ;;  %v894_v55 = vrot.slane %v892_v51, 5  ;;  %v906_v56 = vshll.u32 %v1895_v44, 16  ;;  %v912_v57 = vshll.u32 %v2494_v47, 16  ;;  %v2180_v46 = vld [vmem:[%s2264_s22 + $0x10] ss:$8 sps:$4 sm:$0xff]  }
  0x39   : > { %v1900_v1 = vcombine.low %v859_v20, %v873_v21  ;;  %v882_v3 = vrot.slane %v881_v26, 4  ;;  %v905_v4 = vrot.slane %v903_v54, 4  ;;  %v900_v63 = vrot.slane %v898_v2, 5  ;;  %v1914_v2 = vld [vmem:[%s2264_s22 + $0x38] sm:$0xe] }
  0x3a   : > { %v895_v62 = vor.u32 %v894_v55, %v891_v50  ;;  %v908_v0 = vrot.slane %v906_v56, 5  ;;  %v917_v8 = vshrl.u32 %v1897_v53, 16  ;;  %v914_v17 = vrot.slane %v912_v57, 5  ;;  %v1915_v54 = vld [vmem:[%s2264_s22 + $0x40] sm:$0xe] }
  0x3b   : > { %v887_v11 = vsel %vm2307_vm3, %v882_v3, %v886_v48  ;;  %v920_v18 = vshll.u32 %v1897_v53, 16  ;;  %v926_v22 = vshll.u32 %v2504_v12, 16  ;;  %v1916_v30 = vrot.slane %v1908_v25, 9  ;;  %v1950_v3 = vld [vmem:[%s2264_s22 + $0x10] sm:$0xf] }
  0x3c   : > { %2065 = vmatmul.mubr.msk.bf16.gmra.mxu1 %vm335_vm2, %v1843_v33  ;;  %v896_v13 = vrot.slane %v895_v62, 4  ;;  %v909_v27 = vor.u32 %v908_v0, %v905_v4  ;;  %v919_v28 = vrot.slane %v917_v8, 4  ;;  %v1061_v14 = vrot.slane %v2411_v34, 5  ;;  %v2176_v33 = vld [vmem:[%s2264_s22 + $0x18] ss:$8 sps:$4 sm:$0xff]  }
  0x3d   : > { %2080 = vmatprep.mubr.msk.bf16.mxu1 %vm335_vm2, %v2174_v15  ;;  %v922_v6 = vrot.slane %v920_v18, 5  ;;  %v1917_v32 = vrot.slane %v1909_v9, 9  ;;  %v1065_v60 = vrot.slane %v2427_v38, 5  ;;  %v1918_v49 = vrot.slane %v1910_v7, 9  ;;  %v1952_v25 = vld [vmem:[%s2264_s22 + $0x18] sm:$0xf] }
  0x3e   : > { %v901_v19 = vsel %vm2307_vm3, %v896_v13, %v900_v63  ;;  %v910_v35 = vrot.slane %v909_v27, 4  ;;  %v928_v34 = vrot.slane %v926_v22, 5  ;;  %v1069_v42 = vrot.slane %v2432_v45, 5  ;;  %v2547_v45 = vld [vmem:[%s2758_s1 + $0x38] sm:$0xff]   ;;  %v1975_v18 = vld [vmem:[%s2264_s22 + $0x10] sm:$0xe] }
  0x3f   : > { %2091 = vmatmul.mubr.msk.bf16.vlgmr.msra.gmra.mxu0 %vm335_vm2, %v1900_v1  ;;  %v1901_v37 = vcombine.low %v887_v11, %v901_v19  ;;  %v923_v39 = vor.u32 %v922_v6, %v919_v28  ;;  %v1919_v38 = vrot.slane %v1911_v23, 9  ;;  %v1073_v43 = vrot.slane %v2451_v58, 5  ;;  %v1912_v58 = vld [vmem:[%s2264_s22 + $0x28] sm:$0xe]  ;;  %v1953_v62 = vld [vmem:[%s2264_s22 + $0x1c] sm:$0x1] }
  0x40   : > { %2109 = vmatpush3.bf16.msra.mxu0 %v2456_v59  ;;  %v915_v44 = vsel %vm2307_vm3, %v910_v35, %v914_v17  ;;  %v2542_v41 = vsel %vm2373_vm6, %v1916_v30, %v1061_v14  ;;  %v1913_v59 = vld [vmem:[%s2264_s22 + $0x30] sm:$0xe]  ;;  %v2554_v61 = vsel %vm2373_vm6, %v1917_v32, %v1065_v60  ;;  %v2559_v24 = vsel %vm2373_vm6, %v1918_v49, %v1069_v42  ;;  %v2182_v22 = vld [vmem:[%s2264_s22 + $0x20] ss:$8 sps:$4 sm:$0xff]   ;;  %v1976_v30 = vld [vmem:[%s2264_s22 + $0x18] sm:$0xe] }
  0x41   : > { %2094 = vmatprep.mubr.msk.bf16.mxu0 %vm335_vm2, %v1901_v37  ;;  %v924_v36 = vrot.slane %v923_v39, 4  ;;  %2128 = vmatprep.subr.bf16.mxu0 %v2522_v10  ;;  %v1920_v48 = vrot.slane %v1912_v58, 9  ;;  %v1077_v50 = vrot.slane %v2471_v5, 5  ;;  %v2566_v15 = vsel %vm2373_vm6, %v1919_v38, %v1073_v43  ;;  %v2184_v14 = vld [vmem:[%s2264_s22 + $0x30] ss:$8 sps:$4 sm:$0xff]  }
  0x42   : > { %v1921_v20 = vrot.slane %v1913_v59, 9  ;;  %v1081_v26 = vrot.slane %v2484_v40, 5  ;;  %v1922_v21 = vrot.slane %v1914_v2, 9  ;;  %v1085_v5 = vrot.slane %v2494_v47, 5  ;;  %v2179_v40 = vld [vmem:[%s2264_s22 + $0x38] ss:$8 sps:$4 sm:$0xff]  }
  0x43   : > { %v929_v51 = vsel %vm2307_vm3, %v924_v36, %v928_v34  ;;  %v1923_v55 = vrot.slane %v1915_v54, 9  ;;  %v1089_v56 = vrot.slane %v2504_v12, 5  ;;  %v1924_v57 = vcombine.low %v2542_v41, %v2554_v61  ;;  %v1951_v47 = vld [vmem:[%s2264_s22 + $0x14] sm:$0x1]  ;;  %v1954_v19 = vld [vmem:[%s2264_s22 + $0x20] sm:$0xf] }
  0x44   : > { %2081 = vmatmul.mubr.msk.bf16.vlgmr.msra.gmra.mxu1 %vm335_vm2, %v2176_v33  ;;  %v1902_v53 = vcombine.low %v915_v44, %v929_v51  ;;  %v1925_v1 = vcombine.low %v2559_v24, %v2566_v15  ;;  %v2591_v12 = vsel %vm2373_vm6, %v1921_v20, %v1081_v26  ;;  %v2595_v4 = vsel %vm2373_vm6, %v1922_v21, %v1085_v5  ;;  %v1955_v37 = vld [vmem:[%s2264_s22 + $0x24] sm:$0x1]  ;;  %v1956_v42 = vld [vmem:[%s2264_s22 + $0x28] sm:$0xf]  ;;  %v1957_v38 = vld [vmem:[%s2264_s22 + $0x2c] sm:$0x1] }
  0x45   : > { %2099 = vmatpush3.bf16.msra.mxu1 %v2467_v16  ;;  %2084 = vmatprep.mubr.msk.bf16.mxu1 %vm335_vm2, %v2178_v29  ;;  %v2584_v16 = vsel %vm2373_vm6, %v1920_v48, %v1077_v50  ;;  %v1335_v63 = vshrl.u32 %v1950_v3, 16  ;;  %v1338_v0 = vshll.u32 %v1950_v3, 16  ;;  %v2602_v8 = vsel %vm2373_vm6, %v1923_v55, %v1089_v56  ;;  %v1977_v61 = vld [vmem:[%s2264_s22 + $0x20] sm:$0xe]  ;;  %v1978_v20 = vld [vmem:[%s2264_s22 + $0x28] sm:$0xe] }
  0x46   : > { %2118 = vmatprep.subr.bf16.mxu1 %v2547_v45  ;;  %v1344_v9 = vshll.u32 %v1951_v47, 16  ;;  %v1349_v11 = vshrl.u32 %v1952_v25, 16  ;;  %v1352_v17 = vshll.u32 %v1952_v25, 16  ;;  %v1358_v28 = vshll.u32 %v1953_v62, 16  ;;  %v1958_v21 = vld [vmem:[%s2264_s22 + $0x30] sm:$0xf] }
  0x47   : > { %2095 = vmatmul.mubr.msk.bf16.gmra.mxu0 %vm335_vm2, %v1902_v53  ;;  %v1337_v13 = vrot.slane %v1335_v63, 4  ;;  %v1340_v27 = vrot.slane %v1338_v0, 5  ;;  %v1983_v6 = vrot.slane %v1975_v18, 9  ;;  %v1577_v33 = vrot.slane %v1951_v47, 5  ;;  %v1960_v25 = vld [vmem:[%s2264_s22 + $0x38] sm:$0xf] }
  0x48   : > { %2110 = vmatprep.mubr.msk.bf16.mxu0 %vm335_vm2, %v2180_v46  ;;  %v1346_v32 = vrot.slane %v1344_v9, 5  ;;  %v1351_v60 = vrot.slane %v1349_v11, 4  ;;  %v1354_v7 = vrot.slane %v1352_v17, 5  ;;  %v1360_v23 = vrot.slane %v1358_v28, 5  ;;  %v1961_v18 = vld [vmem:[%s2264_s22 + $0x3c] sm:$0x1] }
  0x49   : > { %v1341_v35 = vor.u32 %v1340_v27, %v1337_v13  ;;  %v1984_v49 = vrot.slane %v1976_v30, 9  ;;  %v1581_v29 = vrot.slane %v1953_v62, 5  ;;  %v1926_v39 = vcombine.low %v2584_v16, %v2591_v12  ;;  %v2185_v62 = vld [vmem:[%s2264_s22 + $0x40] ss:$8 sps:$4 sm:$0xff]   ;;  %v1979_v27 = vld [vmem:[%s2264_s22 + $0x30] sm:$0xe] }
  0x4a   : > { %v1355_v34 = vor.u32 %v1354_v7, %v1351_v60  ;;  %v1363_v43 = vshrl.u32 %v1954_v19, 16  ;;  %v1366_v44 = vshll.u32 %v1954_v19, 16  ;;  %v1927_v36 = vcombine.low %v2595_v4, %v2602_v8 }
  0x4b   : > { %v1342_v41 = vrot.slane %v1341_v35, 4  ;;  %v1372_v58 = vshll.u32 %v1955_v37, 16  ;;  %v1377_v59 = vshrl.u32 %v1956_v42, 16  ;;  %v1578_v48 = vsel %vm2373_vm6, %v1983_v6, %v1577_v33 }
  0x4c   : > { %2085 = vmatmul.mubr.msk.bf16.gmra.mxu1 %vm335_vm2, %v2179_v40  ;;  %v1356_v46 = vrot.slane %v1355_v34, 4  ;;  %v1365_v50 = vrot.slane %v1363_v43, 4  ;;  %v1368_v51 = vrot.slane %v1366_v44, 5  ;;  %v1582_v2 = vsel %vm2373_vm6, %v1984_v49, %v1581_v29  ;;  %v1963_v44 = vld [vmem:[%s2264_s22 + $0x44] sm:$0x1] }
  0x4d   : > { %2100 = vmatprep.mubr.msk.bf16.mxu1 %vm335_vm2, %v1924_v57  ;;  %v1347_v26 = vsel %vm2307_vm3, %v1342_v41, %v1346_v32  ;;  %v1379_v53 = vrot.slane %v1377_v59, 4  ;;  %v1380_v54 = vshll.u32 %v1956_v42, 16  ;;  %v1386_v56 = vshll.u32 %v1957_v38, 16  ;;  %v1959_v57 = vld [vmem:[%s2264_s22 + $0x34] sm:$0x1] }
  0x4e   : > { %v1361_v5 = vsel %vm2307_vm3, %v1356_v46, %v1360_v23  ;;  %v1369_v55 = vor.u32 %v1368_v51, %v1365_v50  ;;  %v1985_v40 = vrot.slane %v1977_v61, 9  ;;  %v2633_v16 = vrot.slane %v1372_v58, 5  ;;  %v1980_v32 = vld [vmem:[%s2264_s22 + $0x38] sm:$0xe]  ;;  %v1962_v23 = vld [vmem:[%s2264_s22 + $0x40] sm:$0xf] }
  0x4f   : > { %2111 = vmatmul.mubr.msk.bf16.vlgmr.msra.gmra.mxu0 %vm335_vm2, %v2182_v22  ;;  %v1382_v3 = vrot.slane %v1380_v54, 5  ;;  %v1585_v47 = vrot.slane %v1955_v37, 5  ;;  %v1986_v12 = vrot.slane %v1978_v20, 9  ;;  %v1589_v0 = vrot.slane %v1957_v38, 5  ;;  %v1965_v51 = vld [vmem:[%s2264_s22 + $0x4c] sm:$0x1] }
  0x50   : > { %2129 = vmatpush3.bf16.msra.mxu0 %v2522_v10  ;;  %2114 = vmatprep.mubr.msk.bf16.mxu0 %vm335_vm2, %v2184_v14  ;;  %v1991_v10 = vcombine.low %v1578_v48, %v1582_v2  ;;  %v2637_v63 = vrot.slane %v1369_v55, 4  ;;  %v1391_v9 = vshrl.u32 %v1958_v21, 16  ;;  %v1966_v11 = vcombine.low %v1347_v26, %v1361_v5  ;;  %v1981_v26 = vld [vmem:[%s2264_s22 + $0x40] sm:$0xe]  ;;  %v1982_v5 = vld [vmem:[%s2264_s22 + $0x48] sm:$0xe] }
  0x51   : > { %v1383_v17 = vor.u32 %v1382_v3, %v1379_v53  ;;  %v1394_v22 = vshll.u32 %v1958_v21, 16  ;;  %v1400_v13 = vshll.u32 %v1959_v57, 16  ;;  %v1388_v28 = vrot.slane %v1386_v56, 5 }
  0x52   : > { %v1586_v30 = vsel %vm2373_vm6, %v1985_v40, %v1585_v47  ;;  %v1393_v6 = vrot.slane %v1391_v9, 4  ;;  %v1405_v14 = vshrl.u32 %v1960_v25, 16  ;;  %v1375_v24 = vsel %vm2307_vm3, %v2637_v63, %v2633_v16 }
  0x53   : > { %v1384_v15 = vrot.slane %v1383_v17, 4  ;;  %v1396_v60 = vrot.slane %v1394_v22, 5  ;;  %v1408_v33 = vshll.u32 %v1960_v25, 16  ;;  %v1414_v19 = vshll.u32 %v1961_v18, 16 }
  0x54   : > { %2101 = vmatmul.mubr.msk.bf16.vlgmr.msra.gmra.mxu1 %vm335_vm2, %v1925_v1  ;;  %v1590_v1 = vsel %vm2373_vm6, %v1986_v12, %v1589_v0  ;;  %v1407_v7 = vrot.slane %v1405_v14, 4  ;;  %v1987_v35 = vrot.slane %v1979_v27, 9  ;;  %v1402_v49 = vrot.slane %v1400_v13, 5 }
  0x55   : > { %2119 = vmatpush3.bf16.msra.mxu1 %v2547_v45  ;;  %2104 = vmatprep.mubr.msk.bf16.mxu1 %vm335_vm2, %v1926_v39  ;;  %v1397_v45 = vor.u32 %v1396_v60, %v1393_v6  ;;  %v1593_v29 = vrot.slane %v1959_v57, 5  ;;  %v1988_v37 = vrot.slane %v1980_v32, 9  ;;  %v1964_v39 = vld [vmem:[%s2264_s22 + $0x48] sm:$0xf]  ;;  %v1389_v34 = vsel %vm2307_vm3, %v1384_v15, %v1388_v28 }
  0x56   : > { %v1992_v42 = vcombine.low %v1586_v30, %v1590_v1  ;;  %v1410_v38 = vrot.slane %v1408_v33, 5  ;;  %v1597_v43 = vrot.slane %v1961_v18, 5  ;;  %v1419_v59 = vshrl.u32 %v1962_v23, 16 }
  0x57   : > { %2115 = vmatmul.mubr.msk.bf16.gmra.mxu0 %vm335_vm2, %v2185_v62  ;;  %v1398_v41 = vrot.slane %v1397_v45, 4  ;;  %v1594_v58 = vsel %vm2373_vm6, %v1987_v35, %v1593_v29  ;;  %v1422_v61 = vshll.u32 %v1962_v23, 16  ;;  %v1416_v48 = vrot.slane %v1414_v19, 5 }
  0x58   : > { %2130 = vmatprep.mubr.msk.bf16.mxu0 %vm335_vm2, %v1991_v10  ;;  %v1411_v46 = vor.u32 %v1410_v38, %v1407_v7  ;;  %v1598_v50 = vsel %vm2373_vm6, %v1988_v37, %v1597_v43  ;;  %v1433_v20 = vshrl.u32 %v1964_v39, 16  ;;  %v1421_v53 = vrot.slane %v1419_v59, 4 }
  0x59   : > { %v1403_v2 = vsel %vm2307_vm3, %v1398_v41, %v1402_v49  ;;  %v1424_v54 = vrot.slane %v1422_v61, 5  ;;  %v1428_v21 = vshll.u32 %v1963_v44, 16  ;;  %v1993_v56 = vcombine.low %v1594_v58, %v1598_v50 }
  0x5a   : > { %v1412_v55 = vrot.slane %v1411_v46, 4  ;;  %v1435_v40 = vrot.slane %v1433_v20, 4  ;;  %v1436_v57 = vshll.u32 %v1964_v39, 16  ;;  %v1442_v3 = vshll.u32 %v1965_v51, 16 }
  0x5b   : > { %v1425_v16 = vor.u32 %v1424_v54, %v1421_v53  ;;  %v1989_v47 = vrot.slane %v1981_v26, 9  ;;  %v1601_v12 = vrot.slane %v1963_v44, 5  ;;  %v1990_v10 = vrot.slane %v1982_v5, 9 }
  0x5c   : > { %2105 = vmatmul.mubr.msk.bf16.gmra.mxu1 %vm335_vm2, %v1927_v36  ;;  %v1417_v25 = vsel %vm2307_vm3, %v1412_v55, %v1416_v48  ;;  %v1438_v62 = vrot.slane %v1436_v57, 5  ;;  %v1605_v63 = vrot.slane %v1965_v51, 5  ;;  %v1967_v4 = vcombine.low %v1375_v24, %v1389_v34 }
  0x5d   : > { %2120 = vmatprep.mubr.msk.bf16.mxu1 %vm335_vm2, %v1966_v11  ;;  %v1602_v36 = vsel %vm2373_vm6, %v1989_v47, %v1601_v12  ;;  %v1968_v9 = vcombine.low %v1403_v2, %v1417_v25  ;;  %v1426_v11 = vrot.slane %v1425_v16, 4  ;;  %v1430_v17 = vrot.slane %v1428_v21, 5 }
  0x5e   : > { %v1439_v8 = vor.u32 %v1438_v62, %v1435_v40  ;;  %v1606_v0 = vsel %vm2373_vm6, %v1990_v10, %v1605_v63  ;;  %v1444_v18 = vrot.slane %v1442_v3, 5 }
  0x5f   : > { %2131 = vmatmul.mubr.msk.bf16.vlgmr.msra.gmra.mxu0 %vm335_vm2, %v1992_v42  ;;  %v1994_v13 = vcombine.low %v1602_v36, %v1606_v0  ;;  %v1431_v27 = vsel %vm2307_vm3, %v1426_v11, %v1430_v17 }
  0x60   : > { %2134 = vmatprep.mubr.msk.bf16.mxu0 %vm335_vm2, %v1993_v56  ;;  %v1440_v22 = vrot.slane %v1439_v8, 4 }
  0x62   : > { %v1445_v28 = vsel %vm2307_vm3, %v1440_v22, %v1444_v18 }
  0x63   : > { %v1969_v52 = vcombine.low %v1431_v27, %v1445_v28 }
  0x64   : > { %2121 = vmatmul.mubr.msk.bf16.vlgmr.msra.gmra.mxu1 %vm335_vm2, %v1967_v4 }
  0x65   : > { %2124 = vmatprep.mubr.msk.bf16.mxu1 %vm335_vm2, %v1968_v9 }
  0x67   : > { %2135 = vmatmul.mubr.msk.bf16.gmra.mxu0 %vm335_vm2, %v1994_v13 }
  0x6c   : > { %2125 = vmatmul.mubr.msk.bf16.gmra.mxu1 %vm335_vm2, %v1969_v52 }
  0xe7   : > { %v2052_v30 = vpop.f32.mrf.mxu0 }
  0xe9   : > { %v382_v6 = vpop.f32.mrf.mxu0 }
  0xeb   : > { %v2053_v14 = vpop.f32.mrf.mxu0 }
  0xec   : > { %v2056_v32 = vpop.f32.mrf.mxu1 }
  0xed   : > { %v385_v24 = vpop.f32.mrf.mxu0 }
  0xee   : > { %v398_v15 = vpop.f32.mrf.mxu1 }
  0xef   : > { %v2072_v1 = vpop.f32.mrf.mxu0 }
  0xf0   : > { %v2057_v60 = vpop.f32.mrf.mxu1 }
  0xf1   : > { %v641_v7 = vpop.f32.mrf.mxu0 }
  0xf2   : > { %v2693_v33 = vpop.f32.mrf.mxu1 }
  0xf3   : > { %v2073_v19 = vpop.f32.mrf.mxu0 }
  0xf4   : > { %v2062_v35 = vpop.f32.mrf.mxu1 }
  0xf5   : > { %v644_v31 = vpop.f32.mrf.mxu0  ;;  %v494_v57 = vadd.f32 %v2062_v35, %v2052_v30 }
  0xf6   : > { %v485_v23 = vpop.f32.mrf.mxu1 }
  0xf7   : > { %v2076_v45 = vpop.f32.mrf.mxu0  ;;  %v486_v47 = vadd.f32 %v485_v23, %v382_v6  ;;  %v674_v62 = vadd.f32 %v2072_v1, %v494_v57 }
  0xf8   : > { %v2063_v49 = vpop.f32.mrf.mxu1 }
  0xf9   : > { %v657_v29 = vpop.f32.mrf.mxu0  ;;  %v497_v10 = vadd.f32 %v2063_v49, %v2053_v14  ;;  %v672_v8 = vadd.f32 %v641_v7, %v486_v47 }
  0xfa   : > { %v488_v37 = vpop.f32.mrf.mxu1 }
  0xfb   : > { %v2695_v39 = vpop.f32.mrf.mxu0  ;;  %v489_v36 = vadd.f32 %v488_v37, %v385_v24  ;;  %v675_v18 = vadd.f32 %v2073_v19, %v497_v10 }
  0xfc   : > { %v2066_v34 = vpop.f32.mrf.mxu1 }
  0xfd   : > { %v2697_v42 = vpop.f32.mrf.mxu0  ;;  %v510_v11 = vadd.f32 %v2066_v34, %v2056_v32  ;;  %v673_v52 = vadd.f32 %v644_v31, %v489_v36 }
  0xfe   : > { %v501_v38 = vpop.f32.mrf.mxu1 }
  0xff   : > { %v2092_v43 = vpop.f32.mrf.mxu0  ;;  %v502_v27 = vadd.f32 %v501_v38, %v398_v15  ;;  %v678_v1 = vadd.f32 %v2076_v45, %v510_v11 }
 0x100   : > { %v2067_v44 = vpop.f32.mrf.mxu1 }
 0x101   : > { %v996_v41 = vpop.f32.mrf.mxu0  ;;  %v513_v35 = vadd.f32 %v2067_v44, %v2057_v60  ;;  %v676_v32 = vadd.f32 %v657_v29, %v502_v27 }
 0x102   : > { %v504_v58 = vpop.f32.mrf.mxu1 }
 0x103   : > { %v2093_v59 = vpop.f32.mrf.mxu0  ;;  %v505_v19 = vadd.f32 %v504_v58, %v2693_v33  ;;  %v679_v38 = vadd.f32 %v2695_v39, %v513_v35 }
 0x104   : > { %v2082_v61 = vpop.f32.mrf.mxu1 }
 0x105   : > { %v999_v46 = vpop.f32.mrf.mxu0  ;;  %v796_v0 = vadd.f32 %v2082_v61, %v674_v62 }
 0x106   : > { %v763_v48 = vpop.f32.mrf.mxu1 }
 0x107   : > { %v2096_v50 = vpop.f32.mrf.mxu0  ;;  %v794_v22 = vadd.f32 %v763_v48, %v672_v8  ;;  %v1029_v30 = vadd.f32 %v2092_v43, %v796_v0 }
 0x108   : > { %v2083_v51 = vpop.f32.mrf.mxu1 }
 0x109   : > { %v2699_v20 = vpop.f32.mrf.mxu0  ;;  %v797_v6 = vadd.f32 %v2083_v51, %v675_v18  ;;  %v1027_v24 = vadd.f32 %v996_v41, %v794_v22 }
 0x10a   : > { %v766_v26 = vpop.f32.mrf.mxu1 }
 0x10b   : > { %v2701_v2 = vpop.f32.mrf.mxu0  ;;  %v795_v23 = vadd.f32 %v766_v26, %v673_v52  ;;  %v1030_v48 = vadd.f32 %v2093_v59, %v797_v6  ;;  %v677_v26 = vadd.f32 %v2697_v42, %v505_v19 }
 0x10c   : > { %v2086_v53 = vpop.f32.mrf.mxu1 }
 0x10d   : > { %v2703_v54 = vpop.f32.mrf.mxu0  ;;  %v800_v34 = vadd.f32 %v2086_v53, %v678_v1  ;;  %v1028_v45 = vadd.f32 %v999_v46, %v795_v23 }
 0x10e   : > { %v779_v21 = vpop.f32.mrf.mxu1 }
 0x10f   : > { %v2112_v5 = vpop.f32.mrf.mxu0  ;;  %v798_v43 = vadd.f32 %v779_v21, %v676_v32  ;;  %v1033_v57 = vadd.f32 %v2096_v50, %v800_v34 }
 0x110   : > { %v2087_v55 = vpop.f32.mrf.mxu1 }
 0x111   : > { %v1279_v56 = vpop.f32.mrf.mxu0  ;;  %v801_v29 = vadd.f32 %v2087_v55, %v679_v38  ;;  %v1031_v47 = vadd.f32 %v2699_v20, %v798_v43 }
 0x112   : > { %v782_v40 = vpop.f32.mrf.mxu1 }
 0x113   : > { %v2113_v16 = vpop.f32.mrf.mxu0  ;;  %v1034_v10 = vadd.f32 %v2701_v2, %v801_v29 }
 0x114   : > { %v2102_v3 = vpop.f32.mrf.mxu1 }
 0x115   : > { %v2705_v12 = vpop.f32.mrf.mxu0  ;;  %v1190_v49 = vadd.f32 %v2102_v3, %v1029_v30 }
 0x116   : > { %v1157_v25 = vpop.f32.mrf.mxu1 }
 0x117   : > { %v2707_v63 = vpop.f32.mrf.mxu0  ;;  %v1188_v15 = vadd.f32 %v1157_v25, %v1027_v24  ;;  %v1312_v60 = vadd.f32 %v2112_v5, %v1190_v49  ;;  %v799_v25 = vadd.f32 %v782_v40, %v677_v26 }
 0x118   : > { %v2103_v4 = vpop.f32.mrf.mxu1 }
 0x119   : > { %v2709_v9 = vpop.f32.mrf.mxu0  ;;  %v1191_v44 = vadd.f32 %v2103_v4, %v1030_v48  ;;  %v1310_v33 = vadd.f32 %v1279_v56, %v1188_v15 }
 0x11a   : > { %v1160_v17 = vpop.f32.mrf.mxu1 }
 0x11b   : > { %v2711_v13 = vpop.f32.mrf.mxu0  ;;  %v1189_v58 = vadd.f32 %v1160_v17, %v1028_v45  ;;  %v1313_v62 = vadd.f32 %v2113_v16, %v1191_v44  ;;  %v1032_v16 = vadd.f32 %v2703_v54, %v799_v25 }
 0x11c   : > { %v2106_v28 = vpop.f32.mrf.mxu1 }
 0x11d   : > { %v2713_v14 = vpop.f32.mrf.mxu0  ;;  %v1194_v39 = vadd.f32 %v2106_v28, %v1033_v57  ;;  %v1311_v20 = vadd.f32 %v2705_v12, %v1189_v58 }
 0x11e   : > { %v1173_v7 = vpop.f32.mrf.mxu1 }
 0x11f   : > { %v2132_v37 = vpop.f32.mrf.mxu0  ;;  %v1192_v4 = vadd.f32 %v1173_v7, %v1031_v47  ;;  %v1316_v2 = vadd.f32 %v2707_v63, %v1194_v39 }
 0x120   : > { %v2107_v61 = vpop.f32.mrf.mxu1 }
 0x121   : > { %v1673_v31 = vpop.f32.mrf.mxu0  ;;  %v1195_v36 = vadd.f32 %v2107_v61, %v1034_v10  ;;  %v1314_v18 = vadd.f32 %v2709_v9, %v1192_v4 }
 0x122   : > { %v1176_v51 = vpop.f32.mrf.mxu1 }
 0x123   : > { %v2133_v41 = vpop.f32.mrf.mxu0  ;;  %v1193_v27 = vadd.f32 %v1176_v51, %v1032_v16  ;;  %v1317_v30 = vadd.f32 %v2711_v13, %v1195_v36 }
 0x124   : > { %v2122_v3 = vpop.f32.mrf.mxu1 }
 0x125   : > { %v1545_v53 = vadd.f32 %v2122_v3, %v1312_v60  ;;  %v1676_v59 = vpop.f32.mrf.mxu0  ;;  %v1315_v24 = vadd.f32 %v2713_v14, %v1193_v27 }
 0x126   : > { %v1512_v21 = vpop.f32.mrf.mxu1 }
 0x127   : > { %v1706_v46 = vadd.f32 %v2132_v37, %v1545_v53  ;;  %v1543_v5 = vadd.f32 %v1512_v21, %v1310_v33  ;;  %v2136_v50 = vpop.f32.mrf.mxu0 }
 0x128   : > { %v2123_v42 = vpop.f32.mrf.mxu1 }
 0x129   : > { %v1714_v55 = vpack.c.bf16 %v1706_v46, %v1706_v46  ;;  %v1704_v56 = vadd.f32 %v1673_v31, %v1543_v5  ;;  %v1546_v40 = vadd.f32 %v2123_v42, %v1313_v62  ;;  %v1689_v12 = vpop.f32.mrf.mxu0 }
 0x12a   : > { %v1515_v8 = vpop.f32.mrf.mxu1 }
 0x12b   : > { %1723 = vst.msk [vmem:[%s2724_s14 + $0x8] sm:$0xf] %vm1720_vm7, %v1714_v55  ;;  %v1712_v0 = vpack.c.bf16 %v1704_v56, %v1704_v56  ;;  %v1707_v11 = vadd.f32 %v2133_v41, %v1546_v40  ;;  %v1544_v17 = vadd.f32 %v1515_v8, %v1311_v20  ;;  %v2137_v7 = vpop.f32.mrf.mxu0 }
 0x12c   : > { %v2126_v22 = vpop.f32.mrf.mxu1 }
 0x12d   : > { %1721 = vst.msk [vmem:[%s2724_s14] sm:$0xf] %vm1720_vm7, %v1712_v0  ;;  %v1715_v28 = vpack.c.bf16 %v1707_v11, %v1707_v11  ;;  %v1705_v54 = vadd.f32 %v1676_v59, %v1544_v17  ;;  %v1549_v63 = vadd.f32 %v2126_v22, %v1316_v2  ;;  %v1692_v61 = vpop.f32.mrf.mxu0 }
 0x12e   : > { %v1528_v52 = vpop.f32.mrf.mxu1 }
 0x12f   : > { %1724 = vst.msk [vmem:[%s2724_s14 + $0xc] sm:$0xf] %vm1720_vm7, %v1715_v28  ;;  %v1713_v6 = vpack.c.bf16 %v1705_v54, %v1705_v54  ;;  %v1710_v1 = vadd.f32 %v2136_v50, %v1549_v63  ;;  %v1547_v35 = vadd.f32 %v1528_v52, %v1314_v18 }
 0x130   : > { %v2127_v9 = vpop.f32.mrf.mxu1 }
 0x131   : > { %1722 = vst.msk [vmem:[%s2724_s14 + $0x4] sm:$0xf] %vm1720_vm7, %v1713_v6  ;;  %v1718_v23 = vpack.c.bf16 %v1710_v1, %v1710_v1  ;;  %v1708_v49 = vadd.f32 %v1689_v12, %v1547_v35  ;;  %v1550_v37 = vadd.f32 %v2127_v9, %v1317_v30 }
 0x132   : > { %v1531_v32 = vpop.f32.mrf.mxu1 }
 0x133   : > { %1727 = vst.msk [vmem:[%s2724_s14 + $0x18] sm:$0xf] %vm1720_vm7, %v1718_v23  ;;  %v1716_v13 = vpack.c.bf16 %v1708_v49, %v1708_v49  ;;  %v1711_v19 = vadd.f32 %v2137_v7, %v1550_v37  ;;  %v1548_v34 = vadd.f32 %v1531_v32, %v1315_v24 }
 0x135   : > { %1725 = vst.msk [vmem:[%s2724_s14 + $0x10] sm:$0xf] %vm1720_vm7, %v1716_v13  ;;  %v1719_v48 = vpack.c.bf16 %v1711_v19, %v1711_v19  ;;  %v1709_v15 = vadd.f32 %v1692_v61, %v1548_v34 }
 0x137   : > { %1728 = vst.msk [vmem:[%s2724_s14 + $0x1c] sm:$0xf] %vm1720_vm7, %v1719_v48  ;;  %v1717_v14 = vpack.c.bf16 %v1709_v15, %v1709_v15 }
 0x139   : > { %1726 = vst.msk [vmem:[%s2724_s14 + $0x14] sm:$0xf] %vm1720_vm7, %v1717_v14 }
 0x13a PF: > { %s12_s11 = sadd.s32 1, %s2208_s11   ;;  %s2764_s9 = smov %s2204_s10 }
 0x13b   : > { %p9_p5 = scmp.ge.s32.totalorder %s12_s11, 4   ;;  %s2765_s10 = smov %s2767_s12 }
 0x13d   :  { %11 = sbr.rel (!%p9_p5) target bundleno = 2 (0x2), region = 63 }

// kernel: zhugo_forward.25
= control target key start
LH: loop header
LB: loop body
LE: loop exit
PB: predicated region body
PF: predicated region fallthrough
CT: control target
= control target key end

     0   :  { %s2352_s12 = smov 0   ;;  %s2354_s13 = smov 0   ;;  %s2897_s0 = inlined_call_operand.vmem [shape: bf16[2,10,10,16], index: 0, kind: input, shape index: {}]   ;;  %s2898_s1 = inlined_call_operand.vmem [shape: bf16[144,16], index: 1, kind: input, shape index: {}]   ;;  %s2899_s2 = inlined_call_operand.vmem [shape: bf16[2,8,8,16], index: 2, kind: input, shape index: {}]   ;;  %s2900_s3 = inlined_call_operand.vmem [shape: bf16[2,8,8,16], index: 3, kind: output, shape index: {}]  }
   0x1   :  { %s2356_s14 = smov 0  }
   0x2 LB: > { %s25_s15 = sadd.s32 1, %s2326_s13  ;;  %p1927_p0 = scmp.ge.s32.totalorder %s2330_s14, 1  ;;  %s2330_s14 = sphi %s2356_s14, %s13_s14   ;;  %s2326_s13 = sphi %s2354_s13, %s2906_s13   ;;  %s2322_s12 = sphi %s2352_s12, %s2905_s12  }
   0x3   : > { %p27_p1 = scmp.ge.s32.totalorder %s25_s15, 2  ;;  %p175_p2 = scmp.lt.s32.totalorder %s2330_s14, 3 }
   0x5   : > { %s2908_s15 = smov (%p27_p1, %s25_s15), 0  ;;  %p176_p3 = pnand %p1927_p0, %p175_p2 }
   0x6   : > { %p214_p4 = scmp.lt.s32.totalorder (!%p176_p3), %s2322_s12, 1 }
   0x7   : > { %179 = sbr.rel (%p176_p3) target bundleno = 316 (0x13c), region = 32 }
   0xc   : > { %v2287_v0 = vld [vmem:[%s2898_s1 + $0x8] sm:$0xff]   ;;  %v2376_v1 = vld [vmem:[%s2898_s1] sm:$0xff]   ;;  %s2910_s12 = smov (!%p214_p4, %s2322_s12), 1  ;;  %v2383_v2 = vld [vmem:[%s2898_s1 + $0x10] sm:$0xff]   ;;  %vm258_vm0 = vsmask.f32 3328 }
   0xd   : > { %2260 = vmatprep.subr.bf16.mxu1 %v2287_v0  ;;  %2170 = vmatprep.subr.bf16.mxu0 %v2287_v0  ;;  %s2262_s22 = smul.u32 80, %s2910_s12  ;;  %vm259_vm1 = vsmask.f32 7440  ;;  %vm393_vm2 = vcmask 130048   ;;  %vm598_vm4 = vcmask 1042432   ;;  %vm599_vm5 = vcmask 1046532  }
   0xe   : > { %2261 = vmatpush3.bf16.msra.mxu1 %v2287_v0  ;;  %2171 = vmatpush3.bf16.msra.mxu0 %v2287_v0  ;;  %vm2434_vm3 = vmor %vm258_vm0, %vm259_vm1  ;;  %s2104_s11 = sshll.u32 %s2910_s12, 5  ;;  %vm1802_vm7 = vcmask 125952  }
   0xf   : > { %2180 = vmatprep.subr.bf16.mxu1 %v2376_v1  ;;  %2190 = vmatprep.subr.bf16.mxu0 %v2383_v2  ;;  %s2391_s25 = scalar_lea.vmem %s2897_s0, %s2262_s22  ;;  %vm2500_vm6 = vmor %vm598_vm4, %vm599_vm5  ;;  %s2848_s18 = scalar_lea.vmem %s2899_s2, %s2104_s11 }
  0x10   : > { %v2394_v3 = vld [vmem:[%s2391_s25] sm:$0xf]  ;;  %v2397_v4 = vld [vmem:[%s2391_s25 + $0x8] sm:$0xf]  ;;  %v2400_v5 = vld [vmem:[%s2391_s25 + $0x4] sm:$0x1]  ;;  %s2866_s21 = scalar_lea.vmem %s2900_s3, %s2104_s11 }
  0x11   : > { %v2403_v6 = vld [vmem:[%s2391_s25 + $0xc] sm:$0x1]  ;;  %v262_v7 = vshrl.u32 %v2394_v3, 16  ;;  %v265_v8 = vshll.u32 %v2394_v3, 16  ;;  %v271_v9 = vshll.u32 %v2400_v5, 16  ;;  %v276_v10 = vshrl.u32 %v2397_v4, 16 }
  0x12   : > { %v279_v11 = vshll.u32 %v2397_v4, 16  ;;  %v285_v12 = vshll.u32 %v2403_v6, 16  ;;  %v603_v13 = vrot.slane %v2400_v5, 5  ;;  %v607_v14 = vrot.slane %v2403_v6, 5  ;;  %v2414_v15 = vld [vmem:[%s2391_s25 + $0x20] sm:$0xf] }
  0x13   : > { %v264_v16 = vrot.slane %v262_v7, 4  ;;  %v267_v17 = vrot.slane %v265_v8, 5  ;;  %v273_v18 = vrot.slane %v271_v9, 5  ;;  %v278_v19 = vrot.slane %v276_v10, 4  ;;  %v2417_v20 = vld [vmem:[%s2391_s25 + $0x28] sm:$0xf] }
  0x14   : > { %v281_v21 = vrot.slane %v279_v11, 5  ;;  %v287_v22 = vrot.slane %v285_v12, 5  ;;  %v2420_v23 = vld [vmem:[%s2391_s25 + $0x24] sm:$0x1]  ;;  %v2423_v24 = vld [vmem:[%s2391_s25 + $0x2c] sm:$0x1]  ;;  %v1942_v25 = vcombine.low %v2394_v3, %v2397_v4  ;;  %v1944_v26 = vcombine.low %v2414_v15, %v2417_v20 }
  0x15   : > { %v268_v27 = vor.u32 %v267_v17, %v264_v16  ;;  %v318_v28 = vshrl.u32 %v2414_v15, 16  ;;  %v321_v29 = vshll.u32 %v2414_v15, 16  ;;  %v327_v30 = vshll.u32 %v2420_v23, 16  ;;  %v2442_v36 = vld [vmem:[%s2391_s25 + $0x10] sm:$0xf] }
  0x16   : > { %v282_v32 = vor.u32 %v281_v21, %v278_v19  ;;  %v332_v33 = vshrl.u32 %v2417_v20, 16  ;;  %v335_v34 = vshll.u32 %v2417_v20, 16  ;;  %v341_v35 = vshll.u32 %v2423_v24, 16  ;;  %v2445_v41 = vld [vmem:[%s2391_s25 + $0x18] sm:$0xf] }
  0x17   : > { %v269_v37 = vrot.slane %v268_v27, 4  ;;  %v320_v38 = vrot.slane %v318_v28, 4  ;;  %v323_v39 = vrot.slane %v321_v29, 5  ;;  %v329_v40 = vrot.slane %v327_v30, 5  ;;  %v2448_v46 = vld [vmem:[%s2391_s25 + $0x14] sm:$0x1] }
  0x18   : > { %v283_v42 = vrot.slane %v282_v32, 4  ;;  %v334_v43 = vrot.slane %v332_v33, 4  ;;  %v337_v44 = vrot.slane %v335_v34, 5  ;;  %v343_v45 = vrot.slane %v341_v35, 5  ;;  %v2457_v53 = vld [vmem:[%s2391_s25 + $0x1c] sm:$0x1] }
  0x19   : > { %v274_v47 = vsel %vm2434_vm3, %v269_v37, %v273_v18  ;;  %v324_v48 = vor.u32 %v323_v39, %v320_v38  ;;  %v619_v49 = vrot.slane %v2420_v23, 5  ;;  %v623_v50 = vrot.slane %v2423_v24, 5  ;;  %v2464_v60 = vld [vmem:[%s2391_s25 + $0x30] sm:$0xf]  ;;  %v2468_v7 = vld [vmem:[%s2391_s25 + $0x38] sm:$0xf] }
  0x1a   : > { %v288_v51 = vsel %vm2434_vm3, %v283_v42, %v287_v22  ;;  %v338_v52 = vor.u32 %v337_v44, %v334_v43  ;;  %v290_v54 = vshrl.u32 %v2442_v36, 16  ;;  %v293_v55 = vshll.u32 %v2442_v36, 16  ;;  %v2475_v12 = vld [vmem:[%s2391_s25 + $0x34] sm:$0x1]  ;;  %v2481_v21 = vld [vmem:[%s2391_s25 + $0x3c] sm:$0x1] }
  0x1b   : > { %v1933_v56 = vcombine.low %v274_v47, %v288_v51  ;;  %v325_v57 = vrot.slane %v324_v48, 4  ;;  %v299_v58 = vshll.u32 %v2448_v46, 16  ;;  %v304_v59 = vshrl.u32 %v2445_v41, 16  ;;  %v574_v22 = vld [vmem:[%s2391_s25] sm:$0xe] }
  0x1c   : > { %v339_v61 = vrot.slane %v338_v52, 4  ;;  %v292_v62 = vrot.slane %v290_v54, 4  ;;  %v295_v63 = vrot.slane %v293_v55, 5  ;;  %v307_v0 = vshll.u32 %v2445_v41, 16  ;;  %v575_v32 = vld [vmem:[%s2391_s25 + $0x8] sm:$0xe] }
  0x1d   : > { %2172 = vmatprep.mubr.msk.bf16.mxu0 %vm393_vm2, %v1933_v56  ;;  %v330_v8 = vsel %vm2434_vm3, %v325_v57, %v329_v40  ;;  %v301_v9 = vrot.slane %v299_v58, 5  ;;  %v306_v10 = vrot.slane %v304_v59, 4  ;;  %v313_v11 = vshll.u32 %v2457_v53, 16  ;;  %v576_v38 = vld [vmem:[%s2391_s25 + $0x10] sm:$0xe] }
  0x1e   : > { %v344_v16 = vsel %vm2434_vm3, %v339_v61, %v343_v45  ;;  %v296_v17 = vor.u32 %v295_v63, %v292_v62  ;;  %v309_v18 = vrot.slane %v307_v0, 5  ;;  %v611_v19 = vrot.slane %v2448_v46, 5  ;;  %v577_v44 = vld [vmem:[%s2391_s25 + $0x18] sm:$0xe]  ;;  %v578_v45 = vld [vmem:[%s2391_s25 + $0x20] sm:$0xe] }
  0x1f   : > { %v1935_v27 = vcombine.low %v330_v8, %v344_v16  ;;  %v315_v28 = vrot.slane %v313_v11, 5  ;;  %v615_v29 = vrot.slane %v2457_v53, 5  ;;  %v346_v30 = vshrl.u32 %v2464_v60, 16  ;;  %v579_v62 = vld [vmem:[%s2391_s25 + $0x28] sm:$0xe] }
  0x20   : > { %v297_v33 = vrot.slane %v296_v17, 4  ;;  %v310_v34 = vor.u32 %v309_v18, %v306_v10  ;;  %v349_v35 = vshll.u32 %v2464_v60, 16  ;;  %v355_v37 = vshll.u32 %v2475_v12, 16  ;;  %v2293_v10 = vld [vmem:[%s2898_s1 + $0x20] sm:$0xff]   ;;  %v580_v11 = vld [vmem:[%s2391_s25 + $0x30] sm:$0xe] }
  0x21   : > { %2176 = vmatprep.mubr.msk.bf16.mxu1 %vm393_vm2, %v1935_v27  ;;  %v348_v39 = vrot.slane %v346_v30, 4  ;;  %v360_v40 = vshrl.u32 %v2468_v7, 16  ;;  %v363_v42 = vshll.u32 %v2468_v7, 16  ;;  %v369_v43 = vshll.u32 %v2481_v21, 16  ;;  %v581_v5 = vld [vmem:[%s2391_s25 + $0x38] sm:$0xe] }
  0x22   : > { %v302_v46 = vsel %vm2434_vm3, %v297_v33, %v301_v9  ;;  %v311_v47 = vrot.slane %v310_v34, 4  ;;  %v351_v48 = vrot.slane %v349_v35, 5  ;;  %v357_v51 = vrot.slane %v355_v37, 5  ;;  %v2538_v34 = vld [vmem:[%s2391_s25 + $0xc] sm:$0x1] }
  0x23   : > { %v362_v53 = vrot.slane %v360_v40, 4  ;;  %v365_v54 = vrot.slane %v363_v42, 5  ;;  %v371_v55 = vrot.slane %v369_v43, 5  ;;  %v1951_v56 = vrot.slane %v574_v22, 9  ;;  %v1987_v37 = vld [vmem:[%s2391_s25 + $0x10] sm:$0xf] }
  0x24   : > { %v316_v57 = vsel %vm2434_vm3, %v311_v47, %v315_v28  ;;  %v352_v58 = vor.u32 %v351_v48, %v348_v39  ;;  %v1952_v59 = vrot.slane %v575_v32, 9  ;;  %v1943_v61 = vcombine.low %v2442_v36, %v2445_v41  ;;  %v2296_v15 = vld [vmem:[%s2391_s25 + $0x8] ss:$8 sps:$4 sm:$0xff]  }
  0x25   : > { %v1934_v63 = vcombine.low %v302_v46, %v316_v57  ;;  %v366_v0 = vor.u32 %v365_v54, %v362_v53  ;;  %v604_v8 = vsel %vm2500_vm6, %v1951_v56, %v603_v13  ;;  %v1953_v9 = vrot.slane %v576_v38, 9  ;;  %v2554_v38 = vld [vmem:[%s2391_s25 + $0x14] sm:$0x1] }
  0x26   : > { %v353_v16 = vrot.slane %v352_v58, 4  ;;  %v608_v17 = vsel %vm2500_vm6, %v1952_v59, %v607_v14  ;;  %v1954_v18 = vrot.slane %v577_v44, 9  ;;  %v1955_v22 = vrot.slane %v578_v45, 9  ;;  %v1989_v44 = vld [vmem:[%s2391_s25 + $0x18] sm:$0xf]  ;;  %v2583_v59 = vld [vmem:[%s2898_s1 + $0x30] sm:$0xff]  }
  0x27   : > { %2173 = vmatmul.mubr.msk.bf16.vlgmr.msra.gmra.mxu0 %vm393_vm2, %v1934_v63  ;;  %v367_v13 = vrot.slane %v366_v0, 4  ;;  %v1959_v27 = vcombine.low %v604_v8, %v608_v17  ;;  %v612_v28 = vsel %vm2500_vm6, %v1953_v9, %v611_v19  ;;  %v1956_v30 = vrot.slane %v579_v62, 9  ;;  %v1985_v19 = vld [vmem:[%s2391_s25 + $0x8] sm:$0xf]  ;;  %v2559_v45 = vld [vmem:[%s2391_s25 + $0x1c] sm:$0x1] }
  0x28   : > { %v358_v6 = vsel %vm2434_vm3, %v353_v16, %v357_v51  ;;  %2191 = vmatpush3.bf16.msra.mxu0 %v2383_v2  ;;  %v616_v14 = vsel %vm2500_vm6, %v1954_v18, %v615_v29  ;;  %v620_v32 = vsel %vm2500_vm6, %v1955_v22, %v619_v49  ;;  %v1945_v33 = vcombine.low %v2464_v60, %v2468_v7  ;;  %v2546_v2 = vld [vmem:[%s2898_s1 + $0x18] sm:$0xff]   ;;  %v2578_v58 = vld [vmem:[%s2391_s25 + $0x24] sm:$0x1]  ;;  %v1993_v9 = vld [vmem:[%s2391_s25 + $0x28] sm:$0xf] }
  0x29   : > { %v372_v35 = vsel %vm2434_vm3, %v367_v13, %v371_v55  ;;  %2192 = vmatprep.mubr.msk.bf16.mxu0 %vm393_vm2, %v1959_v27  ;;  %v1960_v23 = vcombine.low %v612_v28, %v616_v14  ;;  %2210 = vmatprep.subr.bf16.mxu0 %v2293_v10  ;;  %v624_v49 = vsel %vm2500_vm6, %v1956_v30, %v623_v50  ;;  %v1957_v29 = vrot.slane %v580_v11, 9  ;;  %v1991_v50 = vld [vmem:[%s2391_s25 + $0x20] sm:$0xf]  ;;  %v2594_v16 = vld [vmem:[%s2898_s1 + $0x28] sm:$0xff]   ;;  %v2012_v7 = vld [vmem:[%s2391_s25 + $0x18] sm:$0xe] }
  0x2a   : > { %v1936_v39 = vcombine.low %v358_v6, %v372_v35  ;;  %v1961_v40 = vcombine.low %v620_v32, %v624_v49  ;;  %v627_v42 = vrot.slane %v2475_v12, 5  ;;  %v1958_v43 = vrot.slane %v581_v5, 9  ;;  %v2598_v5 = vld [vmem:[%s2391_s25 + $0x2c] sm:$0x1] }
  0x2b   : > { %v631_v46 = vrot.slane %v2481_v21, 5  ;;  %v877_v47 = vshrl.u32 %v1985_v19, 16  ;;  %v880_v24 = vshll.u32 %v1985_v19, 16  ;;  %v886_v48 = vshll.u32 %v2538_v34, 16 }
  0x2c   : > { %2177 = vmatmul.mubr.msk.bf16.vlgmr.msra.gmra.mxu1 %vm393_vm2, %v1936_v39  ;;  %v2567_v51 = vsel %vm2500_vm6, %v1957_v29, %v627_v42  ;;  %v891_v53 = vshrl.u32 %v1987_v37, 16  ;;  %v894_v12 = vshll.u32 %v1987_v37, 16  ;;  %v900_v54 = vshll.u32 %v2554_v38, 16 }
  0x2d   : > { %2181 = vmatpush3.bf16.msra.mxu1 %v2376_v1  ;;  %2182 = vmatprep.mubr.msk.bf16.mxu1 %vm393_vm2, %v1942_v25  ;;  %v632_v21 = vsel %vm2500_vm6, %v1958_v43, %v631_v46  ;;  %v879_v55 = vrot.slane %v877_v47, 4  ;;  %v882_v56 = vrot.slane %v880_v24, 5  ;;  %v888_v57 = vrot.slane %v886_v48, 5  ;;  %v2621_v47 = vld [vmem:[%s2391_s25 + $0x3c] sm:$0x1] }
  0x2e   : > { %2200 = vmatprep.subr.bf16.mxu1 %v2546_v2  ;;  %v1962_v1 = vcombine.low %v2567_v51, %v632_v21  ;;  %v893_v3 = vrot.slane %v891_v53, 4  ;;  %v896_v4 = vrot.slane %v894_v12, 5  ;;  %v902_v25 = vrot.slane %v900_v54, 5  ;;  %v1999_v53 = vld [vmem:[%s2391_s25 + $0x40] sm:$0xf] }
  0x2f   : > { %2193 = vmatmul.mubr.msk.bf16.vlgmr.msra.gmra.mxu0 %vm393_vm2, %v1960_v23  ;;  %v883_v62 = vor.u32 %v882_v56, %v879_v55  ;;  %v905_v63 = vshrl.u32 %v1989_v44, 16  ;;  %v908_v0 = vshll.u32 %v1989_v44, 16  ;;  %v914_v8 = vshll.u32 %v2559_v45, 16  ;;  %v1997_v44 = vld [vmem:[%s2391_s25 + $0x38] sm:$0xf] }
  0x30   : > { %2211 = vmatpush3.bf16.msra.mxu0 %v2293_v10  ;;  %2196 = vmatprep.mubr.msk.bf16.mxu0 %vm393_vm2, %v1961_v40  ;;  %v897_v11 = vor.u32 %v896_v4, %v893_v3  ;;  %v919_v17 = vshrl.u32 %v1991_v50, 16  ;;  %v922_v18 = vshll.u32 %v1991_v50, 16  ;;  %v928_v22 = vshll.u32 %v2578_v58, 16  ;;  %v1995_v10 = vld [vmem:[%s2391_s25 + $0x30] sm:$0xf] }
  0x31   : > { %v884_v13 = vrot.slane %v883_v62, 4  ;;  %v907_v27 = vrot.slane %v905_v63, 4  ;;  %v910_v28 = vrot.slane %v908_v0, 5  ;;  %v916_v30 = vrot.slane %v914_v8, 5  ;;  %2230 = vmatprep.subr.bf16.mxu0 %v2583_v59  ;;  %v2611_v40 = vld [vmem:[%s2391_s25 + $0x34] sm:$0x1] }
  0x32   : > { %v898_v6 = vrot.slane %v897_v11, 4  ;;  %v921_v14 = vrot.slane %v919_v17, 4  ;;  %v924_v32 = vrot.slane %v922_v18, 5  ;;  %v930_v19 = vrot.slane %v928_v22, 5  ;;  %v2631_v12 = vld [vmem:[%s2391_s25 + $0x44] sm:$0x1] }
  0x33   : > { %v889_v35 = vsel %vm2434_vm3, %v884_v13, %v888_v57  ;;  %v911_v23 = vor.u32 %v910_v28, %v907_v27  ;;  %v933_v49 = vshrl.u32 %v1993_v9, 16  ;;  %v936_v29 = vshll.u32 %v1993_v9, 16  ;;  %v2011_v9 = vld [vmem:[%s2391_s25 + $0x10] sm:$0xe] }
  0x34   : > { %2183 = vmatmul.mubr.msk.bf16.vlgmr.msra.gmra.mxu1 %vm393_vm2, %v1943_v61  ;;  %v903_v37 = vsel %vm2434_vm3, %v898_v6, %v902_v25  ;;  %v925_v39 = vor.u32 %v924_v32, %v921_v14  ;;  %v942_v42 = vshll.u32 %v2598_v5, 16  ;;  %v947_v43 = vshrl.u32 %v1995_v10, 16  ;;  %v2010_v25 = vld [vmem:[%s2391_s25 + $0x8] sm:$0xe] }
  0x35   : > { %2201 = vmatpush3.bf16.msra.mxu1 %v2546_v2  ;;  %2186 = vmatprep.mubr.msk.bf16.mxu1 %vm393_vm2, %v1944_v26  ;;  %v2001_v36 = vcombine.low %v889_v35, %v903_v37  ;;  %v912_v41 = vrot.slane %v911_v23, 4  ;;  %v935_v61 = vrot.slane %v933_v49, 4  ;;  %v938_v46 = vrot.slane %v936_v29, 5  ;;  %v2013_v23 = vld [vmem:[%s2391_s25 + $0x20] sm:$0xe] }
  0x36   : > { %2220 = vmatprep.subr.bf16.mxu1 %v2594_v16  ;;  %v926_v24 = vrot.slane %v925_v39, 4  ;;  %v944_v48 = vrot.slane %v942_v42, 5  ;;  %v949_v50 = vrot.slane %v947_v43, 4  ;;  %v950_v51 = vshll.u32 %v1995_v10, 16  ;;  %v2649_v10 = vld [vmem:[%s2898_s1 + $0x40] sm:$0xff]  }
  0x37   : > { %2197 = vmatmul.mubr.msk.bf16.gmra.mxu0 %vm393_vm2, %v1962_v1  ;;  %v917_v20 = vsel %vm2434_vm3, %v912_v41, %v916_v30  ;;  %v939_v26 = vor.u32 %v938_v46, %v935_v61  ;;  %v956_v2 = vshll.u32 %v2611_v40, 16  ;;  %v961_v54 = vshrl.u32 %v1997_v44, 16  ;;  %v2300_v29 = vld [vmem:[%s2391_s25 + $0x28] ss:$8 sps:$4 sm:$0xff]  }
  0x38   : > { %2212 = vmatprep.mubr.msk.bf16.mxu0 %vm393_vm2, %v2001_v36  ;;  %v931_v21 = vsel %vm2434_vm3, %v926_v24, %v930_v19  ;;  %v952_v55 = vrot.slane %v950_v51, 5  ;;  %v964_v56 = vshll.u32 %v1997_v44, 16  ;;  %v970_v57 = vshll.u32 %v2621_v47, 16  ;;  %v2302_v46 = vld [vmem:[%s2391_s25 + $0x10] ss:$8 sps:$4 sm:$0xff]  }
  0x39   : > { %v2002_v1 = vcombine.low %v917_v20, %v931_v21  ;;  %v940_v3 = vrot.slane %v939_v26, 4  ;;  %v963_v4 = vrot.slane %v961_v54, 4  ;;  %v958_v63 = vrot.slane %v956_v2, 5  ;;  %v2016_v2 = vld [vmem:[%s2391_s25 + $0x38] sm:$0xe] }
  0x3a   : > { %v953_v62 = vor.u32 %v952_v55, %v949_v50  ;;  %v966_v0 = vrot.slane %v964_v56, 5  ;;  %v975_v8 = vshrl.u32 %v1999_v53, 16  ;;  %v972_v17 = vrot.slane %v970_v57, 5  ;;  %v2017_v54 = vld [vmem:[%s2391_s25 + $0x40] sm:$0xe] }
  0x3b   : > { %v945_v11 = vsel %vm2434_vm3, %v940_v3, %v944_v48  ;;  %v978_v18 = vshll.u32 %v1999_v53, 16  ;;  %v984_v22 = vshll.u32 %v2631_v12, 16  ;;  %v2018_v30 = vrot.slane %v2010_v25, 9  ;;  %v2052_v3 = vld [vmem:[%s2391_s25 + $0x10] sm:$0xf] }
  0x3c   : > { %2187 = vmatmul.mubr.msk.bf16.gmra.mxu1 %vm393_vm2, %v1945_v33  ;;  %v954_v13 = vrot.slane %v953_v62, 4  ;;  %v967_v27 = vor.u32 %v966_v0, %v963_v4  ;;  %v977_v28 = vrot.slane %v975_v8, 4  ;;  %v1119_v14 = vrot.slane %v2538_v34, 5  ;;  %v2298_v33 = vld [vmem:[%s2391_s25 + $0x18] ss:$8 sps:$4 sm:$0xff]  }
  0x3d   : > { %2202 = vmatprep.mubr.msk.bf16.mxu1 %vm393_vm2, %v2296_v15  ;;  %v980_v6 = vrot.slane %v978_v18, 5  ;;  %v2019_v32 = vrot.slane %v2011_v9, 9  ;;  %v1123_v60 = vrot.slane %v2554_v38, 5  ;;  %v2020_v49 = vrot.slane %v2012_v7, 9  ;;  %v2054_v25 = vld [vmem:[%s2391_s25 + $0x18] sm:$0xf] }
  0x3e   : > { %v959_v19 = vsel %vm2434_vm3, %v954_v13, %v958_v63  ;;  %v968_v35 = vrot.slane %v967_v27, 4  ;;  %v986_v34 = vrot.slane %v984_v22, 5  ;;  %v1127_v42 = vrot.slane %v2559_v45, 5  ;;  %v2674_v45 = vld [vmem:[%s2898_s1 + $0x38] sm:$0xff]   ;;  %v2077_v18 = vld [vmem:[%s2391_s25 + $0x10] sm:$0xe] }
  0x3f   : > { %2213 = vmatmul.mubr.msk.bf16.vlgmr.msra.gmra.mxu0 %vm393_vm2, %v2002_v1  ;;  %v2003_v37 = vcombine.low %v945_v11, %v959_v19  ;;  %v981_v39 = vor.u32 %v980_v6, %v977_v28  ;;  %v2021_v38 = vrot.slane %v2013_v23, 9  ;;  %v1131_v43 = vrot.slane %v2578_v58, 5  ;;  %v2014_v58 = vld [vmem:[%s2391_s25 + $0x28] sm:$0xe]  ;;  %v2055_v62 = vld [vmem:[%s2391_s25 + $0x1c] sm:$0x1] }
  0x40   : > { %2231 = vmatpush3.bf16.msra.mxu0 %v2583_v59  ;;  %v973_v44 = vsel %vm2434_vm3, %v968_v35, %v972_v17  ;;  %v2669_v41 = vsel %vm2500_vm6, %v2018_v30, %v1119_v14  ;;  %v2015_v59 = vld [vmem:[%s2391_s25 + $0x30] sm:$0xe]  ;;  %v2681_v61 = vsel %vm2500_vm6, %v2019_v32, %v1123_v60  ;;  %v2686_v24 = vsel %vm2500_vm6, %v2020_v49, %v1127_v42  ;;  %v2304_v22 = vld [vmem:[%s2391_s25 + $0x20] ss:$8 sps:$4 sm:$0xff]   ;;  %v2078_v30 = vld [vmem:[%s2391_s25 + $0x18] sm:$0xe] }
  0x41   : > { %2216 = vmatprep.mubr.msk.bf16.mxu0 %vm393_vm2, %v2003_v37  ;;  %v982_v36 = vrot.slane %v981_v39, 4  ;;  %2250 = vmatprep.subr.bf16.mxu0 %v2649_v10  ;;  %v2022_v48 = vrot.slane %v2014_v58, 9  ;;  %v1135_v50 = vrot.slane %v2598_v5, 5  ;;  %v2693_v15 = vsel %vm2500_vm6, %v2021_v38, %v1131_v43  ;;  %v2306_v14 = vld [vmem:[%s2391_s25 + $0x30] ss:$8 sps:$4 sm:$0xff]  }
  0x42   : > { %v2023_v20 = vrot.slane %v2015_v59, 9  ;;  %v1139_v26 = vrot.slane %v2611_v40, 5  ;;  %v2024_v21 = vrot.slane %v2016_v2, 9  ;;  %v1143_v5 = vrot.slane %v2621_v47, 5  ;;  %v2301_v40 = vld [vmem:[%s2391_s25 + $0x38] ss:$8 sps:$4 sm:$0xff]  }
  0x43   : > { %v987_v51 = vsel %vm2434_vm3, %v982_v36, %v986_v34  ;;  %v2025_v55 = vrot.slane %v2017_v54, 9  ;;  %v1147_v56 = vrot.slane %v2631_v12, 5  ;;  %v2026_v57 = vcombine.low %v2669_v41, %v2681_v61  ;;  %v2053_v47 = vld [vmem:[%s2391_s25 + $0x14] sm:$0x1]  ;;  %v2056_v19 = vld [vmem:[%s2391_s25 + $0x20] sm:$0xf] }
  0x44   : > { %2203 = vmatmul.mubr.msk.bf16.vlgmr.msra.gmra.mxu1 %vm393_vm2, %v2298_v33  ;;  %v2004_v53 = vcombine.low %v973_v44, %v987_v51  ;;  %v2027_v1 = vcombine.low %v2686_v24, %v2693_v15  ;;  %v2718_v12 = vsel %vm2500_vm6, %v2023_v20, %v1139_v26  ;;  %v2722_v4 = vsel %vm2500_vm6, %v2024_v21, %v1143_v5  ;;  %v2057_v37 = vld [vmem:[%s2391_s25 + $0x24] sm:$0x1]  ;;  %v2058_v42 = vld [vmem:[%s2391_s25 + $0x28] sm:$0xf]  ;;  %v2059_v38 = vld [vmem:[%s2391_s25 + $0x2c] sm:$0x1] }
  0x45   : > { %2221 = vmatpush3.bf16.msra.mxu1 %v2594_v16  ;;  %2206 = vmatprep.mubr.msk.bf16.mxu1 %vm393_vm2, %v2300_v29  ;;  %v2711_v16 = vsel %vm2500_vm6, %v2022_v48, %v1135_v50  ;;  %v1393_v63 = vshrl.u32 %v2052_v3, 16  ;;  %v1396_v0 = vshll.u32 %v2052_v3, 16  ;;  %v2729_v8 = vsel %vm2500_vm6, %v2025_v55, %v1147_v56  ;;  %v2079_v61 = vld [vmem:[%s2391_s25 + $0x20] sm:$0xe]  ;;  %v2080_v20 = vld [vmem:[%s2391_s25 + $0x28] sm:$0xe] }
  0x46   : > { %2240 = vmatprep.subr.bf16.mxu1 %v2674_v45  ;;  %v1402_v9 = vshll.u32 %v2053_v47, 16  ;;  %v1407_v11 = vshrl.u32 %v2054_v25, 16  ;;  %v1410_v17 = vshll.u32 %v2054_v25, 16  ;;  %v1416_v28 = vshll.u32 %v2055_v62, 16  ;;  %v2060_v21 = vld [vmem:[%s2391_s25 + $0x30] sm:$0xf] }
  0x47   : > { %2217 = vmatmul.mubr.msk.bf16.gmra.mxu0 %vm393_vm2, %v2004_v53  ;;  %v1395_v13 = vrot.slane %v1393_v63, 4  ;;  %v1398_v27 = vrot.slane %v1396_v0, 5  ;;  %v2085_v6 = vrot.slane %v2077_v18, 9  ;;  %v1635_v33 = vrot.slane %v2053_v47, 5  ;;  %v2062_v25 = vld [vmem:[%s2391_s25 + $0x38] sm:$0xf] }
  0x48   : > { %2232 = vmatprep.mubr.msk.bf16.mxu0 %vm393_vm2, %v2302_v46  ;;  %v1404_v32 = vrot.slane %v1402_v9, 5  ;;  %v1409_v60 = vrot.slane %v1407_v11, 4  ;;  %v1412_v7 = vrot.slane %v1410_v17, 5  ;;  %v1418_v23 = vrot.slane %v1416_v28, 5  ;;  %v2063_v18 = vld [vmem:[%s2391_s25 + $0x3c] sm:$0x1] }
  0x49   : > { %v1399_v35 = vor.u32 %v1398_v27, %v1395_v13  ;;  %v2086_v49 = vrot.slane %v2078_v30, 9  ;;  %v1639_v29 = vrot.slane %v2055_v62, 5  ;;  %v2028_v39 = vcombine.low %v2711_v16, %v2718_v12  ;;  %v2307_v62 = vld [vmem:[%s2391_s25 + $0x40] ss:$8 sps:$4 sm:$0xff]   ;;  %v2081_v27 = vld [vmem:[%s2391_s25 + $0x30] sm:$0xe] }
  0x4a   : > { %v1413_v34 = vor.u32 %v1412_v7, %v1409_v60  ;;  %v1421_v43 = vshrl.u32 %v2056_v19, 16  ;;  %v1424_v44 = vshll.u32 %v2056_v19, 16  ;;  %v2029_v36 = vcombine.low %v2722_v4, %v2729_v8 }
  0x4b   : > { %v1400_v41 = vrot.slane %v1399_v35, 4  ;;  %v1430_v58 = vshll.u32 %v2057_v37, 16  ;;  %v1435_v59 = vshrl.u32 %v2058_v42, 16  ;;  %v1636_v48 = vsel %vm2500_vm6, %v2085_v6, %v1635_v33 }
  0x4c   : > { %2207 = vmatmul.mubr.msk.bf16.gmra.mxu1 %vm393_vm2, %v2301_v40  ;;  %v1414_v46 = vrot.slane %v1413_v34, 4  ;;  %v1423_v50 = vrot.slane %v1421_v43, 4  ;;  %v1426_v51 = vrot.slane %v1424_v44, 5  ;;  %v1640_v2 = vsel %vm2500_vm6, %v2086_v49, %v1639_v29  ;;  %v2065_v44 = vld [vmem:[%s2391_s25 + $0x44] sm:$0x1] }
  0x4d   : > { %2222 = vmatprep.mubr.msk.bf16.mxu1 %vm393_vm2, %v2026_v57  ;;  %v1405_v26 = vsel %vm2434_vm3, %v1400_v41, %v1404_v32  ;;  %v1437_v53 = vrot.slane %v1435_v59, 4  ;;  %v1438_v54 = vshll.u32 %v2058_v42, 16  ;;  %v1444_v56 = vshll.u32 %v2059_v38, 16  ;;  %v2061_v57 = vld [vmem:[%s2391_s25 + $0x34] sm:$0x1] }
  0x4e   : > { %v1419_v5 = vsel %vm2434_vm3, %v1414_v46, %v1418_v23  ;;  %v1427_v55 = vor.u32 %v1426_v51, %v1423_v50  ;;  %v2087_v40 = vrot.slane %v2079_v61, 9  ;;  %v2760_v16 = vrot.slane %v1430_v58, 5  ;;  %v2082_v32 = vld [vmem:[%s2391_s25 + $0x38] sm:$0xe]  ;;  %v2064_v23 = vld [vmem:[%s2391_s25 + $0x40] sm:$0xf] }
  0x4f   : > { %2233 = vmatmul.mubr.msk.bf16.vlgmr.msra.gmra.mxu0 %vm393_vm2, %v2304_v22  ;;  %v1440_v3 = vrot.slane %v1438_v54, 5  ;;  %v1643_v47 = vrot.slane %v2057_v37, 5  ;;  %v2088_v12 = vrot.slane %v2080_v20, 9  ;;  %v1647_v0 = vrot.slane %v2059_v38, 5  ;;  %v2067_v51 = vld [vmem:[%s2391_s25 + $0x4c] sm:$0x1] }
  0x50   : > { %2251 = vmatpush3.bf16.msra.mxu0 %v2649_v10  ;;  %2236 = vmatprep.mubr.msk.bf16.mxu0 %vm393_vm2, %v2306_v14  ;;  %v2093_v10 = vcombine.low %v1636_v48, %v1640_v2  ;;  %v2764_v63 = vrot.slane %v1427_v55, 4  ;;  %v1449_v9 = vshrl.u32 %v2060_v21, 16  ;;  %v2068_v11 = vcombine.low %v1405_v26, %v1419_v5  ;;  %v2083_v26 = vld [vmem:[%s2391_s25 + $0x40] sm:$0xe]  ;;  %v2084_v5 = vld [vmem:[%s2391_s25 + $0x48] sm:$0xe] }
  0x51   : > { %v1441_v17 = vor.u32 %v1440_v3, %v1437_v53  ;;  %v1452_v22 = vshll.u32 %v2060_v21, 16  ;;  %v1458_v13 = vshll.u32 %v2061_v57, 16  ;;  %v1446_v28 = vrot.slane %v1444_v56, 5 }
  0x52   : > { %v1644_v30 = vsel %vm2500_vm6, %v2087_v40, %v1643_v47  ;;  %v1451_v6 = vrot.slane %v1449_v9, 4  ;;  %v1463_v14 = vshrl.u32 %v2062_v25, 16  ;;  %v1433_v24 = vsel %vm2434_vm3, %v2764_v63, %v2760_v16 }
  0x53   : > { %v1442_v15 = vrot.slane %v1441_v17, 4  ;;  %v1454_v60 = vrot.slane %v1452_v22, 5  ;;  %v1466_v33 = vshll.u32 %v2062_v25, 16  ;;  %v1472_v19 = vshll.u32 %v2063_v18, 16 }
  0x54   : > { %2223 = vmatmul.mubr.msk.bf16.vlgmr.msra.gmra.mxu1 %vm393_vm2, %v2027_v1  ;;  %v1648_v1 = vsel %vm2500_vm6, %v2088_v12, %v1647_v0  ;;  %v1465_v7 = vrot.slane %v1463_v14, 4  ;;  %v2089_v35 = vrot.slane %v2081_v27, 9  ;;  %v1460_v49 = vrot.slane %v1458_v13, 5 }
  0x55   : > { %2241 = vmatpush3.bf16.msra.mxu1 %v2674_v45  ;;  %2226 = vmatprep.mubr.msk.bf16.mxu1 %vm393_vm2, %v2028_v39  ;;  %v1455_v45 = vor.u32 %v1454_v60, %v1451_v6  ;;  %v1651_v29 = vrot.slane %v2061_v57, 5  ;;  %v2090_v37 = vrot.slane %v2082_v32, 9  ;;  %v2066_v39 = vld [vmem:[%s2391_s25 + $0x48] sm:$0xf]  ;;  %v1447_v34 = vsel %vm2434_vm3, %v1442_v15, %v1446_v28 }
  0x56   : > { %v2094_v42 = vcombine.low %v1644_v30, %v1648_v1  ;;  %v1468_v38 = vrot.slane %v1466_v33, 5  ;;  %v1655_v43 = vrot.slane %v2063_v18, 5  ;;  %v1477_v59 = vshrl.u32 %v2064_v23, 16 }
  0x57   : > { %2237 = vmatmul.mubr.msk.bf16.gmra.mxu0 %vm393_vm2, %v2307_v62  ;;  %v1456_v41 = vrot.slane %v1455_v45, 4  ;;  %v1652_v58 = vsel %vm2500_vm6, %v2089_v35, %v1651_v29  ;;  %v1480_v61 = vshll.u32 %v2064_v23, 16  ;;  %v1474_v48 = vrot.slane %v1472_v19, 5 }
  0x58   : > { %2252 = vmatprep.mubr.msk.bf16.mxu0 %vm393_vm2, %v2093_v10  ;;  %v1469_v46 = vor.u32 %v1468_v38, %v1465_v7  ;;  %v1656_v50 = vsel %vm2500_vm6, %v2090_v37, %v1655_v43  ;;  %v1491_v20 = vshrl.u32 %v2066_v39, 16  ;;  %v1479_v53 = vrot.slane %v1477_v59, 4 }
  0x59   : > { %v1461_v2 = vsel %vm2434_vm3, %v1456_v41, %v1460_v49  ;;  %v1482_v54 = vrot.slane %v1480_v61, 5  ;;  %v1486_v21 = vshll.u32 %v2065_v44, 16  ;;  %v2095_v56 = vcombine.low %v1652_v58, %v1656_v50 }
  0x5a   : > { %v1470_v55 = vrot.slane %v1469_v46, 4  ;;  %v1493_v40 = vrot.slane %v1491_v20, 4  ;;  %v1494_v57 = vshll.u32 %v2066_v39, 16  ;;  %v1500_v3 = vshll.u32 %v2067_v51, 16 }
  0x5b   : > { %v1483_v16 = vor.u32 %v1482_v54, %v1479_v53  ;;  %v2091_v47 = vrot.slane %v2083_v26, 9  ;;  %v1659_v12 = vrot.slane %v2065_v44, 5  ;;  %v2092_v10 = vrot.slane %v2084_v5, 9 }
  0x5c   : > { %2227 = vmatmul.mubr.msk.bf16.gmra.mxu1 %vm393_vm2, %v2029_v36  ;;  %v1475_v25 = vsel %vm2434_vm3, %v1470_v55, %v1474_v48  ;;  %v1496_v62 = vrot.slane %v1494_v57, 5  ;;  %v1663_v63 = vrot.slane %v2067_v51, 5  ;;  %v2069_v4 = vcombine.low %v1433_v24, %v1447_v34 }
  0x5d   : > { %2242 = vmatprep.mubr.msk.bf16.mxu1 %vm393_vm2, %v2068_v11  ;;  %v1660_v36 = vsel %vm2500_vm6, %v2091_v47, %v1659_v12  ;;  %v2070_v9 = vcombine.low %v1461_v2, %v1475_v25  ;;  %v1484_v11 = vrot.slane %v1483_v16, 4  ;;  %v1488_v17 = vrot.slane %v1486_v21, 5 }
  0x5e   : > { %v1497_v8 = vor.u32 %v1496_v62, %v1493_v40  ;;  %v1664_v0 = vsel %vm2500_vm6, %v2092_v10, %v1663_v63  ;;  %v1502_v18 = vrot.slane %v1500_v3, 5 }
  0x5f   : > { %2253 = vmatmul.mubr.msk.bf16.vlgmr.msra.gmra.mxu0 %vm393_vm2, %v2094_v42  ;;  %v2096_v13 = vcombine.low %v1660_v36, %v1664_v0  ;;  %v1489_v27 = vsel %vm2434_vm3, %v1484_v11, %v1488_v17 }
  0x60   : > { %2256 = vmatprep.mubr.msk.bf16.mxu0 %vm393_vm2, %v2095_v56  ;;  %v1498_v22 = vrot.slane %v1497_v8, 4 }
  0x62   : > { %v1503_v28 = vsel %vm2434_vm3, %v1498_v22, %v1502_v18 }
  0x63   : > { %v2071_v52 = vcombine.low %v1489_v27, %v1503_v28 }
  0x64   : > { %2243 = vmatmul.mubr.msk.bf16.vlgmr.msra.gmra.mxu1 %vm393_vm2, %v2069_v4 }
  0x65   : > { %2246 = vmatprep.mubr.msk.bf16.mxu1 %vm393_vm2, %v2070_v9 }
  0x67   : > { %2257 = vmatmul.mubr.msk.bf16.gmra.mxu0 %vm393_vm2, %v2096_v13 }
  0x6c   : > { %2247 = vmatmul.mubr.msk.bf16.gmra.mxu1 %vm393_vm2, %v2071_v52 }
  0xe7   : > { %v2174_v30 = vpop.f32.mrf.mxu0 }
  0xe9   : > { %v440_v6 = vpop.f32.mrf.mxu0 }
  0xeb   : > { %v2175_v14 = vpop.f32.mrf.mxu0 }
  0xec   : > { %v2178_v32 = vpop.f32.mrf.mxu1 }
  0xed   : > { %v443_v24 = vpop.f32.mrf.mxu0 }
  0xee   : > { %v456_v15 = vpop.f32.mrf.mxu1 }
  0xef   : > { %v2194_v1 = vpop.f32.mrf.mxu0 }
  0xf0   : > { %v2179_v60 = vpop.f32.mrf.mxu1 }
  0xf1   : > { %v699_v7 = vpop.f32.mrf.mxu0 }
  0xf2   : > { %v2820_v33 = vpop.f32.mrf.mxu1 }
  0xf3   : > { %v2195_v19 = vpop.f32.mrf.mxu0 }
  0xf4   : > { %v2184_v35 = vpop.f32.mrf.mxu1 }
  0xf5   : > { %v702_v31 = vpop.f32.mrf.mxu0  ;;  %v552_v57 = vadd.f32 %v2184_v35, %v2174_v30 }
  0xf6   : > { %v543_v23 = vpop.f32.mrf.mxu1 }
  0xf7   : > { %v2198_v45 = vpop.f32.mrf.mxu0  ;;  %v544_v47 = vadd.f32 %v543_v23, %v440_v6  ;;  %v732_v62 = vadd.f32 %v2194_v1, %v552_v57 }
  0xf8   : > { %v2185_v49 = vpop.f32.mrf.mxu1 }
  0xf9   : > { %v715_v29 = vpop.f32.mrf.mxu0  ;;  %v555_v10 = vadd.f32 %v2185_v49, %v2175_v14  ;;  %v730_v8 = vadd.f32 %v699_v7, %v544_v47 }
  0xfa   : > { %v546_v37 = vpop.f32.mrf.mxu1 }
  0xfb   : > { %v2822_v39 = vpop.f32.mrf.mxu0  ;;  %v547_v36 = vadd.f32 %v546_v37, %v443_v24  ;;  %v733_v18 = vadd.f32 %v2195_v19, %v555_v10 }
  0xfc   : > { %v2188_v34 = vpop.f32.mrf.mxu1 }
  0xfd   : > { %v2824_v42 = vpop.f32.mrf.mxu0  ;;  %v568_v11 = vadd.f32 %v2188_v34, %v2178_v32  ;;  %v731_v52 = vadd.f32 %v702_v31, %v547_v36 }
  0xfe   : > { %v559_v38 = vpop.f32.mrf.mxu1 }
  0xff   : > { %v2214_v43 = vpop.f32.mrf.mxu0  ;;  %v560_v27 = vadd.f32 %v559_v38, %v456_v15  ;;  %v736_v1 = vadd.f32 %v2198_v45, %v568_v11 }
 0x100   : > { %v2189_v44 = vpop.f32.mrf.mxu1 }
 0x101   : > { %v1054_v41 = vpop.f32.mrf.mxu0  ;;  %v571_v24 = vadd.f32 %v2189_v44, %v2179_v60  ;;  %v734_v19 = vadd.f32 %v715_v29, %v560_v27 }
 0x102   : > { %v562_v58 = vpop.f32.mrf.mxu1 }
 0x103   : > { %v2215_v59 = vpop.f32.mrf.mxu0  ;;  %v563_v31 = vadd.f32 %v562_v58, %v2820_v33  ;;  %v737_v38 = vadd.f32 %v2822_v39, %v571_v24  ;;  %v2107_v58 = vld [vmem:[%s2848_s18] sm:$0xff]  }
 0x104   : > { %v2204_v61 = vpop.f32.mrf.mxu1 }
 0x105   : > { %v1057_v46 = vpop.f32.mrf.mxu0  ;;  %v854_v0 = vadd.f32 %v2204_v61, %v732_v62  ;;  %v735_v57 = vadd.f32 %v2824_v42, %v563_v31  ;;  %v2108_v42 = vunpack.c.l.bf16 %v2107_v58 }
 0x106   : > { %v821_v48 = vpop.f32.mrf.mxu1 }
 0x107   : > { %v2218_v50 = vpop.f32.mrf.mxu0  ;;  %v852_v22 = vadd.f32 %v821_v48, %v730_v8  ;;  %v1087_v30 = vadd.f32 %v2214_v43, %v854_v0 }
 0x108   : > { %v2205_v51 = vpop.f32.mrf.mxu1 }
 0x109   : > { %v2826_v20 = vpop.f32.mrf.mxu0  ;;  %v855_v6 = vadd.f32 %v2205_v51, %v733_v18  ;;  %v1085_v35 = vadd.f32 %v1054_v41, %v852_v22  ;;  %v2122_v41 = vld [vmem:[%s2848_s18 + $0x8] sm:$0xff]   ;;  %v2124_v18 = vld [vmem:[%s2848_s18 + $0x18] sm:$0xff]  }
 0x10a   : > { %v824_v26 = vpop.f32.mrf.mxu1  ;;  %v2113_v36 = vunpack.c.h.bf16 %v2122_v41 }
 0x10b   : > { %v2828_v2 = vpop.f32.mrf.mxu0  ;;  %v853_v23 = vadd.f32 %v824_v26, %v731_v52  ;;  %v1088_v45 = vadd.f32 %v2215_v59, %v855_v6 }
 0x10c   : > { %v2208_v53 = vpop.f32.mrf.mxu1 }
 0x10d   : > { %v2830_v54 = vpop.f32.mrf.mxu0  ;;  %v858_v49 = vadd.f32 %v2208_v53, %v736_v1  ;;  %v1086_v61 = vadd.f32 %v1057_v46, %v853_v23  ;;  %v2123_v1 = vld [vmem:[%s2848_s18 + $0x10] sm:$0xff]  }
 0x10e   : > { %v837_v21 = vpop.f32.mrf.mxu1 }
 0x10f   : > { %v2234_v5 = vpop.f32.mrf.mxu0  ;;  %v856_v43 = vadd.f32 %v837_v21, %v734_v19  ;;  %v1091_v29 = vadd.f32 %v2218_v50, %v858_v49 }
 0x110   : > { %v2209_v55 = vpop.f32.mrf.mxu1 }
 0x111   : > { %v1337_v56 = vpop.f32.mrf.mxu0  ;;  %v1089_v39 = vadd.f32 %v2826_v20, %v856_v43 }
 0x112   : > { %v840_v40 = vpop.f32.mrf.mxu1 }
 0x113   : > { %v2235_v16 = vpop.f32.mrf.mxu0  ;;  %v857_v21 = vadd.f32 %v840_v40, %v735_v57  ;;  %v2117_v57 = vunpack.c.h.bf16 %v2123_v1 }
 0x114   : > { %v2224_v3 = vpop.f32.mrf.mxu1 }
 0x115   : > { %v2832_v12 = vpop.f32.mrf.mxu0  ;;  %v1248_v32 = vadd.f32 %v2224_v3, %v1087_v30  ;;  %v859_v3 = vadd.f32 %v2209_v55, %v737_v38 }
 0x116   : > { %v1215_v25 = vpop.f32.mrf.mxu1 }
 0x117   : > { %v2834_v63 = vpop.f32.mrf.mxu0  ;;  %v1246_v60 = vadd.f32 %v1215_v25, %v1085_v35  ;;  %v1370_v48 = vadd.f32 %v2234_v5, %v1248_v32  ;;  %v2112_v25 = vunpack.c.l.bf16 %v2122_v41  ;;  %v1092_v50 = vadd.f32 %v2828_v2, %v859_v3 }
 0x118   : > { %v2225_v4 = vpop.f32.mrf.mxu1  ;;  %v2121_v41 = vunpack.c.h.bf16 %v2124_v18 }
 0x119   : > { %v2836_v9 = vpop.f32.mrf.mxu0  ;;  %v1249_v51 = vadd.f32 %v2225_v4, %v1088_v45  ;;  %v1368_v53 = vadd.f32 %v1337_v56, %v1246_v60 }
 0x11a   : > { %v1218_v17 = vpop.f32.mrf.mxu1 }
 0x11b   : > { %v2838_v13 = vpop.f32.mrf.mxu0  ;;  %v1247_v47 = vadd.f32 %v1218_v17, %v1086_v61  ;;  %v1371_v5 = vadd.f32 %v2235_v16, %v1249_v51  ;;  %v1090_v16 = vadd.f32 %v2830_v54, %v857_v21 }
 0x11c   : > { %v2228_v28 = vpop.f32.mrf.mxu1 }
 0x11d   : > { %v2841_v14 = vpop.f32.mrf.mxu0  ;;  %v1252_v10 = vadd.f32 %v2228_v28, %v1091_v29  ;;  %v1369_v11 = vadd.f32 %v2832_v12, %v1247_v47  ;;  %v2109_v28 = vunpack.c.h.bf16 %v2107_v58 }
 0x11e   : > { %v1231_v7 = vpop.f32.mrf.mxu1 }
 0x11f   : > { %v2254_v15 = vpop.f32.mrf.mxu0  ;;  %v1250_v55 = vadd.f32 %v1231_v7, %v1089_v39  ;;  %v1374_v22 = vadd.f32 %v2834_v63, %v1252_v10  ;;  %v2120_v7 = vunpack.c.l.bf16 %v2124_v18 }
 0x120   : > { %v2229_v37 = vpop.f32.mrf.mxu1 }
 0x121   : > { %v1731_v34 = vpop.f32.mrf.mxu0  ;;  %v1253_v27 = vadd.f32 %v2229_v37, %v1092_v50  ;;  %v1372_v54 = vadd.f32 %v2836_v9, %v1250_v55  ;;  %v2116_v37 = vunpack.c.l.bf16 %v2123_v1 }
 0x122   : > { %v1234_v44 = vpop.f32.mrf.mxu1 }
 0x123   : > { %v2255_v26 = vpop.f32.mrf.mxu0  ;;  %v1251_v24 = vadd.f32 %v1234_v44, %v1090_v16  ;;  %v1375_v31 = vadd.f32 %v2838_v13, %v1253_v27 }
 0x124   : > { %v2244_v33 = vpop.f32.mrf.mxu1 }
 0x125   : > { %v1603_v59 = vadd.f32 %v2244_v33, %v1370_v48  ;;  %v1734_v62 = vpop.f32.mrf.mxu0  ;;  %v1373_v38 = vadd.f32 %v2841_v14, %v1251_v24 }
 0x126   : > { %v1570_v46 = vpop.f32.mrf.mxu1 }
 0x127   : > { %v1764_v4 = vadd.f32 %v2254_v15, %v1603_v59  ;;  %v1601_v8 = vadd.f32 %v1570_v46, %v1368_v53  ;;  %v2258_v0 = vpop.f32.mrf.mxu0 }
 0x128   : > { %v2245_v56 = vpop.f32.mrf.mxu1 }
 0x129   : > { %v1788_v20 = vadd.f32 %v2112_v25, %v1764_v4  ;;  %v1762_v40 = vadd.f32 %v1731_v34, %v1601_v8  ;;  %v1604_v17 = vadd.f32 %v2245_v56, %v1371_v5  ;;  %v1747_v35 = vpop.f32.mrf.mxu0 }
 0x12a   : > { %v1573_v2 = vpop.f32.mrf.mxu1 }
 0x12b   : > { %v1796_v52 = vpack.c.bf16 %v1788_v20, %v1788_v20  ;;  %v1786_v12 = vadd.f32 %v2108_v42, %v1762_v40  ;;  %v1765_v30 = vadd.f32 %v2255_v26, %v1604_v17  ;;  %v1602_v6 = vadd.f32 %v1573_v2, %v1369_v11  ;;  %v2259_v44 = vpop.f32.mrf.mxu0 }
 0x12c   : > { %v2248_v63 = vpop.f32.mrf.mxu1 }
 0x12d   : > { %1805 = vst.msk [vmem:[%s2866_s21 + $0x8] sm:$0xf] %vm1802_vm7, %v1796_v52  ;;  %v1794_v23 = vpack.c.bf16 %v1786_v12, %v1786_v12  ;;  %v1789_v32 = vadd.f32 %v2113_v36, %v1765_v30  ;;  %v1763_v15 = vadd.f32 %v1734_v62, %v1602_v6  ;;  %v1607_v19 = vadd.f32 %v2248_v63, %v1374_v22  ;;  %v1750_v58 = vpop.f32.mrf.mxu0 }
 0x12e   : > { %v1586_v49 = vpop.f32.mrf.mxu1 }
 0x12f   : > { %1803 = vst.msk [vmem:[%s2866_s21] sm:$0xf] %vm1802_vm7, %v1794_v23  ;;  %v1797_v45 = vpack.c.bf16 %v1789_v32, %v1789_v32  ;;  %v1787_v9 = vadd.f32 %v2109_v28, %v1763_v15  ;;  %v1768_v60 = vadd.f32 %v2258_v0, %v1607_v19  ;;  %v1605_v34 = vadd.f32 %v1586_v49, %v1372_v54 }
 0x130   : > { %v2249_v43 = vpop.f32.mrf.mxu1 }
 0x131   : > { %1806 = vst.msk [vmem:[%s2866_s21 + $0xc] sm:$0xf] %vm1802_vm7, %v1797_v45  ;;  %v1795_v61 = vpack.c.bf16 %v1787_v9, %v1787_v9  ;;  %v1792_v13 = vadd.f32 %v2120_v7, %v1768_v60  ;;  %v1766_v48 = vadd.f32 %v1747_v35, %v1605_v34  ;;  %v1608_v51 = vadd.f32 %v2249_v43, %v1375_v31 }
 0x132   : > { %v1589_v26 = vpop.f32.mrf.mxu1 }
 0x133   : > { %1804 = vst.msk [vmem:[%s2866_s21 + $0x4] sm:$0xf] %vm1802_vm7, %v1795_v61  ;;  %v1800_v29 = vpack.c.bf16 %v1792_v13, %v1792_v13  ;;  %v1790_v3 = vadd.f32 %v2116_v37, %v1766_v48  ;;  %v1769_v14 = vadd.f32 %v2259_v44, %v1608_v51  ;;  %v1606_v33 = vadd.f32 %v1589_v26, %v1373_v38 }
 0x135   : > { %1809 = vst.msk [vmem:[%s2866_s21 + $0x18] sm:$0xf] %vm1802_vm7, %v1800_v29  ;;  %v1798_v53 = vpack.c.bf16 %v1790_v3, %v1790_v3  ;;  %v1793_v47 = vadd.f32 %v2121_v41, %v1769_v14  ;;  %v1767_v59 = vadd.f32 %v1750_v58, %v1606_v33 }
 0x137   : > { %1807 = vst.msk [vmem:[%s2866_s21 + $0x10] sm:$0xf] %vm1802_vm7, %v1798_v53  ;;  %v1801_v25 = vpack.c.bf16 %v1793_v47, %v1793_v47  ;;  %v1791_v62 = vadd.f32 %v2117_v57, %v1767_v59 }
 0x139   : > { %1810 = vst.msk [vmem:[%s2866_s21 + $0x1c] sm:$0xf] %vm1802_vm7, %v1801_v25  ;;  %v1799_v39 = vpack.c.bf16 %v1791_v62, %v1791_v62 }
 0x13b   : > { %1808 = vst.msk [vmem:[%s2866_s21 + $0x14] sm:$0xf] %vm1802_vm7, %v1799_v39 }
 0x13c PF: > { %s13_s14 = sadd.s32 1, %s2330_s14   ;;  %s2905_s12 = smov %s2326_s13 }
 0x13d   : > { %p10_p5 = scmp.ge.s32.totalorder %s13_s14, 4   ;;  %s2906_s13 = smov %s2908_s15 }
 0x13f   :  { %12 = sbr.rel (!%p10_p5) target bundleno = 2 (0x2), region = 70 }

</bundles_post_ra>
